<compile_context>
chip_gen: v5e
topology: v5e:2x2
jax: 0.10.0
libtpu: 0.0.40
codegen_flags: <defaults>
</compile_context>

<pallas_src>
import functools

import jax
import jax.numpy as jnp
import numpy as np
from jax.experimental import pallas as pl
from jax.experimental.pallas import tpu as pltpu

_EPS = 1e-5
_LANE = 128


def _round_up(x, m):
    return ((x + m - 1) // m) * m


# --------------------------------------------------------------------------- #
# Pallas kernel: one (image, row-tile) per grid step does conv1+bn1+relu,
# conv2+bn2, the (optional) 1x1 downsample+bn, residual add and final relu.
# --------------------------------------------------------------------------- #
def _resblock_kernel(x_ref, m_ref, w1_ref, b1_ref, w2_ref, b2_ref, *rest,
                     stride, has_ds, th, wq):
    # x_ref : (1, 1, s*s, R_in*Wq, Cinp) bf16 -- per-tile, per-phase FLAT input slab
    #         slab[p, r*Wq + c, :] == xpad[s*(t*TH - 1 + r) + p//s, s*c + p%s, :]
    # m_ref : (1, L1, 1) f32  -- 1.0 where conv1's extended output is a real out1
    #         value (row in [0,Hout), col < Wout); 0.0 where it must act as conv2's
    #         zero padding (halo rows, ragged tail rows, garbage columns).
    # w1_ref: (9, Cinp, Coutp)  bf16, conv1 weight (BN1 folded), tap-major
    # w2_ref: (9, Coutp, Coutp) bf16, conv2 weight (BN2 folded), tap-major
    # b*_ref: (1, Coutp) f32
    # rest  : [wd_ref (Cinp,Coutp) bf16, bd_ref (1,Coutp) f32,]  o_ref, p2_ref
    if has_ds:
        wd_ref, bd_ref, o_ref, p2_ref = rest
    else:
        o_ref, p2_ref = rest

    s = stride
    coutp = o_ref.shape[-1]
    l1 = (th + 2) * wq          # conv1 extended positions (TH rows + conv2 row halo)
    l2 = th * wq                # final output positions (incl. 2 garbage cols / row)
    off = 8                     # sublane-aligned placement of out1 in the scratch

    # ---- conv1 (3x3, stride s) + BN1 + ReLU: 9 MXU matmuls on contiguous taps ----
    acc1 = None
    for kh in range(3):
        for kw in range(3):
            p = (kh % s) * s + (kw % s)
            start = (kh // s) * wq + (kw // s)
            tap = x_ref[0, 0, p, pl.ds(start, l1), :]
            d = jnp.dot(tap, w1_ref[kh * 3 + kw],
                        preferred_element_type=jnp.float32)
            acc1 = d if acc1 is None else acc1 + d
    out1 = (jnp.maximum(acc1 + b1_ref[...], 0.0) * m_ref[0]).astype(jnp.bfloat16)

    # ---- stage out1 for conv2 (fused shift: P2[a,b] == scratch[off-1 + a*Wq + b]) -
    p2_ref[0:off, :] = jnp.zeros((off, coutp), jnp.bfloat16)
    p2_ref[pl.ds(off, l1), :] = out1
    # (scratch row off+l1 is read only by the very last garbage output column; its
    #  value never reaches a valid output position.)

    # ---- conv2 (3x3, stride 1) + BN2: 9 MXU matmuls on contiguous scratch taps ----
    acc2 = None
    for kh in range(3):
        for kw in range(3):
            start = off - 1 + kh * wq + kw
            tap = p2_ref[pl.ds(start, l2), :]
            d = jnp.dot(tap, w2_ref[kh * 3 + kw],
                        preferred_element_type=jnp.float32)
            acc2 = d if acc2 is None else acc2 + d
    out2 = acc2 + b2_ref[...]

    # ---- identity / 1x1 downsample (stride s) + BN --------------------------------
    p = (1 % s) * s + (1 % s)
    start = (1 // s + 1) * wq + (1 // s)
    idn = x_ref[0, 0, p, pl.ds(start, l2), :]
    if has_ds:
        idn = jnp.dot(idn, wd_ref[...],
                      preferred_element_type=jnp.float32) + bd_ref[...]
    else:
        idn = idn.astype(jnp.float32)          # Cinp == Coutp on this path

    # ---- residual add + final ReLU, bf16 store ------------------------------------
    o_ref[0, 0] = jnp.maximum(out2 + idn, 0.0).astype(o_ref.dtype)


# --------------------------------------------------------------------------- #
# Parameter setup (deterministic), BN folding, wrapper, reference.
# --------------------------------------------------------------------------- #
def init_params(key, cin, cout, stride):
    keys = iter(jax.random.split(key, 20))
    u = lambda k, shape, b: jax.random.uniform(k, shape, jnp.float32, -b, b)
    p = {}
    b1 = 1.0 / float(np.sqrt(cin * 9))
    p['w1'] = u(next(keys), (3, 3, cin, cout), b1)             # HWIO
    p['b1'] = u(next(keys), (cout,), b1)
    p['bn1_gamma'] = 1.0 + 0.1 * jax.random.normal(next(keys), (cout,))
    p['bn1_beta'] = 0.1 * jax.random.normal(next(keys), (cout,))
    p['bn1_mean'] = 0.1 * jax.random.normal(next(keys), (cout,))
    p['bn1_var'] = jax.random.uniform(next(keys), (cout,), jnp.float32, 0.5, 1.5)
    b2 = 1.0 / float(np.sqrt(cout * 9))
    p['w2'] = u(next(keys), (3, 3, cout, cout), b2)
    p['b2'] = u(next(keys), (cout,), b2)
    p['bn2_gamma'] = 1.0 + 0.1 * jax.random.normal(next(keys), (cout,))
    p['bn2_beta'] = 0.1 * jax.random.normal(next(keys), (cout,))
    p['bn2_mean'] = 0.1 * jax.random.normal(next(keys), (cout,))
    p['bn2_var'] = jax.random.uniform(next(keys), (cout,), jnp.float32, 0.5, 1.5)
    if stride != 1 or cin != cout:                             # downsample path
        bd = 1.0 / float(np.sqrt(cin))
        p['wd'] = u(next(keys), (1, 1, cin, cout), bd)
        p['bd'] = u(next(keys), (cout,), bd)
        p['bnd_gamma'] = 1.0 + 0.1 * jax.random.normal(next(keys), (cout,))
        p['bnd_beta'] = 0.1 * jax.random.normal(next(keys), (cout,))
        p['bnd_mean'] = 0.1 * jax.random.normal(next(keys), (cout,))
        p['bnd_var'] = jax.random.uniform(next(keys), (cout,), jnp.float32, 0.5, 1.5)
    return p


def _fold_bn(w, b, gamma, beta, mean, var, eps=_EPS):
    scale = gamma * jax.lax.rsqrt(var + eps)                   # (Cout,)
    return w * scale, (b - mean) * scale + beta


def _vmem_bytes(th, wq, cinp, coutp, phases, halo_r, has_ds):
    l1 = (th + 2) * wq
    l2 = th * wq
    r_in = th + 3 + halo_r
    xblk = 2 * phases * r_in * wq * cinp * 2                   # bf16, double-buffered
    oblk = 2 * l2 * coutp * 2
    mblk = 2 * l1 * 4
    wts = 2 * 2 * (9 * cinp * coutp + 9 * coutp * coutp
                   + (cinp * coutp if has_ds else 0))
    p2 = _round_up(l1 + 16, 8) * coutp * 2
    tmp = 8 * l1 * coutp * 4                                   # f32 accumulators/temps
    return xblk + oblk + mblk + wts + p2 + tmp


def _pick_tile_rows(hout, wq, cinp, coutp, phases, halo_r, has_ds,
                    budget=20 * 1024 * 1024):
    th = hout
    while th > 8 and _vmem_bytes(th, wq, cinp, coutp, phases, halo_r,
                                 has_ds) > budget:
        th = max(8, (th + 1) // 2)
    return th


@functools.partial(jax.jit, static_argnames=("stride", "tile_rows"))
def residual_block_pallas(x_nchw, params, stride=1, tile_rows=None):
    s = int(stride)
    x = jnp.transpose(x_nchw, (0, 2, 3, 1))                    # NHWC
    N, H, W, Cin = x.shape
    Cout = params['w1'].shape[-1]
    Hout = (H - 1) // s + 1
    Wout = (W - 1) // s + 1
    Wq = Wout + 2
    halo_r = 2 // s
    Cinp = _round_up(Cin, _LANE)
    Coutp = _round_up(Cout, _LANE)
    has_ds = 'wd' in params

    # ---- row-tile choice + VMEM budget ---------------------------------------
    if tile_rows is None:
        TH = _pick_tile_rows(Hout, Wq, Cinp, Coutp, s * s, halo_r, has_ds)
    else:
        TH = max(1, min(int(tile_rows), Hout))
    n_tiles = -(-Hout // TH)
    R_in = TH + 3 + halo_r
    L1 = (TH + 2) * Wq
    L2 = TH * Wq
    P2R = _round_up(L1 + 16, 8)
    vmem_limit = int(min(100 * 1024 * 1024,
                         max(32 * 1024 * 1024,
                             int(1.25 * _vmem_bytes(TH, Wq, Cinp, Coutp, s * s,
                                                    halo_r, has_ds)))))

    # ---- fold BN, pad channels, tap-major weights, cast bf16 ------------------
    w1f, b1f = _fold_bn(params['w1'], params['b1'], params['bn1_gamma'],
                        params['bn1_beta'], params['bn1_mean'], params['bn1_var'])
    w2f, b2f = _fold_bn(params['w2'], params['b2'], params['bn2_gamma'],
                        params['bn2_beta'], params['bn2_mean'], params['bn2_var'])

    def prep3x3(w, b, cin_p, cout_p):
        cin, cout = w.shape[2], w.shape[3]
        wp = jnp.pad(w, ((0, 0), (0, 0), (0, cin_p - cin), (0, cout_p - cout)))
        wp = wp.reshape(9, cin_p, cout_p).astype(jnp.bfloat16)
        bp = jnp.pad(b, (0, cout_p - cout)).reshape(1, cout_p).astype(jnp.float32)
        return wp, bp

    w1p, b1p = prep3x3(w1f, b1f, Cinp, Coutp)
    w2p, b2p = prep3x3(w2f, b2f, Coutp, Coutp)

    weight_args = [w1p, b1p, w2p, b2p]
    weight_specs = [
        pl.BlockSpec((9, Cinp, Coutp), lambda n, t: (0, 0, 0)),
        pl.BlockSpec((1, Coutp), lambda n, t: (0, 0)),
        pl.BlockSpec((9, Coutp, Coutp), lambda n, t: (0, 0, 0)),
        pl.BlockSpec((1, Coutp), lambda n, t: (0, 0)),
    ]
    if has_ds:
        wdf, bdf = _fold_bn(params['wd'], params['bd'], params['bnd_gamma'],
                            params['bnd_beta'], params['bnd_mean'],
                            params['bnd_var'])
        wdp = jnp.pad(wdf.reshape(Cin, Cout),
                      ((0, Cinp - Cin), (0, Coutp - Cout))).astype(jnp.bfloat16)
        bdp = jnp.pad(bdf, (0, Coutp - Cout)).reshape(1, Coutp).astype(jnp.float32)
        weight_args += [wdp, bdp]
        weight_specs += [pl.BlockSpec((Cinp, Coutp), lambda n, t: (0, 0)),
                         pl.BlockSpec((1, Coutp), lambda n, t: (0, 0))]

    # ---- one wrapper-side rearrangement of the activation:
    #      bf16 cast + halo + channel pad + stride phase split + row-tiles w/ halo
    Rphase = n_tiles * TH + halo_r + 3
    Rg, Cg = s * Rphase, s * Wq
    G = jnp.pad(x.astype(jnp.bfloat16),
                ((0, 0), (s + 1, Rg - (s + 1) - H), (1, Cg - 1 - W),
                 (0, Cinp - Cin)))
    Gr = G.reshape(N, Rphase, s, Wq, s, Cinp).transpose(0, 2, 4, 1, 3, 5)
    Gr = Gr.reshape(N, s * s, Rphase, Wq, Cinp)
    XT = jnp.stack([Gr[:, :, t * TH: t * TH + R_in] for t in range(n_tiles)],
                   axis=1)
    XT = XT.reshape(N, n_tiles, s * s, R_in * Wq, Cinp)

    # ---- per-tile validity mask for conv1's extended output (conv2 zero padding) -
    e = np.arange(TH + 2)
    j = np.arange(Wq)
    masks = np.stack(
        [(((t * TH - 1 + e >= 0) & (t * TH - 1 + e < Hout))[:, None]
          & (j < Wout)[None, :]).astype(np.float32).reshape(L1, 1)
         for t in range(n_tiles)], axis=0)
    mask_arr = jnp.asarray(masks)                               # (n_tiles, L1, 1)

    kernel = functools.partial(_resblock_kernel, stride=s, has_ds=has_ds,
                               th=TH, wq=Wq)
    out = pl.pallas_call(
        kernel,
        out_shape=jax.ShapeDtypeStruct((N, n_tiles, L2, Coutp), jnp.bfloat16),
        grid_spec=pltpu.PrefetchScalarGridSpec(
            num_scalar_prefetch=0,
            grid=(N, n_tiles),
            in_specs=[pl.BlockSpec((1, 1, s * s, R_in * Wq, Cinp),
                                   lambda n, t: (n, t, 0, 0, 0)),
                      pl.BlockSpec((1, L1, 1), lambda n, t: (t, 0, 0))]
                     + weight_specs,
            out_specs=pl.BlockSpec((1, 1, L2, Coutp),
                                   lambda n, t: (n, t, 0, 0)),
            scratch_shapes=[pltpu.VMEM((P2R, Coutp), jnp.bfloat16)],
        ),
        compiler_params=pltpu.CompilerParams(
            dimension_semantics=("parallel", "parallel"),
            vmem_limit_bytes=vmem_limit),
    )(XT, mask_arr, *weight_args)

    # NCHW / unpadded / f32 only for the standalone test; a fused network would
    # keep the padded NHWC bf16 layout end-to-end.
    out = out.reshape(N, n_tiles * TH, Wq, Coutp)[:, :Hout, :Wout, :Cout]
    return jnp.transpose(out, (0, 3, 1, 2)).astype(jnp.float32)


def residual_block_ref(x_nchw, p, stride=1, eps=_EPS):
    x = jnp.transpose(x_nchw, (0, 2, 3, 1))

    def conv(x, w, b, s, pad):
        y = jax.lax.conv_general_dilated(
            x, w, (s, s), [(pad, pad), (pad, pad)],
            dimension_numbers=('NHWC', 'HWIO', 'NHWC'),
            precision=jax.lax.Precision.HIGHEST)
        return y + b

    def bn(y, g, b, m, v):
        return (y - m) * (g * jax.lax.rsqrt(v + eps)) + b

    out = conv(x, p['w1'], p['b1'], stride, 1)
    out = jnp.maximum(bn(out, p['bn1_gamma'], p['bn1_beta'],
                         p['bn1_mean'], p['bn1_var']), 0.0)
    out = conv(out, p['w2'], p['b2'], 1, 1)
    out = bn(out, p['bn2_gamma'], p['bn2_beta'], p['bn2_mean'], p['bn2_var'])
    if 'wd' in p:
        idn = conv(x, p['wd'], p['bd'], stride, 0)
        idn = bn(idn, p['bnd_gamma'], p['bnd_beta'], p['bnd_mean'], p['bnd_var'])
    else:
        idn = x
    return jnp.transpose(jnp.maximum(out + idn, 0.0), (0, 3, 1, 2))


def _run_case(key, N, Cin, Cout, H, W, stride, tile_rows=None):
    kx, kp = jax.random.split(key)
    x = jax.random.normal(kx, (N, Cin, H, W), jnp.float32)     # NCHW like PyTorch
    params = init_params(kp, Cin, Cout, stride)

    y = jax.block_until_ready(
        residual_block_pallas(x, params, stride=stride, tile_rows=tile_rows))
    y_ref = residual_block_ref(x, params, stride=stride)

    Hout = (H - 1) // stride + 1
    Wout = (W - 1) // stride + 1
    assert y.shape == y_ref.shape == (N, Cout, Hout, Wout)
    # bf16 MXU operands, f32 accumulation, bf16 output -> loose-ish tolerance
    np.testing.assert_allclose(np.asarray(y), np.asarray(y_ref),
                               rtol=2e-2, atol=2e-2)


if __name__ == "__main__":
    key = jax.random.PRNGKey(0)
    k1, k2, k3, k4, k5 = jax.random.split(key, 5)

    # downsample branch (Cin != Cout), stride 1, single row tile
    _run_case(k1, N=2, Cin=4, Cout=8, H=16, W=16, stride=1)
    # pure identity branch (Cin == Cout, stride 1): no wd/bd, no downsample matmul
    _run_case(k2, N=2, Cin=8, Cout=8, H=16, W=16, stride=1)
    # strided stage (stride 2 + downsample) via the phase-split path
    _run_case(k3, N=2, Cin=4, Cout=8, H=16, W=16, stride=2)
    # H-row tiling with a ragged last tile (Hout=20, TH=8 -> 3 tiles)
    _run_case(k4, N=1, Cin=4, Cout=8, H=20, W=16, stride=1, tile_rows=8)
    # H-row tiling + stride 2, ragged last tile (Hout=10, TH=4 -> 3 tiles)
    _run_case(k5, N=1, Cin=4, Cout=8, H=20, W=14, stride=2, tile_rows=4)

    print("KERNEL_OK")
</pallas_src>

<mosaic_0001>
module attributes {stable_mosaic.version = 11 : i64} {
  func.func @_resblock_kernel(%arg0: i32, %arg1: i32, %arg2: memref<1x1x1x378x128xbf16, #tpu.memory_space<vmem>>, %arg3: memref<1x324x1xf32, #tpu.memory_space<vmem>>, %arg4: memref<9x128x128xbf16, #tpu.memory_space<vmem>>, %arg5: memref<1x128xf32, #tpu.memory_space<vmem>>, %arg6: memref<9x128x128xbf16, #tpu.memory_space<vmem>>, %arg7: memref<1x128xf32, #tpu.memory_space<vmem>>, %arg8: memref<128x128xbf16, #tpu.memory_space<vmem>>, %arg9: memref<1x128xf32, #tpu.memory_space<vmem>>, %arg10: memref<1x1x288x128xbf16, #tpu.memory_space<vmem>>, %arg11: memref<344x128xbf16, #tpu.memory_space<vmem>>) attributes {dimension_semantics = [#tpu.dimension_semantics<parallel>, #tpu.dimension_semantics<parallel>], iteration_bounds = array<i64: 2, 1>, scalar_prefetch = 0 : i64, scratch_operands = 1 : i64, tpu.core_type = #tpu.core_type<tc>, window_params = [{transform_indices = @transform_0, window_bounds = array<i64: 1, 1, 1, 378, 128>}, {transform_indices = @transform_1, window_bounds = array<i64: 1, 324, 1>}, {pipeline_mode = #tpu.pipeline_mode<synchronous>, transform_indices = @transform_2, window_bounds = array<i64: 9, 128, 128>}, {pipeline_mode = #tpu.pipeline_mode<synchronous>, transform_indices = @transform_3, window_bounds = array<i64: 1, 128>}, {pipeline_mode = #tpu.pipeline_mode<synchronous>, transform_indices = @transform_4, window_bounds = array<i64: 9, 128, 128>}, {pipeline_mode = #tpu.pipeline_mode<synchronous>, transform_indices = @transform_5, window_bounds = array<i64: 1, 128>}, {pipeline_mode = #tpu.pipeline_mode<synchronous>, transform_indices = @transform_6, window_bounds = array<i64: 128, 128>}, {pipeline_mode = #tpu.pipeline_mode<synchronous>, transform_indices = @transform_7, window_bounds = array<i64: 1, 128>}, {transform_indices = @transform_8, window_bounds = array<i64: 1, 1, 288, 128>}]} {
    %c0 = arith.constant 0 : index
    %c0_0 = arith.constant 0 : index
    %c0_1 = arith.constant 0 : index
    %c0_2 = arith.constant 0 : index
    %c0_3 = arith.constant 0 : index
    %0 = vector.load %arg2[%c0, %c0_0, %c0_1, %c0_2, %c0_3] : memref<1x1x1x378x128xbf16, #tpu.memory_space<vmem>>, vector<1x1x1x324x128xbf16>
    %1 = vector.shape_cast %0 : vector<1x1x1x324x128xbf16> to vector<324x128xbf16>
    %c0_4 = arith.constant 0 : index
    %c0_5 = arith.constant 0 : index
    %c0_6 = arith.constant 0 : index
    %2 = vector.load %arg4[%c0_4, %c0_5, %c0_6] : memref<9x128x128xbf16, #tpu.memory_space<vmem>>, vector<1x128x128xbf16>
    %3 = vector.shape_cast %2 : vector<1x128x128xbf16> to vector<128x128xbf16>
    %cst = arith.constant dense<0.000000e+00> : vector<324x128xf32>
    %4 = tpu.matmul %1, %3, %cst {dimension_numbers = #tpu.dot_dimension_numbers<[1], [0], [0], [1], [0, 0, 1, 1], [], []>} : vector<324x128xbf16>, vector<128x128xbf16>, vector<324x128xf32> -> vector<324x128xf32>
    %c0_7 = arith.constant 0 : index
    %c0_8 = arith.constant 0 : index
    %c0_9 = arith.constant 0 : index
    %c1 = arith.constant 1 : index
    %c0_10 = arith.constant 0 : index
    %5 = vector.load %arg2[%c0_7, %c0_8, %c0_9, %c1, %c0_10] : memref<1x1x1x378x128xbf16, #tpu.memory_space<vmem>>, vector<1x1x1x324x128xbf16>
    %6 = vector.shape_cast %5 : vector<1x1x1x324x128xbf16> to vector<324x128xbf16>
    %c1_11 = arith.constant 1 : index
    %c0_12 = arith.constant 0 : index
    %c0_13 = arith.constant 0 : index
    %7 = vector.load %arg4[%c1_11, %c0_12, %c0_13] : memref<9x128x128xbf16, #tpu.memory_space<vmem>>, vector<1x128x128xbf16>
    %8 = vector.shape_cast %7 : vector<1x128x128xbf16> to vector<128x128xbf16>
    %cst_14 = arith.constant dense<0.000000e+00> : vector<324x128xf32>
    %9 = tpu.matmul %6, %8, %cst_14 {dimension_numbers = #tpu.dot_dimension_numbers<[1], [0], [0], [1], [0, 0, 1, 1], [], []>} : vector<324x128xbf16>, vector<128x128xbf16>, vector<324x128xf32> -> vector<324x128xf32>
    %10 = arith.addf %4, %9 : vector<324x128xf32>
    %c0_15 = arith.constant 0 : index
    %c0_16 = arith.constant 0 : index
    %c0_17 = arith.constant 0 : index
    %c2 = arith.constant 2 : index
    %c0_18 = arith.constant 0 : index
    %11 = vector.load %arg2[%c0_15, %c0_16, %c0_17, %c2, %c0_18] : memref<1x1x1x378x128xbf16, #tpu.memory_space<vmem>>, vector<1x1x1x324x128xbf16>
    %12 = vector.shape_cast %11 : vector<1x1x1x324x128xbf16> to vector<324x128xbf16>
    %c2_19 = arith.constant 2 : index
    %c0_20 = arith.constant 0 : index
    %c0_21 = arith.constant 0 : index
    %13 = vector.load %arg4[%c2_19, %c0_20, %c0_21] : memref<9x128x128xbf16, #tpu.memory_space<vmem>>, vector<1x128x128xbf16>
    %14 = vector.shape_cast %13 : vector<1x128x128xbf16> to vector<128x128xbf16>
    %cst_22 = arith.constant dense<0.000000e+00> : vector<324x128xf32>
    %15 = tpu.matmul %12, %14, %cst_22 {dimension_numbers = #tpu.dot_dimension_numbers<[1], [0], [0], [1], [0, 0, 1, 1], [], []>} : vector<324x128xbf16>, vector<128x128xbf16>, vector<324x128xf32> -> vector<324x128xf32>
    %16 = arith.addf %10, %15 : vector<324x128xf32>
    %c0_23 = arith.constant 0 : index
    %c0_24 = arith.constant 0 : index
    %c0_25 = arith.constant 0 : index
    %c18 = arith.constant 18 : index
    %c0_26 = arith.constant 0 : index
    %17 = vector.load %arg2[%c0_23, %c0_24, %c0_25, %c18, %c0_26] : memref<1x1x1x378x128xbf16, #tpu.memory_space<vmem>>, vector<1x1x1x324x128xbf16>
    %18 = vector.shape_cast %17 : vector<1x1x1x324x128xbf16> to vector<324x128xbf16>
    %c3 = arith.constant 3 : index
    %c0_27 = arith.constant 0 : index
    %c0_28 = arith.constant 0 : index
    %19 = vector.load %arg4[%c3, %c0_27, %c0_28] : memref<9x128x128xbf16, #tpu.memory_space<vmem>>, vector<1x128x128xbf16>
    %20 = vector.shape_cast %19 : vector<1x128x128xbf16> to vector<128x128xbf16>
    %cst_29 = arith.constant dense<0.000000e+00> : vector<324x128xf32>
    %21 = tpu.matmul %18, %20, %cst_29 {dimension_numbers = #tpu.dot_dimension_numbers<[1], [0], [0], [1], [0, 0, 1, 1], [], []>} : vector<324x128xbf16>, vector<128x128xbf16>, vector<324x128xf32> -> vector<324x128xf32>
    %22 = arith.addf %16, %21 : vector<324x128xf32>
    %c0_30 = arith.constant 0 : index
    %c0_31 = arith.constant 0 : index
    %c0_32 = arith.constant 0 : index
    %c19 = arith.constant 19 : index
    %c0_33 = arith.constant 0 : index
    %23 = vector.load %arg2[%c0_30, %c0_31, %c0_32, %c19, %c0_33] : memref<1x1x1x378x128xbf16, #tpu.memory_space<vmem>>, vector<1x1x1x324x128xbf16>
    %24 = vector.shape_cast %23 : vector<1x1x1x324x128xbf16> to vector<324x128xbf16>
    %c4 = arith.constant 4 : index
    %c0_34 = arith.constant 0 : index
    %c0_35 = arith.constant 0 : index
    %25 = vector.load %arg4[%c4, %c0_34, %c0_35] : memref<9x128x128xbf16, #tpu.memory_space<vmem>>, vector<1x128x128xbf16>
    %26 = vector.shape_cast %25 : vector<1x128x128xbf16> to vector<128x128xbf16>
    %cst_36 = arith.constant dense<0.000000e+00> : vector<324x128xf32>
    %27 = tpu.matmul %24, %26, %cst_36 {dimension_numbers = #tpu.dot_dimension_numbers<[1], [0], [0], [1], [0, 0, 1, 1], [], []>} : vector<324x128xbf16>, vector<128x128xbf16>, vector<324x128xf32> -> vector<324x128xf32>
    %28 = arith.addf %22, %27 : vector<324x128xf32>
    %c0_37 = arith.constant 0 : index
    %c0_38 = arith.constant 0 : index
    %c0_39 = arith.constant 0 : index
    %c20 = arith.constant 20 : index
    %c0_40 = arith.constant 0 : index
    %29 = vector.load %arg2[%c0_37, %c0_38, %c0_39, %c20, %c0_40] : memref<1x1x1x378x128xbf16, #tpu.memory_space<vmem>>, vector<1x1x1x324x128xbf16>
    %30 = vector.shape_cast %29 : vector<1x1x1x324x128xbf16> to vector<324x128xbf16>
    %c5 = arith.constant 5 : index
    %c0_41 = arith.constant 0 : index
    %c0_42 = arith.constant 0 : index
    %31 = vector.load %arg4[%c5, %c0_41, %c0_42] : memref<9x128x128xbf16, #tpu.memory_space<vmem>>, vector<1x128x128xbf16>
    %32 = vector.shape_cast %31 : vector<1x128x128xbf16> to vector<128x128xbf16>
    %cst_43 = arith.constant dense<0.000000e+00> : vector<324x128xf32>
    %33 = tpu.matmul %30, %32, %cst_43 {dimension_numbers = #tpu.dot_dimension_numbers<[1], [0], [0], [1], [0, 0, 1, 1], [], []>} : vector<324x128xbf16>, vector<128x128xbf16>, vector<324x128xf32> -> vector<324x128xf32>
    %34 = arith.addf %28, %33 : vector<324x128xf32>
    %c0_44 = arith.constant 0 : index
    %c0_45 = arith.constant 0 : index
    %c0_46 = arith.constant 0 : index
    %c36 = arith.constant 36 : index
    %c0_47 = arith.constant 0 : index
    %35 = vector.load %arg2[%c0_44, %c0_45, %c0_46, %c36, %c0_47] : memref<1x1x1x378x128xbf16, #tpu.memory_space<vmem>>, vector<1x1x1x324x128xbf16>
    %36 = vector.shape_cast %35 : vector<1x1x1x324x128xbf16> to vector<324x128xbf16>
    %c6 = arith.constant 6 : index
    %c0_48 = arith.constant 0 : index
    %c0_49 = arith.constant 0 : index
    %37 = vector.load %arg4[%c6, %c0_48, %c0_49] : memref<9x128x128xbf16, #tpu.memory_space<vmem>>, vector<1x128x128xbf16>
    %38 = vector.shape_cast %37 : vector<1x128x128xbf16> to vector<128x128xbf16>
    %cst_50 = arith.constant dense<0.000000e+00> : vector<324x128xf32>
    %39 = tpu.matmul %36, %38, %cst_50 {dimension_numbers = #tpu.dot_dimension_numbers<[1], [0], [0], [1], [0, 0, 1, 1], [], []>} : vector<324x128xbf16>, vector<128x128xbf16>, vector<324x128xf32> -> vector<324x128xf32>
    %40 = arith.addf %34, %39 : vector<324x128xf32>
    %c0_51 = arith.constant 0 : index
    %c0_52 = arith.constant 0 : index
    %c0_53 = arith.constant 0 : index
    %c37 = arith.constant 37 : index
    %c0_54 = arith.constant 0 : index
    %41 = vector.load %arg2[%c0_51, %c0_52, %c0_53, %c37, %c0_54] : memref<1x1x1x378x128xbf16, #tpu.memory_space<vmem>>, vector<1x1x1x324x128xbf16>
    %42 = vector.shape_cast %41 : vector<1x1x1x324x128xbf16> to vector<324x128xbf16>
    %c7 = arith.constant 7 : index
    %c0_55 = arith.constant 0 : index
    %c0_56 = arith.constant 0 : index
    %43 = vector.load %arg4[%c7, %c0_55, %c0_56] : memref<9x128x128xbf16, #tpu.memory_space<vmem>>, vector<1x128x128xbf16>
    %44 = vector.shape_cast %43 : vector<1x128x128xbf16> to vector<128x128xbf16>
    %cst_57 = arith.constant dense<0.000000e+00> : vector<324x128xf32>
    %45 = tpu.matmul %42, %44, %cst_57 {dimension_numbers = #tpu.dot_dimension_numbers<[1], [0], [0], [1], [0, 0, 1, 1], [], []>} : vector<324x128xbf16>, vector<128x128xbf16>, vector<324x128xf32> -> vector<324x128xf32>
    %46 = arith.addf %40, %45 : vector<324x128xf32>
    %c0_58 = arith.constant 0 : index
    %c0_59 = arith.constant 0 : index
    %c0_60 = arith.constant 0 : index
    %c38 = arith.constant 38 : index
    %c0_61 = arith.constant 0 : index
    %47 = vector.load %arg2[%c0_58, %c0_59, %c0_60, %c38, %c0_61] : memref<1x1x1x378x128xbf16, #tpu.memory_space<vmem>>, vector<1x1x1x324x128xbf16>
    %48 = vector.shape_cast %47 : vector<1x1x1x324x128xbf16> to vector<324x128xbf16>
    %c8 = arith.constant 8 : index
    %c0_62 = arith.constant 0 : index
    %c0_63 = arith.constant 0 : index
    %49 = vector.load %arg4[%c8, %c0_62, %c0_63] : memref<9x128x128xbf16, #tpu.memory_space<vmem>>, vector<1x128x128xbf16>
    %50 = vector.shape_cast %49 : vector<1x128x128xbf16> to vector<128x128xbf16>
    %cst_64 = arith.constant dense<0.000000e+00> : vector<324x128xf32>
    %51 = tpu.matmul %48, %50, %cst_64 {dimension_numbers = #tpu.dot_dimension_numbers<[1], [0], [0], [1], [0, 0, 1, 1], [], []>} : vector<324x128xbf16>, vector<128x128xbf16>, vector<324x128xf32> -> vector<324x128xf32>
    %52 = arith.addf %46, %51 : vector<324x128xf32>
    %c0_65 = arith.constant 0 : index
    %c0_66 = arith.constant 0 : index
    %53 = vector.load %arg5[%c0_65, %c0_66] : memref<1x128xf32, #tpu.memory_space<vmem>>, vector<1x128xf32>
    %54 = vector.broadcast %53 : vector<1x128xf32> to vector<324x128xf32>
    %55 = arith.addf %52, %54 : vector<324x128xf32>
    %cst_67 = arith.constant 0.000000e+00 : f32
    %56 = vector.broadcast %cst_67 : f32 to vector<324x128xf32>
    %57 = arith.maximumf %55, %56 : vector<324x128xf32>
    %c0_68 = arith.constant 0 : index
    %c0_69 = arith.constant 0 : index
    %c0_70 = arith.constant 0 : index
    %58 = vector.load %arg3[%c0_68, %c0_69, %c0_70] : memref<1x324x1xf32, #tpu.memory_space<vmem>>, vector<1x324x1xf32>
    %59 = vector.shape_cast %58 : vector<1x324x1xf32> to vector<324x1xf32>
    %60 = vector.broadcast %59 : vector<324x1xf32> to vector<324x128xf32>
    %61 = arith.mulf %57, %60 : vector<324x128xf32>
    %62 = arith.truncf %61 : vector<324x128xf32> to vector<324x128xbf16>
    %cst_71 = arith.constant 0.000000e+00 : bf16
    %63 = vector.broadcast %cst_71 : bf16 to vector<8x128xbf16>
    %c0_72 = arith.constant 0 : index
    %c0_73 = arith.constant 0 : index
    %64 = vector.load %arg11[%c0_72, %c0_73] : memref<344x128xbf16, #tpu.memory_space<vmem>>, vector<8x128xbf16>
    tpu.vector_store %arg11[%c0_72, %c0_73], %63 {strides = array<i32>} : memref<344x128xbf16, #tpu.memory_space<vmem>>, vector<8x128xbf16>,
    %c8_74 = arith.constant 8 : index
    %c0_75 = arith.constant 0 : index
    %65 = vector.load %arg11[%c8_74, %c0_75] : memref<344x128xbf16, #tpu.memory_space<vmem>>, vector<324x128xbf16>
    tpu.vector_store %arg11[%c8_74, %c0_75], %62 {strides = array<i32>} : memref<344x128xbf16, #tpu.memory_space<vmem>>, vector<324x128xbf16>,
    %c7_76 = arith.constant 7 : index
    %c0_77 = arith.constant 0 : index
    %66 = vector.load %arg11[%c7_76, %c0_77] : memref<344x128xbf16, #tpu.memory_space<vmem>>, vector<288x128xbf16>
    %c0_78 = arith.constant 0 : index
    %c0_79 = arith.constant 0 : index
    %c0_80 = arith.constant 0 : index
    %67 = vector.load %arg6[%c0_78, %c0_79, %c0_80] : memref<9x128x128xbf16, #tpu.memory_space<vmem>>, vector<1x128x128xbf16>
    %68 = vector.shape_cast %67 : vector<1x128x128xbf16> to vector<128x128xbf16>
    %cst_81 = arith.constant dense<0.000000e+00> : vector<288x128xf32>
    %69 = tpu.matmul %66, %68, %cst_81 {dimension_numbers = #tpu.dot_dimension_numbers<[1], [0], [0], [1], [0, 0, 1, 1], [], []>} : vector<288x128xbf16>, vector<128x128xbf16>, vector<288x128xf32> -> vector<288x128xf32>
    %c8_82 = arith.constant 8 : index
    %c0_83 = arith.constant 0 : index
    %70 = vector.load %arg11[%c8_82, %c0_83] : memref<344x128xbf16, #tpu.memory_space<vmem>>, vector<288x128xbf16>
    %c1_84 = arith.constant 1 : index
    %c0_85 = arith.constant 0 : index
    %c0_86 = arith.constant 0 : index
    %71 = vector.load %arg6[%c1_84, %c0_85, %c0_86] : memref<9x128x128xbf16, #tpu.memory_space<vmem>>, vector<1x128x128xbf16>
    %72 = vector.shape_cast %71 : vector<1x128x128xbf16> to vector<128x128xbf16>
    %cst_87 = arith.constant dense<0.000000e+00> : vector<288x128xf32>
    %73 = tpu.matmul %70, %72, %cst_87 {dimension_numbers = #tpu.dot_dimension_numbers<[1], [0], [0], [1], [0, 0, 1, 1], [], []>} : vector<288x128xbf16>, vector<128x128xbf16>, vector<288x128xf32> -> vector<288x128xf32>
    %74 = arith.addf %69, %73 : vector<288x128xf32>
    %c9 = arith.constant 9 : index
    %c0_88 = arith.constant 0 : index
    %75 = vector.load %arg11[%c9, %c0_88] : memref<344x128xbf16, #tpu.memory_space<vmem>>, vector<288x128xbf16>
    %c2_89 = arith.constant 2 : index
    %c0_90 = arith.constant 0 : index
    %c0_91 = arith.constant 0 : index
    %76 = vector.load %arg6[%c2_89, %c0_90, %c0_91] : memref<9x128x128xbf16, #tpu.memory_space<vmem>>, vector<1x128x128xbf16>
    %77 = vector.shape_cast %76 : vector<1x128x128xbf16> to vector<128x128xbf16>
    %cst_92 = arith.constant dense<0.000000e+00> : vector<288x128xf32>
    %78 = tpu.matmul %75, %77, %cst_92 {dimension_numbers = #tpu.dot_dimension_numbers<[1], [0], [0], [1], [0, 0, 1, 1], [], []>} : vector<288x128xbf16>, vector<128x128xbf16>, vector<288x128xf32> -> vector<288x128xf32>
    %79 = arith.addf %74, %78 : vector<288x128xf32>
    %c25 = arith.constant 25 : index
    %c0_93 = arith.constant 0 : index
    %80 = vector.load %arg11[%c25, %c0_93] : memref<344x128xbf16, #tpu.memory_space<vmem>>, vector<288x128xbf16>
    %c3_94 = arith.constant 3 : index
    %c0_95 = arith.constant 0 : index
    %c0_96 = arith.constant 0 : index
    %81 = vector.load %arg6[%c3_94, %c0_95, %c0_96] : memref<9x128x128xbf16, #tpu.memory_space<vmem>>, vector<1x128x128xbf16>
    %82 = vector.shape_cast %81 : vector<1x128x128xbf16> to vector<128x128xbf16>
    %cst_97 = arith.constant dense<0.000000e+00> : vector<288x128xf32>
    %83 = tpu.matmul %80, %82, %cst_97 {dimension_numbers = #tpu.dot_dimension_numbers<[1], [0], [0], [1], [0, 0, 1, 1], [], []>} : vector<288x128xbf16>, vector<128x128xbf16>, vector<288x128xf32> -> vector<288x128xf32>
    %84 = arith.addf %79, %83 : vector<288x128xf32>
    %c26 = arith.constant 26 : index
    %c0_98 = arith.constant 0 : index
    %85 = vector.load %arg11[%c26, %c0_98] : memref<344x128xbf16, #tpu.memory_space<vmem>>, vector<288x128xbf16>
    %c4_99 = arith.constant 4 : index
    %c0_100 = arith.constant 0 : index
    %c0_101 = arith.constant 0 : index
    %86 = vector.load %arg6[%c4_99, %c0_100, %c0_101] : memref<9x128x128xbf16, #tpu.memory_space<vmem>>, vector<1x128x128xbf16>
    %87 = vector.shape_cast %86 : vector<1x128x128xbf16> to vector<128x128xbf16>
    %cst_102 = arith.constant dense<0.000000e+00> : vector<288x128xf32>
    %88 = tpu.matmul %85, %87, %cst_102 {dimension_numbers = #tpu.dot_dimension_numbers<[1], [0], [0], [1], [0, 0, 1, 1], [], []>} : vector<288x128xbf16>, vector<128x128xbf16>, vector<288x128xf32> -> vector<288x128xf32>
    %89 = arith.addf %84, %88 : vector<288x128xf32>
    %c27 = arith.constant 27 : index
    %c0_103 = arith.constant 0 : index
    %90 = vector.load %arg11[%c27, %c0_103] : memref<344x128xbf16, #tpu.memory_space<vmem>>, vector<288x128xbf16>
    %c5_104 = arith.constant 5 : index
    %c0_105 = arith.constant 0 : index
    %c0_106 = arith.constant 0 : index
    %91 = vector.load %arg6[%c5_104, %c0_105, %c0_106] : memref<9x128x128xbf16, #tpu.memory_space<vmem>>, vector<1x128x128xbf16>
    %92 = vector.shape_cast %91 : vector<1x128x128xbf16> to vector<128x128xbf16>
    %cst_107 = arith.constant dense<0.000000e+00> : vector<288x128xf32>
    %93 = tpu.matmul %90, %92, %cst_107 {dimension_numbers = #tpu.dot_dimension_numbers<[1], [0], [0], [1], [0, 0, 1, 1], [], []>} : vector<288x128xbf16>, vector<128x128xbf16>, vector<288x128xf32> -> vector<288x128xf32>
    %94 = arith.addf %89, %93 : vector<288x128xf32>
    %c43 = arith.constant 43 : index
    %c0_108 = arith.constant 0 : index
    %95 = vector.load %arg11[%c43, %c0_108] : memref<344x128xbf16, #tpu.memory_space<vmem>>, vector<288x128xbf16>
    %c6_109 = arith.constant 6 : index
    %c0_110 = arith.constant 0 : index
    %c0_111 = arith.constant 0 : index
    %96 = vector.load %arg6[%c6_109, %c0_110, %c0_111] : memref<9x128x128xbf16, #tpu.memory_space<vmem>>, vector<1x128x128xbf16>
    %97 = vector.shape_cast %96 : vector<1x128x128xbf16> to vector<128x128xbf16>
    %cst_112 = arith.constant dense<0.000000e+00> : vector<288x128xf32>
    %98 = tpu.matmul %95, %97, %cst_112 {dimension_numbers = #tpu.dot_dimension_numbers<[1], [0], [0], [1], [0, 0, 1, 1], [], []>} : vector<288x128xbf16>, vector<128x128xbf16>, vector<288x128xf32> -> vector<288x128xf32>
    %99 = arith.addf %94, %98 : vector<288x128xf32>
    %c44 = arith.constant 44 : index
    %c0_113 = arith.constant 0 : index
    %100 = vector.load %arg11[%c44, %c0_113] : memref<344x128xbf16, #tpu.memory_space<vmem>>, vector<288x128xbf16>
    %c7_114 = arith.constant 7 : index
    %c0_115 = arith.constant 0 : index
    %c0_116 = arith.constant 0 : index
    %101 = vector.load %arg6[%c7_114, %c0_115, %c0_116] : memref<9x128x128xbf16, #tpu.memory_space<vmem>>, vector<1x128x128xbf16>
    %102 = vector.shape_cast %101 : vector<1x128x128xbf16> to vector<128x128xbf16>
    %cst_117 = arith.constant dense<0.000000e+00> : vector<288x128xf32>
    %103 = tpu.matmul %100, %102, %cst_117 {dimension_numbers = #tpu.dot_dimension_numbers<[1], [0], [0], [1], [0, 0, 1, 1], [], []>} : vector<288x128xbf16>, vector<128x128xbf16>, vector<288x128xf32> -> vector<288x128xf32>
    %104 = arith.addf %99, %103 : vector<288x128xf32>
    %c45 = arith.constant 45 : index
    %c0_118 = arith.constant 0 : index
    %105 = vector.load %arg11[%c45, %c0_118] : memref<344x128xbf16, #tpu.memory_space<vmem>>, vector<288x128xbf16>
    %c8_119 = arith.constant 8 : index
    %c0_120 = arith.constant 0 : index
    %c0_121 = arith.constant 0 : index
    %106 = vector.load %arg6[%c8_119, %c0_120, %c0_121] : memref<9x128x128xbf16, #tpu.memory_space<vmem>>, vector<1x128x128xbf16>
    %107 = vector.shape_cast %106 : vector<1x128x128xbf16> to vector<128x128xbf16>
    %cst_122 = arith.constant dense<0.000000e+00> : vector<288x128xf32>
    %108 = tpu.matmul %105, %107, %cst_122 {dimension_numbers = #tpu.dot_dimension_numbers<[1], [0], [0], [1], [0, 0, 1, 1], [], []>} : vector<288x128xbf16>, vector<128x128xbf16>, vector<288x128xf32> -> vector<288x128xf32>
    %109 = arith.addf %104, %108 : vector<288x128xf32>
    %c0_123 = arith.constant 0 : index
    %c0_124 = arith.constant 0 : index
    %110 = vector.load %arg7[%c0_123, %c0_124] : memref<1x128xf32, #tpu.memory_space<vmem>>, vector<1x128xf32>
    %111 = vector.broadcast %110 : vector<1x128xf32> to vector<288x128xf32>
    %112 = arith.addf %109, %111 : vector<288x128xf32>
    %c0_125 = arith.constant 0 : index
    %c0_126 = arith.constant 0 : index
    %c0_127 = arith.constant 0 : index
    %c37_128 = arith.constant 37 : index
    %c0_129 = arith.constant 0 : index
    %113 = vector.load %arg2[%c0_125, %c0_126, %c0_127, %c37_128, %c0_129] : memref<1x1x1x378x128xbf16, #tpu.memory_space<vmem>>, vector<1x1x1x288x128xbf16>
    %114 = vector.shape_cast %113 : vector<1x1x1x288x128xbf16> to vector<288x128xbf16>
    %c0_130 = arith.constant 0 : index
    %c0_131 = arith.constant 0 : index
    %115 = vector.load %arg8[%c0_130, %c0_131] : memref<128x128xbf16, #tpu.memory_space<vmem>>, vector<128x128xbf16>
    %cst_132 = arith.constant dense<0.000000e+00> : vector<288x128xf32>
    %116 = tpu.matmul %114, %115, %cst_132 {dimension_numbers = #tpu.dot_dimension_numbers<[1], [0], [0], [1], [0, 0, 1, 1], [], []>} : vector<288x128xbf16>, vector<128x128xbf16>, vector<288x128xf32> -> vector<288x128xf32>
    %c0_133 = arith.constant 0 : index
    %c0_134 = arith.constant 0 : index
    %117 = vector.load %arg9[%c0_133, %c0_134] : memref<1x128xf32, #tpu.memory_space<vmem>>, vector<1x128xf32>
    %118 = vector.broadcast %117 : vector<1x128xf32> to vector<288x128xf32>
    %119 = arith.addf %116, %118 : vector<288x128xf32>
    %120 = arith.addf %112, %119 : vector<288x128xf32>
    %cst_135 = arith.constant 0.000000e+00 : f32
    %121 = vector.broadcast %cst_135 : f32 to vector<288x128xf32>
    %122 = arith.maximumf %120, %121 : vector<288x128xf32>
    %123 = arith.truncf %122 : vector<288x128xf32> to vector<288x128xbf16>
    %c0_136 = arith.constant 0 : index
    %c0_137 = arith.constant 0 : index
    %c0_138 = arith.constant 0 : index
    %c0_139 = arith.constant 0 : index
    %124 = vector.load %arg10[%c0_136, %c0_137, %c0_138, %c0_139] : memref<1x1x288x128xbf16, #tpu.memory_space<vmem>>, vector<1x1x288x128xbf16>
    %125 = vector.shape_cast %124 : vector<1x1x288x128xbf16> to vector<288x128xbf16>
    %126 = vector.shape_cast %123 : vector<288x128xbf16> to vector<1x1x288x128xbf16>
    tpu.vector_store %arg10[%c0_136, %c0_137, %c0_138, %c0_139], %126 {strides = array<i32>} : memref<1x1x288x128xbf16, #tpu.memory_space<vmem>>, vector<1x1x288x128xbf16>,
    return
  }
  func.func @transform_0(%arg0: i32, %arg1: i32) -> (i32, i32, i32, i32, i32) {
    %c0_i32 = arith.constant 0 : i32
    %c0_i32_0 = arith.constant 0 : i32
    %c0_i32_1 = arith.constant 0 : i32
    %c0_i32_2 = arith.constant 0 : i32
    return %arg0, %arg1, %c0_i32, %c0_i32_0, %c0_i32_1 : i32, i32, i32, i32, i32
  }
  func.func @transform_1(%arg0: i32, %arg1: i32) -> (i32, i32, i32) {
    %c0_i32 = arith.constant 0 : i32
    %c0_i32_0 = arith.constant 0 : i32
    %c0_i32_1 = arith.constant 0 : i32
    return %arg1, %c0_i32, %c0_i32_0 : i32, i32, i32
  }
  func.func @transform_2(%arg0: i32, %arg1: i32) -> (i32, i32, i32) {
    %c0_i32 = arith.constant 0 : i32
    %c0_i32_0 = arith.constant 0 : i32
    %c0_i32_1 = arith.constant 0 : i32
    %c0_i32_2 = arith.constant 0 : i32
    return %c0_i32, %c0_i32_0, %c0_i32_1 : i32, i32, i32
  }
  func.func @transform_3(%arg0: i32, %arg1: i32) -> (i32, i32) {
    %c0_i32 = arith.constant 0 : i32
    %c0_i32_0 = arith.constant 0 : i32
    %c0_i32_1 = arith.constant 0 : i32
    return %c0_i32, %c0_i32_0 : i32, i32
  }
  func.func @transform_4(%arg0: i32, %arg1: i32) -> (i32, i32, i32) {
    %c0_i32 = arith.constant 0 : i32
    %c0_i32_0 = arith.constant 0 : i32
    %c0_i32_1 = arith.constant 0 : i32
    %c0_i32_2 = arith.constant 0 : i32
    return %c0_i32, %c0_i32_0, %c0_i32_1 : i32, i32, i32
  }
  func.func @transform_5(%arg0: i32, %arg1: i32) -> (i32, i32) {
    %c0_i32 = arith.constant 0 : i32
    %c0_i32_0 = arith.constant 0 : i32
    %c0_i32_1 = arith.constant 0 : i32
    return %c0_i32, %c0_i32_0 : i32, i32
  }
  func.func @transform_6(%arg0: i32, %arg1: i32) -> (i32, i32) {
    %c0_i32 = arith.constant 0 : i32
    %c0_i32_0 = arith.constant 0 : i32
    %c0_i32_1 = arith.constant 0 : i32
    return %c0_i32, %c0_i32_0 : i32, i32
  }
  func.func @transform_7(%arg0: i32, %arg1: i32) -> (i32, i32) {
    %c0_i32 = arith.constant 0 : i32
    %c0_i32_0 = arith.constant 0 : i32
    %c0_i32_1 = arith.constant 0 : i32
    return %c0_i32, %c0_i32_0 : i32, i32
  }
  func.func @transform_8(%arg0: i32, %arg1: i32) -> (i32, i32, i32, i32) {
    %c0_i32 = arith.constant 0 : i32
    %c0_i32_0 = arith.constant 0 : i32
    %c0_i32_1 = arith.constant 0 : i32
    return %arg0, %arg1, %c0_i32, %c0_i32_0 : i32, i32, i32, i32
  }
}

</mosaic_0001>

<bundles_post_ra>
// kernel: residual_block_pallas.1
= control target key start
LH: loop header
LB: loop body
LE: loop exit
PB: predicated region body
PF: predicated region fallthrough
CT: control target
= control target key end

     0   :  { %s10715_s27 = smov 0   ;;  %s10717_s28 = smov 0   ;;  %s13991_s0 = inlined_call_operand.vmem [shape: bf16[2,1,1,378,128], index: 0, kind: input, shape index: {}]   ;;  %s13992_s1 = inlined_call_operand.vmem [shape: f32[1,324,1], index: 1, kind: input, shape index: {}]   ;;  %s13993_s2 = inlined_call_operand.vmem [shape: bf16[9,128,128], index: 2, kind: input, shape index: {}]   ;;  %s13994_s3 = inlined_call_operand.vmem [shape: f32[1,128], index: 3, kind: input, shape index: {}]   ;;  %s13995_s4 = inlined_call_operand.vmem [shape: bf16[9,128,128], index: 4, kind: input, shape index: {}]   ;;  %s13996_s5 = inlined_call_operand.vmem [shape: f32[1,128], index: 5, kind: input, shape index: {}]   ;;  %s13997_s6 = inlined_call_operand.vmem [shape: bf16[128,128], index: 6, kind: input, shape index: {}]   ;;  %s13998_s7 = inlined_call_operand.vmem [shape: f32[1,128], index: 7, kind: input, shape index: {}]   ;;  %s13999_s8 = inlined_call_operand.vmem [shape: bf16[2,1,288,128], index: 8, kind: output, shape index: {}]  }
   0x1   :  { %s10719_s29 = smov 0  }
   0x2 LB: > { %s30_s30 = sadd.s32 1, %s10663_s28  ;;  %p8355_p0 = scmp.ge.s32.totalorder %s10667_s29, 1  ;;  %s10667_s29 = sphi %s10719_s29, %s18_s29   ;;  %s10663_s28 = sphi %s10717_s28, %s14339_s28   ;;  %s10659_s27 = sphi %s10715_s27, %s14338_s27  }
   0x3   : > { %p32_p1 = scmp.ge.s32.totalorder %s30_s30, 2  ;;  %p292_p2 = scmp.lt.s32.totalorder %s10667_s29, 3 }
   0x5   : > { %s14341_s30 = smov (%p32_p1, %s30_s30), 0  ;;  %p293_p3 = pnand %p8355_p0, %p292_p2 }
   0x7   : > { %296 = sbr.rel (%p293_p3) target bundleno = 2039 (0x7f7), region = 52 }
   0xc   : > { %v9850_v0 = vld [vmem:[%s13993_s2 + $0x78] sm:$0xff]  ;;  %p339_p4 = scmp.lt.s32.totalorder %s10659_s27, 1  ;;  %v9849_v1 = vld [vmem:[%s13993_s2 + $0x70] sm:$0xff]  ;;  %v9848_v5 = vld [vmem:[%s13993_s2 + $0x68] sm:$0xff]  ;;  %vm541_vm0 = vsmask.f32 7424 }
   0xd   : > { %778 = vmatpush.bf16.msra.mxu0 %v9850_v0  ;;  %v9842_v2 = vld [vmem:[%s13993_s2 + $0x38] sm:$0xff]  ;;  %v9847_v6 = vld [vmem:[%s13993_s2 + $0x60] sm:$0xff]  ;;  %v10772_v9 = vld [vmem:[%s13993_s2 + $0xb0] sm:$0xff]  ;;  %vm1097_vm1 = vcmask 1046528   ;;  %vm2241_vm2 = vcmask 1045504   ;;  %vm3528_vm5 = vcmask 1044480  }
   0xe   : > { %v10745_v3 = vld [vmem:[%s13993_s2 + $0xb8] sm:$0xff]  ;;  %s14343_s27 = smov (!%p339_p4, %s10659_s27), 1  ;;  %10509 = vmatpush.bf16.msra.mxu1 %v9842_v2  ;;  %v9884_v10 = vld [vmem:[%s13993_s2 + $0xf0] sm:$0xff]  ;;  %v10790_v15 = vld [vmem:[%s13993_s2 + $0xa8] sm:$0xff]  ;;  %vm3095_vm3 = vsmask.f32 5376 }
   0xf   : > { %v9885_v4 = vld [vmem:[%s13993_s2 + $0xf8] sm:$0xff]  ;;  %10517 = vmatpush.bf16.msra.mxu2 %v10745_v3  ;;  %s10565_s21 = smul.u32 192, %s14343_s27  ;;  %v9841_v11 = vld [vmem:[%s13993_s2 + $0x30] sm:$0xff]  ;;  %v9883_v16 = vld [vmem:[%s13993_s2 + $0xe8] sm:$0xff]  ;;  %vm1808_vm4 = vsmask.f32 6400 }
  0x10   : > { %10525 = vmatpush.bf16.msra.mxu3 %v9885_v4  ;;  %v9846_v7 = vld [vmem:[%s13993_s2 + $0x58] sm:$0xff]  ;;  %v9845_v12 = vld [vmem:[%s13993_s2 + $0x50] sm:$0xff]  ;;  %v9840_v17 = vld [vmem:[%s13993_s2 + $0x28] sm:$0xff]  ;;  %vm4595_vm6 = vsmask.f32 4352  ;;  %s10566_s23 = smul.u32 144, %s14343_s27 }
  0x11   : > { %779 = vmatpush.bf16.msra.mxu0 %v9849_v1  ;;  %s10763_s26 = scalar_lea.vmem %s13991_s0, %s10565_s21  ;;  %v9844_v18 = vld [vmem:[%s13993_s2 + $0x48] sm:$0xff]  ;;  %v10806_v22 = vld [vmem:[%s13993_s2 + $0xa0] sm:$0xff]  ;;  %v10823_v28 = vld [vmem:[%s13993_s2 + $0x98] sm:$0xff] }
  0x12   : > { %v10117_v8 = vld [vmem:[%s10763_s26] sm:$0xff]   ;;  %v10784_v13 = vld [vmem:[%s10763_s26 + $0x8] sm:$0xff]  ;;  %10510 = vmatpush.bf16.msra.mxu1 %v9841_v11  ;;  %v10829_v29 = vld [vmem:[%s13993_s2 + $0xd8] sm:$0xff]  ;;  %s13789_s9 = scalar_lea.vmem %s13999_s8, %s10566_s23 }
  0x13   : > { %v545_v14 = vshll.u32 %v10117_v8, 16  ;;  %10518 = vmatpush.bf16.msra.mxu2 %v10772_v9  ;;  %v543_v19 = vshrl.u32 %v10117_v8, 16  ;;  %v550_v21 = vshll.u32 %v10784_v13, 16  ;;  %v10811_v23 = vld [vmem:[%s13993_s2 + $0xe0] sm:$0xff]  ;;  %v9838_v31 = vld [vmem:[%s13993_s2 + $0x18] sm:$0xff]  ;;  %v10840_v32 = vld [vmem:[%s13993_s2 + $0x90] sm:$0xff] }
  0x14   : > { %10526 = vmatpush.bf16.msra.mxu3 %v9884_v10  ;;  %v9839_v24 = vld [vmem:[%s13993_s2 + $0x20] sm:$0xff]  ;;  %v10845_v33 = vld [vmem:[%s13993_s2 + $0xd0] sm:$0xff]  ;;  %v10857_v36 = vld [vmem:[%s13993_s2 + $0x88] sm:$0xff]  ;;  %v554_v42 = vshrl.u32 %v10784_v13, 16 }
  0x15   : > { %780 = vmatpush.bf16.msra.mxu0 %v9848_v5  ;;  %v547_v20 = vrot.slane %v545_v14, 1  ;;  %v9843_v25 = vld [vmem:[%s13993_s2 + $0x40] sm:$0xff]  ;;  %v552_v27 = vrot.slane %v550_v21, 1  ;;  %v10848_v34 = vld [vmem:[%s10763_s26 + $0x10] sm:$0xff]  ;;  %v10863_v37 = vld [vmem:[%s13993_s2 + $0xc8] sm:$0xff] }
  0x16   : > { %10511 = vmatpush.bf16.msra.mxu1 %v9840_v17  ;;  %v9837_v35 = vld [vmem:[%s13993_s2 + $0x10] sm:$0xff]  ;;  %v10866_v38 = vld [vmem:[%s10763_s26 + $0x20] sm:$0xff]  ;;  %v10869_v39 = vld [vmem:[%s10763_s26 + $0x18] sm:$0xff]  ;;  %v558_v43 = vshll.u32 %v10848_v34, 16  ;;  %v562_v59 = vshrl.u32 %v10848_v34, 16 }
  0x17   : > { %10519 = vmatpush.bf16.msra.mxu2 %v10790_v15  ;;  %v548_v26 = vor.u32 %v547_v20, %v543_v19  ;;  %v10872_v40 = vld [vmem:[%s10763_s26 + $0x20] sm:$0xff]  ;;  %v9862_v41 = vld [vmem:[%s10763_s26 + $0x28] sm:$0xff]  ;;  %v14001_v46 = vrot.slane %v10869_v39, 1  ;;  %v1105_v47 = vrot.slane %v10866_v38, 1  ;;  %v556_v51 = vor.u32 %v554_v42, %v552_v27  ;;  %v9863_v58 = vld [vmem:[%s10763_s26 + $0x30] sm:$0xff] }
  0x18   : > { %10527 = vmatpush.bf16.msra.mxu3 %v9883_v16  ;;  %v9836_v44 = vld [vmem:[%s13993_s2 + $0x8] sm:$0xff]  ;;  %v10884_v45 = vld [vmem:[%s13993_s2 + $0x80] sm:$0xff]  ;;  %v14000_v49 = vrot.slane %v10872_v40, 1  ;;  %v1530_v50 = vrot.slane %v9862_v41, 1  ;;  %v560_v52 = vrot.slane %v558_v43, 1  ;;  %v566_v60 = vshll.u32 %v10869_v39, 16 }
  0x19   : > { %781 = vmatpush.bf16.msra.mxu0 %v9847_v6  ;;  %v553_v30 = vsel %vm541_vm0, %v548_v26, %v552_v27  ;;  %v10892_v48 = vld [vmem:[%s13993_s2 + $0xc0] sm:$0xff]  ;;  %v1106_v53 = vsel %vm1097_vm1, %v14001_v46, %v1105_v47  ;;  %v10909_v57 = vld [vmem:[%s10763_s26 + $0x28] sm:$0xff]  ;;  %v1532_v62 = vrot.slane %v9863_v58, 1  ;;  %v9821_v5 = vld [vmem:[%s10763_s26 + $0x30] sm:$0xff]  ;;  %v574_v8 = vshll.u32 %v10866_v38, 16 }
  0x1a   : > { %10512 = vmatpush.bf16.msra.mxu1 %v9839_v24  ;;  %v9835_v54 = vld [vmem:[%s13993_s2] sm:$0xff]  ;;  %v1531_v55 = vsel %vm1097_vm1, %v14000_v49, %v1530_v50  ;;  %v561_v56 = vsel %vm541_vm0, %v556_v51, %v560_v52  ;;  %v1107_v61 = vrot.slane %v10909_v57, 1  ;;  %v564_v63 = vor.u32 %v562_v59, %v560_v52  ;;  %v9864_v6 = vld [vmem:[%s10763_s26 + $0x38] sm:$0xff] }
  0x1b   : > { %10520 = vmatpush.bf16.msra.mxu2 %v10806_v22  ;;  %v568_v0 = vrot.slane %v566_v60, 1  ;;  %v1534_v10 = vrot.slane %v9864_v6, 1  ;;  %v9865_v16 = vld [vmem:[%s10763_s26 + $0x40] sm:$0xff]  ;;  %v9825_v60 = vld [vmem:[%s10763_s26 + $0x50] sm:$0xff] }
  0x1c   : > { %10528 = vmatpush.bf16.msra.mxu3 %v10811_v23  ;;  %v1108_v1 = vsel %vm1097_vm1, %v1105_v47, %v1107_v61  ;;  %v1536_v20 = vrot.slane %v9865_v16, 1  ;;  %v9823_v27 = vld [vmem:[%s10763_s26 + $0x40] sm:$0xff] }
  0x1d   : > { %782 = vmatpush.bf16.msra.mxu0 %v9846_v7  ;;  %v569_v4 = vsel %vm541_vm0, %v564_v63, %v568_v0  ;;  %v570_v7 = vshrl.u32 %v10869_v39, 16  ;;  %v1535_v13 = vsel %vm1097_vm1, %v1532_v62, %v1534_v10  ;;  %v606_v59 = vshll.u32 %v9823_v27, 16 }
  0x1e   : > { %10513 = vmatpush.bf16.msra.mxu1 %v9838_v31  ;;  %v610_v6 = vshrl.u32 %v9823_v27, 16 }
  0x1f   : > { %10521 = vmatpush.bf16.msra.mxu2 %v10823_v28  ;;  %v608_v63 = vrot.slane %v606_v59, 1 }
  0x20   : > { %10529 = vmatpush.bf16.msra.mxu3 %v10829_v29 }
  0x21   : > { %783 = vmatpush.bf16.msra.mxu0 %v9845_v12  ;;  %v576_v12 = vrot.slane %v574_v8, 1  ;;  %v10959_v8 = vld [vmem:[%s10763_s26 + $0x58] sm:$0xff] }
  0x22   : > { %10514 = vmatpush.bf16.msra.mxu1 %v9837_v35 }
  0x23   : > { %10522 = vmatpush.bf16.msra.mxu2 %v10840_v32 }
  0x24   : > { %10530 = vmatpush.bf16.msra.mxu3 %v10845_v33 }
  0x25   : > { %784 = vmatpush.bf16.msra.mxu0 %v9844_v18  ;;  %v582_v18 = vshll.u32 %v10909_v57, 16 }
  0x26   : > { %10515 = vmatpush.bf16.msra.mxu1 %v9836_v44 }
  0x27   : > { %10523 = vmatpush.bf16.msra.mxu2 %v10857_v36 }
  0x28   : > { %10531 = vmatpush.bf16.msra.mxu3 %v10863_v37 }
  0x29   : > { %785 = vmatpush.bf16.msra.mxu0 %v9843_v25  ;;  %v1537_v25 = vsel %vm1097_vm1, %v1534_v10, %v1536_v20  ;;  %v612_v10 = vor.u32 %v610_v6, %v608_v63 }
  0x2a   : > { %10516 = vmatpush.bf16.msra.mxu1 %v9835_v54 }
  0x2b   : > { %10524 = vmatpush.bf16.msra.mxu2 %v10884_v45 }
  0x2c   : > { %786 = vmatmul.bf16.vlgmr.msra.gmra.mxu0 %v553_v30  ;;  %10532 = vmatpush.bf16.msra.mxu3 %v10892_v48  ;;  %v586_v30 = vshrl.u32 %v10909_v57, 16 }
  0x2d   : > { %963 = vmatpush.bf16.msrb.mxu0 %v9842_v2  ;;  %986 = vmatmul.bf16.vlgmr.msra.gmra.mxu1 %v10869_v39  ;;  %v1533_v2 = vsel %vm1097_vm1, %v1530_v50, %v1532_v62 }
  0x2e   : > { %1231 = vmatmul.bf16.vlgmr.msra.gmra.mxu2 %v1106_v53 }
  0x2f   : > { %1656 = vmatmul.bf16.vlgmr.msra.gmra.mxu3 %v1531_v55 }
  0x31   : > { %964 = vmatpush.bf16.msrb.mxu0 %v9841_v11  ;;  %v572_v11 = vor.u32 %v570_v7, %v568_v0 }
  0x33   : > { %v577_v14 = vsel %vm541_vm0, %v572_v11, %v576_v12 }
  0x35   : > { %965 = vmatpush.bf16.msrb.mxu0 %v9840_v17  ;;  %v578_v17 = vshrl.u32 %v10866_v38, 16 }
  0x37   : > { %v580_v21 = vor.u32 %v578_v17, %v576_v12 }
  0x39   : > { %966 = vmatpush.bf16.msrb.mxu0 %v9839_v24 }
  0x3c   : > { %791 = vmatmul.bf16.gmra.mxu0 %v561_v56 }
  0x3d   : > { %967 = vmatpush.bf16.msrb.mxu0 %v9838_v31  ;;  %991 = vmatmul.bf16.gmra.mxu1 %v10866_v38  ;;  %v590_v31 = vshll.u32 %v9821_v5, 16 }
  0x3e   : > { %1236 = vmatmul.bf16.gmra.mxu2 %v1108_v1  ;;  %v9868_v1 = vld [vmem:[%s10763_s26 + $0x58] sm:$0xff] }
  0x3f   : > { %1661 = vmatmul.bf16.gmra.mxu3 %v1533_v2  ;;  %v592_v38 = vrot.slane %v590_v31, 1  ;;  %v1542_v2 = vrot.slane %v9868_v1, 1 }
  0x41   : > { %968 = vmatpush.bf16.msrb.mxu0 %v9837_v35 }
  0x45   : > { %969 = vmatpush.bf16.msrb.mxu0 %v9836_v44  ;;  %v9824_v44 = vld [vmem:[%s10763_s26 + $0x48] sm:$0xff] }
  0x46   : > { %v1115_v50 = vrot.slane %v9824_v44, 1  ;;  %v614_v7 = vshll.u32 %v9824_v44, 16 }
  0x48   : > { %v616_v11 = vrot.slane %v614_v7, 1 }
  0x49   : > { %970 = vmatpush.bf16.msrb.mxu0 %v9835_v54  ;;  %v9867_v54 = vld [vmem:[%s10763_s26 + $0x50] sm:$0xff] }
  0x4a   : > { %v1540_v55 = vrot.slane %v9867_v54, 1 }
  0x4c   : > { %796 = vmatmul.bf16.gmra.mxu0 %v569_v4 }
  0x4d   : > { %1208 = vmatpush.bf16.msra.mxu0 %v10745_v3  ;;  %v1109_v3 = vrot.slane %v9821_v5, 1  ;;  %996 = vmatmul.bf16.gmra.mxu1 %v10909_v57 }
  0x4f   : > { %1666 = vmatmul.bf16.gmra.mxu3 %v1535_v13 }
  0x51   : > { %1209 = vmatpush.bf16.msra.mxu0 %v10772_v9  ;;  %v1110_v9 = vsel %vm1097_vm1, %v1107_v61, %v1109_v3  ;;  %v1117_v61 = vrot.slane %v9825_v60, 1 }
  0x52   : > { %1241 = vmatmul.bf16.gmra.mxu2 %v1110_v9  ;;  %v9869_v9 = vld [vmem:[%s10763_s26 + $0x60] sm:$0xff] }
  0x53   : > { %v1118_v0 = vsel %vm1097_vm1, %v1115_v50, %v1117_v61  ;;  %v1544_v13 = vrot.slane %v9869_v9, 1 }
  0x55   : > { %1210 = vmatpush.bf16.msra.mxu0 %v10790_v15  ;;  %v9822_v15 = vld [vmem:[%s10763_s26 + $0x38] sm:$0xff]  ;;  %v1545_v16 = vsel %vm1097_vm1, %v1542_v2, %v1544_v13 }
  0x56   : > { %v1111_v19 = vrot.slane %v9822_v15, 1  ;;  %v598_v47 = vshll.u32 %v9822_v15, 16  ;;  %v602_v58 = vshrl.u32 %v9822_v15, 16 }
  0x58   : > { %v1112_v24 = vsel %vm1097_vm1, %v1109_v3, %v1111_v19  ;;  %v600_v52 = vrot.slane %v598_v47, 1  ;;  %v1119_v3 = vrot.slane %v10959_v8, 1 }
  0x59   : > { %1211 = vmatpush.bf16.msra.mxu0 %v10806_v22  ;;  %v584_v22 = vrot.slane %v582_v18, 1  ;;  %v618_v18 = vshrl.u32 %v9824_v44, 16 }
  0x5a   : > { %v604_v62 = vor.u32 %v602_v58, %v600_v52  ;;  %v1120_v12 = vsel %vm1097_vm1, %v1117_v61, %v1119_v3 }
  0x5b   : > { %v585_v26 = vsel %vm541_vm0, %v580_v21, %v584_v22 }
  0x5c   : > { %801 = vmatmul.bf16.gmra.mxu0 %v577_v14  ;;  %v609_v4 = vsel %vm541_vm0, %v604_v62, %v608_v63  ;;  %v634_v63 = vshrl.u32 %v10959_v8, 16 }
  0x5d   : > { %1212 = vmatpush.bf16.msra.mxu0 %v10823_v28  ;;  %1001 = vmatmul.bf16.gmra.mxu1 %v9821_v5  ;;  %v9866_v28 = vld [vmem:[%s10763_s26 + $0x48] sm:$0xff] }
  0x5e   : > { %v1538_v35 = vrot.slane %v9866_v28, 1 }
  0x5f   : > { %1671 = vmatmul.bf16.gmra.mxu3 %v1537_v25 }
  0x60   : > { %v1539_v42 = vsel %vm1097_vm1, %v1536_v20, %v1538_v35  ;;  %v1541_v57 = vsel %vm1097_vm1, %v1538_v35, %v1540_v55  ;;  %v10971_v20 = vld [vmem:[%s10763_s26 + $0x60] sm:$0xff] }
  0x61   : > { %1213 = vmatpush.bf16.msra.mxu0 %v10840_v32  ;;  %v1113_v32 = vrot.slane %v9823_v27, 1  ;;  %v1121_v21 = vrot.slane %v10971_v20, 1 }
  0x62   : > { %1246 = vmatmul.bf16.gmra.mxu2 %v1112_v24 }
  0x63   : > { %v1114_v41 = vsel %vm1097_vm1, %v1111_v19, %v1113_v32  ;;  %v1116_v53 = vsel %vm1097_vm1, %v1113_v32, %v1115_v50  ;;  %v622_v19 = vshll.u32 %v9825_v60, 16  ;;  %v1122_v25 = vsel %vm1097_vm1, %v1119_v3, %v1121_v21 }
  0x65   : > { %1214 = vmatpush.bf16.msra.mxu0 %v10857_v36  ;;  %v588_v36 = vor.u32 %v586_v30, %v584_v22  ;;  %v620_v22 = vor.u32 %v618_v18, %v616_v11  ;;  %v624_v24 = vrot.slane %v622_v19, 1 }
  0x67   : > { %v593_v43 = vsel %vm541_vm0, %v588_v36, %v592_v38  ;;  %v625_v30 = vsel %vm541_vm0, %v620_v22, %v624_v24 }
  0x69   : > { %1215 = vmatpush.bf16.msra.mxu0 %v10884_v45  ;;  %v594_v45 = vshrl.u32 %v9821_v5, 16  ;;  %v1543_v5 = vsel %vm1097_vm1, %v1540_v55, %v1542_v2 }
  0x6b   : > { %v596_v51 = vor.u32 %v594_v45, %v592_v38  ;;  %v10985_v45 = vld [vmem:[%s10763_s26 + $0x68] sm:$0xff] }
  0x6c   : > { %806 = vmatmul.bf16.gmra.mxu0 %v585_v26  ;;  %v9870_v26 = vld [vmem:[%s10763_s26 + $0x68] sm:$0xff] }
  0x6d   : > { %1006 = vmatmul.bf16.gmra.mxu1 %v9822_v15  ;;  %v601_v56 = vsel %vm541_vm0, %v596_v51, %v600_v52  ;;  %v617_v15 = vsel %vm541_vm0, %v612_v10, %v616_v11  ;;  %v1123_v52 = vrot.slane %v10985_v45, 1  ;;  %v9872_v10 = vld [vmem:[%s10763_s26 + $0x78] sm:$0xff] }
  0x6f   : > { %1676 = vmatmul.bf16.gmra.mxu3 %v1539_v42  ;;  %v630_v42 = vshll.u32 %v10959_v8, 16  ;;  %v1124_v54 = vsel %vm1097_vm1, %v1121_v21, %v1123_v52 }
  0x71   : > { %v632_v51 = vrot.slane %v630_v42, 1 }
  0x72   : > { %1251 = vmatmul.bf16.gmra.mxu2 %v1114_v41  ;;  %v626_v41 = vshrl.u32 %v9825_v60, 16 }
  0x73   : > { %v636_v6 = vor.u32 %v634_v63, %v632_v51 }
  0x74   : > { %v628_v50 = vor.u32 %v626_v41, %v624_v24  ;;  %v11013_v41 = vld [vmem:[%s10763_s26 + $0x78] sm:$0xff] }
  0x7c   : > { %811 = vmatmul.bf16.gmra.mxu0 %v593_v43 }
  0x7d   : > { %1011 = vmatmul.bf16.gmra.mxu1 %v9823_v27  ;;  %v1546_v27 = vrot.slane %v9870_v26, 1  ;;  %v646_v26 = vshll.u32 %v10985_v45, 16 }
  0x7f   : > { %1681 = vmatmul.bf16.gmra.mxu3 %v1541_v57  ;;  %v1547_v32 = vsel %vm1097_vm1, %v1544_v13, %v1546_v27  ;;  %v633_v57 = vsel %vm541_vm0, %v628_v50, %v632_v51  ;;  %v648_v50 = vrot.slane %v646_v26, 1  ;;  %v1127_v51 = vrot.slane %v11013_v41, 1 }
  0x82   : > { %1256 = vmatmul.bf16.gmra.mxu2 %v1116_v53  ;;  %v9871_v53 = vld [vmem:[%s10763_s26 + $0x70] sm:$0xff] }
  0x83   : > { %v1548_v55 = vrot.slane %v9871_v53, 1 }
  0x85   : > { %v1549_v59 = vsel %vm1097_vm1, %v1546_v27, %v1548_v55 }
  0x8c   : > { %816 = vmatmul.bf16.gmra.mxu0 %v601_v56 }
  0x8d   : > { %1016 = vmatmul.bf16.gmra.mxu1 %v9824_v44 }
  0x8f   : > { %1686 = vmatmul.bf16.gmra.mxu3 %v1543_v5 }
  0x92   : > { %1261 = vmatmul.bf16.gmra.mxu2 %v1118_v0  ;;  %v638_v0 = vshll.u32 %v10971_v20, 16 }
  0x94   : > { %v640_v7 = vrot.slane %v638_v0, 1 }
  0x96   : > { %v641_v13 = vsel %vm541_vm0, %v636_v6, %v640_v7 }
  0x9c   : > { %821 = vmatmul.bf16.gmra.mxu0 %v609_v4  ;;  %v11000_v4 = vld [vmem:[%s10763_s26 + $0x70] sm:$0xff] }
  0x9d   : > { %1021 = vmatmul.bf16.gmra.mxu1 %v9825_v60  ;;  %v1125_v3 = vrot.slane %v11000_v4, 1 }
  0x9f   : > { %1691 = vmatmul.bf16.gmra.mxu3 %v1545_v16  ;;  %v1126_v11 = vsel %vm1097_vm1, %v1123_v52, %v1125_v3  ;;  %v9873_v52 = vld [vmem:[%s10763_s26 + $0x80] sm:$0xff]  ;;  %v1128_v53 = vsel %vm1097_vm1, %v1125_v3, %v1127_v51  ;;  %v654_v3 = vshll.u32 %v11000_v4, 16 }
  0xa2   : > { %1266 = vmatmul.bf16.gmra.mxu2 %v1120_v12  ;;  %v1550_v12 = vrot.slane %v9872_v10, 1 }
  0xa9   : > { %v10964_v14 = vpop.f32.mrf.mxu0 }
  0xaa   : > { %v987_v31 = vpop.f32.mrf.mxu1 }
  0xac   : > { %826 = vmatmul.bf16.gmra.mxu0 %v617_v15  ;;  %v1551_v15 = vsel %vm1097_vm1, %v1548_v55, %v1550_v12 }
  0xad   : > { %1026 = vmatmul.bf16.gmra.mxu1 %v10959_v8 }
  0xaf   : > { %1696 = vmatmul.bf16.gmra.mxu3 %v1547_v32 }
  0xb1   : > { %v10968_v17 = vpop.f32.mrf.mxu0  ;;  %v1232_v35 = vpop.f32.mrf.mxu2 }
  0xb2   : > { %1271 = vmatmul.bf16.gmra.mxu2 %v1122_v25  ;;  %v1657_v36 = vpop.f32.mrf.mxu3  ;;  %v989_v43 = vpop.f32.mrf.mxu1  ;;  %v642_v25 = vshrl.u32 %v10971_v20, 16 }
  0xb9   : > { %v10976_v28 = vpop.f32.mrf.mxu0  ;;  %v1234_v44 = vpop.f32.mrf.mxu2 }
  0xba   : > { %v1659_v47 = vpop.f32.mrf.mxu3  ;;  %v992_v58 = vpop.f32.mrf.mxu1 }
  0xbc   : > { %831 = vmatmul.bf16.gmra.mxu0 %v625_v30 }
  0xbd   : > { %1031 = vmatmul.bf16.gmra.mxu1 %v10971_v20  ;;  %v1552_v20 = vrot.slane %v9873_v52, 1  ;;  %v658_v52 = vshrl.u32 %v11000_v4, 16 }
  0xbf   : > { %1701 = vmatmul.bf16.gmra.mxu3 %v1549_v59 }
  0xc1   : > { %v10981_v38 = vpop.f32.mrf.mxu0  ;;  %v1237_v60 = vpop.f32.mrf.mxu2 }
  0xc2   : > { %1276 = vmatmul.bf16.gmra.mxu2 %v1124_v54  ;;  %v1662_v61 = vpop.f32.mrf.mxu3  ;;  %v994_v1 = vpop.f32.mrf.mxu1 }
  0xc9   : > { %v10990_v56 = vpop.f32.mrf.mxu0  ;;  %v1239_v2 = vpop.f32.mrf.mxu2 }
  0xca   : > { %v1664_v5 = vpop.f32.mrf.mxu3  ;;  %v997_v8 = vpop.f32.mrf.mxu1 }
  0xcc   : > { %836 = vmatmul.bf16.gmra.mxu0 %v633_v57 }
  0xcd   : > { %1036 = vmatmul.bf16.gmra.mxu1 %v10985_v45 }
  0xcf   : > { %1706 = vmatmul.bf16.gmra.mxu3 %v1551_v15  ;;  %v656_v15 = vrot.slane %v654_v3, 1 }
  0xd1   : > { %v10995_v62 = vpop.f32.mrf.mxu0 }
  0xd2   : > { %1281 = vmatmul.bf16.gmra.mxu2 %v1126_v11  ;;  %v1667_v21 = vpop.f32.mrf.mxu3  ;;  %v999_v27 = vpop.f32.mrf.mxu1 }
  0xd5   : > { %v1242_v18 = vpop.f32.mrf.mxu2 }
  0xd9   : > { %v802_v9 = vpop.f32.mrf.mxu0 }
  0xda   : > { %v988_v16 = vadd.f32 %v987_v31, %v802_v9  ;;  %v11015_v42 = vpop.f32.mrf.mxu3  ;;  %v1002_v55 = vpop.f32.mrf.mxu1 }
  0xdc   : > { %v1327_v19 = vadd.f32 %v1232_v35, %v988_v16  ;;  %841 = vmatmul.bf16.gmra.mxu0 %v641_v13  ;;  %v644_v35 = vor.u32 %v642_v25, %v640_v7  ;;  %v650_v7 = vshrl.u32 %v10985_v45, 16 }
  0xdd   : > { %v1244_v32 = vpop.f32.mrf.mxu2  ;;  %1041 = vmatmul.bf16.gmra.mxu1 %v11000_v4 }
  0xde   : > { %v11008_v22 = vadd.f32 %v1657_v36, %v1327_v19  ;;  %v9874_v19 = vld [vmem:[%s10763_s26 + $0x88] sm:$0xff] }
  0xdf   : > { %v1554_v45 = vrot.slane %v9874_v19, 1 }
  0xe1   : > { %v804_v24 = vpop.f32.mrf.mxu0 }
  0xe2   : > { %v990_v30 = vadd.f32 %v989_v43, %v804_v24  ;;  %1286 = vmatmul.bf16.gmra.mxu2 %v1128_v53  ;;  %v649_v43 = vsel %vm541_vm0, %v644_v35, %v648_v50  ;;  %v1004_v10 = vpop.f32.mrf.mxu1  ;;  %v662_v53 = vshll.u32 %v11013_v41, 16 }
  0xe4   : > { %v1328_v31 = vadd.f32 %v1234_v44, %v990_v30  ;;  %v1553_v44 = vsel %vm1097_vm1, %v1550_v12, %v1552_v20  ;;  %v11030_v12 = vld [vmem:[%s10763_s26 + $0x80] sm:$0xff] }
  0xe5   : > { %1711 = vmatmul.bf16.gmra.mxu3 %v1553_v44  ;;  %v1247_v59 = vpop.f32.mrf.mxu2  ;;  %v1129_v16 = vrot.slane %v11030_v12, 1 }
  0xe6   : > { %v11019_v36 = vadd.f32 %v1659_v47, %v1328_v31  ;;  %v1672_v47 = vpop.f32.mrf.mxu3 }
  0xe7   : > { %v1130_v24 = vsel %vm1097_vm1, %v1127_v51, %v1129_v16 }
  0xe9   : > { %v807_v54 = vpop.f32.mrf.mxu0 }
  0xea   : > { %v993_v57 = vadd.f32 %v992_v58, %v807_v54  ;;  %v1007_v26 = vpop.f32.mrf.mxu1 }
  0xec   : > { %v1329_v63 = vadd.f32 %v1237_v60, %v993_v57  ;;  %846 = vmatmul.bf16.gmra.mxu0 %v649_v43  ;;  %v652_v60 = vor.u32 %v650_v7, %v648_v50  ;;  %v9875_v7 = vld [vmem:[%s10763_s26 + $0x90] sm:$0xff] }
  0xed   : > { %v1249_v9 = vpop.f32.mrf.mxu2  ;;  %1046 = vmatmul.bf16.gmra.mxu1 %v11013_v41  ;;  %v1556_v3 = vrot.slane %v9875_v7, 1 }
  0xee   : > { %v11025_v0 = vadd.f32 %v1662_v61, %v1329_v63  ;;  %v11032_v13 = vpop.f32.mrf.mxu3  ;;  %v664_v63 = vrot.slane %v662_v53, 1 }
  0xf1   : > { %v809_v6 = vpop.f32.mrf.mxu0 }
  0xf2   : > { %v995_v11 = vadd.f32 %v994_v1, %v809_v6  ;;  %1291 = vmatmul.bf16.gmra.mxu2 %v1130_v24  ;;  %v657_v1 = vsel %vm541_vm0, %v652_v60, %v656_v15  ;;  %v1009_v54 = vpop.f32.mrf.mxu1 }
  0xf4   : > { %v1330_v58 = vadd.f32 %v1239_v2, %v995_v11  ;;  %v1555_v2 = vsel %vm1097_vm1, %v1552_v20, %v1554_v45  ;;  %v11047_v20 = vld [vmem:[%s10763_s26 + $0x88] sm:$0xff] }
  0xf5   : > { %1716 = vmatmul.bf16.gmra.mxu3 %v1555_v2  ;;  %v1252_v31 = vpop.f32.mrf.mxu2  ;;  %v1131_v6 = vrot.slane %v11047_v20, 1 }
  0xf6   : > { %v11036_v61 = vadd.f32 %v1664_v5, %v1330_v58  ;;  %v1677_v5 = vpop.f32.mrf.mxu3 }
  0xf7   : > { %v1132_v4 = vsel %vm1097_vm1, %v1129_v16, %v1131_v6 }
  0xf9   : > { %v812_v25 = vpop.f32.mrf.mxu0 }
  0xfa   : > { %v998_v30 = vadd.f32 %v997_v8, %v812_v25  ;;  %v1012_v58 = vpop.f32.mrf.mxu1  ;;  %v666_v25 = vshrl.u32 %v11013_v41, 16 }
  0xfc   : > { %v1331_v35 = vadd.f32 %v1242_v18, %v998_v30  ;;  %851 = vmatmul.bf16.gmra.mxu0 %v657_v1  ;;  %v660_v18 = vor.u32 %v658_v52, %v656_v15  ;;  %v670_v1 = vshll.u32 %v11030_v12, 16 }
  0xfd   : > { %v1254_v44 = vpop.f32.mrf.mxu2  ;;  %1051 = vmatmul.bf16.gmra.mxu1 %v11030_v12 }
  0xfe   : > { %v11042_v50 = vadd.f32 %v1667_v21, %v1331_v35  ;;  %v11049_v57 = vpop.f32.mrf.mxu3 }
 0x101   : > { %v814_v51 = vpop.f32.mrf.mxu0 }
 0x102   : > { %v1000_v43 = vadd.f32 %v999_v27, %v814_v51  ;;  %1296 = vmatmul.bf16.gmra.mxu2 %v1132_v4  ;;  %v665_v27 = vsel %vm541_vm0, %v660_v18, %v664_v63  ;;  %v1014_v2 = vpop.f32.mrf.mxu1  ;;  %v672_v51 = vrot.slane %v670_v1, 1 }
 0x104   : > { %v1332_v8 = vadd.f32 %v1244_v32, %v1000_v43  ;;  %v1557_v32 = vsel %vm1097_vm1, %v1554_v45, %v1556_v3 }
 0x105   : > { %1721 = vmatmul.bf16.gmra.mxu3 %v1557_v32  ;;  %v1257_v15 = vpop.f32.mrf.mxu2  ;;  %v674_v32 = vshrl.u32 %v11030_v12, 16 }
 0x106   : > { %v11054_v21 = vadd.f32 %v11015_v42, %v1332_v8  ;;  %v1682_v42 = vpop.f32.mrf.mxu3 }
 0x109   : > { %v817_v11 = vpop.f32.mrf.mxu0 }
 0x10a   : > { %v1003_v60 = vadd.f32 %v1002_v55, %v817_v11  ;;  %v11067_v55 = vld [vmem:[%s10763_s26 + $0x90] sm:$0xff]  ;;  %v11078_v7 = vpop.f32.mrf.mxu1 }
 0x10b   : > { %v1133_v53 = vrot.slane %v11067_v55, 1 }
 0x10c   : > { %v1333_v19 = vadd.f32 %v1247_v59, %v1003_v60  ;;  %856 = vmatmul.bf16.gmra.mxu0 %v665_v27  ;;  %v668_v59 = vor.u32 %v666_v25, %v664_v63  ;;  %v678_v60 = vshll.u32 %v11047_v20, 16  ;;  %v676_v25 = vor.u32 %v674_v32, %v672_v51 }
 0x10d   : > { %v11064_v35 = vpop.f32.mrf.mxu2  ;;  %v1134_v41 = vsel %vm1097_vm1, %v1131_v6, %v1133_v53  ;;  %1056 = vmatmul.bf16.gmra.mxu1 %v11047_v20  ;;  %v686_v32 = vshll.u32 %v11067_v55, 16 }
 0x10e   : > { %v11060_v24 = vadd.f32 %v1672_v47, %v1333_v19  ;;  %v11069_v52 = vpop.f32.mrf.mxu3  ;;  %v9876_v47 = vld [vmem:[%s10763_s26 + $0x98] sm:$0xff]  ;;  %v673_v18 = vsel %vm541_vm0, %v668_v59, %v672_v51  ;;  %v680_v1 = vrot.slane %v678_v60, 1 }
 0x10f   : > { %v1558_v8 = vrot.slane %v9876_v47, 1 }
 0x111   : > { %v819_v16 = vpop.f32.mrf.mxu0 }
 0x112   : > { %v1005_v30 = vadd.f32 %v1004_v10, %v819_v16  ;;  %1301 = vmatmul.bf16.gmra.mxu2 %v1134_v41  ;;  %v11090_v19 = vpop.f32.mrf.mxu1  ;;  %v11095_v16 = vld [vmem:[%s10763_s26 + $0x98] sm:$0xff]  ;;  %v681_v41 = vsel %vm541_vm0, %v676_v25, %v680_v1 }
 0x114   : > { %v1334_v45 = vadd.f32 %v1249_v9, %v1005_v30  ;;  %v1559_v9 = vsel %vm1097_vm1, %v1556_v3, %v1558_v8 }
 0x115   : > { %1726 = vmatmul.bf16.gmra.mxu3 %v1559_v9  ;;  %v11081_v4 = vpop.f32.mrf.mxu2 }
 0x116   : > { %v11074_v43 = vadd.f32 %v11032_v13, %v1334_v45  ;;  %v11084_v13 = vpop.f32.mrf.mxu3  ;;  %v9877_v45 = vld [vmem:[%s10763_s26 + $0xa0] sm:$0xff] }
 0x117   : > { %v1560_v47 = vrot.slane %v9877_v45, 1 }
 0x119   : > { %v822_v10 = vpop.f32.mrf.mxu0 }
 0x11a   : > { %v1008_v63 = vadd.f32 %v1007_v26, %v822_v10  ;;  %v1022_v10 = vpop.f32.mrf.mxu1 }
 0x11c   : > { %v1335_v11 = vadd.f32 %v1252_v31, %v1008_v63  ;;  %861 = vmatmul.bf16.gmra.mxu0 %v673_v18 }
 0x11d   : > { %v11092_v3 = vpop.f32.mrf.mxu2  ;;  %1061 = vmatmul.bf16.gmra.mxu1 %v11067_v55 }
 0x11e   : > { %v11086_v6 = vadd.f32 %v1677_v5, %v1335_v11  ;;  %v11097_v30 = vpop.f32.mrf.mxu3  ;;  %v1135_v5 = vrot.slane %v11095_v16, 1 }
 0x120   : > { %v1136_v12 = vsel %vm1097_vm1, %v1133_v53, %v1135_v5  ;;  %v420_v53 = vld [vmem:[%s10763_s26 + $0xa0] sm:$0x7] }
 0x121   : > { %v824_v27 = vpop.f32.mrf.mxu0 }
 0x122   : > { %v1010_v26 = vadd.f32 %v1009_v54, %v824_v27  ;;  %1306 = vmatmul.bf16.gmra.mxu2 %v1136_v12  ;;  %v682_v27 = vshrl.u32 %v11047_v20, 16  ;;  %v11113_v60 = vpop.f32.mrf.mxu1  ;;  %v688_v12 = vrot.slane %v686_v32, 1 }
 0x124   : > { %v1336_v31 = vadd.f32 %v1254_v44, %v1010_v26  ;;  %v1561_v44 = vsel %vm1097_vm1, %v1558_v8, %v1560_v47  ;;  %v519_v8 = vunpack.c.l.b16 %v420_v53 }
 0x125   : > { %1731 = vmatmul.bf16.gmra.mxu3 %v1561_v44  ;;  %v1267_v18 = vpop.f32.mrf.mxu2 }
 0x126   : > { %v11102_v59 = vadd.f32 %v11049_v57, %v1336_v31  ;;  %v1692_v57 = vpop.f32.mrf.mxu3 }
 0x129   : > { %v827_v54 = vpop.f32.mrf.mxu0 }
 0x12a   : > { %v1013_v51 = vadd.f32 %v1012_v58, %v827_v54  ;;  %v1402_v58 = vld [vmem:[%s10763_s26 + $0xa8] sm:$0x7] }
 0x12b   : > { %v1501_v25 = vunpack.c.l.b16 %v1402_v58 }
 0x12c   : > { %v1337_v9 = vadd.f32 %v1257_v15, %v1013_v51  ;;  %866 = vmatmul.bf16.gmra.mxu0 %v681_v41  ;;  %v11118_v15 = vpack.c.b16 %v519_v8, %v519_v8 }
 0x12d   : > { %v11116_v31 = vpop.f32.mrf.mxu2  ;;  %v1522_v41 = vpack.c.b16 %v1501_v25, %v1501_v25  ;;  %1066 = vmatmul.bf16.gmra.mxu1 %v11095_v16 }
 0x12e   : > { %v11108_v63 = vadd.f32 %v1682_v42, %v1337_v9  ;;  %v684_v42 = vor.u32 %v682_v27, %v680_v1  ;;  %v11121_v54 = vpop.f32.mrf.mxu3  ;;  %v1137_v20 = vrot.slane %v11118_v15, 1 }
 0x12f   : > { %v1562_v51 = vrot.slane %v1522_v41, 1 }
 0x130   : > { %v689_v53 = vsel %vm541_vm0, %v684_v42, %v688_v12  ;;  %v403_v42 = vld [vmem:[%s10763_s26 + $0xa0] sm:$0x3] }
 0x131   : > { %v829_v11 = vpop.f32.mrf.mxu0  ;;  %v892_v41 = vunpack.c.l.b16 %v403_v42 }
 0x132   : > { %v1015_v26 = vadd.f32 %v1014_v2, %v829_v11  ;;  %v1138_v2 = vsel %vm1097_vm1, %v1135_v5, %v1137_v20  ;;  %v1027_v11 = vpop.f32.mrf.mxu1 }
 0x133   : > { %1311 = vmatmul.bf16.gmra.mxu2 %v1138_v2 }
 0x134   : > { %v1338_v45 = vadd.f32 %v11064_v35, %v1015_v26  ;;  %v1563_v35 = vsel %vm1097_vm1, %v1560_v47, %v1562_v51  ;;  %v690_v26 = vshrl.u32 %v11067_v55, 16  ;;  %v694_v47 = vshll.u32 %v11095_v16, 16 }
 0x135   : > { %1736 = vmatmul.bf16.gmra.mxu3 %v1563_v35  ;;  %v1272_v27 = vpop.f32.mrf.mxu2  ;;  %v893_v55 = vpack.c.b16 %v892_v41, %v892_v41 }
 0x136   : > { %v11125_v44 = vadd.f32 %v11069_v52, %v1338_v45  ;;  %v1697_v52 = vpop.f32.mrf.mxu3  ;;  %v692_v25 = vor.u32 %v690_v26, %v688_v12  ;;  %v696_v45 = vrot.slane %v694_v47, 1  ;;  %v698_v26 = vshrl.u32 %v11095_v16, 16 }
 0x139   : > { %v832_v9 = vpop.f32.mrf.mxu0 }
 0x13a   : > { %v1018_v1 = vadd.f32 %v11078_v7, %v832_v9  ;;  %v11140_v58 = vpop.f32.mrf.mxu1 }
 0x13c   : > { %v1339_v32 = vadd.f32 %v11081_v4, %v1018_v1  ;;  %871 = vmatmul.bf16.gmra.mxu0 %v689_v53 }
 0x13d   : > { %v11142_v7 = vpop.f32.mrf.mxu2  ;;  %1071 = vmatmul.bf16.gmra.mxu1 %v893_v55 }
 0x13e   : > { %v11134_v5 = vadd.f32 %v11084_v13, %v1339_v32  ;;  %14045 = vst [vmem:[#allocation3_spill] sm:$0xff] %v11142_v7  ;;  %v11144_v4 = vpop.f32.mrf.mxu3  ;;  %v697_v13 = vsel %vm541_vm0, %v692_v25, %v696_v45 }
 0x13f   : > { %14046 = vst [vmem:[#allocation4_spill] sm:$0xff] %v11144_v4 }
 0x141   : > { %v11136_v8 = vpop.f32.mrf.mxu0 }
 0x142   : > { %v1032_v9 = vpop.f32.mrf.mxu1 }
 0x143   : > { %1316 = vmatmul.bf16.gmra.mxu2 %v1137_v20  ;;  %v702_v20 = vshll.u32 %v11118_v15, 16 }
 0x145   : > { %1741 = vmatmul.bf16.gmra.mxu3 %v1562_v51  ;;  %v1277_v35 = vpop.f32.mrf.mxu2  ;;  %v704_v51 = vrot.slane %v702_v20, 1 }
 0x146   : > { %v1702_v32 = vpop.f32.mrf.mxu3 }
 0x149   : > { %v837_v2 = vpop.f32.mrf.mxu0 }
 0x14a   : > { %v1023_v53 = vadd.f32 %v1022_v10, %v837_v2  ;;  %v11154_v47 = vpop.f32.mrf.mxu1  ;;  %v700_v10 = vor.u32 %v698_v26, %v696_v45  ;;  %v706_v45 = vshrl.u32 %v11118_v15, 16 }
 0x14b   : > { %14047 = vst [vmem:[#allocation5_spill] sm:$0xff] %v11154_v47 }
 0x14c   : > { %v1341_v1 = vadd.f32 %v1267_v18, %v1023_v53  ;;  %876 = vmatmul.bf16.gmra.mxu0 %v697_v13  ;;  %v705_v41 = vsel %vm541_vm0, %v700_v10, %v704_v51  ;;  %v708_v20 = vor.u32 %v706_v45, %v704_v51 }
 0x14d   : > { %v11156_v25 = vpop.f32.mrf.mxu2 }
 0x14e   : > { %v11148_v49 = vadd.f32 %v1692_v57, %v1341_v1  ;;  %14048 = vst [vmem:[#allocation6_spill] sm:$0xff] %v11156_v25  ;;  %v11158_v42 = vpop.f32.mrf.mxu3 }
 0x14f   : > { %14049 = vst [vmem:[#allocation7_spill] sm:$0xff] %v11158_v42 }
 0x151   : > { %v11150_v12 = vpop.f32.mrf.mxu0 }
 0x152   : > { %v1037_v2 = vpop.f32.mrf.mxu1 }
 0x155   : > { %v1282_v13 = vpop.f32.mrf.mxu2 }
 0x156   : > { %v1707_v55 = vpop.f32.mrf.mxu3 }
 0x159   : > { %v842_v18 = vpop.f32.mrf.mxu0 }
 0x15a   : > { %v1028_v57 = vadd.f32 %v1027_v11, %v842_v18  ;;  %v11165_v46 = vpop.f32.mrf.mxu1 }
 0x15b   : > { %14051 = vst [vmem:[#allocation9_spill] sm:$0xff] %v11165_v46 }
 0x15c   : > { %v1343_v53 = vadd.f32 %v1272_v27, %v1028_v57  ;;  %881 = vmatmul.bf16.gmra.mxu0 %v705_v41 }
 0x15d   : > { %v11167_v25 = vpop.f32.mrf.mxu2 }
 0x15e   : > { %v11161_v16 = vadd.f32 %v1697_v52, %v1343_v53  ;;  %14052 = vst [vmem:[#allocation10_spill] sm:$0xff] %v11167_v25  ;;  %v11170_v26 = vpop.f32.mrf.mxu3 }
 0x15f   : > { %14053 = vst [vmem:[#allocation11_spill] sm:$0xff] %v11170_v26 }
 0x160   : > { %14050 = vst [vmem:[#allocation8_spill] sm:$0xff] %v11161_v16 }
 0x161   : > { %v11163_v1 = vpop.f32.mrf.mxu0 }
 0x162   : > { %v1042_v42 = vpop.f32.mrf.mxu1 }
 0x165   : > { %v1287_v27 = vpop.f32.mrf.mxu2 }
 0x168   : > { %v1712_v52 = vpop.f32.mrf.mxu3 }
 0x169   : > { %v847_v10 = vpop.f32.mrf.mxu0 }
 0x16a   : > { %v1033_v11 = vadd.f32 %v1032_v9, %v847_v10  ;;  %v11176_v53 = vpop.f32.mrf.mxu1  ;;  %v10598_v9 = vld [vmem:[%s10763_s26] sm:$0xff]  }
 0x16b   : > { %14056 = vst [vmem:[#allocation14_spill] sm:$0xff] %v11176_v53 }
 0x16c   : > { %v1345_v18 = vadd.f32 %v1277_v35, %v1033_v11  ;;  %886 = vmatmul.bf16.gmra.mxu0 %v708_v20 }
 0x16d   : > { %v11178_v25 = vpop.f32.mrf.mxu2 }
 0x16e   : > { %v11172_v41 = vadd.f32 %v1702_v32, %v1345_v18  ;;  %14057 = vst [vmem:[#allocation15_spill] sm:$0xff] %v11178_v25  ;;  %v10599_v32 = vld [vmem:[%s13993_s2 + $0xf8] sm:$0xff]  ;;  %v10601_v18 = vld [vmem:[%s13993_s2 + $0xe8] sm:$0xff] }
 0x170   : > { %14054 = vst [vmem:[#allocation12_spill] sm:$0xff] %v11172_v41  ;;  %v11180_v15 = vpop.f32.mrf.mxu3 }
 0x171   : > { %v11174_v57 = vpop.f32.mrf.mxu0  ;;  %14058 = vst [vmem:[#allocation16_spill] sm:$0xff] %v11180_v15 }
 0x172   : > { %14055 = vst [vmem:[#allocation13_spill] sm:$0xff] %v11174_v57  ;;  %v1047_v51 = vpop.f32.mrf.mxu1 }
 0x175   : > { %v1292_v46 = vpop.f32.mrf.mxu2 }
 0x178   : > { %v1717_v35 = vpop.f32.mrf.mxu3 }
 0x179   : > { %v852_v26 = vpop.f32.mrf.mxu0 }
 0x17a   : > { %v1038_v45 = vadd.f32 %v1037_v2, %v852_v26  ;;  %v11190_v11 = vpop.f32.mrf.mxu1  ;;  %v10600_v2 = vld [vmem:[%s13993_s2 + $0xf0] sm:$0xff] }
 0x17b   : > { %14061 = vst [vmem:[#allocation19_spill] sm:$0xff] %v11190_v11  ;;  %v10602_v11 = vld [vmem:[%s10763_s26 + $0x8] sm:$0xff] }
 0x17c   : > { %v1347_v47 = vadd.f32 %v1282_v13, %v1038_v45  ;;  %971 = vmatmul.bf16.vlgmr.msrb.gmra.mxu0 %v10598_v9  ;;  %v9929_v13 = vld [vmem:[%s13993_s2 + $0x1b8] sm:$0xff]  ;;  %v1099_v53 = vrot.slane %v10602_v11, 1 }
 0x17d   : > { %1633 = vmatpush.bf16.msrb.mxu0 %v10599_v32  ;;  %v11198_v26 = vpop.f32.mrf.mxu2  ;;  %2777 = vmatpush.bf16.msrb.mxu2 %v9929_v13  ;;  %v9901_v45 = vld [vmem:[%s13993_s2 + $0x178] sm:$0xff] }
 0x17e   : > { %v11186_v20 = vadd.f32 %v1707_v55, %v1347_v47  ;;  %14062 = vst [vmem:[#allocation20_spill] sm:$0xff] %v11198_v26  ;;  %v9957_v47 = vld [vmem:[%s13993_s2 + $0x1f8] sm:$0xff]  ;;  %2352 = vmatpush.bf16.msrb.mxu1 %v9901_v45 }
 0x17f   : > { %3353 = vmatpush.bf16.msrb.mxu3 %v9957_v47 }
 0x180   : > { %14059 = vst [vmem:[#allocation17_spill] sm:$0xff] %v11186_v20  ;;  %v11203_v55 = vpop.f32.mrf.mxu3  ;;  %v2220_v20 = vld [vmem:[%s10763_s26 + $0x8] sm:$0xc] }
 0x181   : > { %v11188_v10 = vpop.f32.mrf.mxu0  ;;  %1634 = vmatpush.bf16.msrb.mxu0 %v10600_v2  ;;  %14063 = vst [vmem:[#allocation21_spill] sm:$0xff] %v11203_v55 }
 0x182   : > { %14060 = vst [vmem:[#allocation18_spill] sm:$0xff] %v11188_v10  ;;  %v1052_v32 = vpop.f32.mrf.mxu1 }
 0x185   : > { %1635 = vmatpush.bf16.msrb.mxu0 %v10601_v18  ;;  %v1297_v13 = vpop.f32.mrf.mxu2 }
 0x188   : > { %v1722_v55 = vpop.f32.mrf.mxu3 }
 0x189   : > { %v857_v9 = vpop.f32.mrf.mxu0  ;;  %1636 = vmatpush.bf16.msrb.mxu0 %v10811_v23 }
 0x18a   : > { %v1043_v2 = vadd.f32 %v1042_v42, %v857_v9  ;;  %v11218_v18 = vpop.f32.mrf.mxu1 }
 0x18b   : > { %14066 = vst [vmem:[#allocation24_spill] sm:$0xff] %v11218_v18  ;;  %v10373_v18 = vld [vmem:[%s10763_s26] sm:$0xf0] }
 0x18c   : > { %v1349_v26 = vadd.f32 %v1287_v27, %v1043_v2  ;;  %976 = vmatmul.bf16.gmra.mxu0 %v10602_v11  ;;  %v9900_v11 = vld [vmem:[%s13993_s2 + $0x170] sm:$0xff] }
 0x18d   : > { %1637 = vmatpush.bf16.msrb.mxu0 %v10829_v29  ;;  %v11221_v45 = vpop.f32.mrf.mxu2  ;;  %2353 = vmatpush.bf16.msrb.mxu1 %v9900_v11 }
 0x18e   : > { %v11214_v15 = vadd.f32 %v1712_v52, %v1349_v26  ;;  %14067 = vst [vmem:[#allocation25_spill] sm:$0xff] %v11221_v45 }
 0x190   : > { %14064 = vst [vmem:[#allocation22_spill] sm:$0xff] %v11214_v15  ;;  %v11223_v23 = vpop.f32.mrf.mxu3 }
 0x191   : > { %v11216_v47 = vpop.f32.mrf.mxu0  ;;  %1638 = vmatpush.bf16.msrb.mxu0 %v10845_v33  ;;  %14068 = vst [vmem:[#allocation26_spill] sm:$0xff] %v11223_v23  ;;  %v10374_v33 = vld [vmem:[%s10763_s26] sm:$0xe] }
 0x192   : > { %14065 = vst [vmem:[#allocation23_spill] sm:$0xff] %v11216_v47  ;;  %v1057_v27 = vpop.f32.mrf.mxu1  ;;  %v10375_v45 = vor.u32 %v10374_v33, %v10373_v18 }
 0x194   : > { %v1098_v15 = vrot.slane %v10375_v45, 1 }
 0x195   : > { %1639 = vmatpush.bf16.msrb.mxu0 %v10863_v37  ;;  %v1302_v52 = vpop.f32.mrf.mxu2 }
 0x198   : > { %v1727_v9 = vpop.f32.mrf.mxu3 }
 0x199   : > { %v862_v42 = vpop.f32.mrf.mxu0  ;;  %1640 = vmatpush.bf16.msrb.mxu0 %v10892_v48 }
 0x19a   : > { %v1048_v29 = vadd.f32 %v1047_v51, %v862_v42  ;;  %v11234_v23 = vpop.f32.mrf.mxu1 }
 0x19b   : > { %14071 = vst [vmem:[#allocation29_spill] sm:$0xff] %v11234_v23 }
 0x19c   : > { %v1351_v26 = vadd.f32 %v1292_v46, %v1048_v29  ;;  %981 = vmatmul.bf16.gmra.mxu0 %v10848_v34  ;;  %v9928_v34 = vld [vmem:[%s13993_s2 + $0x1b0] sm:$0xff] }
 0x19d   : > { %v11236_v37 = vpop.f32.mrf.mxu2  ;;  %v9956_v46 = vld [vmem:[%s13993_s2 + $0x1f0] sm:$0xff]  ;;  %2778 = vmatpush.bf16.msrb.mxu2 %v9928_v34 }
 0x19e   : > { %v11228_v2 = vadd.f32 %v1717_v35, %v1351_v26  ;;  %14072 = vst [vmem:[#allocation30_spill] sm:$0xff] %v11236_v37  ;;  %3354 = vmatpush.bf16.msrb.mxu3 %v9956_v46  ;;  %v1100_v35 = vsel %vm1097_vm1, %v1098_v15, %v1099_v53  ;;  %v10603_v15 = vld [vmem:[%s10763_s26 + $0x10] sm:$0xff] }
 0x19f   : > { %v1101_v37 = vrot.slane %v10603_v15, 1 }
 0x1a0   : > { %14069 = vst [vmem:[#allocation27_spill] sm:$0xff] %v11228_v2  ;;  %v11238_v48 = vpop.f32.mrf.mxu3 }
 0x1a1   : > { %v11232_v25 = vpop.f32.mrf.mxu0  ;;  %14073 = vst [vmem:[#allocation31_spill] sm:$0xff] %v11238_v48  ;;  %v1102_v23 = vsel %vm1097_vm1, %v1099_v53, %v1101_v37  ;;  %v9892_v53 = vld [vmem:[%s13993_s2 + $0x130] sm:$0xff] }
 0x1a2   : > { %14070 = vst [vmem:[#allocation28_spill] sm:$0xff] %v11232_v25  ;;  %v1062_v18 = vpop.f32.mrf.mxu1  ;;  %v9950_v25 = vld [vmem:[%s13993_s2 + $0x1c0] sm:$0xff] }
 0x1a5   : > { %v1307_v45 = vpop.f32.mrf.mxu2 }
 0x1a8   : > { %v1732_v26 = vpop.f32.mrf.mxu3 }
 0x1a9   : > { %v867_v51 = vpop.f32.mrf.mxu0 }
 0x1aa   : > { %v1053_v42 = vadd.f32 %v1052_v32, %v867_v51  ;;  %v11254_v34 = vpop.f32.mrf.mxu1 }
 0x1ab   : > { %14076 = vst [vmem:[#allocation34_spill] sm:$0xff] %v11254_v34 }
 0x1ac   : > { %v1353_v29 = vadd.f32 %v1297_v13, %v1053_v42  ;;  %1216 = vmatmul.bf16.vlgmr.msra.gmra.mxu0 %v1100_v35 }
 0x1ad   : > { %v11256_v46 = vpop.f32.mrf.mxu2 }
 0x1ae   : > { %v11250_v33 = vadd.f32 %v1722_v55, %v1353_v29  ;;  %14077 = vst [vmem:[#allocation35_spill] sm:$0xff] %v11256_v46  ;;  %v9893_v55 = vld [vmem:[%s13993_s2 + $0x138] sm:$0xff]  ;;  %v11288_v46 = vld [vmem:[%s10763_s26 + $0xc] sm:$0xf] }
 0x1af   : > { %2066 = vmatpush.bf16.msra.mxu0 %v9893_v55 }
 0x1b0   : > { %14074 = vst [vmem:[#allocation32_spill] sm:$0xff] %v11250_v33  ;;  %v11259_v32 = vpop.f32.mrf.mxu3 }
 0x1b1   : > { %v11252_v48 = vpop.f32.mrf.mxu0  ;;  %14078 = vst [vmem:[#allocation36_spill] sm:$0xff] %v11259_v32 }
 0x1b2   : > { %14075 = vst [vmem:[#allocation33_spill] sm:$0xff] %v11252_v48  ;;  %v1067_v2 = vpop.f32.mrf.mxu1 }
 0x1b3   : > { %2067 = vmatpush.bf16.msra.mxu0 %v9892_v53  ;;  %v9927_v53 = vld [vmem:[%s13993_s2 + $0x1a8] sm:$0xff] }
 0x1b4   : > { %2779 = vmatpush.bf16.msrb.mxu2 %v9927_v53 }
 0x1b6   : > { %v1312_v35 = vpop.f32.mrf.mxu2 }
 0x1b8   : > { %v1737_v11 = vpop.f32.mrf.mxu3 }
 0x1b9   : > { %v872_v51 = vpop.f32.mrf.mxu0 }
 0x1ba   : > { %v1058_v13 = vadd.f32 %v1057_v27, %v872_v51  ;;  %v11269_v32 = vpop.f32.mrf.mxu1  ;;  %v14084_v51 = vrot.slane %v10869_v39, 1  ;;  %v9955_v39 = vld [vmem:[%s13993_s2 + $0x1e8] sm:$0xff] }
 0x1bb   : > { %14081 = vst [vmem:[#allocation39_spill] sm:$0xff] %v11269_v32  ;;  %v1362_v32 = vld [vmem:[%s10763_s26 + $0x8] sm:$0xe]  ;;  %3355 = vmatpush.bf16.msrb.mxu3 %v9955_v39 }
 0x1bc   : > { %v1355_v42 = vadd.f32 %v1302_v52, %v1058_v13  ;;  %1221 = vmatmul.bf16.gmra.mxu0 %v1102_v23  ;;  %v9891_v52 = vld [vmem:[%s13993_s2 + $0x128] sm:$0xff]  ;;  %v1104_v13 = vsel %vm1097_vm1, %v1101_v37, %v14084_v51  ;;  %v1461_v37 = vunpack.c.l.b16 %v1362_v32  ;;  %v11312_v32 = vld [vmem:[%s10763_s26 + $0x10] sm:$0xff] }
 0x1bd   : > { %2068 = vmatpush.bf16.msra.mxu0 %v9891_v52  ;;  %v9899_v51 = vld [vmem:[%s13993_s2 + $0x168] sm:$0xff] }
 0x1be   : > { %v11265_v29 = vadd.f32 %v1727_v9, %v1355_v42  ;;  %v11274_v27 = vpop.f32.mrf.mxu2  ;;  %2354 = vmatpush.bf16.msrb.mxu1 %v9899_v51 }
 0x1bf   : > { %14082 = vst [vmem:[#allocation40_spill] sm:$0xff] %v11274_v27 }
 0x1c0   : > { %14079 = vst [vmem:[#allocation37_spill] sm:$0xff] %v11265_v29  ;;  %v11276_v23 = vpop.f32.mrf.mxu3  ;;  %v9902_v29 = vld [vmem:[%s10763_s26 + $0x10] sm:$0xf0] }
 0x1c1   : > { %v11267_v15 = vpop.f32.mrf.mxu0  ;;  %14083 = vst [vmem:[#allocation41_spill] sm:$0xff] %v11276_v23 }
 0x1c2   : > { %14080 = vst [vmem:[#allocation38_spill] sm:$0xff] %v11267_v15  ;;  %v11284_v42 = vpop.f32.mrf.mxu1  ;;  %v9930_v15 = vld [vmem:[%s10763_s26 + $0x18] sm:$0xff] }
 0x1c6   : > { %v11293_v23 = vpop.f32.mrf.mxu2 }
 0x1c8   : > { %v11299_v52 = vpop.f32.mrf.mxu3 }
 0x1c9   : > { %v877_v9 = vpop.f32.mrf.mxu0 }
 0x1ca   : > { %v1063_v55 = vadd.f32 %v1062_v18, %v877_v9  ;;  %v14002_v18 = vunpack.c.l.b16 %v11288_v46  ;;  %v1074_v53 = vpop.f32.mrf.mxu1 }
 0x1cb   : > { %v9898_v53 = vld [vmem:[%s13993_s2 + $0x160] sm:$0xff] }
 0x1cc   : > { %v1357_v27 = vadd.f32 %v1307_v45, %v1063_v55  ;;  %1226 = vmatmul.bf16.gmra.mxu0 %v1104_v13  ;;  %v9890_v45 = vld [vmem:[%s13993_s2 + $0x120] sm:$0xff]  ;;  %v11316_v55 = vpack.c.b16 %v14002_v18, %v1461_v37  ;;  %2355 = vmatpush.bf16.msrb.mxu1 %v9898_v53 }
 0x1cd   : > { %2069 = vmatpush.bf16.msra.mxu0 %v9890_v45  ;;  %v1524_v45 = vrot.slane %v11312_v32, 1  ;;  %v9954_v37 = vld [vmem:[%s13993_s2 + $0x1e0] sm:$0xff] }
 0x1ce   : > { %v11301_v9 = vadd.f32 %v1732_v26, %v1357_v27  ;;  %v9889_v26 = vld [vmem:[%s13993_s2 + $0x118] sm:$0xff]  ;;  %v9926_v27 = vld [vmem:[%s13993_s2 + $0x1a0] sm:$0xff]  ;;  %v1319_v39 = vpop.f32.mrf.mxu2  ;;  %v1523_v51 = vrot.slane %v11316_v55, 1  ;;  %3356 = vmatpush.bf16.msrb.mxu3 %v9954_v37 }
 0x1cf   : > { %2780 = vmatpush.bf16.msrb.mxu2 %v9926_v27  ;;  %v9953_v39 = vld [vmem:[%s13993_s2 + $0x1d8] sm:$0xff] }
 0x1d0   : > { %14085 = vst [vmem:[#allocation42_spill] sm:$0xff] %v11301_v9  ;;  %v1744_v9 = vpop.f32.mrf.mxu3  ;;  %v1525_v34 = vsel %vm1097_vm1, %v1523_v51, %v1524_v45  ;;  %v9897_v37 = vld [vmem:[%s13993_s2 + $0x158] sm:$0xff] }
 0x1d1   : > { %v11309_v13 = vpop.f32.mrf.mxu0  ;;  %2070 = vmatpush.bf16.msra.mxu0 %v9889_v26  ;;  %v9925_v26 = vld [vmem:[%s13993_s2 + $0x198] sm:$0xff]  ;;  %v9888_v9 = vld [vmem:[%s13993_s2 + $0x110] sm:$0xff]  ;;  %2356 = vmatpush.bf16.msrb.mxu1 %v9897_v37 }
 0x1d2   : > { %14086 = vst [vmem:[#allocation43_spill] sm:$0xff] %v11309_v13  ;;  %3357 = vmatpush.bf16.msrb.mxu3 %v9953_v39  ;;  %v9923_v39 = vld [vmem:[%s13993_s2 + $0x188] sm:$0xff]  ;;  %v8800_v13 = vld [vmem:[%s10763_s26 + $0x10] sm:$0xc] }
 0x1d3   : > { %2781 = vmatpush.bf16.msrb.mxu2 %v9925_v26  ;;  %v2931_v26 = vld [vmem:[%s10763_s26 + $0x10] sm:$0xc] }
 0x1d5   : > { %2071 = vmatpush.bf16.msra.mxu0 %v9888_v9 }
 0x1d9   : > { %v882_v18 = vpop.f32.mrf.mxu0 }
 0x1da   : > { %v1068_v27 = vadd.f32 %v1067_v2, %v882_v18  ;;  %v9924_v2 = vld [vmem:[%s13993_s2 + $0x190] sm:$0xff]  ;;  %v9887_v18 = vld [vmem:[%s13993_s2 + $0x108] sm:$0xff] }
 0x1db   : > { %2782 = vmatpush.bf16.msrb.mxu2 %v9924_v2  ;;  %2072 = vmatpush.bf16.msra.mxu0 %v9887_v18  ;;  %v9951_v2 = vld [vmem:[%s13993_s2 + $0x1c8] sm:$0xff]  ;;  %v9886_v18 = vld [vmem:[%s13993_s2 + $0x100] sm:$0xff] }
 0x1dc   : > { %v1359_v51 = vadd.f32 %v1312_v35, %v1068_v27  ;;  %1641 = vmatmul.bf16.vlgmr.msrb.gmra.mxu0 %v1525_v34  ;;  %v9952_v34 = vld [vmem:[%s13993_s2 + $0x1d0] sm:$0xff]  ;;  %v11357_v35 = vld [vmem:[%s10763_s26 + $0x18] sm:$0xff] }
 0x1dd   : > { %v11361_v27 = vld [vmem:[%s10763_s26 + $0x14] sm:$0xf]  ;;  %3358 = vmatpush.bf16.msrb.mxu3 %v9952_v34  ;;  %v9895_v34 = vld [vmem:[%s13993_s2 + $0x148] sm:$0xff] }
 0x1de   : > { %v11351_v53 = vadd.f32 %v1737_v11, %v1359_v51  ;;  %14088 = vst [vmem:[#allocation45_spill] sm:$0xff] %v11361_v27  ;;  %v9896_v11 = vld [vmem:[%s13993_s2 + $0x150] sm:$0xff]  ;;  %v3032_v51 = vunpack.c.l.b16 %v2931_v26  ;;  %v14003_v37 = vunpack.c.l.b16 %v11361_v27  ;;  %v9922_v26 = vld [vmem:[%s13993_s2 + $0x180] sm:$0xff] }
 0x1df   : > { %2357 = vmatpush.bf16.msrb.mxu1 %v9896_v11  ;;  %2783 = vmatpush.bf16.msrb.mxu2 %v9923_v39  ;;  %v9903_v11 = vld [vmem:[%s10763_s26 + $0x18] sm:$0xff]  ;;  %v8801_v39 = vor.u32 %v9902_v29, %v8800_v13  ;;  %v9894_v29 = vld [vmem:[%s13993_s2 + $0x140] sm:$0xff] }
 0x1e0   : > { %14087 = vst [vmem:[#allocation44_spill] sm:$0xff] %v11351_v53  ;;  %v3074_v53 = vpack.c.b16 %v14003_v37, %v3032_v51  ;;  %2073 = vmatpush.bf16.msra.mxu0 %v9886_v18  ;;  %v2668_v51 = vrot.slane %v9903_v11, 2  ;;  %v3105_v18 = vshrl.u32 %v9930_v15, 16  ;;  %v3108_v11 = vshll.u32 %v9930_v15, 16 }
 0x1e1   : > { %v11363_v9 = vpop.f32.mrf.mxu0  ;;  %3359 = vmatpush.bf16.msrb.mxu3 %v9951_v2  ;;  %v2667_v47 = vrot.slane %v8801_v39, 2 }
 0x1e2   : > { %14089 = vst [vmem:[#allocation46_spill] sm:$0xff] %v11363_v9  ;;  %v1526_v9 = vrot.slane %v11357_v35, 1  ;;  %v3097_v33 = vshrl.u32 %v3074_v53, 16  ;;  %v3100_v48 = vshll.u32 %v3074_v53, 16 }
 0x1e3   : > { %2358 = vmatpush.bf16.msrb.mxu1 %v9895_v34  ;;  %2784 = vmatpush.bf16.msrb.mxu2 %v9922_v26  ;;  %v2669_v2 = vsel %vm2241_vm2, %v2667_v47, %v2668_v51  ;;  %v3107_v26 = vrot.slane %v3105_v18, 2 }
 0x1e4   : > { %v1527_v37 = vsel %vm1097_vm1, %v1524_v45, %v1526_v9  ;;  %v3099_v13 = vrot.slane %v3097_v33, 2  ;;  %v3102_v53 = vrot.slane %v3100_v48, 3  ;;  %v2239_v45 = vunpack.c.l.b16 %v2220_v20 }
 0x1e5   : > { %3360 = vmatpush.bf16.msrb.mxu3 %v9950_v25  ;;  %v9965_v25 = vld [vmem:[%s13993_s2 + $0x238] sm:$0xff]  ;;  %v3110_v33 = vrot.slane %v3108_v11, 3  ;;  %v14090_v48 = vunpack.c.l.b16 %v11288_v46 }
 0x1e6   : > { %2785 = vmatmul.bf16.vlgmr.msrb.gmra.mxu2 %v2669_v2  ;;  %v3103_v47 = vor.u32 %v3102_v53, %v3099_v13  ;;  %3639 = vmatpush.bf16.msrb.mxu0 %v9965_v25  ;;  %v9904_v13 = vld [vmem:[%s10763_s26 + $0x20] sm:$0xff]  ;;  %v2245_v25 = vrot.slane %v11357_v35, 2 }
 0x1e7   : > { %2359 = vmatpush.bf16.msrb.mxu1 %v9894_v29  ;;  %v2240_v27 = vpack.c.b16 %v14090_v48, %v2239_v45  ;;  %v3111_v20 = vor.u32 %v3110_v33, %v3107_v26  ;;  %v9931_v29 = vld [vmem:[%s10763_s26 + $0x20] sm:$0xff]  ;;  %v2670_v18 = vrot.slane %v9904_v13, 2  ;;  %v14092_v45 = vrot.slane %v10872_v40, 1  ;;  %v9932_v13 = vld [vmem:[%s10763_s26 + $0x28] sm:$0xff] }
 0x1e8   : > { %v3114_v46 = vshrl.u32 %v9931_v29, 16  ;;  %v3117_v53 = vshll.u32 %v9931_v29, 16  ;;  %v1813_v33 = vshll.u32 %v11316_v55, 16  ;;  %v1818_v48 = vshrl.u32 %v11312_v32, 16 }
 0x1e9   : > { %v887_v10 = vpop.f32.mrf.mxu0  ;;  %v2242_v15 = vrot.slane %v2240_v27, 2  ;;  %v1529_v27 = vsel %vm1097_vm1, %v1526_v9, %v14092_v45  ;;  %v2671_v26 = vsel %vm2241_vm2, %v2668_v51, %v2670_v18 }
 0x1ea   : > { %v1073_v34 = vadd.f32 %v11284_v42, %v887_v10  ;;  %v2243_v10 = vrot.slane %v11312_v32, 2  ;;  %v3119_v11 = vrot.slane %v3117_v53, 3  ;;  %v9905_v53 = vld [vmem:[%s10763_s26 + $0x28] sm:$0xff] }
 0x1ec   : > { %v1361_v39 = vadd.f32 %v11293_v23, %v1073_v34  ;;  %1646 = vmatmul.bf16.gmra.mxu0 %v1527_v37  ;;  %v3112_v37 = vsel %vm3095_vm3, %v3103_v47, %v3111_v20  ;;  %v2244_v2 = vsel %vm2241_vm2, %v2242_v15, %v2243_v10  ;;  %v3116_v34 = vrot.slane %v3114_v46, 2 }
 0x1ed   : > { %3361 = vmatmul.bf16.vlgmr.msrb.gmra.mxu3 %v3112_v37  ;;  %2360 = vmatmul.bf16.vlgmr.msrb.gmra.mxu1 %v2244_v2  ;;  %v1810_v47 = vshrl.u32 %v11316_v55, 16  ;;  %v1821_v15 = vshll.u32 %v11312_v32, 16  ;;  %v2246_v9 = vsel %vm2241_vm2, %v2243_v10, %v2245_v25  ;;  %v1815_v37 = vrot.slane %v1813_v33, 2  ;;  %v10604_v33 = vld [vmem:[%s10763_s26 + $0x20] sm:$0xff] }
 0x1ee   : > { %v11409_v42 = vadd.f32 %v11299_v52, %v1361_v39  ;;  %v3120_v39 = vor.u32 %v3119_v11, %v3116_v34  ;;  %v1820_v2 = vrot.slane %v1818_v48, 1  ;;  %v3123_v34 = vshrl.u32 %v9932_v13, 16 }
 0x1ef   : > { %v1823_v29 = vrot.slane %v1821_v15, 2  ;;  %v3126_v11 = vshll.u32 %v9932_v13, 16  ;;  %v2672_v32 = vrot.slane %v9905_v53, 2  ;;  %v2247_v48 = vrot.slane %v10604_v33, 2  ;;  %v9933_v13 = vld [vmem:[%s10763_s26 + $0x30] sm:$0xff] }
 0x1f0   : > { %14091 = vst [vmem:[#allocation47_spill] sm:$0xff] %v11409_v42  ;;  %v3121_v40 = vsel %vm3095_vm3, %v3111_v20, %v3120_v39  ;;  %v3125_v20 = vrot.slane %v3123_v34, 2  ;;  %v1827_v15 = vshrl.u32 %v11357_v35, 16  ;;  %v9906_v53 = vld [vmem:[%s10763_s26 + $0x30] sm:$0xff]  ;;  %v3135_v34 = vshll.u32 %v9933_v13, 16 }
 0x1f1   : > { %v889_v23 = vpop.f32.mrf.mxu0  ;;  %v1824_v55 = vor.u32 %v1823_v29, %v1820_v2  ;;  %v3128_v45 = vrot.slane %v3126_v11, 3 }
 0x1f2   : > { %v1812_v23 = vrot.slane %v1810_v47, 1  ;;  %v1829_v2 = vrot.slane %v1827_v15, 1  ;;  %v10605_v15 = vld [vmem:[%s10763_s26 + $0x28] sm:$0xff] }
 0x1f3   : > { %v3129_v47 = vor.u32 %v3128_v45, %v3125_v20 }
 0x1f4   : > { %v1816_v46 = vor.u32 %v1815_v37, %v1812_v23  ;;  %v2248_v23 = vsel %vm2241_vm2, %v2245_v25, %v2247_v48  ;;  %v3137_v25 = vrot.slane %v3135_v34, 3 }
 0x1f6   : > { %2790 = vmatmul.bf16.gmra.mxu2 %v2671_v26  ;;  %v2673_v26 = vsel %vm2241_vm2, %v2670_v18, %v2672_v32  ;;  %v9964_v18 = vld [vmem:[%s13993_s2 + $0x230] sm:$0xff] }
 0x1f7   : > { %3640 = vmatpush.bf16.msrb.mxu0 %v9964_v18 }
 0x1f9   : > { %v11415_v52 = vpop.f32.mrf.mxu0 }
 0x1fc   : > { %1651 = vmatmul.bf16.gmra.mxu0 %v1529_v27  ;;  %v1825_v27 = vsel %vm1808_vm4, %v1816_v46, %v1824_v55 }
 0x1fd   : > { %3366 = vmatmul.bf16.gmra.mxu3 %v3121_v40  ;;  %2365 = vmatmul.bf16.gmra.mxu1 %v2246_v9  ;;  %v1830_v40 = vshll.u32 %v11357_v35, 16  ;;  %v3130_v9 = vsel %vm3095_vm3, %v3120_v39, %v3129_v47  ;;  %v3132_v35 = vshrl.u32 %v9933_v13, 16  ;;  %v2674_v39 = vrot.slane %v9906_v53, 2 }
 0x1ff   : > { %v1832_v29 = vrot.slane %v1830_v40, 2  ;;  %v3134_v11 = vrot.slane %v3132_v35, 2  ;;  %v2249_v40 = vrot.slane %v10605_v15, 2  ;;  %v9907_v35 = vld [vmem:[%s10763_s26 + $0x38] sm:$0xff] }
 0x201   : > { %v11428_v51 = vpop.f32.mrf.mxu0  ;;  %v1833_v46 = vor.u32 %v1832_v29, %v1829_v2  ;;  %v2250_v29 = vsel %vm2241_vm2, %v2247_v48, %v2249_v40 }
 0x203   : > { %v1834_v45 = vsel %vm1808_vm4, %v1824_v55, %v1833_v46  ;;  %v9934_v55 = vld [vmem:[%s10763_s26 + $0x38] sm:$0xff] }
 0x204   : > { %v3141_v34 = vshrl.u32 %v9934_v55, 16 }
 0x206   : > { %2795 = vmatmul.bf16.gmra.mxu2 %v2673_v26  ;;  %v3138_v26 = vor.u32 %v3137_v25, %v3134_v11  ;;  %v3144_v11 = vshll.u32 %v9934_v55, 16  ;;  %v2676_v25 = vrot.slane %v9907_v35, 2  ;;  %v1848_v55 = vshll.u32 %v10605_v15, 16 }
 0x208   : > { %v3139_v2 = vsel %vm3095_vm3, %v3129_v47, %v3138_v26  ;;  %v3146_v47 = vrot.slane %v3144_v11, 3 }
 0x209   : > { %v11432_v10 = vpop.f32.mrf.mxu0 }
 0x20c   : > { %2074 = vmatmul.bf16.vlgmr.msra.gmra.mxu0 %v1825_v27  ;;  %v2675_v27 = vsel %vm2241_vm2, %v2672_v32, %v2674_v39 }
 0x20d   : > { %3371 = vmatmul.bf16.gmra.mxu3 %v3130_v9  ;;  %2370 = vmatmul.bf16.gmra.mxu1 %v2248_v23  ;;  %v1836_v9 = vshrl.u32 %v10604_v33, 16  ;;  %v1839_v23 = vshll.u32 %v10604_v33, 16  ;;  %v973_v33 = vadd.f32 %v11415_v52, %v10964_v14  ;;  %v975_v52 = vadd.f32 %v11428_v51, %v10968_v17 }
 0x20f   : > { %v1838_v13 = vrot.slane %v1836_v9, 1  ;;  %v1841_v53 = vrot.slane %v1839_v23, 2  ;;  %v2677_v9 = vsel %vm2241_vm2, %v2674_v39, %v2676_v25 }
 0x211   : > { %v11441_v37 = vpop.f32.mrf.mxu0  ;;  %v1842_v32 = vor.u32 %v1841_v53, %v1838_v13  ;;  %v1845_v53 = vshrl.u32 %v10605_v15, 16 }
 0x213   : > { %v1843_v48 = vsel %vm1808_vm4, %v1833_v46, %v1842_v32  ;;  %v1847_v39 = vrot.slane %v1845_v53, 1 }
 0x216   : > { %2800 = vmatmul.bf16.gmra.mxu2 %v2675_v27 }
 0x219   : > { %v11448_v20 = vpop.f32.mrf.mxu0 }
 0x21c   : > { %2079 = vmatmul.bf16.gmra.mxu0 %v1834_v45  ;;  %v3143_v45 = vrot.slane %v3141_v34, 2  ;;  %v1850_v34 = vrot.slane %v1848_v55, 2 }
 0x21d   : > { %3376 = vmatmul.bf16.gmra.mxu3 %v3139_v2  ;;  %2375 = vmatmul.bf16.gmra.mxu1 %v2250_v29  ;;  %v10606_v29 = vld [vmem:[%s10763_s26 + $0x30] sm:$0xff] }
 0x21e   : > { %v3147_v2 = vor.u32 %v3146_v47, %v3143_v45  ;;  %v2251_v13 = vrot.slane %v10606_v29, 2  ;;  %v9935_v45 = vld [vmem:[%s10763_s26 + $0x40] sm:$0xff] }
 0x21f   : > { %v9908_v47 = vld [vmem:[%s10763_s26 + $0x40] sm:$0xff]  ;;  %v3153_v15 = vshll.u32 %v9935_v45, 16 }
 0x220   : > { %v3148_v35 = vsel %vm3095_vm3, %v3138_v26, %v3147_v2  ;;  %v2252_v14 = vsel %vm2241_vm2, %v2249_v40, %v2251_v13  ;;  %v978_v40 = vadd.f32 %v11432_v10, %v10976_v28  ;;  %v1854_v28 = vshrl.u32 %v10606_v29, 16 }
 0x221   : > { %v11455_v18 = vpop.f32.mrf.mxu0  ;;  %v1857_v10 = vshll.u32 %v10606_v29, 16 }
 0x226   : > { %2805 = vmatmul.bf16.gmra.mxu2 %v2677_v9  ;;  %v3155_v9 = vrot.slane %v3153_v15, 3  ;;  %v9936_v15 = vld [vmem:[%s10763_s26 + $0x48] sm:$0xff] }
 0x227   : > { %v3159_v29 = vshrl.u32 %v9936_v15, 16 }
 0x229   : > { %v1217_v27 = vpop.f32.mrf.mxu0 }
 0x22a   : > { %v11463_v23 = vadd.f32 %v1217_v27, %v973_v33  ;;  %v1851_v33 = vor.u32 %v1850_v34, %v1847_v39  ;;  %v3150_v27 = vshrl.u32 %v9935_v45, 16  ;;  %v980_v39 = vadd.f32 %v11441_v37, %v10981_v38 }
 0x22b   : > { %v1856_v45 = vrot.slane %v1854_v28, 1 }
 0x22c   : > { %2084 = vmatmul.bf16.gmra.mxu0 %v1843_v48  ;;  %v2678_v48 = vrot.slane %v9908_v47, 2  ;;  %v3152_v26 = vrot.slane %v3150_v27, 2  ;;  %v1852_v51 = vsel %vm1808_vm4, %v1842_v32, %v1851_v33  ;;  %v1859_v47 = vrot.slane %v1857_v10, 2  ;;  %v10608_v10 = vld [vmem:[%s10763_s26 + $0x40] sm:$0xff] }
 0x22d   : > { %3381 = vmatmul.bf16.gmra.mxu3 %v3148_v35  ;;  %2380 = vmatmul.bf16.gmra.mxu1 %v2252_v14  ;;  %v10607_v14 = vld [vmem:[%s10763_s26 + $0x38] sm:$0xff] }
 0x22e   : > { %v2679_v53 = vsel %vm2241_vm2, %v2676_v25, %v2678_v48  ;;  %v3156_v35 = vor.u32 %v3155_v9, %v3152_v26  ;;  %v1860_v26 = vor.u32 %v1859_v47, %v1856_v45  ;;  %v3162_v9 = vshll.u32 %v9936_v15, 16  ;;  %v9937_v15 = vld [vmem:[%s10763_s26 + $0x50] sm:$0xff] }
 0x230   : > { %v3157_v32 = vsel %vm3095_vm3, %v3147_v2, %v3156_v35  ;;  %v3161_v2 = vrot.slane %v3159_v29, 2  ;;  %v1861_v37 = vsel %vm1808_vm4, %v1851_v33, %v1860_v26  ;;  %v9910_v29 = vld [vmem:[%s10763_s26 + $0x50] sm:$0xff] }
 0x231   : > { %v1219_v46 = vpop.f32.mrf.mxu0 }
 0x232   : > { %v11470_v11 = vadd.f32 %v1219_v46, %v975_v52  ;;  %v2253_v52 = vrot.slane %v10607_v14, 2  ;;  %v9963_v46 = vld [vmem:[%s13993_s2 + $0x228] sm:$0xff] }
 0x233   : > { %3641 = vmatpush.bf16.msrb.mxu0 %v9963_v46 }
 0x234   : > { %v2254_v25 = vsel %vm2241_vm2, %v2251_v13, %v2253_v52  ;;  %v983_v13 = vadd.f32 %v11448_v20, %v10990_v56  ;;  %v985_v20 = vadd.f32 %v11455_v18, %v10995_v62 }
 0x236   : > { %2810 = vmatmul.bf16.gmra.mxu2 %v2679_v53 }
 0x239   : > { %v1222_v17 = vpop.f32.mrf.mxu0 }
 0x23a   : > { %v11478_v55 = vadd.f32 %v1222_v17, %v978_v40  ;;  %v9909_v40 = vld [vmem:[%s10763_s26 + $0x48] sm:$0xff] }
 0x23b   : > { %v2680_v17 = vrot.slane %v9909_v40, 2 }
 0x23c   : > { %2089 = vmatmul.bf16.gmra.mxu0 %v1852_v51  ;;  %v3164_v51 = vrot.slane %v3162_v9, 3  ;;  %v3168_v9 = vshrl.u32 %v9937_v15, 16 }
 0x23d   : > { %3386 = vmatmul.bf16.gmra.mxu3 %v3157_v32  ;;  %2385 = vmatmul.bf16.gmra.mxu1 %v2254_v25  ;;  %v2681_v53 = vsel %vm2241_vm2, %v2678_v48, %v2680_v17  ;;  %v2255_v32 = vrot.slane %v10608_v10, 2  ;;  %v1863_v25 = vshrl.u32 %v10607_v14, 16 }
 0x23e   : > { %v3165_v28 = vor.u32 %v3164_v51, %v3161_v2  ;;  %v2682_v2 = vrot.slane %v9910_v29, 2 }
 0x23f   : > { %v2256_v56 = vsel %vm2241_vm2, %v2253_v52, %v2255_v32  ;;  %v1865_v48 = vrot.slane %v1863_v25, 1  ;;  %v1872_v25 = vshrl.u32 %v10608_v10, 16 }
 0x240   : > { %v2683_v62 = vsel %vm2241_vm2, %v2680_v17, %v2682_v2 }
 0x241   : > { %v1224_v34 = vpop.f32.mrf.mxu0 }
 0x242   : > { %v11488_v27 = vadd.f32 %v1224_v34, %v980_v39  ;;  %v1866_v39 = vshll.u32 %v10607_v14, 16  ;;  %v3166_v34 = vsel %vm3095_vm3, %v3156_v35, %v3165_v28  ;;  %v3171_v14 = vshll.u32 %v9937_v15, 16 }
 0x243   : > { %v3170_v35 = vrot.slane %v3168_v9, 2 }
 0x244   : > { %v1868_v45 = vrot.slane %v1866_v39, 2  ;;  %v1875_v39 = vshll.u32 %v10608_v10, 16 }
 0x246   : > { %2815 = vmatmul.bf16.gmra.mxu2 %v2681_v53  ;;  %v1869_v40 = vor.u32 %v1868_v45, %v1865_v48  ;;  %v9911_v45 = vld [vmem:[%s10763_s26 + $0x58] sm:$0xff] }
 0x247   : > { %v2684_v9 = vrot.slane %v9911_v45, 2 }
 0x248   : > { %v1870_v51 = vsel %vm1808_vm4, %v1860_v26, %v1869_v40  ;;  %v1874_v26 = vrot.slane %v1872_v25, 1 }
 0x249   : > { %v1227_v38 = vpop.f32.mrf.mxu0 }
 0x24a   : > { %v11496_v46 = vadd.f32 %v1227_v38, %v983_v13  ;;  %v3173_v13 = vrot.slane %v3171_v14, 3 }
 0x24c   : > { %2094 = vmatmul.bf16.gmra.mxu0 %v1861_v37  ;;  %v3174_v38 = vor.u32 %v3173_v13, %v3170_v35  ;;  %v10609_v37 = vld [vmem:[%s10763_s26 + $0x48] sm:$0xff]  ;;  %v2685_v35 = vsel %vm2241_vm2, %v2682_v2, %v2684_v9 }
 0x24d   : > { %3391 = vmatmul.bf16.gmra.mxu3 %v3166_v34  ;;  %2390 = vmatmul.bf16.gmra.mxu1 %v2256_v56  ;;  %v2257_v53 = vrot.slane %v10609_v37, 2  ;;  %v1881_v25 = vshrl.u32 %v10609_v37, 16 }
 0x24e   : > { %v3175_v34 = vsel %vm3095_vm3, %v3165_v28, %v3174_v38 }
 0x24f   : > { %v2258_v56 = vsel %vm2241_vm2, %v2255_v32, %v2257_v53 }
 0x251   : > { %v1229_v33 = vpop.f32.mrf.mxu0 }
 0x252   : > { %v11503_v47 = vadd.f32 %v1229_v33, %v985_v20  ;;  %v1877_v33 = vrot.slane %v1875_v39, 2  ;;  %v1884_v39 = vshll.u32 %v10609_v37, 16 }
 0x254   : > { %v1878_v48 = vor.u32 %v1877_v33, %v1874_v26  ;;  %v1886_v26 = vrot.slane %v1884_v39, 2 }
 0x256   : > { %2820 = vmatmul.bf16.gmra.mxu2 %v2683_v62  ;;  %v1879_v32 = vsel %vm1808_vm4, %v1869_v40, %v1878_v48 }
 0x259   : > { %v1642_v52 = vpop.f32.mrf.mxu0 }
 0x25a   : > { %v11510_v18 = vadd.f32 %v1642_v52, %v11463_v23  ;;  %v9938_v23 = vld [vmem:[%s10763_s26 + $0x58] sm:$0xff] }
 0x25b   : > { %v3177_v15 = vshrl.u32 %v9938_v23, 16  ;;  %v3180_v29 = vshll.u32 %v9938_v23, 16  ;;  %v9939_v23 = vld [vmem:[%s10763_s26 + $0x60] sm:$0xff] }
 0x25c   : > { %2099 = vmatmul.bf16.gmra.mxu0 %v1870_v51  ;;  %v10610_v51 = vld [vmem:[%s10763_s26 + $0x50] sm:$0xff] }
 0x25d   : > { %3396 = vmatmul.bf16.gmra.mxu3 %v3175_v34  ;;  %2395 = vmatmul.bf16.gmra.mxu1 %v2258_v56  ;;  %v3179_v10 = vrot.slane %v3177_v15, 2  ;;  %v3182_v14 = vrot.slane %v3180_v29, 3  ;;  %v2259_v62 = vrot.slane %v10610_v51, 2  ;;  %v9912_v29 = vld [vmem:[%s10763_s26 + $0x60] sm:$0xff] }
 0x25f   : > { %v3183_v52 = vor.u32 %v3182_v14, %v3179_v10  ;;  %v2260_v34 = vsel %vm2241_vm2, %v2257_v53, %v2259_v62  ;;  %v3186_v10 = vshrl.u32 %v9939_v23, 16  ;;  %v3189_v14 = vshll.u32 %v9939_v23, 16 }
 0x260   : > { %v2686_v53 = vrot.slane %v9912_v29, 2 }
 0x261   : > { %v1644_v20 = vpop.f32.mrf.mxu0 }
 0x262   : > { %v11516_v17 = vadd.f32 %v1644_v20, %v11470_v11  ;;  %v9962_v11 = vld [vmem:[%s13993_s2 + $0x220] sm:$0xff]  ;;  %v1883_v20 = vrot.slane %v1881_v25, 1 }
 0x263   : > { %3642 = vmatpush.bf16.msrb.mxu0 %v9962_v11  ;;  %v2687_v11 = vsel %vm2241_vm2, %v2684_v9, %v2686_v53 }
 0x264   : > { %v1887_v45 = vor.u32 %v1886_v26, %v1883_v20  ;;  %v1893_v20 = vshll.u32 %v10610_v51, 16 }
 0x266   : > { %2825 = vmatmul.bf16.gmra.mxu2 %v2685_v35 }
 0x269   : > { %v1647_v28 = vpop.f32.mrf.mxu0  ;;  %v11529_v40 = vpop.f32.mrf.mxu2 }
 0x26a   : > { %v11523_v13 = vadd.f32 %v1647_v28, %v11478_v55  ;;  %v2361_v2 = vpop.f32.mrf.mxu1  ;;  %v3184_v55 = vsel %vm3095_vm3, %v3174_v38, %v3183_v52  ;;  %v3188_v28 = vrot.slane %v3186_v10, 2 }
 0x26c   : > { %2104 = vmatmul.bf16.gmra.mxu0 %v1879_v32  ;;  %v3191_v32 = vrot.slane %v3189_v14, 3  ;;  %v1895_v14 = vrot.slane %v1893_v20, 2 }
 0x26d   : > { %3401 = vmatmul.bf16.gmra.mxu3 %v3184_v55  ;;  %2400 = vmatmul.bf16.gmra.mxu1 %v2260_v34  ;;  %v10611_v55 = vld [vmem:[%s10763_s26 + $0x58] sm:$0xff] }
 0x26e   : > { %v3192_v39 = vor.u32 %v3191_v32, %v3188_v28  ;;  %v2261_v34 = vrot.slane %v10611_v55, 2  ;;  %v9940_v32 = vld [vmem:[%s10763_s26 + $0x68] sm:$0xff]  ;;  %v1902_v7 = vshll.u32 %v10611_v55, 16 }
 0x26f   : > { %v3195_v42 = vshrl.u32 %v9940_v32, 16 }
 0x270   : > { %v3362_v37 = vpop.f32.mrf.mxu3  ;;  %v2262_v9 = vsel %vm2241_vm2, %v2259_v62, %v2261_v34 }
 0x271   : > { %v1649_v56 = vpop.f32.mrf.mxu0  ;;  %v11537_v15 = vpop.f32.mrf.mxu2 }
 0x272   : > { %v11534_v33 = vadd.f32 %v1649_v56, %v11488_v27  ;;  %v11540_v38 = vpop.f32.mrf.mxu1  ;;  %v1888_v27 = vsel %vm1808_vm4, %v1878_v48, %v1887_v45  ;;  %v1890_v56 = vshrl.u32 %v10610_v51, 16  ;;  %v3193_v48 = vsel %vm3095_vm3, %v3183_v52, %v3192_v39 }
 0x273   : > { %v3198_v52 = vshll.u32 %v9940_v32, 16  ;;  %v1899_v32 = vshrl.u32 %v10611_v55, 16 }
 0x274   : > { %v1892_v10 = vrot.slane %v1890_v56, 1  ;;  %v3197_v56 = vrot.slane %v3195_v42, 2 }
 0x275   : > { %v3200_v20 = vrot.slane %v3198_v52, 3  ;;  %v1901_v52 = vrot.slane %v1899_v32, 1 }
 0x276   : > { %2830 = vmatmul.bf16.gmra.mxu2 %v2687_v11  ;;  %v1896_v51 = vor.u32 %v1895_v14, %v1892_v10  ;;  %v9913_v11 = vld [vmem:[%s10763_s26 + $0x68] sm:$0xff]  ;;  %v10612_v10 = vld [vmem:[%s10763_s26 + $0x60] sm:$0xff] }
 0x277   : > { %v2688_v62 = vrot.slane %v9913_v11, 2  ;;  %v2263_v14 = vrot.slane %v10612_v10, 2 }
 0x278   : > { %v3364_v26 = vpop.f32.mrf.mxu3 }
 0x279   : > { %v1652_v35 = vpop.f32.mrf.mxu0  ;;  %v11548_v23 = vpop.f32.mrf.mxu2 }
 0x27a   : > { %v11545_v25 = vadd.f32 %v1652_v35, %v11496_v46  ;;  %v11550_v29 = vpop.f32.mrf.mxu1 }
 0x27c   : > { %2109 = vmatmul.bf16.gmra.mxu0 %v1888_v27 }
 0x27d   : > { %3406 = vmatmul.bf16.gmra.mxu3 %v3193_v48  ;;  %2405 = vmatmul.bf16.gmra.mxu1 %v2262_v9  ;;  %v2689_v48 = vsel %vm2241_vm2, %v2686_v53, %v2688_v62 }
 0x280   : > { %v11558_v35 = vpop.f32.mrf.mxu3 }
 0x281   : > { %v1654_v46 = vpop.f32.mrf.mxu0  ;;  %v11560_v27 = vpop.f32.mrf.mxu2 }
 0x282   : > { %v11555_v28 = vadd.f32 %v1654_v46, %v11503_v47  ;;  %v11563_v41 = vpop.f32.mrf.mxu1  ;;  %v1897_v47 = vsel %vm1808_vm4, %v1887_v45, %v1896_v51  ;;  %v3201_v46 = vor.u32 %v3200_v20, %v3197_v56  ;;  %v1904_v56 = vrot.slane %v1902_v7, 2  ;;  %v9941_v20 = vld [vmem:[%s10763_s26 + $0x70] sm:$0xff] }
 0x283   : > { %v3207_v7 = vshll.u32 %v9941_v20, 16 }
 0x286   : > { %2835 = vmatmul.bf16.gmra.mxu2 %v2689_v48  ;;  %v3204_v48 = vshrl.u32 %v9941_v20, 16  ;;  %v10613_v20 = vld [vmem:[%s10763_s26 + $0x68] sm:$0xff] }
 0x288   : > { %v11569_v16 = vpop.f32.mrf.mxu3 }
 0x289   : > { %v2075_v57 = vpop.f32.mrf.mxu0  ;;  %v11571_v42 = vpop.f32.mrf.mxu2 }
 0x28a   : > { %v2179_v9 = vadd.f32 %v2075_v57, %v11510_v18  ;;  %v11574_v45 = vpop.f32.mrf.mxu1  ;;  %v3202_v57 = vsel %vm3095_vm3, %v3192_v39, %v3201_v46  ;;  %v2264_v18 = vsel %vm2241_vm2, %v2261_v34, %v2263_v14 }
 0x28c   : > { %v2465_v4 = vadd.f32 %v2361_v2, %v2179_v9  ;;  %2114 = vmatmul.bf16.gmra.mxu0 %v1897_v47 }
 0x28d   : > { %3411 = vmatmul.bf16.gmra.mxu3 %v3202_v57  ;;  %2410 = vmatmul.bf16.gmra.mxu1 %v2264_v18  ;;  %v3209_v57 = vrot.slane %v3207_v7, 3 }
 0x28e   : > { %v2890_v11 = vadd.f32 %v11529_v40, %v2465_v4  ;;  %v9961_v4 = vld [vmem:[%s13993_s2 + $0x218] sm:$0xff]  ;;  %v1905_v40 = vor.u32 %v1904_v56, %v1901_v52 }
 0x28f   : > { %3643 = vmatpush.bf16.msrb.mxu0 %v9961_v4  ;;  %v1911_v4 = vshll.u32 %v10612_v10, 16 }
 0x290   : > { %v11578_v53 = vadd.f32 %v3362_v37, %v2890_v11  ;;  %v11586_v39 = vpop.f32.mrf.mxu3  ;;  %v9914_v37 = vld [vmem:[%s10763_s26 + $0x70] sm:$0xff] }
 0x291   : > { %v2077_v2 = vpop.f32.mrf.mxu0  ;;  %v11588_v34 = vpop.f32.mrf.mxu2  ;;  %v2690_v32 = vrot.slane %v9914_v37, 2 }
 0x292   : > { %14093 = vst [vmem:[#allocation48_spill] sm:$0xff] %v11578_v53  ;;  %v2180_v55 = vadd.f32 %v2077_v2, %v11516_v17  ;;  %v11592_v9 = vpop.f32.mrf.mxu1  ;;  %v1906_v2 = vsel %vm1808_vm4, %v1896_v51, %v1905_v40  ;;  %v2265_v53 = vrot.slane %v10613_v20, 2 }
 0x293   : > { %v2691_v52 = vsel %vm2241_vm2, %v2688_v62, %v2690_v32 }
 0x294   : > { %v2466_v47 = vadd.f32 %v11540_v38, %v2180_v55  ;;  %v3206_v38 = vrot.slane %v3204_v48, 2  ;;  %v2266_v62 = vsel %vm2241_vm2, %v2263_v14, %v2265_v53 }
 0x296   : > { %v2891_v17 = vadd.f32 %v11537_v15, %v2466_v47  ;;  %2840 = vmatmul.bf16.gmra.mxu2 %v2691_v52  ;;  %v3210_v55 = vor.u32 %v3209_v57, %v3206_v38  ;;  %v1908_v47 = vshrl.u32 %v10612_v10, 16  ;;  %v1913_v38 = vrot.slane %v1911_v4, 2  ;;  %v9942_v57 = vld [vmem:[%s10763_s26 + $0x78] sm:$0xff] }
 0x297   : > { %v3213_v52 = vshrl.u32 %v9942_v57, 16 }
 0x298   : > { %v11594_v11 = vadd.f32 %v3364_v26, %v2891_v17  ;;  %v11601_v26 = vpop.f32.mrf.mxu3  ;;  %v1910_v17 = vrot.slane %v1908_v47, 1 }
 0x299   : > { %v2080_v18 = vpop.f32.mrf.mxu0  ;;  %v11603_v37 = vpop.f32.mrf.mxu2 }
 0x29a   : > { %v2181_v56 = vadd.f32 %v2080_v18, %v11523_v13  ;;  %v11606_v48 = vpop.f32.mrf.mxu1  ;;  %v3211_v13 = vsel %vm3095_vm3, %v3201_v46, %v3210_v55  ;;  %v1914_v14 = vor.u32 %v1913_v38, %v1910_v17 }
 0x29c   : > { %v2467_v15 = vadd.f32 %v11550_v29, %v2181_v56  ;;  %2119 = vmatmul.bf16.gmra.mxu0 %v1906_v2  ;;  %v3216_v56 = vshll.u32 %v9942_v57, 16  ;;  %v1915_v17 = vsel %vm1808_vm4, %v1905_v40, %v1914_v14 }
 0x29d   : > { %3416 = vmatmul.bf16.gmra.mxu3 %v3211_v13  ;;  %2415 = vmatmul.bf16.gmra.mxu1 %v2266_v62 }
 0x29e   : > { %v2892_v51 = vadd.f32 %v11548_v23, %v2467_v15  ;;  %v9973_v23 = vld [vmem:[%s13995_s4 + $0x38] sm:$0xff]  ;;  %v3218_v62 = vrot.slane %v3216_v56, 3 }
 0x29f   : > { %4832 = vmatpush.bf16.msra.mxu2 %v9973_v23  ;;  %v10614_v23 = vld [vmem:[%s10763_s26 + $0x70] sm:$0xff] }
 0x2a0   : > { %v11611_v7 = vadd.f32 %v11558_v35, %v2892_v51  ;;  %v10007_v35 = vld [vmem:[%s13995_s4 + $0xb8] sm:$0xff]  ;;  %v11622_v18 = vpop.f32.mrf.mxu3  ;;  %v3215_v51 = vrot.slane %v3213_v52, 2  ;;  %v2267_v57 = vrot.slane %v10614_v23, 2 }
 0x2a1   : > { %v2082_v29 = vpop.f32.mrf.mxu0  ;;  %v11624_v2 = vpop.f32.mrf.mxu2  ;;  %5292 = vmatpush.bf16.msra.mxu3 %v10007_v35  ;;  %v1917_v35 = vshrl.u32 %v10613_v20, 16 }
 0x2a2   : > { %v2182_v10 = vadd.f32 %v2082_v29, %v11534_v33  ;;  %v9915_v33 = vld [vmem:[%s10763_s26 + $0x78] sm:$0xff]  ;;  %v11631_v47 = vpop.f32.mrf.mxu1  ;;  %v2268_v56 = vsel %vm2241_vm2, %v2265_v53, %v2267_v57  ;;  %v9916_v53 = vld [vmem:[%s10763_s26 + $0x80] sm:$0xff] }
 0x2a3   : > { %v2692_v4 = vrot.slane %v9915_v33, 2 }
 0x2a4   : > { %v2468_v46 = vadd.f32 %v11563_v41, %v2182_v10  ;;  %v9981_v41 = vld [vmem:[%s13995_s4 + $0x78] sm:$0xff]  ;;  %v3219_v10 = vor.u32 %v3218_v62, %v3215_v51  ;;  %v9943_v62 = vld [vmem:[%s10763_s26 + $0x80] sm:$0xff] }
 0x2a5   : > { %4475 = vmatpush.bf16.msra.mxu1 %v9981_v41  ;;  %v2693_v38 = vsel %vm2241_vm2, %v2690_v32, %v2692_v4  ;;  %v1919_v41 = vrot.slane %v1917_v35, 1  ;;  %v2694_v35 = vrot.slane %v9916_v53, 2 }
 0x2a6   : > { %v2893_v15 = vadd.f32 %v11560_v27, %v2468_v46  ;;  %2845 = vmatmul.bf16.gmra.mxu2 %v2693_v38 }
 0x2a8   : > { %v11634_v13 = vadd.f32 %v11569_v16, %v2893_v15  ;;  %v1920_v16 = vshll.u32 %v10613_v20, 16  ;;  %v11641_v33 = vpop.f32.mrf.mxu3 }
 0x2a9   : > { %v2085_v29 = vpop.f32.mrf.mxu0  ;;  %v11643_v52 = vpop.f32.mrf.mxu2 }
 0x2aa   : > { %v2183_v27 = vadd.f32 %v2085_v29, %v11545_v25  ;;  %v11646_v32 = vpop.f32.mrf.mxu1  ;;  %v3220_v25 = vsel %vm3095_vm3, %v3210_v55, %v3219_v10  ;;  %v1922_v51 = vrot.slane %v1920_v16, 2  ;;  %v3222_v55 = vshrl.u32 %v9943_v62, 16 }
 0x2ac   : > { %v2469_v46 = vadd.f32 %v11574_v45, %v2183_v27  ;;  %2124 = vmatmul.bf16.gmra.mxu0 %v1915_v17  ;;  %v1923_v29 = vor.u32 %v1922_v51, %v1919_v41  ;;  %v10615_v51 = vld [vmem:[%s10763_s26 + $0x78] sm:$0xff] }
 0x2ad   : > { %3421 = vmatmul.bf16.gmra.mxu3 %v3220_v25  ;;  %2420 = vmatmul.bf16.gmra.mxu1 %v2268_v56  ;;  %v2695_v56 = vsel %vm2241_vm2, %v2692_v4, %v2694_v35 }
 0x2ae   : > { %v2894_v40 = vadd.f32 %v11571_v42, %v2469_v46  ;;  %v1924_v25 = vsel %vm1808_vm4, %v1914_v14, %v1923_v29 }
 0x2b0   : > { %v11651_v15 = vadd.f32 %v11586_v39, %v2894_v40  ;;  %v11656_v17 = vpop.f32.mrf.mxu3  ;;  %v3225_v39 = vshll.u32 %v9943_v62, 16  ;;  %v1926_v62 = vshrl.u32 %v10614_v23, 16 }
 0x2b1   : > { %v2087_v45 = vpop.f32.mrf.mxu0  ;;  %v11658_v38 = vpop.f32.mrf.mxu2 }
 0x2b2   : > { %v2184_v20 = vadd.f32 %v2087_v45, %v11555_v28  ;;  %v11662_v46 = vpop.f32.mrf.mxu1  ;;  %v3224_v28 = vrot.slane %v3222_v55, 2  ;;  %v3227_v40 = vrot.slane %v3225_v39, 3 }
 0x2b4   : > { %v2470_v42 = vadd.f32 %v11592_v9, %v2184_v20  ;;  %v3228_v41 = vor.u32 %v3227_v40, %v3224_v28  ;;  %v2269_v20 = vrot.slane %v10615_v51, 2  ;;  %v9944_v40 = vld [vmem:[%s10763_s26 + $0x88] sm:$0xff] }
 0x2b6   : > { %v2895_v27 = vadd.f32 %v11588_v34, %v2470_v42  ;;  %2850 = vmatmul.bf16.gmra.mxu2 %v2695_v56  ;;  %v1929_v42 = vshll.u32 %v10614_v23, 16  ;;  %v3229_v55 = vsel %vm3095_vm3, %v3219_v10, %v3228_v41 }
 0x2b8   : > { %v11665_v16 = vadd.f32 %v11601_v26, %v2895_v27  ;;  %v11672_v26 = vpop.f32.mrf.mxu3  ;;  %v1928_v27 = vrot.slane %v1926_v62, 1  ;;  %v1931_v28 = vrot.slane %v1929_v42, 2 }
 0x2b9   : > { %v2090_v9 = vpop.f32.mrf.mxu0  ;;  %v11674_v53 = vpop.f32.mrf.mxu2 }
 0x2ba   : > { %v2185_v45 = vadd.f32 %v2090_v9, %v11008_v22  ;;  %v9960_v22 = vld [vmem:[%s13993_s2 + $0x210] sm:$0xff]  ;;  %v11680_v4 = vpop.f32.mrf.mxu1 }
 0x2bb   : > { %3644 = vmatpush.bf16.msrb.mxu0 %v9960_v22 }
 0x2bc   : > { %v2471_v34 = vadd.f32 %v11606_v48, %v2185_v45  ;;  %2129 = vmatmul.bf16.gmra.mxu0 %v1924_v25  ;;  %v2270_v48 = vsel %vm2241_vm2, %v2267_v57, %v2269_v20  ;;  %v1932_v25 = vor.u32 %v1931_v28, %v1928_v27  ;;  %v9917_v57 = vld [vmem:[%s10763_s26 + $0x88] sm:$0xff]  ;;  %v3234_v45 = vshll.u32 %v9944_v40, 16  ;;  %v10616_v28 = vld [vmem:[%s10763_s26 + $0x80] sm:$0xff] }
 0x2bd   : > { %3426 = vmatmul.bf16.gmra.mxu3 %v3229_v55  ;;  %2425 = vmatmul.bf16.gmra.mxu1 %v2270_v48  ;;  %v2696_v42 = vrot.slane %v9917_v57, 2 }
 0x2be   : > { %v2896_v14 = vadd.f32 %v11603_v37, %v2471_v34  ;;  %v3236_v22 = vrot.slane %v3234_v45, 3  ;;  %v1933_v55 = vsel %vm1808_vm4, %v1923_v29, %v1932_v25 }
 0x2bf   : > { %v2697_v48 = vsel %vm2241_vm2, %v2694_v35, %v2696_v42 }
 0x2c0   : > { %v11685_v23 = vadd.f32 %v11622_v18, %v2896_v14  ;;  %v11690_v56 = vpop.f32.mrf.mxu3  ;;  %v3231_v18 = vshrl.u32 %v9944_v40, 16  ;;  %v1935_v40 = vshrl.u32 %v10615_v51, 16 }
 0x2c1   : > { %v2092_v39 = vpop.f32.mrf.mxu0  ;;  %v11692_v10 = vpop.f32.mrf.mxu2 }
 0x2c2   : > { %v2186_v37 = vadd.f32 %v2092_v39, %v11019_v36  ;;  %v11696_v62 = vpop.f32.mrf.mxu1  ;;  %v3233_v36 = vrot.slane %v3231_v18, 2 }
 0x2c4   : > { %v2472_v9 = vadd.f32 %v11631_v47, %v2186_v37  ;;  %v3237_v27 = vor.u32 %v3236_v22, %v3233_v36  ;;  %v2271_v37 = vrot.slane %v10616_v28, 2  ;;  %v1937_v36 = vrot.slane %v1935_v40, 1 }
 0x2c6   : > { %v2897_v34 = vadd.f32 %v11624_v2, %v2472_v9  ;;  %2855 = vmatmul.bf16.gmra.mxu2 %v2697_v48  ;;  %v1938_v9 = vshll.u32 %v10615_v51, 16  ;;  %v3238_v18 = vsel %vm3095_vm3, %v3228_v41, %v3237_v27  ;;  %v2272_v45 = vsel %vm2241_vm2, %v2269_v20, %v2271_v37  ;;  %v9945_v41 = vld [vmem:[%s10763_s26 + $0x90] sm:$0xff] }
 0x2c8   : > { %v11699_v14 = vadd.f32 %v11641_v33, %v2897_v34  ;;  %v9972_v33 = vld [vmem:[%s13995_s4 + $0x30] sm:$0xff]  ;;  %v11709_v57 = vpop.f32.mrf.mxu3  ;;  %v1940_v22 = vrot.slane %v1938_v9, 2 }
 0x2c9   : > { %v2095_v47 = vpop.f32.mrf.mxu0  ;;  %v11711_v29 = vpop.f32.mrf.mxu2  ;;  %4833 = vmatpush.bf16.msra.mxu2 %v9972_v33  ;;  %v3243_v33 = vshll.u32 %v9945_v41, 16 }
 0x2ca   : > { %v2187_v39 = vadd.f32 %v2095_v47, %v11025_v0  ;;  %v10006_v0 = vld [vmem:[%s13995_s4 + $0xb0] sm:$0xff] }
 0x2cb   : > { %5293 = vmatpush.bf16.msra.mxu3 %v10006_v0 }
 0x2cc   : > { %v2473_v2 = vadd.f32 %v11646_v32, %v2187_v39  ;;  %2134 = vmatmul.bf16.gmra.mxu0 %v1933_v55  ;;  %v11717_v32 = vpop.f32.mrf.mxu1  ;;  %v1941_v55 = vor.u32 %v1940_v22, %v1937_v36  ;;  %v9918_v39 = vld [vmem:[%s10763_s26 + $0x90] sm:$0xff]  ;;  %v10617_v22 = vld [vmem:[%s10763_s26 + $0x88] sm:$0xff] }
 0x2cd   : > { %3431 = vmatmul.bf16.gmra.mxu3 %v3238_v18  ;;  %2430 = vmatmul.bf16.gmra.mxu1 %v2272_v45  ;;  %v3245_v18 = vrot.slane %v3243_v33, 3 }
 0x2ce   : > { %v2898_v35 = vadd.f32 %v11643_v52, %v2473_v2  ;;  %v9980_v52 = vld [vmem:[%s13995_s4 + $0x70] sm:$0xff]  ;;  %v3240_v2 = vshrl.u32 %v9945_v41, 16  ;;  %v1942_v45 = vsel %vm1808_vm4, %v1932_v25, %v1941_v55  ;;  %v1944_v41 = vshrl.u32 %v10616_v28, 16 }
 0x2cf   : > { %4476 = vmatpush.bf16.msra.mxu1 %v9980_v52 }
 0x2d0   : > { %v11722_v51 = vadd.f32 %v11656_v17, %v2898_v35  ;;  %v11730_v48 = vpop.f32.mrf.mxu3  ;;  %v3242_v35 = vrot.slane %v3240_v2, 2 }
 0x2d1   : > { %v2097_v34 = vpop.f32.mrf.mxu0  ;;  %v11732_v17 = vpop.f32.mrf.mxu2 }
 0x2d2   : > { %v2188_v47 = vadd.f32 %v2097_v34, %v11036_v61  ;;  %v2698_v61 = vrot.slane %v9918_v39, 2  ;;  %v3246_v36 = vor.u32 %v3245_v18, %v3242_v35  ;;  %v9946_v18 = vld [vmem:[%s10763_s26 + $0x98] sm:$0xff] }
 0x2d4   : > { %v2474_v20 = vadd.f32 %v11662_v46, %v2188_v47  ;;  %v11736_v9 = vpop.f32.mrf.mxu1  ;;  %v2699_v52 = vsel %vm2241_vm2, %v2696_v42, %v2698_v61  ;;  %v2273_v47 = vrot.slane %v10617_v22, 2 }
 0x2d6   : > { %v2899_v40 = vadd.f32 %v11658_v38, %v2474_v20  ;;  %2860 = vmatmul.bf16.gmra.mxu2 %v2699_v52  ;;  %v1947_v20 = vshll.u32 %v10616_v28, 16  ;;  %v2274_v2 = vsel %vm2241_vm2, %v2271_v37, %v2273_v47  ;;  %v3249_v37 = vshrl.u32 %v9946_v18, 16 }
 0x2d8   : > { %v11739_v0 = vadd.f32 %v11672_v26, %v2899_v40  ;;  %v11746_v26 = vpop.f32.mrf.mxu3  ;;  %v1946_v40 = vrot.slane %v1944_v41, 1  ;;  %v1949_v35 = vrot.slane %v1947_v20, 2 }
 0x2d9   : > { %v2100_v46 = vpop.f32.mrf.mxu0  ;;  %v11748_v39 = vpop.f32.mrf.mxu2 }
 0x2da   : > { %v2189_v34 = vadd.f32 %v2100_v46, %v11042_v50  ;;  %v3247_v50 = vsel %vm3095_vm3, %v3237_v27, %v3246_v36  ;;  %v1950_v46 = vor.u32 %v1949_v35, %v1946_v40  ;;  %v9919_v27 = vld [vmem:[%s10763_s26 + $0x98] sm:$0xff]  ;;  %v11781_v35 = vld [vmem:[%s10763_s26 + $0x90] sm:$0xff] }
 0x2db   : > { %v2700_v41 = vrot.slane %v9919_v27, 2 }
 0x2dc   : > { %v2475_v38 = vadd.f32 %v11680_v4, %v2189_v34  ;;  %2139 = vmatmul.bf16.gmra.mxu0 %v1942_v45  ;;  %v11751_v42 = vpop.f32.mrf.mxu1 }
 0x2dd   : > { %3436 = vmatmul.bf16.gmra.mxu3 %v3247_v50  ;;  %2435 = vmatmul.bf16.gmra.mxu1 %v2274_v2  ;;  %v1951_v2 = vsel %vm1808_vm4, %v1941_v55, %v1950_v46 }
 0x2de   : > { %v2900_v25 = vadd.f32 %v11674_v53, %v2475_v38 }
 0x2e0   : > { %v11756_v33 = vadd.f32 %v11690_v56, %v2900_v25  ;;  %v11761_v45 = vpop.f32.mrf.mxu3  ;;  %v3252_v56 = vshll.u32 %v9946_v18, 16  ;;  %v1953_v18 = vshrl.u32 %v10617_v22, 16 }
 0x2e1   : > { %v2102_v4 = vpop.f32.mrf.mxu0  ;;  %v11763_v52 = vpop.f32.mrf.mxu2 }
 0x2e2   : > { %v2190_v28 = vadd.f32 %v2102_v4, %v11054_v21  ;;  %v3251_v21 = vrot.slane %v3249_v37, 2  ;;  %v3254_v25 = vrot.slane %v3252_v56, 3  ;;  %v2701_v4 = vsel %vm2241_vm2, %v2698_v61, %v2700_v41 }
 0x2e4   : > { %v2476_v53 = vadd.f32 %v11696_v62, %v2190_v28  ;;  %v11767_v38 = vpop.f32.mrf.mxu1  ;;  %v9959_v62 = vld [vmem:[%s13993_s2 + $0x208] sm:$0xff] }
 0x2e5   : > { %3645 = vmatpush.bf16.msrb.mxu0 %v9959_v62 }
 0x2e6   : > { %v2901_v34 = vadd.f32 %v11692_v10, %v2476_v53  ;;  %2865 = vmatmul.bf16.gmra.mxu2 %v2701_v4  ;;  %v11778_v10 = vor.u32 %v3254_v25, %v3251_v21  ;;  %v1956_v53 = vshll.u32 %v10617_v22, 16 }
 0x2e8   : > { %v11770_v20 = vadd.f32 %v11709_v57, %v2901_v34  ;;  %v2275_v57 = vrot.slane %v11781_v35, 2  ;;  %v11785_v27 = vpop.f32.mrf.mxu3  ;;  %v3256_v37 = vsel %vm3095_vm3, %v3246_v36, %v11778_v10  ;;  %v1955_v34 = vrot.slane %v1953_v18, 1 }
 0x2e9   : > { %v2105_v50 = vpop.f32.mrf.mxu0  ;;  %v11787_v55 = vpop.f32.mrf.mxu2  ;;  %v1958_v21 = vrot.slane %v1956_v53, 2 }
 0x2ea   : > { %v2191_v40 = vadd.f32 %v2105_v50, %v11060_v24 }
 0x2eb   : > { %v11803_v50 = vor.u32 %v1958_v21, %v1955_v34  ;;  %v10669_v21 = vmov 0  }
 0x2ec   : > { %v2477_v28 = vadd.f32 %v11717_v32, %v2191_v40  ;;  %2144 = vmatmul.bf16.gmra.mxu0 %v1951_v2  ;;  %v11790_v61 = vpop.f32.mrf.mxu1  ;;  %v2276_v32 = vsel %vm2241_vm2, %v2273_v47, %v2275_v57  ;;  %v11810_v47 = vld [vmem:[%s10763_s26 + $0xa0] sm:$0xff]  ;;  %10592 = vset.pattern.permute.xlu0 %v10669_v21  ;;  %4207 = vst [vmem:[#allocation2] sm:$0xf] %v10669_v21 }
 0x2ed   : > { %3441 = vmatmul.bf16.gmra.mxu3 %v3256_v37  ;;  %2440 = vmatmul.bf16.gmra.mxu1 %v2276_v32  ;;  %v1960_v32 = vsel %vm1808_vm4, %v1950_v46, %v11803_v50 }
 0x2ee   : > { %v2902_v24 = vadd.f32 %v11711_v29, %v2477_v28  ;;  %v9947_v29 = vld [vmem:[%s10763_s26 + $0xa0] sm:$0xff]  ;;  %10593 = vset.pattern.permute.xlu1 %v10669_v21  ;;  %10594 = vset.pattern.permute.xlu2 %v10669_v21 }
 0x2ef   : > { %v3261_v4 = vshll.u32 %v9947_v29, 16 }
 0x2f0   : > { %v11798_v56 = vadd.f32 %v11730_v48, %v2902_v24  ;;  %v11805_v36 = vpop.f32.mrf.mxu3  ;;  %v3258_v48 = vshrl.u32 %v9947_v29, 16  ;;  %v10005_v24 = vld [vmem:[%s13995_s4 + $0xa8] sm:$0xff]  ;;  %v11840_v29 = vld [vmem:[%s10763_s26 + $0x98] sm:$0xff] }
 0x2f1   : > { %v2107_v22 = vpop.f32.mrf.mxu0  ;;  %v11807_v2 = vpop.f32.mrf.mxu2  ;;  %v3263_v37 = vrot.slane %v3261_v4, 3  ;;  %5294 = vmatpush.bf16.msra.mxu3 %v10005_v24  ;;  %v1965_v4 = vshll.u32 %v11781_v35, 16 }
 0x2f2   : > { %v2192_v62 = vadd.f32 %v2107_v22, %v11074_v43  ;;  %v9971_v43 = vld [vmem:[%s13995_s4 + $0x28] sm:$0xff]  ;;  %v3260_v18 = vrot.slane %v3258_v48, 2  ;;  %v1962_v48 = vshrl.u32 %v11781_v35, 16 }
 0x2f3   : > { %4834 = vmatpush.bf16.msra.mxu2 %v9971_v43 }
 0x2f4   : > { %v2478_v25 = vadd.f32 %v11736_v9, %v2192_v62  ;;  %v11816_v28 = vpop.f32.mrf.mxu1  ;;  %v2702_v9 = vrot.slane %v11810_v47, 2  ;;  %v3879_v62 = vld [vmem:[%s13992_s1] sm:$0xff]  ;;  %v11837_v46 = vor.u32 %v3263_v37, %v3260_v18  ;;  %v1971_v47 = vshrl.u32 %v11840_v29, 16 }
 0x2f5   : > { %3922 = vperm.xlu0 %10592, %v3879_v62  }
 0x2f6   : > { %v2903_v40 = vadd.f32 %v11732_v17, %v2478_v25  ;;  %v2703_v22 = vsel %vm2241_vm2, %v2700_v41, %v2702_v9  ;;  %v3881_v25 = vld [vmem:[%s13992_s1 + $0x10] sm:$0xff]  ;;  %v3265_v24 = vsel %vm3095_vm3, %v11778_v10, %v11837_v46  ;;  %v3880_v10 = vld [vmem:[%s13992_s1 + $0x8] sm:$0xff] }
 0x2f7   : > { %2870 = vmatmul.bf16.gmra.mxu2 %v2703_v22  ;;  %3932 = vperm.xlu1 %10593, %v3881_v25   ;;  %v1964_v22 = vrot.slane %v1962_v48, 1 }
 0x2f8   : > { %v11820_v53 = vadd.f32 %v11746_v26, %v2903_v40  ;;  %v9979_v26 = vld [vmem:[%s13995_s4 + $0x68] sm:$0xff]  ;;  %v11849_v40 = vpop.f32.mrf.mxu3 }
 0x2f9   : > { %v2110_v17 = vpop.f32.mrf.mxu0  ;;  %4477 = vmatpush.bf16.msra.mxu1 %v9979_v26  ;;  %v11851_v43 = vpop.f32.mrf.mxu2  ;;  %v9948_v26 = vld [vmem:[%s10763_s26 + $0xa8] sm:$0xff] }
 0x2fa   : > { %v2193_v34 = vadd.f32 %v2110_v17, %v11086_v6  ;;  %v2277_v6 = vrot.slane %v11840_v29, 2  ;;  %v3270_v25 = vshll.u32 %v9948_v26, 16 }
 0x2fc   : > { %v2479_v41 = vadd.f32 %v11751_v42, %v2193_v34  ;;  %2149 = vmatmul.bf16.gmra.mxu0 %v1960_v32  ;;  %v11854_v42 = vpop.f32.mrf.mxu1  ;;  %v2278_v37 = vsel %vm2241_vm2, %v2275_v57, %v2277_v6 }
 0x2fd   : > { %3446 = vmatmul.bf16.gmra.mxu3 %v3265_v24  ;;  %2445 = vmatmul.bf16.gmra.mxu1 %v2278_v37  ;;  %v3272_v37 = vrot.slane %v3270_v25, 3 }
 0x2fe   : > { %v2904_v18 = vadd.f32 %v11748_v39, %v2479_v41  ;;  %v1967_v39 = vrot.slane %v1965_v4, 2  ;;  %3927 = vperm.xlu0 %10592, %v3880_v10   ;;  %v3267_v41 = vshrl.u32 %v9948_v26, 16  ;;  %v11907_v10 = vld [vmem:[%s10763_s26 + $0xa0] sm:$0xff] }
 0x300   : > { %v11865_v17 = vadd.f32 %v11761_v45, %v2904_v18  ;;  %v3882_v45 = vld [vmem:[%s13992_s1 + $0x18] sm:$0xff]  ;;  %v11876_v57 = vor.u32 %v1967_v39, %v1964_v22  ;;  %v11878_v21 = vpop.f32.mrf.mxu3  ;;  %v3269_v18 = vrot.slane %v3267_v41, 2 }
 0x301   : > { %v2112_v32 = vpop.f32.mrf.mxu0  ;;  %v11880_v62 = vpop.f32.mrf.mxu2  ;;  %3937 = vperm.xlu1 %10593, %v3882_v45  }
 0x302   : > { %v2194_v34 = vadd.f32 %v2112_v32, %v11102_v59  ;;  %v11883_v59 = vld [vmem:[%s10763_s26 + $0xa8] sm:$0xff]  ;;  %v1969_v22 = vsel %vm1808_vm4, %v11803_v50, %v11876_v57  ;;  %v2279_v50 = vrot.slane %v11907_v10, 2 }
 0x304   : > { %v2480_v35 = vadd.f32 %v11767_v38, %v2194_v34  ;;  %v11886_v4 = vpop.f32.mrf.mxu1  ;;  %v2704_v38 = vrot.slane %v11883_v59, 2  ;;  %v3885_v34 = vld [vmem:[%s13992_s1 + $0x30] sm:$0xff] }
 0x306   : > { %v2905_v48 = vadd.f32 %v11763_v52, %v2480_v35  ;;  %v2705_v52 = vsel %vm2241_vm2, %v2702_v9, %v2704_v38  ;;  %3952 = vperm.xlu0 %10592, %v3885_v34   ;;  %v1974_v9 = vshll.u32 %v11840_v29, 16  ;;  %v3888_v29 = vld [vmem:[%s13992_s1 + $0x48] sm:$0xff]  ;;  %v9949_v34 = vld [vmem:[%s10763_s26 + $0xb0] sm:$0x10] }
 0x307   : > { %2875 = vmatmul.bf16.gmra.mxu2 %v2705_v52 }
 0x308   : > { %v11890_v24 = vadd.f32 %v11785_v27, %v2905_v48  ;;  %v11904_v27 = vor.u32 %v3272_v37, %v3269_v18  ;;  %v11916_v35 = vpop.f32.mrf.mxu3  ;;  %v2280_v48 = vsel %vm2241_vm2, %v2277_v6, %v2279_v50  ;;  %v2546_v6 = vld [vmem:[%s10763_s26 + $0xb0] sm:$0xf] }
 0x309   : > { %v2115_v32 = vpop.f32.mrf.mxu0  ;;  %v11918_v45 = vpop.f32.mrf.mxu2 }
 0x30a   : > { %v2195_v39 = vadd.f32 %v2115_v32, %v11108_v63  ;;  %v3886_v63 = vld [vmem:[%s13992_s1 + $0x38] sm:$0xff]  ;;  %v1976_v32 = vrot.slane %v1974_v9, 2 }
 0x30b   : > { %3957 = vperm.xlu1 %10593, %v3886_v63  }
 0x30c   : > { %v2481_v26 = vadd.f32 %v11790_v61, %v2195_v39  ;;  %2154 = vmatmul.bf16.gmra.mxu0 %v1969_v22  ;;  %v11921_v25 = vpop.f32.mrf.mxu1  ;;  %v3274_v61 = vsel %vm3095_vm3, %v11837_v46, %v11904_v27  ;;  %v1787_v22 = vld [vmem:[%s10763_s26 + $0xa8] sm:$0xf]  ;;  %v9958_v46 = vld [vmem:[%s13993_s2 + $0x200] sm:$0xff]  ;;  %v9004_v39 = vld [vmem:[%s10763_s26 + $0xb0] sm:$0xf] }
 0x30d   : > { %3451 = vmatmul.bf16.gmra.mxu3 %v3274_v61  ;;  %2450 = vmatmul.bf16.gmra.mxu1 %v2280_v48  ;;  %v11949_v63 = vor.u32 %v9949_v34, %v9004_v39  ;;  %v1806_v48 = vunpack.c.l.b16 %v1787_v22 }
 0x30e   : > { %v2906_v41 = vadd.f32 %v11787_v55, %v2481_v26  ;;  %v1973_v55 = vrot.slane %v1971_v47, 1  ;;  %3967 = vperm.xlu0 %10592, %v3888_v29   ;;  %3646 = vmatpush.bf16.msrb.mxu0 %v9958_v46 }
 0x30f   : > { %v11976_v34 = vpack.c.b16 %v1806_v48, %v1806_v48 }
 0x310   : > { %v11932_v18 = vadd.f32 %v11805_v36, %v2906_v41  ;;  %v2645_v36 = vunpack.c.l.b16 %v2546_v6  ;;  %v11951_v47 = vor.u32 %v1976_v32, %v1973_v55  ;;  %v11953_v9 = vpop.f32.mrf.mxu3  ;;  %v1020_v55 = vadd.f32 %v11090_v19, %v11136_v8  ;;  %v3891_v19 = vld [vmem:[%s13992_s1 + $0x60] sm:$0xff] }
 0x311   : > { %v2117_v37 = vpop.f32.mrf.mxu0  ;;  %v11955_v41 = vpop.f32.mrf.mxu2 }
 0x312   : > { %v2196_v52 = vadd.f32 %v2117_v37, %v11125_v44  ;;  %v3889_v44 = vld [vmem:[%s13992_s1 + $0x50] sm:$0xff]  ;;  %v11957_v61 = vpack.c.b16 %v2645_v36, %v2645_v36 }
 0x313   : > { %3972 = vperm.xlu1 %10593, %v3889_v44   ;;  %v1983_v44 = vshll.u32 %v11907_v10, 16 }
 0x314   : > { %v2482_v26 = vadd.f32 %v11816_v28, %v2196_v52  ;;  %v3276_v28 = vshrl.u32 %v11949_v63, 16  ;;  %v3279_v52 = vshll.u32 %v11949_v63, 16  ;;  %v11962_v46 = vpop.f32.mrf.mxu1  ;;  %v2706_v29 = vrot.slane %v11957_v61, 2 }
 0x316   : > { %v2907_v37 = vadd.f32 %v11807_v2, %v2482_v26  ;;  %v3278_v6 = vrot.slane %v3276_v28, 2  ;;  %v3281_v36 = vrot.slane %v3279_v52, 3  ;;  %v1978_v2 = vsel %vm1808_vm4, %v11876_v57, %v11951_v47  ;;  %3982 = vperm.xlu0 %10592, %v3891_v19  }
 0x317   : > { %v2707_v39 = vsel %vm2241_vm2, %v2704_v38, %v2706_v29  ;;  %v1340_v57 = vadd.f32 %v11092_v3, %v1020_v55  ;;  %v3892_v38 = vld [vmem:[%s13992_s1 + $0x68] sm:$0xff] }
 0x318   : > { %v11968_v32 = vadd.f32 %v11849_v40, %v2907_v37  ;;  %2880 = vmatmul.bf16.gmra.mxu2 %v2707_v39  ;;  %v11982_v8 = vor.u32 %v3281_v36, %v3278_v6  ;;  %v2281_v40 = vrot.slane %v11976_v34, 2  ;;  %v11992_v61 = vpop.f32.mrf.mxu3 }
 0x319   : > { %v2120_v22 = vpop.f32.mrf.mxu0  ;;  %v11994_v48 = vpop.f32.mrf.mxu2  ;;  %v1765_v52 = vadd.f32 %v11097_v30, %v1340_v57  ;;  %v3894_v30 = vld [vmem:[%s13992_s1 + $0x78] sm:$0xff] }
 0x31a   : > { %v2197_v26 = vadd.f32 %v2120_v22, %v11134_v5  ;;  %v1980_v5 = vshrl.u32 %v11907_v10, 16  ;;  %v3283_v3 = vsel %vm3095_vm3, %v11904_v27, %v11982_v8  ;;  %v1985_v22 = vrot.slane %v1983_v44, 2  ;;  %v10004_v27 = vld [vmem:[%s13995_s4 + $0xa0] sm:$0xff] }
 0x31b   : > { %3987 = vperm.xlu1 %10593, %v3892_v38   ;;  %5295 = vmatpush.bf16.msra.mxu3 %v10004_v27  ;;  %v3883_v10 = vld [vmem:[%s13992_s1 + $0x20] sm:$0xff] }
 0x31c   : > { %v2483_v59 = vadd.f32 %v11854_v42, %v2197_v26  ;;  %2159 = vmatmul.bf16.gmra.mxu0 %v1978_v2  ;;  %v11997_v28 = vpop.f32.mrf.mxu1  ;;  %v2282_v42 = vsel %vm2241_vm2, %v2279_v50, %v2281_v40  ;;  %v1982_v36 = vrot.slane %v1980_v5, 1  ;;  %v3895_v50 = vld [vmem:[%s13992_s1 + $0x80] sm:$0xff]  ;;  %3942 = vperm.xlu2 %10594, %v3883_v10  }
 0x31d   : > { %3456 = vmatmul.bf16.gmra.mxu3 %v3283_v3  ;;  %2455 = vmatmul.bf16.gmra.mxu1 %v2282_v42 }
 0x31e   : > { %v2908_v37 = vadd.f32 %v11851_v43, %v2483_v59  ;;  %v9970_v43 = vld [vmem:[%s13995_s4 + $0x20] sm:$0xff]  ;;  %3997 = vperm.xlu0 %10592, %v3894_v30   ;;  %v1986_v39 = vor.u32 %v1985_v22, %v1982_v36  ;;  %v1025_v59 = vadd.f32 %v11113_v60, %v11150_v12  ;;  %v3884_v60 = vld [vmem:[%s13992_s1 + $0x28] sm:$0xff]  ;;  %v3898_v12 = vld [vmem:[%s13992_s1 + $0x98] sm:$0xff] }
 0x31f   : > { %4835 = vmatpush.bf16.msra.mxu2 %v9970_v43 }
 0x320   : > { %v12009_v55 = vadd.f32 %v11878_v21, %v2908_v37  ;;  %v9978_v21 = vld [vmem:[%s13995_s4 + $0x60] sm:$0xff]  ;;  %v3417_v26 = vpop.f32.mrf.mxu3  ;;  %v1987_v5 = vsel %vm1808_vm4, %v11951_v47, %v1986_v39  ;;  %v3897_v37 = vld [vmem:[%s13992_s1 + $0x90] sm:$0xff]  ;;  %v1342_v3 = vadd.f32 %v11116_v31, %v1025_v59  ;;  %v1992_v47 = vshll.u32 %v11976_v34, 16 }
 0x321   : > { %v2122_v6 = vpop.f32.mrf.mxu0  ;;  %v12031_v19 = vpop.f32.mrf.mxu2  ;;  %4478 = vmatpush.bf16.msra.mxu1 %v9978_v21 }
 0x322   : > { %v12014_v2 = vadd.f32 %v2122_v6, %v1765_v52  ;;  %v1767_v43 = vadd.f32 %v11121_v54, %v1342_v3  ;;  %v1994_v27 = vrot.slane %v1992_v47, 2  ;;  %v3887_v54 = vld [vmem:[%s13992_s1 + $0x40] sm:$0xff] }
 0x323   : > { %4002 = vperm.xlu1 %10593, %v3895_v50  }
 0x324   : > { %v12033_v57 = vpop.f32.mrf.mxu1  ;;  %3947 = vperm.xlu2 %10594, %v3884_v60   ;;  %v3890_v60 = vld [vmem:[%s13992_s1 + $0x58] sm:$0xff] }
 0x326   : > { %4012 = vperm.xlu0 %10592, %v3897_v37   ;;  %v14095_v37 = vld [vmem:[#allocation3_spill] sm:$0xff] }
 0x328   : > { %2885 = vmatmul.bf16.gmra.mxu2 %v2706_v29  ;;  %v12053_v52 = vpop.f32.mrf.mxu3 }
 0x329   : > { %v2125_v38 = vpop.f32.mrf.mxu0  ;;  %v12055_v29 = vpop.f32.mrf.mxu2 }
 0x32a   : > { %v2199_v44 = vadd.f32 %v2125_v38, %v11148_v49  ;;  %v1989_v49 = vshrl.u32 %v11976_v34, 16  ;;  %v14094_v38 = vld [vmem:[#allocation8_spill] sm:$0xff] }
 0x32b   : > { %4017 = vperm.xlu1 %10593, %v3898_v12  }
 0x32c   : > { %v2485_v42 = vadd.f32 %v11921_v25, %v2199_v44  ;;  %2164 = vmatmul.bf16.gmra.mxu0 %v1987_v5  ;;  %v2421_v25 = vpop.f32.mrf.mxu1  ;;  %v1991_v22 = vrot.slane %v1989_v49, 1  ;;  %3962 = vperm.xlu2 %10594, %v3887_v54   ;;  %v3903_v44 = vld [vmem:[%s13992_s1 + $0xc0] sm:$0xff] }
 0x32d   : > { %3461 = vmatmul.bf16.gmra.mxu3 %v11982_v8  ;;  %2460 = vmatmul.bf16.gmra.mxu1 %v2281_v40  ;;  %v1030_v40 = vadd.f32 %v11140_v58, %v11163_v1  ;;  %v3904_v58 = vld [vmem:[%s13992_s1 + $0xc8] sm:$0xff] }
 0x32e   : > { %v2910_v31 = vadd.f32 %v11918_v45, %v2485_v42  ;;  %v3900_v45 = vld [vmem:[%s13992_s1 + $0xa8] sm:$0xff]  ;;  %v1995_v21 = vor.u32 %v1994_v27, %v1991_v22  ;;  %v3906_v22 = vld [vmem:[%s13992_s1 + $0xd8] sm:$0xff]  ;;  %v3907_v27 = vld [vmem:[%s13992_s1 + $0xe0] sm:$0xff] }
 0x32f   : > { %4027 = vperm.xlu0 %10592, %v3900_v45   ;;  %v1344_v3 = vadd.f32 %v14095_v37, %v1030_v40  ;;  %v14101_v40 = vld [vmem:[#allocation5_spill] sm:$0xff] }
 0x330   : > { %v12060_v6 = vadd.f32 %v11953_v9, %v2910_v31  ;;  %v3901_v9 = vld [vmem:[%s13992_s1 + $0xb0] sm:$0xff]  ;;  %v3422_v10 = vpop.f32.mrf.mxu3  ;;  %v1996_v59 = vsel %vm1808_vm4, %v1986_v39, %v1995_v21  ;;  %v9969_v37 = vld [vmem:[%s13995_s4 + $0x18] sm:$0xff] }
 0x331   : > { %v2127_v36 = vpop.f32.mrf.mxu0  ;;  %v12076_v8 = vpop.f32.mrf.mxu2  ;;  %4836 = vmatpush.bf16.msra.mxu2 %v9969_v37 }
 0x332   : > { %v12062_v30 = vadd.f32 %v2127_v36, %v1767_v43 }
 0x333   : > { %4032 = vperm.xlu1 %10593, %v3901_v9   ;;  %v14100_v9 = vld [vmem:[#allocation13_spill] sm:$0xff] }
 0x334   : > { %v12078_v34 = vpop.f32.mrf.mxu1  ;;  %3977 = vperm.xlu2 %10594, %v3890_v60  }
 0x337   : > { %4042 = vperm.xlu0 %10592, %v3903_v44   ;;  %v3507_v44 = vld [vmem:[%s10763_s26 + $0x10] sm:$0x8] }
 0x338   : > { %v12095_v1 = vpop.f32.mrf.mxu3 }
 0x339   : > { %v2130_v50 = vpop.f32.mrf.mxu0  ;;  %14096 = vst [vmem:[#allocation8_spill] sm:$0xff] %v12095_v1  ;;  %v12097_v39 = vpop.f32.mrf.mxu2 }
 0x33a   : > { %v2201_v5 = vadd.f32 %v2130_v50, %v14094_v38  ;;  %v1035_v50 = vadd.f32 %v14101_v40, %v14100_v9  ;;  %v14102_v38 = vld [vmem:[#allocation12_spill] sm:$0xff]  ;;  %v14105_v9 = vld [vmem:[#allocation7_spill] sm:$0xff] }
 0x33b   : > { %4047 = vperm.xlu1 %10593, %v3904_v58  }
 0x33c   : > { %v2487_v42 = vadd.f32 %v11997_v28, %v2201_v5  ;;  %2169 = vmatmul.bf16.gmra.mxu0 %v1996_v59  ;;  %v12100_v49 = vpop.f32.mrf.mxu1  ;;  %v14097_v28 = vld [vmem:[#allocation4_spill] sm:$0xff] }
 0x33d   : > { %v1769_v47 = vadd.f32 %v14097_v28, %v1344_v3  ;;  %v3909_v3 = vld [vmem:[%s13992_s1 + $0xf0] sm:$0xff]  ;;  %v3896_v28 = vld [vmem:[%s13992_s1 + $0x88] sm:$0xff] }
 0x33e   : > { %v2912_v12 = vadd.f32 %v11994_v48, %v2487_v42  ;;  %v3893_v48 = vld [vmem:[%s13992_s1 + $0x70] sm:$0xff]  ;;  %v14103_v42 = vld [vmem:[#allocation6_spill] sm:$0xff] }
 0x33f   : > { %4057 = vperm.xlu0 %10592, %v3906_v22   ;;  %3992 = vperm.xlu2 %10594, %v3893_v48   ;;  %v1346_v60 = vadd.f32 %v14103_v42, %v1035_v50 }
 0x340   : > { %v12103_v31 = vadd.f32 %v3417_v26, %v2912_v12  ;;  %v12116_v45 = vpop.f32.mrf.mxu3  ;;  %v10003_v12 = vld [vmem:[%s13995_s4 + $0x98] sm:$0xff] }
 0x341   : > { %v2132_v43 = vpop.f32.mrf.mxu0  ;;  %v12118_v26 = vpop.f32.mrf.mxu2  ;;  %5296 = vmatpush.bf16.msra.mxu3 %v10003_v12  ;;  %v1771_v40 = vadd.f32 %v14105_v9, %v1346_v60  ;;  %v10621_v60 = vld [vmem:[%s10763_s26 + $0x18] sm:$0xff] }
 0x342   : > { %v12105_v36 = vadd.f32 %v2132_v43, %v1769_v47  ;;  %14098 = vst [vmem:[#allocation3_spill] sm:$0xff] %v12118_v26  ;;  %v3910_v47 = vld [vmem:[%s13992_s1 + $0xf8] sm:$0xff]  ;;  %v3526_v43 = vunpack.c.l.b16 %v3507_v44 }
 0x343   : > { %4062 = vperm.xlu1 %10593, %v3907_v27  }
 0x344   : > { %v12120_v54 = vpop.f32.mrf.mxu1 }
 0x345   : > { %14099 = vst [vmem:[#allocation4_spill] sm:$0xff] %v12120_v54 }
 0x347   : > { %4072 = vperm.xlu0 %10592, %v3909_v3   ;;  %4007 = vperm.xlu2 %10594, %v3896_v28   ;;  %v3899_v3 = vld [vmem:[%s13992_s1 + $0xa0] sm:$0xff] }
 0x348   : > { %v12142_v22 = vpop.f32.mrf.mxu3 }
 0x349   : > { %v2135_v59 = vpop.f32.mrf.mxu0  ;;  %14104 = vst [vmem:[#allocation13_spill] sm:$0xff] %v12142_v22  ;;  %v12144_v48 = vpop.f32.mrf.mxu2 }
 0x34a   : > { %v2203_v5 = vadd.f32 %v2135_v59, %v14102_v38  ;;  %v14106_v38 = vld [vmem:[#allocation45_spill] sm:$0xff] }
 0x34b   : > { %4077 = vperm.xlu1 %10593, %v3910_v47  }
 0x34c   : > { %v2489_v58 = vadd.f32 %v2421_v25, %v2203_v5  ;;  %2174 = vmatmul.bf16.gmra.mxu0 %v1995_v21  ;;  %v9977_v21 = vld [vmem:[%s13995_s4 + $0x58] sm:$0xff]  ;;  %v2431_v27 = vpop.f32.mrf.mxu1  ;;  %v14107_v5 = vunpack.c.l.b16 %v14106_v38 }
 0x34d   : > { %4479 = vmatpush.bf16.msra.mxu1 %v9977_v21 }
 0x34e   : > { %v2914_v25 = vadd.f32 %v12055_v29, %v2489_v58  ;;  %v3527_v44 = vpack.c.b16 %v14107_v5, %v3526_v43  ;;  %v3912_v29 = vld [vmem:[%s13992_s1 + $0x108] sm:$0xff]  ;;  %v3530_v58 = vrot.slane %v10621_v60, 3  ;;  %v3915_v5 = vld [vmem:[%s13992_s1 + $0x120] sm:$0xff] }
 0x34f   : > { %4087 = vperm.xlu0 %10592, %v3912_v29   ;;  %4022 = vperm.xlu2 %10594, %v3899_v3   ;;  %v14110_v43 = vld [vmem:[#allocation18_spill] sm:$0xff] }
 0x350   : > { %v12151_v50 = vadd.f32 %v3422_v10, %v2914_v25  ;;  %v3913_v10 = vld [vmem:[%s13992_s1 + $0x110] sm:$0xff]  ;;  %v3529_v42 = vrot.slane %v3527_v44, 3  ;;  %v3432_v12 = vpop.f32.mrf.mxu3  ;;  %v14111_v25 = vld [vmem:[#allocation9_spill] sm:$0xff]  ;;  %v14113_v44 = vld [vmem:[#allocation10_spill] sm:$0xff] }
 0x351   : > { %v2137_v59 = vpop.f32.mrf.mxu0  ;;  %v12167_v28 = vpop.f32.mrf.mxu2  ;;  %v1040_v21 = vadd.f32 %v14111_v25, %v14110_v43 }
 0x352   : > { %v12155_v37 = vadd.f32 %v2137_v59, %v1771_v40  ;;  %14108 = vst [vmem:[#allocation5_spill] sm:$0xff] %v12167_v28  ;;  %v3531_v40 = vsel %vm3528_vm5, %v3529_v42, %v3530_v58  ;;  %v14112_v59 = vld [vmem:[#allocation17_spill] sm:$0xff]  ;;  %v3916_v42 = vld [vmem:[%s13992_s1 + $0x128] sm:$0xff] }
 0x353   : > { %4092 = vperm.xlu1 %10593, %v3913_v10   ;;  %v1348_v29 = vadd.f32 %v14113_v44, %v1040_v21  ;;  %v3902_v10 = vld [vmem:[%s13992_s1 + $0xb8] sm:$0xff]  ;;  %v3905_v44 = vld [vmem:[%s13992_s1 + $0xd0] sm:$0xff] }
 0x354   : > { %v12169_v47 = vpop.f32.mrf.mxu1 }
 0x355   : > { %14109 = vst [vmem:[#allocation12_spill] sm:$0xff] %v12169_v47  ;;  %v14123_v47 = vld [vmem:[#allocation15_spill] sm:$0xff] }
 0x357   : > { %4102 = vperm.xlu0 %10592, %v3915_v5   ;;  %4037 = vperm.xlu2 %10594, %v3902_v10   ;;  %v3918_v5 = vld [vmem:[%s13992_s1 + $0x138] sm:$0xff] }
 0x358   : > { %v12186_v60 = vpop.f32.mrf.mxu3 }
 0x359   : > { %v2140_v9 = vpop.f32.mrf.mxu0  ;;  %14114 = vst [vmem:[#allocation6_spill] sm:$0xff] %v12186_v60  ;;  %v2861_v43 = vpop.f32.mrf.mxu2  ;;  %v14122_v60 = vld [vmem:[#allocation22_spill] sm:$0xff] }
 0x35a   : > { %v2205_v38 = vadd.f32 %v2140_v9, %v14112_v59  ;;  %v14115_v9 = vld [vmem:[#allocation11_spill] sm:$0xff] }
 0x35b   : > { %4107 = vperm.xlu1 %10593, %v3916_v42  }
 0x35c   : > { %v2491_v3 = vadd.f32 %v12100_v49, %v2205_v38  ;;  %3647 = vmatmul.bf16.vlgmr.msrb.gmra.mxu0 %v3531_v40  ;;  %v2436_v21 = vpop.f32.mrf.mxu1  ;;  %v1773_v49 = vadd.f32 %v14115_v9, %v1348_v29  ;;  %v10622_v29 = vld [vmem:[%s10763_s26 + $0x20] sm:$0xff] }
 0x35d   : > { %v14121_v9 = vld [vmem:[#allocation14_spill] sm:$0xff] }
 0x35e   : > { %v2916_v25 = vadd.f32 %v12097_v39, %v2491_v3  ;;  %v3919_v39 = vld [vmem:[%s13992_s1 + $0x140] sm:$0xf]  ;;  %v3532_v3 = vrot.slane %v10622_v29, 3 }
 0x35f   : > { %4117 = vperm.xlu0 %10592, %v3918_v5   ;;  %4052 = vperm.xlu2 %10594, %v3905_v44   ;;  %v3908_v44 = vld [vmem:[%s13992_s1 + $0xe8] sm:$0xff] }
 0x360   : > { %v12191_v40 = vadd.f32 %v12116_v45, %v2916_v25  ;;  %v3437_v45 = vpop.f32.mrf.mxu3  ;;  %v14120_v25 = vld [vmem:[#allocation23_spill] sm:$0xff]  ;;  %v3533_v5 = vsel %vm3528_vm5, %v3530_v58, %v3532_v3 }
 0x361   : > { %v2142_v59 = vpop.f32.mrf.mxu0  ;;  %v12205_v10 = vpop.f32.mrf.mxu2 }
 0x362   : > { %14116 = vst [vmem:[#allocation7_spill] sm:$0xff] %v12191_v40  ;;  %v12193_v38 = vadd.f32 %v2142_v59, %v1773_v49  ;;  %v1045_v49 = vadd.f32 %v14121_v9, %v14120_v25 }
 0x363   : > { %14118 = vst [vmem:[#allocation18_spill] sm:$0xff] %v12205_v10  ;;  %4122 = vperm.xlu1 %10593, %v3919_v39   ;;  %v14125_v10 = vld [vmem:[#allocation16_spill] sm:$0xff] }
 0x364   : > { %14117 = vst [vmem:[#allocation45_spill] sm:$0xff] %v12193_v38  ;;  %v12207_v42 = vpop.f32.mrf.mxu1  ;;  %v1350_v22 = vadd.f32 %v14123_v47, %v1045_v49  ;;  %v10623_v47 = vld [vmem:[%s10763_s26 + $0x28] sm:$0xff] }
 0x365   : > { %14119 = vst [vmem:[#allocation9_spill] sm:$0xff] %v12207_v42  ;;  %v3534_v49 = vrot.slane %v10623_v47, 3  ;;  %v14133_v47 = vld [vmem:[#allocation20_spill] sm:$0xff] }
 0x366   : > { %v1775_v58 = vadd.f32 %v14125_v10, %v1350_v22  ;;  %v10002_v22 = vld [vmem:[%s13995_s4 + $0x90] sm:$0xff] }
 0x367   : > { %4067 = vperm.xlu2 %10594, %v3908_v44   ;;  %v14130_v10 = vld [vmem:[#allocation28_spill] sm:$0xff]  ;;  %5297 = vmatpush.bf16.msra.mxu3 %v10002_v22 }
 0x368   : > { %v12217_v39 = vpop.f32.mrf.mxu3 }
 0x369   : > { %v2145_v59 = vpop.f32.mrf.mxu0  ;;  %14124 = vst [vmem:[#allocation17_spill] sm:$0xff] %v12217_v39  ;;  %v2866_v25 = vpop.f32.mrf.mxu2 }
 0x36a   : > { %v2207_v28 = vadd.f32 %v2145_v59, %v14122_v60 }
 0x36c   : > { %v2493_v26 = vadd.f32 %v2431_v27, %v2207_v28  ;;  %3652 = vmatmul.bf16.gmra.mxu0 %v3533_v5  ;;  %v2441_v9 = vpop.f32.mrf.mxu1  ;;  %v9968_v27 = vld [vmem:[%s13995_s4 + $0x10] sm:$0xff]  ;;  %v3911_v28 = vld [vmem:[%s13992_s1 + $0x100] sm:$0xff] }
 0x36d   : > { %4837 = vmatpush.bf16.msra.mxu2 %v9968_v27  ;;  %v14131_v5 = vld [vmem:[#allocation19_spill] sm:$0xff] }
 0x36e   : > { %v2918_v29 = vadd.f32 %v12144_v48, %v2493_v26  ;;  %v1050_v44 = vadd.f32 %v14131_v5, %v14130_v10  ;;  %v14132_v27 = vld [vmem:[#allocation27_spill] sm:$0xff]  ;;  %v3914_v10 = vld [vmem:[%s13992_s1 + $0x118] sm:$0xff] }
 0x36f   : > { %4082 = vperm.xlu2 %10594, %v3911_v28  }
 0x370   : > { %v12221_v42 = vadd.f32 %v3432_v12, %v2918_v29  ;;  %v3442_v26 = vpop.f32.mrf.mxu3  ;;  %v9976_v29 = vld [vmem:[%s13995_s4 + $0x50] sm:$0xff] }
 0x371   : > { %v2147_v60 = vpop.f32.mrf.mxu0  ;;  %v12232_v48 = vpop.f32.mrf.mxu2  ;;  %4480 = vmatpush.bf16.msra.mxu1 %v9976_v29 }
 0x372   : > { %14126 = vst [vmem:[#allocation10_spill] sm:$0xff] %v12221_v42  ;;  %v12223_v59 = vadd.f32 %v2147_v60, %v1775_v58  ;;  %v3535_v60 = vsel %vm3528_vm5, %v3532_v3, %v3534_v49 }
 0x373   : > { %14128 = vst [vmem:[#allocation23_spill] sm:$0xff] %v12232_v48  ;;  %v1352_v48 = vadd.f32 %v14133_v47, %v1050_v44  ;;  %v10624_v44 = vld [vmem:[%s10763_s26 + $0x30] sm:$0xff] }
 0x374   : > { %14127 = vst [vmem:[#allocation11_spill] sm:$0xff] %v12223_v59  ;;  %v12237_v12 = vpop.f32.mrf.mxu1  ;;  %v14135_v59 = vld [vmem:[#allocation21_spill] sm:$0xff]  ;;  %v14141_v47 = vld [vmem:[#allocation24_spill] sm:$0xff] }
 0x375   : > { %14129 = vst [vmem:[#allocation14_spill] sm:$0xff] %v12237_v12  ;;  %v1777_v3 = vadd.f32 %v14135_v59, %v1352_v48 }
 0x377   : > { %4097 = vperm.xlu2 %10594, %v3914_v10   ;;  %v14142_v10 = vld [vmem:[#allocation32_spill] sm:$0xff] }
 0x378   : > { %v12250_v22 = vpop.f32.mrf.mxu3 }
 0x379   : > { %v2150_v58 = vpop.f32.mrf.mxu0  ;;  %14134 = vst [vmem:[#allocation22_spill] sm:$0xff] %v12250_v22 }
 0x37a   : > { %v2209_v28 = vadd.f32 %v2150_v58, %v14132_v27  ;;  %v2871_v12 = vpop.f32.mrf.mxu2 }
 0x37c   : > { %v2495_v39 = vadd.f32 %v2436_v21, %v2209_v28  ;;  %3657 = vmatmul.bf16.gmra.mxu0 %v3535_v60  ;;  %v2446_v42 = vpop.f32.mrf.mxu1  ;;  %v3917_v21 = vld [vmem:[%s13992_s1 + $0x130] sm:$0xff]  ;;  %v3536_v60 = vrot.slane %v10624_v44, 3 }
 0x37e   : > { %v2920_v5 = vadd.f32 %v2861_v43, %v2495_v39  ;;  %v14140_v39 = vld [vmem:[#allocation33_spill] sm:$0xff]  ;;  %v3537_v48 = vsel %vm3528_vm5, %v3534_v49, %v3536_v60 }
 0x37f   : > { %4112 = vperm.xlu2 %10594, %v3917_v21  }
 0x380   : > { %v12253_v40 = vadd.f32 %v3437_v45, %v2920_v5  ;;  %v3447_v27 = vpop.f32.mrf.mxu3  ;;  %v1055_v45 = vadd.f32 %v14141_v47, %v14140_v39  ;;  %v10625_v47 = vld [vmem:[%s10763_s26 + $0x38] sm:$0xff] }
 0x381   : > { %v2152_v58 = vpop.f32.mrf.mxu0  ;;  %v3538_v49 = vrot.slane %v10625_v47, 3  ;;  %v9967_v47 = vld [vmem:[%s13995_s4 + $0x8] sm:$0xff] }
 0x382   : > { %14136 = vst [vmem:[#allocation15_spill] sm:$0xff] %v12253_v40  ;;  %v12255_v29 = vadd.f32 %v2152_v58, %v1777_v3  ;;  %v12261_v28 = vpop.f32.mrf.mxu2  ;;  %v14143_v3 = vld [vmem:[#allocation25_spill] sm:$0xff]  ;;  %4838 = vmatpush.bf16.msra.mxu2 %v9967_v47 }
 0x383   : > { %14138 = vst [vmem:[#allocation28_spill] sm:$0xff] %v12261_v28  ;;  %v1354_v58 = vadd.f32 %v14143_v3, %v1055_v45 }
 0x384   : > { %14137 = vst [vmem:[#allocation16_spill] sm:$0xff] %v12255_v29  ;;  %v12263_v43 = vpop.f32.mrf.mxu1  ;;  %v14145_v29 = vld [vmem:[#allocation26_spill] sm:$0xff] }
 0x385   : > { %14139 = vst [vmem:[#allocation19_spill] sm:$0xff] %v12263_v43  ;;  %v1779_v43 = vadd.f32 %v14145_v29, %v1354_v58 }
 0x388   : > { %v12270_v44 = vpop.f32.mrf.mxu3 }
 0x389   : > { %v2155_v59 = vpop.f32.mrf.mxu0  ;;  %14144 = vst [vmem:[#allocation27_spill] sm:$0xff] %v12270_v44 }
 0x38a   : > { %v2211_v5 = vadd.f32 %v2155_v59, %v14142_v10  ;;  %v2876_v40 = vpop.f32.mrf.mxu2 }
 0x38c   : > { %v2497_v22 = vadd.f32 %v2441_v9, %v2211_v5  ;;  %3662 = vmatmul.bf16.gmra.mxu0 %v3537_v48  ;;  %v2451_v28 = vpop.f32.mrf.mxu1  ;;  %v14150_v9 = vld [vmem:[#allocation38_spill] sm:$0xff]  ;;  %v14151_v48 = vld [vmem:[#allocation29_spill] sm:$0xff] }
 0x38d   : > { %v1060_v10 = vadd.f32 %v14151_v48, %v14150_v9  ;;  %v14152_v5 = vld [vmem:[#allocation37_spill] sm:$0xff]  ;;  %v14155_v9 = vld [vmem:[#allocation31_spill] sm:$0xff] }
 0x38e   : > { %v2922_v21 = vadd.f32 %v2866_v25, %v2497_v22  ;;  %v3539_v22 = vsel %vm3528_vm5, %v3536_v60, %v3538_v49 }
 0x390   : > { %v12273_v54 = vadd.f32 %v3442_v26, %v2922_v21  ;;  %v3452_v1 = vpop.f32.mrf.mxu3  ;;  %v14153_v26 = vld [vmem:[#allocation30_spill] sm:$0xff] }
 0x391   : > { %v2157_v38 = vpop.f32.mrf.mxu0  ;;  %v1356_v3 = vadd.f32 %v14153_v26, %v1060_v10  ;;  %v14160_v26 = vld [vmem:[#allocation43_spill] sm:$0xff] }
 0x392   : > { %14146 = vst [vmem:[#allocation20_spill] sm:$0xff] %v12273_v54  ;;  %v12275_v39 = vadd.f32 %v2157_v38, %v1779_v43  ;;  %v12278_v59 = vpop.f32.mrf.mxu2 }
 0x393   : > { %14148 = vst [vmem:[#allocation33_spill] sm:$0xff] %v12278_v59  ;;  %v1781_v48 = vadd.f32 %v14155_v9, %v1356_v3  ;;  %v14161_v3 = vld [vmem:[#allocation34_spill] sm:$0xff] }
 0x394   : > { %14147 = vst [vmem:[#allocation21_spill] sm:$0xff] %v12275_v39  ;;  %v12280_v45 = vpop.f32.mrf.mxu1  ;;  %v14162_v9 = vld [vmem:[#allocation42_spill] sm:$0xff] }
 0x395   : > { %14149 = vst [vmem:[#allocation24_spill] sm:$0xff] %v12280_v45 }
 0x398   : > { %v12287_v38 = vpop.f32.mrf.mxu3 }
 0x399   : > { %v2160_v25 = vpop.f32.mrf.mxu0  ;;  %14154 = vst [vmem:[#allocation32_spill] sm:$0xff] %v12287_v38 }
 0x39a   : > { %v2213_v29 = vadd.f32 %v2160_v25, %v14152_v5  ;;  %v10626_v25 = vld [vmem:[%s10763_s26 + $0x40] sm:$0xff] }
 0x39b   : > { %v2881_v21 = vpop.f32.mrf.mxu2 }
 0x39c   : > { %v2499_v58 = vadd.f32 %v2446_v42, %v2213_v29  ;;  %3667 = vmatmul.bf16.gmra.mxu0 %v3539_v22  ;;  %v2456_v59 = vpop.f32.mrf.mxu1  ;;  %v10001_v42 = vld [vmem:[%s13995_s4 + $0x88] sm:$0xff]  ;;  %v3540_v22 = vrot.slane %v10626_v25, 3 }
 0x39d   : > { %5298 = vmatpush.bf16.msra.mxu3 %v10001_v42  ;;  %v14163_v42 = vld [vmem:[#allocation35_spill] sm:$0xff] }
 0x39e   : > { %v2924_v43 = vadd.f32 %v2871_v12, %v2499_v58  ;;  %v9975_v12 = vld [vmem:[%s13995_s4 + $0x48] sm:$0xff]  ;;  %v1065_v58 = vadd.f32 %v14161_v3, %v14160_v26  ;;  %v3541_v47 = vsel %vm3528_vm5, %v3538_v49, %v3540_v22 }
 0x39f   : > { %4481 = vmatpush.bf16.msra.mxu1 %v9975_v12  ;;  %v10627_v3 = vld [vmem:[%s10763_s26 + $0x48] sm:$0xff] }
 0x3a0   : > { %v12293_v45 = vadd.f32 %v3447_v27, %v2924_v43  ;;  %v3457_v5 = vpop.f32.mrf.mxu3  ;;  %v3542_v49 = vrot.slane %v10627_v3, 3 }
 0x3a1   : > { %v2162_v60 = vpop.f32.mrf.mxu0 }
 0x3a2   : > { %14156 = vst [vmem:[#allocation25_spill] sm:$0xff] %v12293_v45  ;;  %v12298_v10 = vadd.f32 %v2162_v60, %v1781_v48  ;;  %v1358_v60 = vadd.f32 %v14163_v42, %v1065_v58  ;;  %v14165_v45 = vld [vmem:[#allocation36_spill] sm:$0xff] }
 0x3a3   : > { %v12304_v29 = vpop.f32.mrf.mxu2 }
 0x3a4   : > { %14157 = vst [vmem:[#allocation26_spill] sm:$0xff] %v12298_v10  ;;  %v12306_v27 = vpop.f32.mrf.mxu1 }
 0x3a5   : > { %14158 = vst [vmem:[#allocation38_spill] sm:$0xff] %v12304_v29 }
 0x3a6   : > { %14159 = vst [vmem:[#allocation29_spill] sm:$0xff] %v12306_v27  ;;  %v1783_v27 = vadd.f32 %v14165_v45, %v1358_v60  ;;  %v14169_v45 = vld [vmem:[#allocation40_spill] sm:$0xff] }
 0x3a8   : > { %v12313_v12 = vpop.f32.mrf.mxu3 }
 0x3a9   : > { %v2165_v43 = vpop.f32.mrf.mxu0  ;;  %14164 = vst [vmem:[#allocation37_spill] sm:$0xff] %v12313_v12 }
 0x3aa   : > { %v2215_v48 = vadd.f32 %v2165_v43, %v14162_v9 }
 0x3ab   : > { %v2886_v44 = vpop.f32.mrf.mxu2 }
 0x3ac   : > { %v2501_v38 = vadd.f32 %v2451_v28, %v2215_v48  ;;  %3672 = vmatmul.bf16.gmra.mxu0 %v3541_v47  ;;  %v2461_v29 = vpop.f32.mrf.mxu1  ;;  %v14166_v28 = vld [vmem:[#allocation46_spill] sm:$0xff]  ;;  %v14167_v47 = vld [vmem:[#allocation39_spill] sm:$0xff] }
 0x3ad   : > { %v1070_v9 = vadd.f32 %v14167_v47, %v14166_v28  ;;  %v10628_v28 = vld [vmem:[%s10763_s26 + $0x50] sm:$0xff] }
 0x3ae   : > { %v2926_v25 = vadd.f32 %v2876_v40, %v2501_v38  ;;  %v3543_v40 = vsel %vm3528_vm5, %v3540_v22, %v3542_v49  ;;  %v14168_v38 = vld [vmem:[#allocation44_spill] sm:$0xff]  ;;  %v3544_v47 = vrot.slane %v10628_v28, 3  ;;  %v9966_v22 = vld [vmem:[%s13995_s4] sm:$0xff] }
 0x3af   : > { %4839 = vmatpush.bf16.msra.mxu2 %v9966_v22 }
 0x3b0   : > { %v12316_v10 = vadd.f32 %v3452_v1, %v2926_v25  ;;  %v3462_v39 = vpop.f32.mrf.mxu3  ;;  %v1360_v1 = vadd.f32 %v14169_v45, %v1070_v9  ;;  %v14170_v25 = vld [vmem:[#allocation41_spill] sm:$0xff]  ;;  %v14171_v9 = vld [vmem:[#allocation47_spill] sm:$0xff] }
 0x3b1   : > { %v2167_v54 = vpop.f32.mrf.mxu0  ;;  %v9974_v45 = vld [vmem:[%s13995_s4 + $0x40] sm:$0xff] }
 0x3b2   : > { %v12318_v26 = vadd.f32 %v2167_v54, %v1783_v27  ;;  %v1785_v3 = vadd.f32 %v14170_v25, %v1360_v1  ;;  %v10000_v1 = vld [vmem:[%s13995_s4 + $0x80] sm:$0xff]  ;;  %4482 = vmatpush.bf16.msra.mxu1 %v9974_v45 }
 0x3b3   : > { %v2888_v43 = vpop.f32.mrf.mxu2  ;;  %5299 = vmatpush.bf16.msra.mxu3 %v10000_v1 }
 0x3b4   : > { %v2463_v58 = vpop.f32.mrf.mxu1 }
 0x3b8   : > { %v3464_v54 = vpop.f32.mrf.mxu3 }
 0x3b9   : > { %v2170_v48 = vpop.f32.mrf.mxu0 }
 0x3ba   : > { %v2217_v42 = vadd.f32 %v2170_v48, %v14168_v38 }
 0x3bc   : > { %v2503_v60 = vadd.f32 %v2456_v59, %v2217_v42  ;;  %3677 = vmatmul.bf16.gmra.mxu0 %v3543_v40  ;;  %v3545_v59 = vsel %vm3528_vm5, %v3542_v49, %v3544_v47  ;;  %v14173_v49 = vld [vmem:[#allocation48_spill] sm:$0xff] }
 0x3be   : > { %v2928_v27 = vadd.f32 %v2881_v21, %v2503_v60  ;;  %v10629_v60 = vld [vmem:[%s10763_s26 + $0x58] sm:$0xff] }
 0x3bf   : > { %v3546_v54 = vrot.slane %v10629_v60, 3 }
 0x3c0   : > { %v12327_v12 = vadd.f32 %v3457_v5, %v2928_v27 }
 0x3c1   : > { %v2172_v43 = vpop.f32.mrf.mxu0 }
 0x3c2   : > { %v12329_v58 = vadd.f32 %v2172_v43, %v1785_v3  ;;  %v3923_v43 = vpop.permute.xlu0 %3922 }
 0x3c9   : > { %v2175_v48 = vpop.f32.mrf.mxu0 }
 0x3ca   : > { %v2219_v40 = vadd.f32 %v2175_v48, %v14171_v9  ;;  %v10630_v9 = vld [vmem:[%s10763_s26 + $0x60] sm:$0xff] }
 0x3cc   : > { %v2505_v21 = vadd.f32 %v2461_v29, %v2219_v40  ;;  %3682 = vmatmul.bf16.gmra.mxu0 %v3545_v59  ;;  %v3547_v29 = vsel %vm3528_vm5, %v3544_v47, %v3546_v54  ;;  %v3548_v40 = vrot.slane %v10630_v9, 3 }
 0x3ce   : > { %v2930_v5 = vadd.f32 %v2886_v44, %v2505_v21  ;;  %v12349_v44 = vld [vmem:[%s13994_s3] ss:$0 sm:$0xff]  ;;  %v4249_v21 = vld [vmem:[#allocation2] sm:$0x8]  ;;  %v3549_v47 = vsel %vm3528_vm5, %v3546_v54, %v3548_v40 }
 0x3cf   : > { %v4575_v1 = vunpack.c.l.b16 %v4249_v21 }
 0x3d0   : > { %v12337_v38 = vadd.f32 %v3462_v39, %v2930_v5 }
 0x3d1   : > { %v2177_v42 = vpop.f32.mrf.mxu0 }
 0x3d2   : > { %14172 = vst [vmem:[#allocation30_spill] sm:$0xff] %v12337_v38 }
 0x3d9   : > { %v3648_v39 = vpop.f32.mrf.mxu0 }
 0x3da   : > { %v3752_v27 = vadd.f32 %v3648_v39, %v14173_v49 }
 0x3dc   : > { %v3797_v25 = vadd.f32 %v12349_v44, %v3752_v27  ;;  %3687 = vmatmul.bf16.gmra.mxu0 %v3547_v29 }
 0x3de   : > { %v3838_v3 = vmax.f32 %v3797_v25, 0.0  ;;  %v3933_v25 = vpop.permute.xlu1 %3932 }
 0x3e0   : > { %v4125_v28 = vmul.f32 %v3923_v43, %v3838_v3  ;;  %v3928_v3 = vpop.permute.xlu0 %3927 }
 0x3e1   : > { %v3650_v22 = vpop.f32.mrf.mxu0 }
 0x3e2   : > { %v4166_v48 = vpack.c.bf16 %v4125_v28, %v4125_v28  ;;  %v3753_v59 = vadd.f32 %v3650_v22, %v11594_v11 }
 0x3e4   : > { %4208 = vst [vmem:[#allocation2 + $0x4] sm:$0xf] %v4166_v48  ;;  %v3798_v5 = vadd.f32 %v12349_v44, %v3753_v59 }
 0x3e6   : > { %v3839_v39 = vmax.f32 %v3798_v5, 0.0  ;;  %v10631_v5 = vld [vmem:[%s10763_s26 + $0x68] sm:$0xff] }
 0x3e8   : > { %v4126_v43 = vmul.f32 %v3928_v3, %v3839_v39 }
 0x3e9   : > { %v3653_v42 = vpop.f32.mrf.mxu0 }
 0x3ea   : > { %v3754_v45 = vadd.f32 %v3653_v42, %v11611_v7  ;;  %v3550_v42 = vrot.slane %v10631_v5, 3 }
 0x3eb   : > { %v4250_v60 = vld [vmem:[#allocation2 + $0x4] sm:$0xf] }
 0x3ec   : > { %v3799_v29 = vadd.f32 %v12349_v44, %v3754_v45  ;;  %3692 = vmatmul.bf16.gmra.mxu0 %v3549_v47  ;;  %v4355_v49 = vunpack.c.l.b16 %v4250_v60 }
 0x3ee   : > { %v3840_v27 = vmax.f32 %v3799_v29, 0.0  ;;  %v4576_v11 = vpack.c.b16 %v4355_v49, %v4575_v1 }
 0x3f0   : > { %v4127_v28 = vmul.f32 %v3933_v25, %v3840_v27  ;;  %v4597_v48 = vshrl.u32 %v4576_v11, 16  ;;  %v4600_v59 = vshll.u32 %v4576_v11, 16  ;;  %v10040_v27 = vld [vmem:[%s13995_s4 + $0x138] sm:$0xff] }
 0x3f1   : > { %v3655_v22 = vpop.f32.mrf.mxu0  ;;  %v10032_v11 = vld [vmem:[%s13995_s4 + $0xf8] sm:$0xff]  ;;  %6047 = vmatpush.bf16.msrb.mxu2 %v10040_v27 }
 0x3f2   : > { %v10123_v54 = vpack.c.bf16 %v4127_v28, %v4126_v43  ;;  %v3755_v7 = vadd.f32 %v3655_v22, %v11634_v13  ;;  %v4599_v47 = vrot.slane %v4597_v48, 3  ;;  %v4602_v45 = vrot.slane %v4600_v59, 4  ;;  %v10048_v13 = vld [vmem:[%s13995_s4 + $0x178] sm:$0xff]  ;;  %5788 = vmatpush.bf16.msrb.mxu1 %v10032_v11 }
 0x3f3   : > { %6354 = vmatpush.bf16.msrb.mxu3 %v10048_v13 }
 0x3f4   : > { %10376 = vst [vmem:[#allocation2 + $0x8] sm:$0xff] %v10123_v54   ;;  %v10217_v9 = vunpack.c.l.b16 %v10123_v54  ;;  %v4605_v21 = vshrl.u32 %v10123_v54, 16  ;;  %v4608_v60 = vshll.u32 %v10123_v54, 16  ;;  %v3800_v39 = vadd.f32 %v12349_v44, %v3755_v7  ;;  %v3938_v7 = vpop.permute.xlu1 %3937 }
 0x3f5   : > { %v4603_v3 = vor.u32 %v4602_v45, %v4599_v47 }
 0x3f6   : > { %v4391_v29 = vpack.c.b16 %v10217_v9, %v4355_v49  ;;  %v4607_v1 = vrot.slane %v4605_v21, 3  ;;  %v4610_v38 = vrot.slane %v4608_v60, 4  ;;  %v3551_v49 = vsel %vm3528_vm5, %v3548_v40, %v3550_v42  ;;  %v3943_v9 = vpop.permute.xlu2 %3942 }
 0x3f7   : > { %v3841_v48 = vmax.f32 %v3800_v39, 0.0 }
 0x3f8   : > { %4483 = vmatmul.bf16.vlgmr.msra.gmra.mxu1 %v4391_v29  ;;  %v4611_v43 = vor.u32 %v4610_v38, %v4607_v1  ;;  %v10632_v29 = vld [vmem:[%s10763_s26 + $0x70] sm:$0xff] }
 0x3f9   : > { %v3658_v25 = vpop.f32.mrf.mxu0  ;;  %v4128_v21 = vmul.f32 %v3938_v7, %v3841_v48  ;;  %v3552_v1 = vrot.slane %v10632_v29, 3 }
 0x3fa   : > { %v3756_v28 = vadd.f32 %v3658_v25, %v11651_v15  ;;  %v4612_v22 = vsel %vm4595_vm6, %v4603_v3, %v4611_v43 }
 0x3fb   : > { %4840 = vmatmul.bf16.vlgmr.msra.gmra.mxu2 %v4612_v22  ;;  %v9982_v47 = vld [vmem:[#allocation2 + $0x4] sm:$0xff]  ;;  %v3553_v3 = vsel %vm3528_vm5, %v3550_v42, %v3552_v1 }
 0x3fc   : > { %v3801_v59 = vadd.f32 %v12349_v44, %v3756_v28  ;;  %3697 = vmatmul.bf16.gmra.mxu0 %v3551_v49  ;;  %v5081_v13 = vshll.u32 %v9982_v47, 16 }
 0x3fe   : > { %v3842_v54 = vmax.f32 %v3801_v59, 0.0 }
 0x400   : > { %v4129_v40 = vmul.f32 %v3943_v9, %v3842_v54  ;;  %v5079_v9 = vshrl.u32 %v9982_v47, 16  ;;  %v10633_v47 = vld [vmem:[%s10763_s26 + $0x78] sm:$0xff] }
 0x401   : > { %v3660_v5 = vpop.f32.mrf.mxu0 }
 0x402   : > { %v10128_v38 = vpack.c.bf16 %v4129_v40, %v4128_v21  ;;  %v3757_v15 = vadd.f32 %v3660_v5, %v11665_v16  ;;  %v5083_v16 = vrot.slane %v5081_v13, 1  ;;  %v3953_v5 = vpop.permute.xlu0 %3952 }
 0x404   : > { %10377 = vst [vmem:[#allocation2 + $0x10] sm:$0xff] %v10128_v38   ;;  %v4614_v45 = vshrl.u32 %v10128_v38, 16  ;;  %v4617_v60 = vshll.u32 %v10128_v38, 16  ;;  %v3802_v11 = vadd.f32 %v12349_v44, %v3757_v15  ;;  %v3948_v38 = vpop.permute.xlu2 %3947  ;;  %v5084_v42 = vor.u32 %v5083_v16, %v5079_v9  ;;  %v10047_v16 = vld [vmem:[%s13995_s4 + $0x170] sm:$0xff] }
 0x405   : > { %6355 = vmatpush.bf16.msrb.mxu3 %v10047_v16 }
 0x406   : > { %v4616_v39 = vrot.slane %v4614_v45, 3  ;;  %v4619_v27 = vrot.slane %v4617_v60, 4  ;;  %v3843_v54 = vmax.f32 %v3802_v11, 0.0  ;;  %v3554_v11 = vrot.slane %v10633_v47, 3 }
 0x408   : > { %v4620_v25 = vor.u32 %v4619_v27, %v4616_v39 }
 0x409   : > { %v3663_v49 = vpop.f32.mrf.mxu0 }
 0x40a   : > { %v3758_v28 = vadd.f32 %v3663_v49, %v11685_v23  ;;  %v4621_v22 = vsel %vm4595_vm6, %v4611_v43, %v4620_v25  ;;  %v4130_v23 = vmul.f32 %v3948_v38, %v3843_v54 }
 0x40b   : > { %v10535_v48 = vld [vmem:[#allocation2 + $0xc] sm:$0xff]   ;;  %4845 = vmatmul.bf16.gmra.mxu2 %v4621_v22  ;;  %v7007_v16 = vld [vmem:[#allocation2 + $0x14] sm:$0xc] }
 0x40c   : > { %v9983_v59 = vld [vmem:[#allocation2 + $0xc] sm:$0xff]  ;;  %v3803_v7 = vadd.f32 %v12349_v44, %v3758_v28  ;;  %3702 = vmatmul.bf16.gmra.mxu0 %v3553_v3  ;;  %4488 = vmatmul.bf16.gmra.mxu1 %v10535_v48 }
 0x40d   : > { %v5086_v21 = vshll.u32 %v9983_v59, 16  ;;  %v10039_v48 = vld [vmem:[%s13995_s4 + $0x130] sm:$0xff] }
 0x40e   : > { %v3844_v40 = vmax.f32 %v3803_v7, 0.0  ;;  %6048 = vmatpush.bf16.msrb.mxu2 %v10039_v48 }
 0x40f   : > { %v5088_v15 = vrot.slane %v5086_v21, 1 }
 0x410   : > { %v4131_v45 = vmul.f32 %v3953_v5, %v3844_v40 }
 0x411   : > { %v3665_v43 = vpop.f32.mrf.mxu0  ;;  %v5089_v60 = vsel %vm541_vm0, %v5084_v42, %v5088_v15  ;;  %v5090_v42 = vshrl.u32 %v9983_v59, 16 }
 0x412   : > { %v10133_v29 = vpack.c.bf16 %v4131_v45, %v4130_v23  ;;  %5300 = vmatmul.bf16.vlgmr.msra.gmra.mxu3 %v5089_v60  ;;  %v3759_v39 = vadd.f32 %v3665_v43, %v11699_v14  ;;  %v3555_v14 = vsel %vm3528_vm5, %v3552_v1, %v3554_v11  ;;  %v3958_v43 = vpop.permute.xlu1 %3957  ;;  %v3963_v1 = vpop.permute.xlu2 %3962 }
 0x413   : > { %v5092_v60 = vor.u32 %v5090_v42, %v5088_v15  ;;  %v12405_v15 = vld [vmem:[%s10763_s26 + $0x80] sm:$0xff] }
 0x414   : > { %10378 = vst [vmem:[#allocation2 + $0x18] sm:$0xff] %v10133_v29   ;;  %v4623_v27 = vshrl.u32 %v10133_v29, 16  ;;  %v4626_v13 = vshll.u32 %v10133_v29, 16  ;;  %v3804_v28 = vadd.f32 %v12349_v44, %v3759_v39  ;;  %v3556_v48 = vrot.slane %v12405_v15, 3 }
 0x416   : > { %v4625_v49 = vrot.slane %v4623_v27, 3  ;;  %v4628_v3 = vrot.slane %v4626_v13, 4  ;;  %v3845_v5 = vmax.f32 %v3804_v28, 0.0  ;;  %v10031_v28 = vld [vmem:[%s13995_s4 + $0xf0] sm:$0xff] }
 0x417   : > { %5789 = vmatpush.bf16.msrb.mxu1 %v10031_v28 }
 0x418   : > { %v4629_v22 = vor.u32 %v4628_v3, %v4625_v49  ;;  %v4132_v29 = vmul.f32 %v3958_v43, %v3845_v5 }
 0x419   : > { %v3668_v54 = vpop.f32.mrf.mxu0 }
 0x41a   : > { %v3760_v7 = vadd.f32 %v3668_v54, %v11722_v51  ;;  %v4630_v9 = vsel %vm4595_vm6, %v4620_v25, %v4629_v22 }
 0x41b   : > { %v10537_v21 = vld [vmem:[#allocation2 + $0x14] sm:$0xff]   ;;  %4850 = vmatmul.bf16.gmra.mxu2 %v4630_v9 }
 0x41c   : > { %v9984_v40 = vld [vmem:[#allocation2 + $0x14] sm:$0xff]  ;;  %v3805_v38 = vadd.f32 %v12349_v44, %v3760_v7  ;;  %3707 = vmatmul.bf16.gmra.mxu0 %v3555_v14  ;;  %4493 = vmatmul.bf16.gmra.mxu1 %v10537_v21 }
 0x41d   : > { %v5094_v23 = vshll.u32 %v9984_v40, 16  ;;  %v12398_v47 = vld [vmem:[#allocation2 + $0x18] sm:$0xf] }
 0x41e   : > { %v3846_v45 = vmax.f32 %v3805_v38, 0.0  ;;  %v6581_v7 = vunpack.c.l.b16 %v12398_v47  ;;  %v3557_v38 = vsel %vm3528_vm5, %v3554_v11, %v3556_v48 }
 0x41f   : > { %v5096_v51 = vrot.slane %v5094_v23, 1 }
 0x420   : > { %v4133_v25 = vmul.f32 %v3963_v1, %v3846_v45 }
 0x421   : > { %v3670_v39 = vpop.f32.mrf.mxu0  ;;  %v5097_v27 = vsel %vm541_vm0, %v5092_v60, %v5096_v51 }
 0x422   : > { %v10138_v13 = vpack.c.bf16 %v4133_v25, %v4132_v29  ;;  %5305 = vmatmul.bf16.gmra.mxu3 %v5097_v27  ;;  %v3761_v49 = vadd.f32 %v3670_v39, %v11739_v0  ;;  %v7026_v0 = vunpack.c.l.b16 %v7007_v16  ;;  %v5098_v39 = vshrl.u32 %v9984_v40, 16 }
 0x424   : > { %10379 = vst [vmem:[#allocation2 + $0x20] sm:$0xff] %v10138_v13   ;;  %v4632_v59 = vshrl.u32 %v10138_v13, 16  ;;  %v4635_v3 = vshll.u32 %v10138_v13, 16  ;;  %v3806_v9 = vadd.f32 %v12349_v44, %v3761_v49  ;;  %v7027_v45 = vpack.c.b16 %v6581_v7, %v7026_v0  ;;  %v3968_v49 = vpop.permute.xlu0 %3967 }
 0x426   : > { %v4634_v54 = vrot.slane %v4632_v59, 3  ;;  %v4637_v14 = vrot.slane %v4635_v3, 4  ;;  %v3847_v29 = vmax.f32 %v3806_v9, 0.0  ;;  %v7288_v13 = vshrl.u32 %v7027_v45, 16 }
 0x427   : > { %v5100_v59 = vor.u32 %v5098_v39, %v5096_v51  ;;  %v7028_v0 = vrot.slane %v7027_v45, 2 }
 0x428   : > { %v4638_v21 = vor.u32 %v4637_v14, %v4634_v54  ;;  %v4134_v16 = vmul.f32 %v3968_v49, %v3847_v29 }
 0x429   : > { %v3673_v5 = vpop.f32.mrf.mxu0 }
 0x42a   : > { %v3762_v42 = vadd.f32 %v3673_v5, %v11756_v33  ;;  %v4639_v23 = vsel %vm4595_vm6, %v4629_v22, %v4638_v21  ;;  %v7291_v33 = vshll.u32 %v7027_v45, 16  ;;  %v3973_v22 = vpop.permute.xlu1 %3972 }
 0x42b   : > { %v10539_v43 = vld [vmem:[#allocation2 + $0x1c] sm:$0xff]   ;;  %4855 = vmatmul.bf16.gmra.mxu2 %v4639_v23 }
 0x42c   : > { %v9985_v1 = vld [vmem:[#allocation2 + $0x1c] sm:$0xff]  ;;  %v3807_v25 = vadd.f32 %v12349_v44, %v3762_v42  ;;  %3712 = vmatmul.bf16.gmra.mxu0 %v3557_v38  ;;  %4498 = vmatmul.bf16.gmra.mxu1 %v10539_v43  ;;  %v7290_v38 = vrot.slane %v7288_v13, 2  ;;  %v7293_v42 = vrot.slane %v7291_v33, 3 }
 0x42d   : > { %v12415_v60 = vld [vmem:[#allocation2 + $0x1c] sm:$0xff]  ;;  %v5102_v27 = vshll.u32 %v9985_v1, 16 }
 0x42e   : > { %v3848_v11 = vmax.f32 %v3807_v25, 0.0  ;;  %v6645_v28 = vshrl.u32 %v12415_v60, 16  ;;  %v7029_v15 = vrot.slane %v12415_v60, 2  ;;  %v6648_v14 = vshll.u32 %v12415_v60, 16 }
 0x42f   : > { %v5104_v3 = vrot.slane %v5102_v27, 1  ;;  %v10635_v27 = vld [vmem:[%s10763_s26 + $0x88] sm:$0xff]  ;;  %v7294_v13 = vor.u32 %v7293_v42, %v7290_v38  ;;  %v5106_v42 = vshrl.u32 %v9985_v1, 16 }
 0x430   : > { %v4135_v54 = vmul.f32 %v3973_v22, %v3848_v11  ;;  %v12423_v51 = vsel %vm2241_vm2, %v7028_v0, %v7029_v15  ;;  %v7295_v23 = vrot.slane %v6645_v28, 2  ;;  %v7296_v39 = vrot.slane %v6648_v14, 3 }
 0x431   : > { %v3675_v9 = vpop.f32.mrf.mxu0  ;;  %v5105_v40 = vsel %vm541_vm0, %v5100_v59, %v5104_v3  ;;  %v3558_v45 = vrot.slane %v10635_v27, 3 }
 0x432   : > { %v10143_v5 = vpack.c.bf16 %v4135_v54, %v4134_v16  ;;  %5310 = vmatmul.bf16.gmra.mxu3 %v5105_v40  ;;  %v3763_v43 = vadd.f32 %v3675_v9, %v11770_v20  ;;  %v7297_v33 = vor.u32 %v7296_v39, %v7295_v23  ;;  %v3978_v39 = vpop.permute.xlu2 %3977 }
 0x433   : > { %v3559_v20 = vsel %vm3528_vm5, %v3556_v48, %v3558_v45  ;;  %v5108_v48 = vor.u32 %v5106_v42, %v5104_v3  ;;  %v10046_v42 = vld [vmem:[%s13995_s4 + $0x168] sm:$0xff] }
 0x434   : > { %10380 = vst [vmem:[#allocation2 + $0x28] sm:$0xff] %v10143_v5   ;;  %v4641_v29 = vshrl.u32 %v10143_v5, 16  ;;  %v4644_v25 = vshll.u32 %v10143_v5, 16  ;;  %v3808_v22 = vadd.f32 %v12349_v44, %v3763_v43  ;;  %v12433_v16 = vsel %vm3095_vm3, %v7294_v13, %v7297_v33  ;;  %6356 = vmatpush.bf16.msrb.mxu3 %v10046_v42 }
 0x436   : > { %v4643_v11 = vrot.slane %v4641_v29, 3  ;;  %v4646_v49 = vrot.slane %v4644_v25, 4  ;;  %v3849_v29 = vmax.f32 %v3808_v22, 0.0  ;;  %v3983_v25 = vpop.permute.xlu0 %3982 }
 0x438   : > { %v4647_v59 = vor.u32 %v4646_v49, %v4643_v11  ;;  %v4136_v49 = vmul.f32 %v3978_v39, %v3849_v29 }
 0x439   : > { %v3678_v54 = vpop.f32.mrf.mxu0 }
 0x43a   : > { %v3764_v9 = vadd.f32 %v3678_v54, %v11798_v56  ;;  %v4648_v40 = vsel %vm4595_vm6, %v4638_v21, %v4647_v59 }
 0x43b   : > { %v10541_v0 = vld [vmem:[#allocation2 + $0x24] sm:$0xff]   ;;  %4860 = vmatmul.bf16.gmra.mxu2 %v4648_v40 }
 0x43c   : > { %v9986_v5 = vld [vmem:[#allocation2 + $0x24] sm:$0xff]  ;;  %v3809_v38 = vadd.f32 %v12349_v44, %v3764_v9  ;;  %3717 = vmatmul.bf16.gmra.mxu0 %v3559_v20  ;;  %4503 = vmatmul.bf16.gmra.mxu1 %v10541_v0 }
 0x43d   : > { %v12438_v27 = vld [vmem:[#allocation2 + $0x24] sm:$0xff]  ;;  %v5110_v23 = vshll.u32 %v9986_v5, 16 }
 0x43e   : > { %v3850_v43 = vmax.f32 %v3809_v38, 0.0  ;;  %v14005_v56 = vshrl.u32 %v12438_v27, 16  ;;  %v7031_v21 = vrot.slane %v12438_v27, 2  ;;  %v14006_v20 = vshll.u32 %v12438_v27, 16  ;;  %v10038_v38 = vld [vmem:[%s13995_s4 + $0x128] sm:$0xff] }
 0x43f   : > { %v5112_v11 = vrot.slane %v5110_v23, 1  ;;  %v10636_v23 = vld [vmem:[%s10763_s26 + $0x90] sm:$0xff]  ;;  %6049 = vmatpush.bf16.msrb.mxu2 %v10038_v38 }
 0x440   : > { %v4137_v13 = vmul.f32 %v3983_v25, %v3850_v43  ;;  %v12446_v1 = vsel %vm2241_vm2, %v7029_v15, %v7031_v21  ;;  %v7299_v3 = vrot.slane %v14005_v56, 2  ;;  %v10030_v15 = vld [vmem:[%s13995_s4 + $0xe8] sm:$0xff]  ;;  %v3560_v43 = vrot.slane %v10636_v23, 3 }
 0x441   : > { %v3680_v22 = vpop.f32.mrf.mxu0  ;;  %v5113_v54 = vsel %vm541_vm0, %v5108_v48, %v5112_v11  ;;  %v7300_v25 = vrot.slane %v14006_v20, 3  ;;  %5790 = vmatpush.bf16.msrb.mxu1 %v10030_v15  ;;  %v3988_v15 = vpop.permute.xlu1 %3987 }
 0x442   : > { %v10148_v9 = vpack.c.bf16 %v4137_v13, %v4136_v49  ;;  %5315 = vmatmul.bf16.gmra.mxu3 %v5113_v54  ;;  %v3765_v40 = vadd.f32 %v3680_v22, %v11820_v53  ;;  %v3561_v54 = vsel %vm3528_vm5, %v3558_v45, %v3560_v43 }
 0x443   : > { %v7301_v48 = vor.u32 %v7300_v25, %v7299_v3 }
 0x444   : > { %10381 = vst [vmem:[#allocation2 + $0x30] sm:$0xff] %v10148_v9   ;;  %v4650_v0 = vshrl.u32 %v10148_v9, 16  ;;  %v4653_v29 = vshll.u32 %v10148_v9, 16  ;;  %v3810_v49 = vadd.f32 %v12349_v44, %v3765_v40  ;;  %v5114_v40 = vshrl.u32 %v9986_v5, 16 }
 0x445   : > { %v12466_v9 = vsel %vm3095_vm3, %v7297_v33, %v7301_v48  ;;  %v3993_v33 = vpop.permute.xlu2 %3992 }
 0x446   : > { %v4652_v53 = vrot.slane %v4650_v0, 3  ;;  %v4655_v39 = vrot.slane %v4653_v29, 4  ;;  %v3851_v38 = vmax.f32 %v3810_v49, 0.0  ;;  %v5116_v25 = vor.u32 %v5114_v40, %v5112_v11 }
 0x448   : > { %v4656_v13 = vor.u32 %v4655_v39, %v4652_v53  ;;  %v4138_v39 = vmul.f32 %v3988_v15, %v3851_v38 }
 0x449   : > { %v3683_v22 = vpop.f32.mrf.mxu0 }
 0x44a   : > { %v3766_v23 = vadd.f32 %v3683_v22, %v11865_v17  ;;  %v4657_v56 = vsel %vm4595_vm6, %v4647_v59, %v4656_v13 }
 0x44b   : > { %v10543_v20 = vld [vmem:[#allocation2 + $0x2c] sm:$0xff]   ;;  %4865 = vmatmul.bf16.gmra.mxu2 %v4657_v56 }
 0x44c   : > { %v9987_v0 = vld [vmem:[#allocation2 + $0x2c] sm:$0xff]  ;;  %v3811_v3 = vadd.f32 %v12349_v44, %v3766_v23  ;;  %3722 = vmatmul.bf16.gmra.mxu0 %v3561_v54  ;;  %4508 = vmatmul.bf16.gmra.mxu1 %v10543_v20 }
 0x44d   : > { %v12470_v29 = vld [vmem:[#allocation2 + $0x2c] sm:$0xff]  ;;  %v5118_v42 = vshll.u32 %v9987_v0, 16 }
 0x44e   : > { %v3852_v45 = vmax.f32 %v3811_v3, 0.0  ;;  %v14007_v17 = vshrl.u32 %v12470_v29, 16  ;;  %v7033_v59 = vrot.slane %v12470_v29, 2  ;;  %v14008_v49 = vshll.u32 %v12470_v29, 16 }
 0x44f   : > { %v5120_v53 = vrot.slane %v5118_v42, 1  ;;  %v10637_v42 = vld [vmem:[%s10763_s26 + $0x98] sm:$0xff] }
 0x450   : > { %v4139_v22 = vmul.f32 %v3993_v33, %v3852_v45  ;;  %v12478_v5 = vsel %vm2241_vm2, %v7031_v21, %v7033_v59  ;;  %v7303_v11 = vrot.slane %v14007_v17, 2  ;;  %v7304_v38 = vrot.slane %v14008_v49, 3 }
 0x451   : > { %v3685_v23 = vpop.f32.mrf.mxu0  ;;  %v5121_v56 = vsel %vm541_vm0, %v5116_v25, %v5120_v53  ;;  %v3562_v45 = vrot.slane %v10637_v42, 3 }
 0x452   : > { %v10153_v20 = vpack.c.bf16 %v4139_v22, %v4138_v39  ;;  %5320 = vmatmul.bf16.gmra.mxu3 %v5121_v56  ;;  %v3767_v54 = vadd.f32 %v3685_v23, %v11890_v24  ;;  %v7305_v25 = vor.u32 %v7304_v38, %v7303_v11  ;;  %v4003_v38 = vpop.permute.xlu1 %4002 }
 0x453   : > { %v3563_v17 = vsel %vm3528_vm5, %v3560_v43, %v3562_v45  ;;  %v3998_v43 = vpop.permute.xlu0 %3997 }
 0x454   : > { %10382 = vst [vmem:[#allocation2 + $0x38] sm:$0xff] %v10153_v20   ;;  %v4659_v3 = vshrl.u32 %v10153_v20, 16  ;;  %v4662_v40 = vshll.u32 %v10153_v20, 16  ;;  %v3812_v39 = vadd.f32 %v12349_v44, %v3767_v54  ;;  %v12488_v22 = vsel %vm3095_vm3, %v7301_v48, %v7305_v25 }
 0x455   : > { %14174 = vst [vmem:[#allocation31_spill] sm:$0xff] %v12488_v22  ;;  %v5122_v48 = vshrl.u32 %v9987_v0, 16 }
 0x456   : > { %v4661_v15 = vrot.slane %v4659_v3, 3  ;;  %v4664_v33 = vrot.slane %v4662_v40, 4  ;;  %v3853_v3 = vmax.f32 %v3812_v39, 0.0 }
 0x458   : > { %v4665_v21 = vor.u32 %v4664_v33, %v4661_v15 }
 0x459   : > { %v3688_v56 = vpop.f32.mrf.mxu0 }
 0x45a   : > { %v3768_v24 = vadd.f32 %v3688_v56, %v11932_v18  ;;  %v4666_v23 = vsel %vm4595_vm6, %v4656_v13, %v4665_v21  ;;  %v5124_v18 = vor.u32 %v5122_v48, %v5120_v53  ;;  %v4140_v56 = vmul.f32 %v3998_v43, %v3853_v3  ;;  %v12520_v43 = vld [vmem:[%s10763_s26 + $0xa0] sm:$0xff] }
 0x45b   : > { %v10545_v20 = vld [vmem:[#allocation2 + $0x34] sm:$0xff]   ;;  %4870 = vmatmul.bf16.gmra.mxu2 %v4666_v23 }
 0x45c   : > { %v12493_v49 = vld [vmem:[#allocation2 + $0x34] sm:$0xff]  ;;  %v3813_v11 = vadd.f32 %v12349_v44, %v3768_v24  ;;  %3727 = vmatmul.bf16.gmra.mxu0 %v3563_v17  ;;  %4513 = vmatmul.bf16.gmra.mxu1 %v10545_v20 }
 0x45d   : > { %v12495_v42 = vld [vmem:[#allocation2 + $0x34] sm:$0xff]  ;;  %v5126_v54 = vshll.u32 %v12493_v49, 16 }
 0x45e   : > { %v3854_v40 = vmax.f32 %v3813_v11, 0.0  ;;  %v14010_v13 = vshrl.u32 %v12495_v42, 16  ;;  %v7035_v33 = vrot.slane %v12495_v42, 2  ;;  %v14009_v24 = vshll.u32 %v12495_v42, 16 }
 0x45f   : > { %v5128_v15 = vrot.slane %v5126_v54, 1  ;;  %v10037_v54 = vld [vmem:[%s13995_s4 + $0x120] sm:$0xff] }
 0x460   : > { %v4141_v39 = vmul.f32 %v4003_v38, %v3854_v40  ;;  %v12506_v20 = vsel %vm2241_vm2, %v7033_v59, %v7035_v33  ;;  %v7307_v53 = vrot.slane %v14010_v13, 2  ;;  %v10045_v40 = vld [vmem:[%s13995_s4 + $0x160] sm:$0xff]  ;;  %v7308_v59 = vrot.slane %v14009_v24, 3  ;;  %6050 = vmatpush.bf16.msrb.mxu2 %v10037_v54 }
 0x461   : > { %v3690_v17 = vpop.f32.mrf.mxu0  ;;  %v5129_v23 = vsel %vm541_vm0, %v5124_v18, %v5128_v15  ;;  %14175 = vst [vmem:[#allocation43_spill] sm:$0xff] %v12506_v20  ;;  %v3564_v38 = vrot.slane %v12520_v43, 3  ;;  %6357 = vmatpush.bf16.msrb.mxu3 %v10045_v40 }
 0x462   : > { %v10158_v0 = vpack.c.bf16 %v4141_v39, %v4140_v56  ;;  %5325 = vmatmul.bf16.gmra.mxu3 %v5129_v23  ;;  %v3769_v3 = vadd.f32 %v3690_v17, %v11968_v32  ;;  %v7309_v32 = vor.u32 %v7308_v59, %v7307_v53  ;;  %v10029_v23 = vld [vmem:[%s13995_s4 + $0xe0] sm:$0xff] }
 0x463   : > { %5791 = vmatpush.bf16.msrb.mxu1 %v10029_v23 }
 0x464   : > { %10383 = vst [vmem:[#allocation2 + $0x40] sm:$0xff] %v10158_v0   ;;  %v4668_v11 = vshrl.u32 %v10158_v0, 16  ;;  %v4671_v48 = vshll.u32 %v10158_v0, 16  ;;  %v3814_v39 = vadd.f32 %v12349_v44, %v3769_v3  ;;  %v12530_v0 = vsel %vm3095_vm3, %v7305_v25, %v7309_v32 }
 0x465   : > { %14176 = vst [vmem:[#allocation34_spill] sm:$0xff] %v12530_v0 }
 0x466   : > { %v4670_v18 = vrot.slane %v4668_v11, 3  ;;  %v4673_v56 = vrot.slane %v4671_v48, 4  ;;  %v3565_v11 = vsel %vm3528_vm5, %v3562_v45, %v3564_v38  ;;  %v2484_v48 = vadd.f32 %v11886_v4, %v12014_v2  ;;  %v10073_v4 = vld [vmem:[%s13995_s4 + $0x1b8] sm:$0xff] }
 0x467   : > { %v3855_v25 = vmax.f32 %v3814_v39, 0.0  ;;  %6872 = vmatpush.bf16.msra.mxu0 %v10073_v4  ;;  %v4008_v39 = vpop.permute.xlu2 %4007 }
 0x468   : > { %v12524_v17 = vor.u32 %v4673_v56, %v4670_v18  ;;  %v2909_v45 = vadd.f32 %v11880_v62, %v2484_v48  ;;  %v4013_v56 = vpop.permute.xlu0 %4012 }
 0x469   : > { %v3693_v24 = vpop.f32.mrf.mxu0 }
 0x46a   : > { %v3770_v53 = vadd.f32 %v3693_v24, %v12009_v55  ;;  %v4675_v3 = vsel %vm4595_vm6, %v4665_v21, %v12524_v17  ;;  %v5130_v55 = vshrl.u32 %v12493_v49, 16  ;;  %v10072_v49 = vld [vmem:[%s13995_s4 + $0x1b0] sm:$0xff] }
 0x46b   : > { %v10547_v54 = vld [vmem:[#allocation2 + $0x3c] sm:$0xff]   ;;  %4875 = vmatmul.bf16.gmra.mxu2 %v4675_v3  ;;  %v4142_v3 = vmul.f32 %v4008_v39, %v3855_v25  ;;  %6873 = vmatpush.bf16.msra.mxu0 %v10072_v49 }
 0x46c   : > { %v12540_v40 = vld [vmem:[#allocation2 + $0x3c] sm:$0xff]  ;;  %v3815_v18 = vadd.f32 %v12349_v44, %v3770_v53  ;;  %3732 = vmatmul.bf16.gmra.mxu0 %v3565_v11  ;;  %4518 = vmatmul.bf16.gmra.mxu1 %v10547_v54  ;;  %v5132_v23 = vor.u32 %v5130_v55, %v5128_v15 }
 0x46d   : > { %v12542_v59 = vld [vmem:[#allocation2 + $0x3c] sm:$0xff]  ;;  %v5134_v2 = vshll.u32 %v12540_v40, 16 }
 0x46e   : > { %v3856_v21 = vmax.f32 %v3815_v18, 0.0  ;;  %v14012_v24 = vshrl.u32 %v12542_v59, 16  ;;  %v7037_v53 = vrot.slane %v12542_v59, 2  ;;  %v14011_v54 = vshll.u32 %v12542_v59, 16 }
 0x46f   : > { %v5136_v11 = vrot.slane %v5134_v2, 1  ;;  %v3485_v18 = vadd.f32 %v11916_v35, %v2909_v45  ;;  %v10071_v35 = vld [vmem:[%s13995_s4 + $0x1a8] sm:$0xff] }
 0x470   : > { %v4143_v13 = vmul.f32 %v4013_v56, %v3856_v21  ;;  %v7311_v15 = vrot.slane %v14012_v24, 2  ;;  %v12566_v25 = vsel %vm2241_vm2, %v7035_v33, %v7037_v53  ;;  %v12574_v45 = vld [vmem:[%s10763_s26 + $0xa8] sm:$0xff]  ;;  %6874 = vmatpush.bf16.msra.mxu0 %v10071_v35 }
 0x471   : > { %v3695_v62 = vpop.f32.mrf.mxu0  ;;  %v5137_v48 = vsel %vm541_vm0, %v5132_v23, %v5136_v11  ;;  %14177 = vst [vmem:[#allocation42_spill] sm:$0xff] %v12566_v25  ;;  %v3566_v56 = vrot.slane %v12574_v45, 3 }
 0x472   : > { %v10163_v4 = vpack.c.bf16 %v4143_v13, %v4142_v3  ;;  %5330 = vmatmul.bf16.gmra.mxu3 %v5137_v48  ;;  %v3771_v55 = vadd.f32 %v3695_v62, %v3485_v18  ;;  %v7312_v13 = vrot.slane %v14011_v54, 3  ;;  %v10070_v48 = vld [vmem:[%s13995_s4 + $0x1a0] sm:$0xff] }
 0x474   : > { %10384 = vst [vmem:[#allocation2 + $0x48] sm:$0xff] %v10163_v4   ;;  %v4677_v2 = vshrl.u32 %v10163_v4, 16  ;;  %v4680_v21 = vshll.u32 %v10163_v4, 16  ;;  %v12577_v33 = vor.u32 %v7312_v13, %v7311_v15  ;;  %v3816_v3 = vadd.f32 %v12349_v44, %v3771_v55  ;;  %6875 = vmatpush.bf16.msra.mxu0 %v10070_v48  ;;  %v4023_v48 = vpop.permute.xlu2 %4022 }
 0x475   : > { %v4484_v49 = vpop.f32.mrf.mxu1  ;;  %v3567_v15 = vsel %vm3528_vm5, %v3564_v38, %v3566_v56  ;;  %v2486_v55 = vadd.f32 %v11962_v46, %v12062_v30  ;;  %v10069_v46 = vld [vmem:[%s13995_s4 + $0x198] sm:$0xff] }
 0x476   : > { %v4679_v39 = vrot.slane %v4677_v2, 3  ;;  %v4682_v23 = vrot.slane %v4680_v21, 4  ;;  %v12587_v18 = vsel %vm3095_vm3, %v7309_v32, %v12577_v33 }
 0x477   : > { %14178 = vst [vmem:[#allocation35_spill] sm:$0xff] %v12587_v18  ;;  %v2911_v38 = vadd.f32 %v11955_v41, %v2486_v55 }
 0x478   : > { %v12580_v62 = vor.u32 %v4682_v23, %v4679_v39  ;;  %v3857_v39 = vmax.f32 %v3816_v3, 0.0  ;;  %6876 = vmatpush.bf16.msra.mxu0 %v10069_v46 }
 0x479   : > { %v3698_v4 = vpop.f32.mrf.mxu0 }
 0x47a   : > { %v3772_v2 = vadd.f32 %v3698_v4, %v12060_v6  ;;  %v4684_v21 = vsel %vm4595_vm6, %v12524_v17, %v12580_v62  ;;  %v5138_v6 = vshrl.u32 %v12540_v40, 16  ;;  %v4018_v17 = vpop.permute.xlu1 %4017  ;;  %v10068_v40 = vld [vmem:[%s13995_s4 + $0x190] sm:$0xff] }
 0x47b   : > { %v10549_v35 = vld [vmem:[#allocation2 + $0x44] sm:$0xff]   ;;  %4880 = vmatmul.bf16.gmra.mxu2 %v4684_v21  ;;  %v4144_v54 = vmul.f32 %v4018_v17, %v3857_v39 }
 0x47c   : > { %v12600_v32 = vld [vmem:[#allocation2 + $0x44] sm:$0xff]  ;;  %v3817_v43 = vadd.f32 %v12349_v44, %v3772_v2  ;;  %3737 = vmatmul.bf16.gmra.mxu0 %v3567_v15  ;;  %4523 = vmatmul.bf16.gmra.mxu1 %v10549_v35  ;;  %v5140_v3 = vor.u32 %v5138_v6, %v5136_v11  ;;  %v3487_v11 = vadd.f32 %v11992_v61, %v2911_v38 }
 0x47d   : > { %v12602_v13 = vld [vmem:[#allocation2 + $0x44] sm:$0xff]  ;;  %v5142_v30 = vshll.u32 %v12600_v32, 16  ;;  %v4486_v6 = vpop.f32.mrf.mxu1  ;;  %6877 = vmatpush.bf16.msra.mxu0 %v10068_v40 }
 0x47e   : > { %v3858_v23 = vmax.f32 %v3817_v43, 0.0  ;;  %v4841_v2 = vpop.f32.mrf.mxu2  ;;  %v14018_v15 = vshrl.u32 %v12602_v13, 16  ;;  %v7039_v21 = vrot.slane %v12602_v13, 2  ;;  %v14013_v43 = vshll.u32 %v12602_v13, 16  ;;  %v10067_v61 = vld [vmem:[%s13995_s4 + $0x188] sm:$0xff] }
 0x47f   : > { %v5144_v4 = vrot.slane %v5142_v30, 1  ;;  %v12613_v35 = vadd.f32 %v4841_v2, %v4484_v49 }
 0x480   : > { %v4145_v24 = vmul.f32 %v4023_v48, %v3858_v23  ;;  %v12626_v49 = vsel %vm2241_vm2, %v7037_v53, %v7039_v21  ;;  %v7315_v39 = vrot.slane %v14018_v15, 2 }
 0x481   : > { %v3700_v41 = vpop.f32.mrf.mxu0  ;;  %v5145_v55 = vsel %vm541_vm0, %v5140_v3, %v5144_v4  ;;  %14179 = vst [vmem:[#allocation36_spill] sm:$0xff] %v12626_v49  ;;  %6878 = vmatpush.bf16.msra.mxu0 %v10067_v61 }
 0x482   : > { %v10168_v46 = vpack.c.bf16 %v4145_v24, %v4144_v54  ;;  %5335 = vmatmul.bf16.gmra.mxu3 %v5145_v55  ;;  %v3773_v30 = vadd.f32 %v3700_v41, %v3487_v11  ;;  %v3568_v24 = vrot.slane %v11949_v63, 3  ;;  %v7316_v54 = vrot.slane %v14013_v43, 3  ;;  %v10036_v55 = vld [vmem:[%s13995_s4 + $0x118] sm:$0xff] }
 0x483   : > { %v10044_v11 = vld [vmem:[%s13995_s4 + $0x158] sm:$0xff]  ;;  %6051 = vmatpush.bf16.msrb.mxu2 %v10036_v55 }
 0x484   : > { %10385 = vst [vmem:[#allocation2 + $0x50] sm:$0xff] %v10168_v46   ;;  %v4686_v17 = vshrl.u32 %v10168_v46, 16  ;;  %v4689_v23 = vshll.u32 %v10168_v46, 16  ;;  %v12636_v3 = vor.u32 %v7316_v54, %v7315_v39  ;;  %v3818_v2 = vadd.f32 %v12349_v44, %v3773_v30  ;;  %v10028_v46 = vld [vmem:[%s13995_s4 + $0xd8] sm:$0xff]  ;;  %v10066_v30 = vld [vmem:[%s13995_s4 + $0x180] sm:$0xff]  ;;  %6358 = vmatpush.bf16.msrb.mxu3 %v10044_v11  ;;  %v4033_v11 = vpop.permute.xlu1 %4032 }
 0x485   : > { %5792 = vmatpush.bf16.msrb.mxu1 %v10028_v46  ;;  %6879 = vmatpush.bf16.msra.mxu0 %v10066_v30 }
 0x486   : > { %v4688_v38 = vrot.slane %v4686_v17, 3  ;;  %v4691_v48 = vrot.slane %v4689_v23, 4  ;;  %v4843_v53 = vpop.f32.mrf.mxu2  ;;  %v12663_v17 = vsel %vm3095_vm3, %v12577_v33, %v12636_v3  ;;  %v2488_v23 = vadd.f32 %v12033_v57, %v12105_v36 }
 0x487   : > { %v12639_v40 = vadd.f32 %v4843_v53, %v4486_v6  ;;  %v3569_v6 = vsel %vm3528_vm5, %v3566_v56, %v3568_v24  ;;  %14180 = vst [vmem:[#allocation46_spill] sm:$0xff] %v12663_v17  ;;  %v3859_v33 = vmax.f32 %v3818_v2, 0.0  ;;  %v5146_v57 = vshrl.u32 %v12600_v32, 16 }
 0x488   : > { %v12641_v41 = vor.u32 %v4691_v48, %v4688_v38  ;;  %v2913_v36 = vadd.f32 %v12031_v19, %v2488_v23 }
 0x489   : > { %v3703_v39 = vpop.f32.mrf.mxu0  ;;  %v4489_v54 = vpop.f32.mrf.mxu1 }
 0x48a   : > { %v3774_v61 = vadd.f32 %v3703_v39, %v12103_v31  ;;  %v4693_v45 = vsel %vm4595_vm6, %v12580_v62, %v12641_v41  ;;  %v4028_v62 = vpop.permute.xlu0 %4027  ;;  %v5148_v39 = vor.u32 %v5146_v57, %v5144_v4  ;;  %v3489_v19 = vadd.f32 %v12053_v52, %v2913_v36 }
 0x48b   : > { %v10551_v56 = vld [vmem:[#allocation2 + $0x4c] sm:$0xff]   ;;  %4885 = vmatmul.bf16.gmra.mxu2 %v4693_v45 }
 0x48c   : > { %v12671_v38 = vld [vmem:[#allocation2 + $0x4c] sm:$0xff]  ;;  %v3819_v53 = vadd.f32 %v12349_v44, %v3774_v61  ;;  %3742 = vmatmul.bf16.gmra.mxu0 %v3569_v6  ;;  %4528 = vmatmul.bf16.gmra.mxu1 %v10551_v56  ;;  %v4146_v44 = vmul.f32 %v4028_v62, %v3859_v33 }
 0x48d   : > { %v12673_v48 = vld [vmem:[#allocation2 + $0x4c] sm:$0xff]  ;;  %v5150_v31 = vshll.u32 %v12671_v38, 16 }
 0x48e   : > { %v3860_v55 = vmax.f32 %v3819_v53, 0.0  ;;  %v4846_v30 = vpop.f32.mrf.mxu2  ;;  %v14017_v43 = vshrl.u32 %v12673_v48, 16  ;;  %v7041_v2 = vrot.slane %v12673_v48, 2  ;;  %v14014_v32 = vshll.u32 %v12673_v48, 16 }
 0x48f   : > { %v5152_v46 = vrot.slane %v5150_v31, 1  ;;  %v12681_v61 = vadd.f32 %v4846_v30, %v4489_v54 }
 0x490   : > { %v4147_v6 = vmul.f32 %v4033_v11, %v3860_v55  ;;  %v12691_v53 = vsel %vm2241_vm2, %v7039_v21, %v7041_v2  ;;  %v7319_v54 = vrot.slane %v14017_v43, 2  ;;  %v7320_v52 = vrot.slane %v14014_v32, 3  ;;  %v12705_v21 = vld [vmem:[%s13994_s3] ss:$0 sm:$0xff] }
 0x491   : > { %v3705_v45 = vpop.f32.mrf.mxu0  ;;  %v5153_v56 = vsel %vm541_vm0, %v5148_v39, %v5152_v46  ;;  %v4491_v4 = vpop.f32.mrf.mxu1  ;;  %14181 = vst [vmem:[#allocation39_spill] sm:$0xff] %v12691_v53 }
 0x492   : > { %v10173_v23 = vpack.c.bf16 %v4147_v6, %v4146_v44  ;;  %5340 = vmatmul.bf16.gmra.mxu3 %v5153_v56  ;;  %v3775_v33 = vadd.f32 %v3705_v45, %v3489_v19  ;;  %v12700_v30 = vor.u32 %v7320_v52, %v7319_v54  ;;  %v6489_v56 = vld [vmem:[#allocation2 + $0x14] sm:$0xe] }
 0x493   : > { %v6580_v52 = vunpack.c.l.b16 %v6489_v56 }
 0x494   : > { %10386 = vst [vmem:[#allocation2 + $0x58] sm:$0xff] %v10173_v23   ;;  %v4695_v57 = vshrl.u32 %v10173_v23, 16  ;;  %v4698_v31 = vshll.u32 %v10173_v23, 16  ;;  %v3820_v44 = vadd.f32 %v12705_v21, %v3775_v33  ;;  %v2490_v23 = vadd.f32 %v12078_v34, %v12155_v37 }
 0x495   : > { %v5301_v36 = vpop.f32.mrf.mxu3 }
 0x496   : > { %v12698_v62 = vadd.f32 %v5301_v36, %v12613_v35  ;;  %v4697_v55 = vrot.slane %v4695_v57, 3  ;;  %v4700_v11 = vrot.slane %v4698_v31, 4  ;;  %v4848_v39 = vpop.f32.mrf.mxu2  ;;  %v12715_v35 = vsel %vm3095_vm3, %v12636_v3, %v12700_v30 }
 0x497   : > { %v12708_v6 = vadd.f32 %v4848_v39, %v4491_v4  ;;  %14182 = vst [vmem:[#allocation44_spill] sm:$0xff] %v12715_v35  ;;  %v4043_v39 = vpop.permute.xlu0 %4042 }
 0x498   : > { %v12710_v45 = vor.u32 %v4700_v11, %v4697_v55  ;;  %v3861_v55 = vmax.f32 %v3820_v44, 0.0  ;;  %v2915_v11 = vadd.f32 %v12076_v8, %v2490_v23 }
 0x499   : > { %v3708_v19 = vpop.f32.mrf.mxu0  ;;  %v4494_v57 = vpop.f32.mrf.mxu1 }
 0x49a   : > { %v3776_v54 = vadd.f32 %v3708_v19, %v12151_v50  ;;  %v4702_v4 = vsel %vm4595_vm6, %v12641_v41, %v12710_v45  ;;  %v5154_v50 = vshrl.u32 %v12671_v38, 16  ;;  %v6617_v41 = vpack.c.b16 %v6581_v7, %v6580_v52  ;;  %v4038_v19 = vpop.permute.xlu2 %4037  ;;  %v14183_v52 = vld [vmem:[#allocation8_spill] sm:$0xff] }
 0x49b   : > { %v10553_v33 = vld [vmem:[#allocation2 + $0x54] sm:$0xff]   ;;  %4890 = vmatmul.bf16.gmra.mxu2 %v4702_v4  ;;  %v4148_v38 = vmul.f32 %v4038_v19, %v3861_v55 }
 0x49c   : > { %v12723_v31 = vld [vmem:[#allocation2 + $0x54] sm:$0xff]  ;;  %v3821_v3 = vadd.f32 %v12705_v21, %v3776_v54  ;;  %3747 = vmatmul.bf16.gmra.mxu0 %v3568_v24  ;;  %4533 = vmatmul.bf16.gmra.mxu1 %v10553_v33  ;;  %v5156_v63 = vor.u32 %v5154_v50, %v5152_v46  ;;  %v6637_v23 = vshrl.u32 %v6617_v41, 16  ;;  %v6647_v50 = vrot.slane %v6645_v28, 1 }
 0x49d   : > { %v12725_v36 = vld [vmem:[#allocation2 + $0x54] sm:$0xff]  ;;  %v5303_v34 = vpop.f32.mrf.mxu3  ;;  %v5158_v37 = vshll.u32 %v12723_v31, 16 }
 0x49e   : > { %v3862_v56 = vmax.f32 %v3821_v3, 0.0  ;;  %v12736_v44 = vadd.f32 %v5303_v34, %v12639_v40  ;;  %v4851_v54 = vpop.f32.mrf.mxu2  ;;  %v14016_v4 = vshrl.u32 %v12725_v36, 16  ;;  %v14015_v47 = vshll.u32 %v12725_v36, 16 }
 0x49f   : > { %v12738_v24 = vrot.slane %v5158_v37, 1  ;;  %v12741_v32 = vadd.f32 %v4851_v54, %v4494_v57  ;;  %v6640_v40 = vshll.u32 %v6617_v41, 16  ;;  %v3491_v3 = vadd.f32 %v14183_v52, %v2915_v11 }
 0x4a0   : > { %v4149_v33 = vmul.f32 %v4043_v39, %v3862_v56  ;;  %v6650_v57 = vrot.slane %v6648_v14, 2  ;;  %v7043_v55 = vrot.slane %v12725_v36, 2  ;;  %v7323_v37 = vrot.slane %v14016_v4, 2 }
 0x4a1   : > { %v3710_v7 = vpop.f32.mrf.mxu0  ;;  %v5161_v8 = vsel %vm541_vm0, %v5156_v63, %v12738_v24  ;;  %v4496_v34 = vpop.f32.mrf.mxu1  ;;  %v7324_v11 = vrot.slane %v14015_v47, 3  ;;  %v6639_v63 = vrot.slane %v6637_v23, 1  ;;  %v6642_v54 = vrot.slane %v6640_v40, 2 }
 0x4a2   : > { %v10178_v46 = vpack.c.bf16 %v4149_v33, %v4148_v38  ;;  %5345 = vmatmul.bf16.gmra.mxu3 %v5161_v8  ;;  %v3777_v39 = vadd.f32 %v3710_v7, %v3491_v3  ;;  %v12761_v60 = vsel %vm2241_vm2, %v7041_v2, %v7043_v55  ;;  %v12766_v33 = vor.u32 %v6650_v57, %v6647_v50  ;;  %v10035_v2 = vld [vmem:[%s13995_s4 + $0x110] sm:$0xff]  ;;  %v14186_v57 = vld [vmem:[#allocation45_spill] sm:$0xff] }
 0x4a3   : > { %14184 = vst [vmem:[#allocation40_spill] sm:$0xff] %v12761_v60  ;;  %v12768_v8 = vor.u32 %v7324_v11, %v7323_v37  ;;  %6052 = vmatpush.bf16.msrb.mxu2 %v10035_v2  ;;  %v14189_v2 = vld [vmem:[#allocation3_spill] sm:$0xff] }
 0x4a4   : > { %10387 = vst [vmem:[#allocation2 + $0x60] sm:$0xff] %v10178_v46   ;;  %v4704_v56 = vshrl.u32 %v10178_v46, 16  ;;  %v4707_v41 = vshll.u32 %v10178_v46, 16  ;;  %v3822_v23 = vadd.f32 %v12705_v21, %v3777_v39  ;;  %v6643_v46 = vor.u32 %v6642_v54, %v6639_v63  ;;  %v14188_v39 = vld [vmem:[#allocation7_spill] sm:$0xff] }
 0x4a5   : > { %v5306_v19 = vpop.f32.mrf.mxu3  ;;  %v12784_v50 = vsel %vm3095_vm3, %v12700_v30, %v12768_v8 }
 0x4a6   : > { %v12764_v28 = vadd.f32 %v5306_v19, %v12681_v61  ;;  %v4706_v14 = vrot.slane %v4704_v56, 3  ;;  %v4709_v38 = vrot.slane %v4707_v41, 4  ;;  %v4853_v7 = vpop.f32.mrf.mxu2  ;;  %v10043_v61 = vld [vmem:[%s13995_s4 + $0x150] sm:$0xff]  ;;  %14185 = vst [vmem:[#allocation41_spill] sm:$0xff] %v12784_v50  ;;  %v6652_v19 = vsel %vm1808_vm4, %v6643_v46, %v12766_v33 }
 0x4a7   : > { %v12771_v40 = vadd.f32 %v4853_v7, %v4496_v34  ;;  %v14187_v34 = vld [vmem:[#allocation4_spill] sm:$0xff]  ;;  %6359 = vmatpush.bf16.msrb.mxu3 %v10043_v61 }
 0x4a8   : > { %v12773_v52 = vor.u32 %v4709_v38, %v4706_v14  ;;  %v2492_v37 = vadd.f32 %v14187_v34, %v14186_v57  ;;  %v3863_v14 = vmax.f32 %v3822_v23, 0.0  ;;  %v4048_v57 = vpop.permute.xlu1 %4047 }
 0x4a9   : > { %v3713_v3 = vpop.f32.mrf.mxu0  ;;  %v4499_v41 = vpop.f32.mrf.mxu1 }
 0x4aa   : > { %v3778_v56 = vadd.f32 %v3713_v3, %v14188_v39  ;;  %v4711_v11 = vsel %vm4595_vm6, %v12710_v45, %v12773_v52  ;;  %v5162_v3 = vshrl.u32 %v12723_v31, 16  ;;  %v2917_v61 = vadd.f32 %v14189_v2, %v2492_v37  ;;  %v4053_v39 = vpop.permute.xlu2 %4052 }
 0x4ab   : > { %v10555_v63 = vld [vmem:[#allocation2 + $0x5c] sm:$0xff]   ;;  %4895 = vmatmul.bf16.gmra.mxu2 %v4711_v11 }
 0x4ac   : > { %v12794_v54 = vld [vmem:[#allocation2 + $0x5c] sm:$0xff]  ;;  %v3823_v38 = vadd.f32 %v12705_v21, %v3778_v56  ;;  %6880 = vmatmul.bf16.vlgmr.msra.gmra.mxu0 %v6652_v19  ;;  %4538 = vmatmul.bf16.gmra.mxu1 %v10555_v63  ;;  %v5164_v23 = vor.u32 %v5162_v3, %v12738_v24  ;;  %v4150_v19 = vmul.f32 %v4048_v57, %v3863_v14  ;;  %v14191_v24 = vshrl.u32 %v12438_v27, 16 }
 0x4ad   : > { %v12796_v30 = vld [vmem:[#allocation2 + $0x5c] sm:$0xff]  ;;  %v5308_v7 = vpop.f32.mrf.mxu3  ;;  %v5166_v45 = vshll.u32 %v12794_v54, 16 }
 0x4ae   : > { %v3864_v46 = vmax.f32 %v3823_v38, 0.0  ;;  %v12803_v34 = vadd.f32 %v5308_v7, %v12708_v6  ;;  %v4856_v56 = vpop.f32.mrf.mxu2  ;;  %v14020_v11 = vshrl.u32 %v12796_v30, 16  ;;  %v14019_v31 = vshll.u32 %v12796_v30, 16  ;;  %v14190_v38 = vld [vmem:[#allocation13_spill] sm:$0xff] }
 0x4af   : > { %v5168_v47 = vrot.slane %v5166_v45, 1  ;;  %v12807_v4 = vadd.f32 %v4856_v56, %v4499_v41  ;;  %v3493_v2 = vadd.f32 %v14190_v38, %v2917_v61  ;;  %v6656_v3 = vrot.slane %v14191_v24, 1  ;;  %v10027_v61 = vld [vmem:[%s13995_s4 + $0xd0] sm:$0xff] }
 0x4b0   : > { %v4151_v63 = vmul.f32 %v4053_v39, %v3864_v46  ;;  %v14192_v45 = vshll.u32 %v12438_v27, 16  ;;  %v14021_v14 = vrot.slane %v12796_v30, 2  ;;  %v7327_v41 = vrot.slane %v14020_v11, 2  ;;  %5793 = vmatpush.bf16.msrb.mxu1 %v10027_v61  ;;  %v4063_v11 = vpop.permute.xlu1 %4062 }
 0x4b1   : > { %v3715_v43 = vpop.f32.mrf.mxu0  ;;  %v5169_v37 = vsel %vm541_vm0, %v5164_v23, %v5168_v47  ;;  %v4501_v7 = vpop.f32.mrf.mxu1  ;;  %v7328_v23 = vrot.slane %v14019_v31, 3 }
 0x4b2   : > { %v10183_v6 = vpack.c.bf16 %v4151_v63, %v4150_v19  ;;  %5350 = vmatmul.bf16.gmra.mxu3 %v5169_v37  ;;  %v6659_v15 = vrot.slane %v14192_v45, 2  ;;  %v3779_v57 = vadd.f32 %v3715_v43, %v3493_v2  ;;  %v12829_v27 = vsel %vm2241_vm2, %v7043_v55, %v14021_v14  ;;  %v14195_v55 = vld [vmem:[#allocation11_spill] sm:$0xff] }
 0x4b3   : > { %14193 = vst [vmem:[#allocation47_spill] sm:$0xff] %v12829_v27  ;;  %v12836_v2 = vor.u32 %v7328_v23, %v7327_v41 }
 0x4b4   : > { %10388 = vst [vmem:[#allocation2 + $0x68] sm:$0xff] %v10183_v6   ;;  %v4713_v46 = vshrl.u32 %v10183_v6, 16  ;;  %v4716_v39 = vshll.u32 %v10183_v6, 16  ;;  %v12834_v37 = vor.u32 %v6659_v15, %v6656_v3  ;;  %v3824_v6 = vadd.f32 %v12705_v21, %v3779_v57  ;;  %v14197_v15 = vld [vmem:[#allocation10_spill] sm:$0xff] }
 0x4b5   : > { %v5311_v56 = vpop.f32.mrf.mxu3 }
 0x4b6   : > { %v12832_v19 = vadd.f32 %v5311_v56, %v12741_v32  ;;  %v4715_v43 = vrot.slane %v4713_v46, 3  ;;  %v4718_v63 = vrot.slane %v4716_v39, 4  ;;  %v4858_v38 = vpop.f32.mrf.mxu2  ;;  %v12846_v32 = vsel %vm3095_vm3, %v12768_v8, %v12836_v2  ;;  %v14196_v46 = vld [vmem:[#allocation12_spill] sm:$0xff] }
 0x4b7   : > { %v12839_v24 = vadd.f32 %v4858_v38, %v4501_v7  ;;  %14194 = vst [vmem:[#allocation48_spill] sm:$0xff] %v12846_v32  ;;  %v2494_v39 = vadd.f32 %v14196_v46, %v14195_v55  ;;  %v6661_v7 = vsel %vm1808_vm4, %v12766_v33, %v12834_v37  ;;  %v3865_v8 = vmax.f32 %v3824_v6, 0.0  ;;  %v14198_v38 = vld [vmem:[#allocation5_spill] sm:$0xff]  ;;  %v4058_v46 = vpop.permute.xlu0 %4057 }
 0x4b8   : > { %v12841_v45 = vor.u32 %v4718_v63, %v4715_v43  ;;  %v5170_v63 = vshrl.u32 %v12794_v54, 16 }
 0x4b9   : > { %v3718_v31 = vpop.f32.mrf.mxu0  ;;  %v4504_v61 = vpop.f32.mrf.mxu1  ;;  %v2919_v55 = vadd.f32 %v14198_v38, %v2494_v39  ;;  %v14199_v38 = vld [vmem:[#allocation6_spill] sm:$0xff] }
 0x4ba   : > { %v3780_v3 = vadd.f32 %v3718_v31, %v14197_v15  ;;  %v4720_v41 = vsel %vm4595_vm6, %v12773_v52, %v12841_v45  ;;  %v5172_v14 = vor.u32 %v5170_v63, %v5168_v47  ;;  %v14200_v47 = vshrl.u32 %v12470_v29, 16 }
 0x4bb   : > { %v10557_v57 = vld [vmem:[#allocation2 + $0x64] sm:$0xff]   ;;  %4900 = vmatmul.bf16.gmra.mxu2 %v4720_v41  ;;  %v4152_v41 = vmul.f32 %v4058_v46, %v3865_v8  ;;  %v14201_v63 = vshll.u32 %v12470_v29, 16 }
 0x4bc   : > { %v12857_v23 = vld [vmem:[#allocation2 + $0x64] sm:$0xff]  ;;  %v3825_v43 = vadd.f32 %v12705_v21, %v3780_v3  ;;  %6885 = vmatmul.bf16.gmra.mxu0 %v6661_v7  ;;  %4543 = vmatmul.bf16.gmra.mxu1 %v10557_v57 }
 0x4bd   : > { %v12859_v56 = vld [vmem:[#allocation2 + $0x64] sm:$0xff]  ;;  %v5313_v31 = vpop.f32.mrf.mxu3  ;;  %v5174_v52 = vshll.u32 %v12857_v23, 16 }
 0x4be   : > { %v3866_v33 = vmax.f32 %v3825_v43, 0.0  ;;  %v12866_v15 = vadd.f32 %v5313_v31, %v12771_v40  ;;  %v4861_v32 = vpop.f32.mrf.mxu2  ;;  %v14023_v3 = vshrl.u32 %v12859_v56, 16  ;;  %v14022_v54 = vshll.u32 %v12859_v56, 16 }
 0x4bf   : > { %v5176_v6 = vrot.slane %v5174_v52, 1  ;;  %v12869_v57 = vadd.f32 %v4861_v32, %v4504_v61  ;;  %v3495_v43 = vadd.f32 %v14199_v38, %v2919_v55  ;;  %v6665_v31 = vrot.slane %v14200_v47, 1 }
 0x4c0   : > { %v4153_v7 = vmul.f32 %v4063_v11, %v3866_v33  ;;  %v6668_v52 = vrot.slane %v14201_v63, 2  ;;  %v14024_v11 = vrot.slane %v12859_v56, 2  ;;  %v7331_v32 = vrot.slane %v14023_v3, 2 }
 0x4c1   : > { %v3720_v27 = vpop.f32.mrf.mxu0  ;;  %v5177_v39 = vsel %vm541_vm0, %v5172_v14, %v5176_v6  ;;  %v4506_v40 = vpop.f32.mrf.mxu1  ;;  %v7332_v55 = vrot.slane %v14022_v54, 3  ;;  %v14202_v33 = vrot.slane %v12796_v30, 2 }
 0x4c2   : > { %v10188_v50 = vpack.c.bf16 %v4153_v7, %v4152_v41  ;;  %5355 = vmatmul.bf16.gmra.mxu3 %v5177_v39  ;;  %v3781_v61 = vadd.f32 %v3720_v27, %v3495_v43  ;;  %v12893_v38 = vor.u32 %v6668_v52, %v6665_v31  ;;  %v14207_v31 = vld [vmem:[#allocation15_spill] sm:$0xff] }
 0x4c3   : > { %v12888_v29 = vsel %vm2241_vm2, %v14202_v33, %v14024_v11  ;;  %v4068_v11 = vpop.permute.xlu2 %4067 }
 0x4c4   : > { %10389 = vst [vmem:[#allocation2 + $0x70] sm:$0xff] %v10188_v50   ;;  %v4722_v8 = vshrl.u32 %v10188_v50, 16  ;;  %v4725_v14 = vshll.u32 %v10188_v50, 16  ;;  %v12895_v50 = vor.u32 %v7332_v55, %v7331_v32  ;;  %v3826_v43 = vadd.f32 %v12705_v21, %v3781_v61 }
 0x4c5   : > { %v5316_v46 = vpop.f32.mrf.mxu3  ;;  %14203 = vst [vmem:[#allocation8_spill] sm:$0xff] %v12888_v29 }
 0x4c6   : > { %v12891_v41 = vadd.f32 %v5316_v46, %v12807_v4  ;;  %v4724_v7 = vrot.slane %v4722_v8, 3  ;;  %v4727_v39 = vrot.slane %v4725_v14, 4  ;;  %v4863_v27 = vpop.f32.mrf.mxu2  ;;  %v12905_v33 = vsel %vm3095_vm3, %v12836_v2, %v12895_v50  ;;  %v14205_v4 = vld [vmem:[#allocation16_spill] sm:$0xff]  ;;  %v14206_v8 = vld [vmem:[#allocation9_spill] sm:$0xff] }
 0x4c7   : > { %v12898_v47 = vadd.f32 %v4863_v27, %v4506_v40  ;;  %14204 = vst [vmem:[#allocation45_spill] sm:$0xff] %v12905_v33  ;;  %v2496_v14 = vadd.f32 %v14206_v8, %v14205_v4  ;;  %v6670_v40 = vsel %vm1808_vm4, %v12834_v37, %v12893_v38  ;;  %v3867_v2 = vmax.f32 %v3826_v43, 0.0  ;;  %v14208_v4 = vld [vmem:[#allocation18_spill] sm:$0xff] }
 0x4c8   : > { %v12900_v63 = vor.u32 %v4727_v39, %v4724_v7  ;;  %v5178_v27 = vshrl.u32 %v12857_v23, 16 }
 0x4c9   : > { %v3723_v54 = vpop.f32.mrf.mxu0  ;;  %v4509_v46 = vpop.f32.mrf.mxu1  ;;  %v2921_v8 = vadd.f32 %v14208_v4, %v2496_v14  ;;  %v14209_v4 = vld [vmem:[#allocation17_spill] sm:$0xff] }
 0x4ca   : > { %v3782_v52 = vadd.f32 %v3723_v54, %v14207_v31  ;;  %v4729_v32 = vsel %vm4595_vm6, %v12841_v45, %v12900_v63  ;;  %v4073_v31 = vpop.permute.xlu0 %4072  ;;  %v5180_v33 = vor.u32 %v5178_v27, %v5176_v6  ;;  %v14210_v6 = vshrl.u32 %v12495_v42, 16 }
 0x4cb   : > { %v10559_v61 = vld [vmem:[#allocation2 + $0x6c] sm:$0xff]   ;;  %4905 = vmatmul.bf16.gmra.mxu2 %v4729_v32  ;;  %v4154_v32 = vmul.f32 %v4068_v11, %v3867_v2  ;;  %v14211_v27 = vshll.u32 %v12495_v42, 16 }
 0x4cc   : > { %v12916_v55 = vld [vmem:[#allocation2 + $0x6c] sm:$0xff]  ;;  %v3827_v39 = vadd.f32 %v12705_v21, %v3782_v52  ;;  %6890 = vmatmul.bf16.gmra.mxu0 %v6670_v40  ;;  %4548 = vmatmul.bf16.gmra.mxu1 %v10559_v61 }
 0x4cd   : > { %v12918_v7 = vld [vmem:[#allocation2 + $0x6c] sm:$0xff]  ;;  %v5318_v54 = vpop.f32.mrf.mxu3  ;;  %v5182_v45 = vshll.u32 %v12916_v55, 16 }
 0x4ce   : > { %v3868_v37 = vmax.f32 %v3827_v39, 0.0  ;;  %v12925_v3 = vadd.f32 %v5318_v54, %v12839_v24  ;;  %v4866_v29 = vpop.f32.mrf.mxu2  ;;  %v14025_v52 = vshrl.u32 %v12918_v7, 16  ;;  %v14027_v14 = vshll.u32 %v12918_v7, 16  ;;  %v10026_v42 = vld [vmem:[%s13995_s4 + $0xc8] sm:$0xff] }
 0x4cf   : > { %v5184_v43 = vrot.slane %v5182_v45, 1  ;;  %v12928_v61 = vadd.f32 %v4866_v29, %v4509_v46  ;;  %v3497_v39 = vadd.f32 %v14209_v4, %v2921_v8  ;;  %v6674_v54 = vrot.slane %v14210_v6, 1  ;;  %v10042_v8 = vld [vmem:[%s13995_s4 + $0x148] sm:$0xff]  ;;  %5794 = vmatpush.bf16.msrb.mxu1 %v10026_v42 }
 0x4d0   : > { %v4155_v40 = vmul.f32 %v4073_v31, %v3868_v37  ;;  %v6677_v45 = vrot.slane %v14211_v27, 2  ;;  %v14026_v11 = vrot.slane %v12918_v7, 2  ;;  %v7335_v29 = vrot.slane %v14025_v52, 2  ;;  %6360 = vmatpush.bf16.msrb.mxu3 %v10042_v8 }
 0x4d1   : > { %v3725_v23 = vpop.f32.mrf.mxu0  ;;  %v5185_v60 = vsel %vm541_vm0, %v5180_v33, %v5184_v43  ;;  %v4511_v24 = vpop.f32.mrf.mxu1  ;;  %v14212_v37 = vrot.slane %v12859_v56, 2 }
 0x4d2   : > { %v10193_v35 = vpack.c.bf16 %v4155_v40, %v4154_v32  ;;  %5360 = vmatmul.bf16.gmra.mxu3 %v5185_v60  ;;  %v3783_v33 = vadd.f32 %v3725_v23, %v3497_v39  ;;  %v10034_v60 = vld [vmem:[%s13995_s4 + $0x108] sm:$0xff]  ;;  %v12961_v39 = vor.u32 %v6677_v45, %v6674_v54  ;;  %v14217_v45 = vld [vmem:[#allocation20_spill] sm:$0xff] }
 0x4d3   : > { %v12954_v32 = vsel %vm2241_vm2, %v14212_v37, %v14026_v11  ;;  %6053 = vmatpush.bf16.msrb.mxu2 %v10034_v60 }
 0x4d4   : > { %10390 = vst [vmem:[#allocation2 + $0x78] sm:$0xff] %v10193_v35   ;;  %v4731_v46 = vshrl.u32 %v10193_v35, 16  ;;  %v4734_v2 = vshll.u32 %v10193_v35, 16  ;;  %v7336_v35 = vrot.slane %v14027_v14, 3  ;;  %v3828_v52 = vadd.f32 %v12705_v21, %v3783_v33 }
 0x4d5   : > { %v5321_v31 = vpop.f32.mrf.mxu3  ;;  %14213 = vst [vmem:[#allocation4_spill] sm:$0xff] %v12954_v32 }
 0x4d6   : > { %v12959_v40 = vadd.f32 %v5321_v31, %v12869_v57  ;;  %v4733_v23 = vrot.slane %v4731_v46, 3  ;;  %v4736_v4 = vrot.slane %v4734_v2, 4  ;;  %v4868_v6 = vpop.f32.mrf.mxu2  ;;  %v12963_v27 = vor.u32 %v7336_v35, %v7335_v29  ;;  %v14215_v46 = vld [vmem:[#allocation21_spill] sm:$0xff]  ;;  %v14216_v2 = vld [vmem:[#allocation14_spill] sm:$0xff] }
 0x4d7   : > { %v12966_v37 = vadd.f32 %v4868_v6, %v4511_v24  ;;  %v2498_v54 = vadd.f32 %v14216_v2, %v14215_v46  ;;  %v6679_v24 = vsel %vm1808_vm4, %v12893_v38, %v12961_v39  ;;  %v4078_v46 = vpop.permute.xlu1 %4077 }
 0x4d8   : > { %v12968_v11 = vor.u32 %v4736_v4, %v4733_v23  ;;  %v12973_v57 = vsel %vm3095_vm3, %v12895_v50, %v12963_v27  ;;  %v3869_v50 = vmax.f32 %v3828_v52, 0.0  ;;  %v5186_v23 = vshrl.u32 %v12916_v55, 16  ;;  %v14218_v4 = vld [vmem:[#allocation23_spill] sm:$0xff] }
 0x4d9   : > { %v3728_v14 = vpop.f32.mrf.mxu0  ;;  %14214 = vst [vmem:[#allocation7_spill] sm:$0xff] %v12973_v57  ;;  %v4514_v8 = vpop.f32.mrf.mxu1  ;;  %v2923_v6 = vadd.f32 %v14218_v4, %v2498_v54  ;;  %v14219_v4 = vld [vmem:[#allocation22_spill] sm:$0xff] }
 0x4da   : > { %v3784_v60 = vadd.f32 %v3728_v14, %v14217_v45  ;;  %v4738_v29 = vsel %vm4595_vm6, %v12900_v63, %v12968_v11  ;;  %v4083_v45 = vpop.permute.xlu2 %4082  ;;  %v5188_v57 = vor.u32 %v5186_v23, %v5184_v43  ;;  %v14220_v43 = vshrl.u32 %v12542_v59, 16 }
 0x4db   : > { %v10561_v33 = vld [vmem:[#allocation2 + $0x74] sm:$0xff]   ;;  %4910 = vmatmul.bf16.gmra.mxu2 %v4738_v29  ;;  %v4156_v29 = vmul.f32 %v4078_v46, %v3869_v50  ;;  %v14221_v23 = vshll.u32 %v12542_v59, 16 }
 0x4dc   : > { %v12984_v42 = vld [vmem:[#allocation2 + $0x74] sm:$0xff]  ;;  %v3829_v35 = vadd.f32 %v12705_v21, %v3784_v60  ;;  %6895 = vmatmul.bf16.gmra.mxu0 %v6679_v24  ;;  %4553 = vmatmul.bf16.gmra.mxu1 %v10561_v33 }
 0x4dd   : > { %v12986_v31 = vld [vmem:[#allocation2 + $0x74] sm:$0xff]  ;;  %v5323_v14 = vpop.f32.mrf.mxu3  ;;  %v5190_v63 = vshll.u32 %v12984_v42, 16 }
 0x4de   : > { %v3870_v38 = vmax.f32 %v3829_v35, 0.0  ;;  %v12993_v2 = vadd.f32 %v5323_v14, %v12898_v47  ;;  %v4871_v32 = vpop.f32.mrf.mxu2  ;;  %v14029_v60 = vshrl.u32 %v12986_v31, 16  ;;  %v14028_v55 = vshll.u32 %v12986_v31, 16 }
 0x4df   : > { %v5192_v52 = vrot.slane %v5190_v63, 1  ;;  %v12996_v33 = vadd.f32 %v4871_v32, %v4514_v8  ;;  %v3499_v35 = vadd.f32 %v14219_v4, %v2923_v6  ;;  %v6683_v14 = vrot.slane %v14220_v43, 1 }
 0x4e0   : > { %v4157_v24 = vmul.f32 %v4083_v45, %v3870_v38  ;;  %v6686_v63 = vrot.slane %v14221_v23, 2  ;;  %v14030_v50 = vrot.slane %v12986_v31, 2  ;;  %v7339_v32 = vrot.slane %v14029_v60, 2 }
 0x4e1   : > { %v3730_v53 = vpop.f32.mrf.mxu0  ;;  %v5193_v54 = vsel %vm541_vm0, %v5188_v57, %v5192_v52  ;;  %v4516_v47 = vpop.f32.mrf.mxu1  ;;  %v7340_v6 = vrot.slane %v14028_v55, 3  ;;  %v14222_v45 = vrot.slane %v12918_v7, 2 }
 0x4e2   : > { %v10198_v17 = vpack.c.bf16 %v4157_v24, %v4156_v29  ;;  %5365 = vmatmul.bf16.gmra.mxu3 %v5193_v54  ;;  %v3785_v8 = vadd.f32 %v3730_v53, %v3499_v35  ;;  %v13020_v4 = vor.u32 %v6686_v63, %v6683_v14  ;;  %v14227_v14 = vld [vmem:[#allocation25_spill] sm:$0xff] }
 0x4e3   : > { %v13015_v59 = vsel %vm2241_vm2, %v14222_v45, %v14030_v50  ;;  %v4093_v50 = vpop.permute.xlu1 %4092 }
 0x4e4   : > { %10391 = vst [vmem:[#allocation2 + $0x80] sm:$0xff] %v10198_v17   ;;  %v4740_v46 = vshrl.u32 %v10198_v17, 16  ;;  %v4743_v57 = vshll.u32 %v10198_v17, 16  ;;  %v13022_v17 = vor.u32 %v7340_v6, %v7339_v32  ;;  %v3830_v35 = vadd.f32 %v12705_v21, %v3785_v8 }
 0x4e5   : > { %v5326_v38 = vpop.f32.mrf.mxu3  ;;  %14223 = vst [vmem:[#allocation3_spill] sm:$0xff] %v13015_v59 }
 0x4e6   : > { %v13018_v29 = vadd.f32 %v5326_v38, %v12928_v61  ;;  %v4742_v24 = vrot.slane %v4740_v46, 3  ;;  %v4745_v54 = vrot.slane %v4743_v57, 4  ;;  %v4873_v53 = vpop.f32.mrf.mxu2  ;;  %v13032_v45 = vsel %vm3095_vm3, %v12963_v27, %v13022_v17  ;;  %v14225_v61 = vld [vmem:[#allocation26_spill] sm:$0xff]  ;;  %v14226_v46 = vld [vmem:[#allocation19_spill] sm:$0xff] }
 0x4e7   : > { %v13025_v43 = vadd.f32 %v4873_v53, %v4516_v47  ;;  %14224 = vst [vmem:[#allocation13_spill] sm:$0xff] %v13032_v45  ;;  %v2500_v57 = vadd.f32 %v14226_v46, %v14225_v61  ;;  %v6688_v47 = vsel %vm1808_vm4, %v12961_v39, %v13020_v4  ;;  %v3871_v27 = vmax.f32 %v3830_v35, 0.0  ;;  %v14228_v61 = vld [vmem:[#allocation28_spill] sm:$0xff] }
 0x4e8   : > { %v13027_v23 = vor.u32 %v4745_v54, %v4742_v24  ;;  %v5194_v53 = vshrl.u32 %v12984_v42, 16 }
 0x4e9   : > { %v3733_v55 = vpop.f32.mrf.mxu0  ;;  %v4519_v38 = vpop.f32.mrf.mxu1  ;;  %v2925_v46 = vadd.f32 %v14228_v61, %v2500_v57  ;;  %v14229_v61 = vld [vmem:[#allocation27_spill] sm:$0xff] }
 0x4ea   : > { %v3786_v63 = vadd.f32 %v3733_v55, %v14227_v14  ;;  %v4747_v32 = vsel %vm4595_vm6, %v12968_v11, %v13027_v23  ;;  %v4088_v14 = vpop.permute.xlu0 %4087  ;;  %v5196_v45 = vor.u32 %v5194_v53, %v5192_v52  ;;  %v14230_v52 = vshrl.u32 %v12602_v13, 16 }
 0x4eb   : > { %v10563_v8 = vld [vmem:[#allocation2 + $0x7c] sm:$0xff]   ;;  %4915 = vmatmul.bf16.gmra.mxu2 %v4747_v32  ;;  %v4158_v32 = vmul.f32 %v4088_v14, %v3871_v27  ;;  %v14231_v53 = vshll.u32 %v12602_v13, 16  ;;  %v14232_v14 = vrot.slane %v12986_v31, 2 }
 0x4ec   : > { %v13043_v6 = vld [vmem:[#allocation2 + $0x7c] sm:$0xff]  ;;  %v3831_v54 = vadd.f32 %v12705_v21, %v3786_v63  ;;  %6900 = vmatmul.bf16.gmra.mxu0 %v6688_v47  ;;  %4558 = vmatmul.bf16.gmra.mxu1 %v10563_v8 }
 0x4ed   : > { %v13045_v24 = vld [vmem:[#allocation2 + $0x7c] sm:$0xff]  ;;  %v5328_v55 = vpop.f32.mrf.mxu3  ;;  %v5198_v11 = vshll.u32 %v13043_v6, 16  ;;  %v6695_v27 = vrot.slane %v14231_v53, 2 }
 0x4ee   : > { %v3872_v39 = vmax.f32 %v3831_v54, 0.0  ;;  %v13052_v60 = vadd.f32 %v5328_v55, %v12966_v37  ;;  %v4876_v59 = vpop.f32.mrf.mxu2  ;;  %v14031_v63 = vshrl.u32 %v13045_v24, 16  ;;  %v14033_v57 = vshll.u32 %v13045_v24, 16  ;;  %v10041_v13 = vld [vmem:[%s13995_s4 + $0x140] sm:$0xff] }
 0x4ef   : > { %v5200_v35 = vrot.slane %v5198_v11, 1  ;;  %v13055_v8 = vadd.f32 %v4876_v59, %v4519_v38  ;;  %v3501_v54 = vadd.f32 %v14229_v61, %v2925_v46  ;;  %v6692_v55 = vrot.slane %v14230_v52, 1  ;;  %6361 = vmatpush.bf16.msrb.mxu3 %v10041_v13 }
 0x4f0   : > { %v4159_v47 = vmul.f32 %v4093_v50, %v3872_v39  ;;  %v14032_v50 = vrot.slane %v13045_v24, 2  ;;  %v7343_v59 = vrot.slane %v14031_v63, 2 }
 0x4f1   : > { %v3735_v42 = vpop.f32.mrf.mxu0  ;;  %v5201_v49 = vsel %vm541_vm0, %v5196_v45, %v5200_v35  ;;  %v4521_v37 = vpop.f32.mrf.mxu1 }
 0x4f2   : > { %v13060_v18 = vpack.c.bf16 %v4159_v47, %v4158_v32  ;;  %5370 = vmatmul.bf16.gmra.mxu3 %v5201_v49  ;;  %v3787_v45 = vadd.f32 %v3735_v42, %v3501_v54  ;;  %v10033_v49 = vld [vmem:[%s13995_s4 + $0x100] sm:$0xff]  ;;  %v13083_v39 = vsel %vm2241_vm2, %v14232_v14, %v14032_v50  ;;  %v7344_v32 = vrot.slane %v14033_v57, 3  ;;  %v14234_v50 = vld [vmem:[#allocation24_spill] sm:$0xff] }
 0x4f3   : > { %14233 = vst [vmem:[#allocation11_spill] sm:$0xff] %v13083_v39  ;;  %6054 = vmatpush.bf16.msrb.mxu2 %v10033_v49  ;;  %v13090_v54 = vor.u32 %v6695_v27, %v6692_v55  ;;  %v2502_v57 = vadd.f32 %v14234_v50, %v12318_v26 }
 0x4f4   : > { %10392 = vst [vmem:[#allocation2 + $0x88] sm:$0xff] %v13060_v18   ;;  %v4749_v38 = vshrl.u32 %v13060_v18, 16  ;;  %v4752_v11 = vshll.u32 %v13060_v18, 16  ;;  %v7345_v53 = vor.u32 %v7344_v32, %v7343_v59  ;;  %v3832_v63 = vadd.f32 %v12705_v21, %v3787_v45  ;;  %v4098_v32 = vpop.permute.xlu2 %4097 }
 0x4f5   : > { %v5331_v46 = vpop.f32.mrf.mxu3 }
 0x4f6   : > { %v13088_v47 = vadd.f32 %v5331_v46, %v12996_v33  ;;  %v4751_v42 = vrot.slane %v4749_v38, 3  ;;  %v4754_v61 = vrot.slane %v4752_v11, 4  ;;  %v4878_v52 = vpop.f32.mrf.mxu2  ;;  %v13101_v33 = vsel %vm3095_vm3, %v13022_v17, %v7345_v53  ;;  %v14236_v11 = vld [vmem:[#allocation33_spill] sm:$0xff]  ;;  %v4103_v46 = vpop.permute.xlu0 %4102 }
 0x4f7   : > { %v13093_v25 = vadd.f32 %v4878_v52, %v4521_v37  ;;  %14235 = vst [vmem:[#allocation12_spill] sm:$0xff] %v13101_v33  ;;  %v6697_v37 = vsel %vm1808_vm4, %v13020_v4, %v13090_v54  ;;  %v3873_v50 = vmax.f32 %v3832_v63, 0.0  ;;  %v5202_v4 = vshrl.u32 %v13043_v6, 16 }
 0x4f8   : > { %v13095_v14 = vor.u32 %v4754_v61, %v4751_v42 }
 0x4f9   : > { %v3738_v39 = vpop.f32.mrf.mxu0  ;;  %v4524_v55 = vpop.f32.mrf.mxu1  ;;  %v5204_v42 = vor.u32 %v5202_v4, %v5200_v35  ;;  %v14238_v35 = vshrl.u32 %v12673_v48, 16 }
 0x4fa   : > { %v3788_v38 = vadd.f32 %v3738_v39, %v12316_v10  ;;  %v4756_v27 = vsel %vm4595_vm6, %v13027_v23, %v13095_v14  ;;  %v10025_v10 = vld [vmem:[%s13995_s4 + $0xc0] sm:$0xff]  ;;  %v2927_v23 = vadd.f32 %v14236_v11, %v2502_v57 }
 0x4fb   : > { %v10564_v59 = vld [vmem:[#allocation2 + $0x84] sm:$0xff]   ;;  %4920 = vmatmul.bf16.gmra.mxu2 %v4756_v27  ;;  %5795 = vmatpush.bf16.msrb.mxu1 %v10025_v10  ;;  %v4160_v27 = vmul.f32 %v4098_v32, %v3873_v50  ;;  %v14240_v32 = vrot.slane %v13045_v24, 2 }
 0x4fc   : > { %v13110_v45 = vld [vmem:[#allocation2 + $0x84] sm:$0xff]  ;;  %v3833_v17 = vadd.f32 %v12705_v21, %v3788_v38  ;;  %6905 = vmatmul.bf16.gmra.mxu0 %v6697_v37  ;;  %4563 = vmatmul.bf16.gmra.mxu1 %v10564_v59  ;;  %v14237_v59 = vld [vmem:[#allocation32_spill] sm:$0xff] }
 0x4fd   : > { %v13112_v26 = vld [vmem:[#allocation2 + $0x84] sm:$0xff]  ;;  %v5333_v49 = vpop.f32.mrf.mxu3  ;;  %v5206_v13 = vshll.u32 %v13110_v45, 16  ;;  %v3503_v11 = vadd.f32 %v14237_v59, %v2927_v23 }
 0x4fe   : > { %v3874_v39 = vmax.f32 %v3833_v17, 0.0  ;;  %v13122_v63 = vadd.f32 %v5333_v49, %v13025_v43  ;;  %v4881_v52 = vpop.f32.mrf.mxu2  ;;  %v14035_v38 = vshrl.u32 %v13112_v26, 16  ;;  %v14034_v6 = vshll.u32 %v13112_v26, 16 }
 0x4ff   : > { %v5208_v61 = vrot.slane %v5206_v13, 1  ;;  %v13125_v37 = vadd.f32 %v4881_v52, %v4524_v55  ;;  %v6701_v49 = vrot.slane %v14238_v35, 1  ;;  %v14239_v13 = vshll.u32 %v12673_v48, 16  ;;  %v14242_v52 = vld [vmem:[#allocation29_spill] sm:$0xff] }
 0x500   : > { %v4161_v57 = vmul.f32 %v4103_v46, %v3874_v39  ;;  %v14036_v55 = vrot.slane %v13112_v26, 2  ;;  %v7347_v46 = vrot.slane %v14035_v38, 2  ;;  %v7348_v23 = vrot.slane %v14034_v6, 3 }
 0x501   : > { %v3740_v33 = vpop.f32.mrf.mxu0  ;;  %v5209_v17 = vsel %vm541_vm0, %v5204_v42, %v5208_v61  ;;  %v4526_v10 = vpop.f32.mrf.mxu1  ;;  %v6704_v50 = vrot.slane %v14239_v13, 2 }
 0x502   : > { %v10208_v43 = vpack.c.bf16 %v4161_v57, %v4160_v27  ;;  %5375 = vmatmul.bf16.gmra.mxu3 %v5209_v17  ;;  %v3789_v4 = vadd.f32 %v3740_v33, %v3503_v11  ;;  %v13144_v42 = vsel %vm2241_vm2, %v14240_v32, %v14036_v55  ;;  %v13149_v33 = vor.u32 %v7348_v23, %v7347_v46  ;;  %v13163_v46 = vld [vmem:[#allocation2 + $0xc] sm:$0xff]   ;;  %v14245_v55 = vld [vmem:[#allocation37_spill] sm:$0xff] }
 0x503   : > { %14241 = vst [vmem:[#allocation10_spill] sm:$0xff] %v13144_v42  ;;  %v2504_v27 = vadd.f32 %v14242_v52, %v12329_v58  ;;  %v13154_v59 = vor.u32 %v6704_v50, %v6701_v49  ;;  %v13165_v23 = vld [vmem:[#allocation2 + $0xc] sm:$0xf0]  ;;  %v14244_v58 = vld [vmem:[#allocation38_spill] sm:$0xff] }
 0x504   : > { %10393 = vst [vmem:[#allocation2 + $0x90] sm:$0xff] %v10208_v43   ;;  %v3834_v57 = vadd.f32 %v12705_v21, %v3789_v4  ;;  %v13160_v43 = vsel %vm3095_vm3, %v7345_v53, %v13149_v33 }
 0x505   : > { %v5336_v39 = vpop.f32.mrf.mxu3  ;;  %14243 = vst [vmem:[#allocation5_spill] sm:$0xff] %v13160_v43 }
 0x506   : > { %v13147_v48 = vadd.f32 %v5336_v39, %v13055_v8  ;;  %v4883_v11 = vpop.f32.mrf.mxu2  ;;  %v2929_v39 = vadd.f32 %v14244_v58, %v2504_v27  ;;  %v3875_v4 = vmax.f32 %v3834_v57, 0.0  ;;  %v4108_v27 = vpop.permute.xlu1 %4107 }
 0x507   : > { %v13156_v17 = vadd.f32 %v4883_v11, %v4526_v10  ;;  %v6706_v10 = vsel %vm1808_vm4, %v13090_v54, %v13154_v59  ;;  %v5210_v11 = vshrl.u32 %v13110_v45, 16 }
 0x508   : > { %v3505_v43 = vadd.f32 %v14245_v55, %v2929_v39 }
 0x509   : > { %v3743_v35 = vpop.f32.mrf.mxu0  ;;  %v4529_v13 = vpop.f32.mrf.mxu1  ;;  %v5212_v42 = vor.u32 %v5210_v11, %v5208_v61  ;;  %v10089_v61 = vld [vmem:[%s13995_s4 + $0x238] sm:$0xff] }
 0x50a   : > { %v3790_v8 = vadd.f32 %v3743_v35, %v12327_v12  ;;  %v10282_v12 = vunpack.c.h.b16 %v13060_v18  ;;  %v10081_v11 = vld [vmem:[%s13995_s4 + $0x1f8] sm:$0xff]  ;;  %7438 = vmatpush.bf16.msra.mxu2 %v10089_v61 }
 0x50b   : > { %v4285_v49 = vld [vmem:[#allocation2 + $0x90] sm:$0xf]  ;;  %v4967_v38 = vld [vmem:[#allocation2 + $0x94] sm:$0x1]  ;;  %7131 = vmatpush.bf16.msra.mxu1 %v10081_v11 }
 0x50c   : > { %v13171_v50 = vld [vmem:[#allocation2 + $0x8c] sm:$0xff]  ;;  %v3835_v53 = vadd.f32 %v12705_v21, %v3790_v8  ;;  %6910 = vmatmul.bf16.gmra.mxu0 %v6706_v10  ;;  %v4390_v32 = vunpack.c.l.b16 %v4285_v49  ;;  %v4113_v8 = vpop.permute.xlu2 %4112  ;;  %v4162_v10 = vmul.f32 %v4108_v27, %v3875_v4 }
 0x50d   : > { %v5338_v52 = vpop.f32.mrf.mxu3  ;;  %v5214_v35 = vshll.u32 %v13171_v50, 16  ;;  %v13185_v22 = vld [vmem:[#allocation2 + $0x8c] sm:$0xff] }
 0x50e   : > { %v3876_v57 = vmax.f32 %v3835_v53, 0.0  ;;  %v13178_v58 = vadd.f32 %v5338_v52, %v13093_v25  ;;  %v4408_v54 = vpack.c.b16 %v4390_v32, %v10282_v12  ;;  %v4594_v6 = vpack.c.b16 %v4390_v32, %v4390_v32  ;;  %v4886_v49 = vpop.f32.mrf.mxu2 }
 0x50f   : > { %v13181_v18 = vrot.slane %v5214_v35, 1  ;;  %v13183_v45 = vadd.f32 %v4886_v49, %v4529_v13  ;;  %v5058_v32 = vunpack.c.l.b16 %v4967_v38  ;;  %v14246_v38 = vshrl.u32 %v12725_v36, 16 }
 0x510   : > { %v4163_v0 = vmul.f32 %v4113_v8, %v3876_v57  ;;  %4568 = vmatmul.bf16.gmra.mxu1 %v4408_v54  ;;  %v4758_v20 = vshrl.u32 %v4594_v6, 16  ;;  %v4761_v53 = vshll.u32 %v4594_v6, 16  ;;  %v10115_v6 = vld [vmem:[%s13997_s6 + $0x38] sm:$0xff]  ;;  %v14247_v35 = vshll.u32 %v12725_v36, 16 }
 0x511   : > { %v3745_v25 = vpop.f32.mrf.mxu0  ;;  %v5217_v12 = vsel %vm541_vm0, %v5212_v42, %v13181_v18  ;;  %v4531_v4 = vpop.f32.mrf.mxu1  ;;  %v6710_v42 = vrot.slane %v14246_v38, 1  ;;  %7999 = vmatpush.bf16.msra.mxu3 %v10115_v6  ;;  %v14039_v57 = vshrl.u32 %v13185_v22, 16  ;;  %v7057_v54 = vrot.slane %v13185_v22, 2 }
 0x512   : > { %v10213_v55 = vpack.c.bf16 %v4163_v0, %v4162_v10  ;;  %v3791_v39 = vadd.f32 %v3745_v25, %v3505_v43  ;;  %5380 = vmatmul.bf16.gmra.mxu3 %v5217_v12  ;;  %v4760_v52 = vrot.slane %v4758_v20, 3  ;;  %v4763_v13 = vrot.slane %v4761_v53, 4  ;;  %v13202_v0 = vld [vmem:[#allocation2 + $0x14] sm:$0xff]  ;;  %v4118_v12 = vpop.permute.xlu0 %4117 }
 0x513   : > { %v6713_v27 = vrot.slane %v14247_v35, 2  ;;  %v5577_v10 = vshll.u32 %v13163_v46, 16  ;;  %v5077_v49 = vpack.c.b16 %v5058_v32, %v5058_v32  ;;  %v14037_v36 = vshll.u32 %v13185_v22, 16 }
 0x514   : > { %10394 = vst [vmem:[#allocation2 + $0x98] sm:$0xff] %v10213_v55   ;;  %v3836_v20 = vadd.f32 %v12705_v21, %v3791_v39  ;;  %v4764_v43 = vor.u32 %v4763_v13, %v4760_v52  ;;  %v14040_v39 = vshll.u32 %v13202_v0, 16  ;;  %v14248_v32 = vrot.slane %v13112_v26, 2 }
 0x515   : > { %v5341_v8 = vpop.f32.mrf.mxu3  ;;  %v13214_v61 = vor.u32 %v6713_v27, %v6710_v42  ;;  %v5579_v11 = vrot.slane %v5577_v10, 1  ;;  %v5222_v38 = vshll.u32 %v5077_v49, 16  ;;  %v7352_v42 = vrot.slane %v14037_v36, 3  ;;  %v14250_v27 = vld [vmem:[#allocation30_spill] sm:$0xff]  ;;  %v10643_v49 = vld [vmem:[#allocation2 + $0xc] sm:$0xe] }
 0x516   : > { %v3877_v53 = vmax.f32 %v3836_v20, 0.0  ;;  %v13210_v25 = vadd.f32 %v5341_v8, %v13125_v37  ;;  %v4765_v21 = vsel %vm4595_vm6, %v13095_v14, %v4764_v43  ;;  %v4888_v55 = vpop.f32.mrf.mxu2  ;;  %v13224_v37 = vsel %vm2241_vm2, %v14248_v32, %v7057_v54 }
 0x517   : > { %4925 = vmatmul.bf16.gmra.mxu2 %v4765_v21  ;;  %v13217_v13 = vadd.f32 %v4888_v55, %v4531_v4  ;;  %14249 = vst [vmem:[#allocation6_spill] sm:$0xff] %v13224_v37  ;;  %v7351_v14 = vrot.slane %v14039_v57, 2  ;;  %v5575_v43 = vshrl.u32 %v13163_v46, 16  ;;  %v6715_v8 = vsel %vm1808_vm4, %v13154_v59, %v13214_v61 }
 0x518   : > { %v4164_v52 = vmul.f32 %v4118_v12, %v3877_v53  ;;  %v13237_v53 = vrot.slane %v14040_v39, 1  ;;  %v5218_v10 = vshrl.u32 %v13171_v50, 16  ;;  %v10641_v12 = vld [vmem:[%s13994_s3] ss:$0 sm:$0xff]  ;;  %v4123_v50 = vpop.permute.xlu1 %4122 }
 0x519   : > { %v3748_v6 = vpop.f32.mrf.mxu0  ;;  %v4534_v20 = vpop.f32.mrf.mxu1  ;;  %v7353_v21 = vor.u32 %v7352_v42, %v7351_v14  ;;  %v5580_v32 = vor.u32 %v5579_v11, %v5575_v43 }
 0x51a   : > { %v4205_v35 = vpack.c.bf16 %v4164_v52, %v4164_v52  ;;  %v3792_v4 = vadd.f32 %v3748_v6, %v14250_v27  ;;  %v5220_v59 = vor.u32 %v5218_v10, %v13181_v18  ;;  %v5224_v6 = vrot.slane %v5222_v38, 1 }
 0x51b   : > { %v13243_v46 = vld [vmem:[#allocation2 + $0x94] sm:$0xff]  ;;  %v5585_v14 = vsel %vm541_vm0, %v5580_v32, %v13237_v53  ;;  %v14042_v10 = vrot.slane %v13202_v0, 1 }
 0x51c   : > { %4247 = vst [vmem:[#allocation2 + $0xa0] sm:$0xf] %v4205_v35  ;;  %v3837_v55 = vadd.f32 %v10641_v12, %v3792_v4  ;;  %6915 = vmatmul.bf16.gmra.mxu0 %v6715_v8  ;;  %v10644_v8 = vor.u32 %v10643_v49, %v13165_v23  ;;  %v14038_v11 = vshrl.u32 %v13243_v46, 16  ;;  %v5225_v18 = vsel %vm541_vm0, %v5220_v59, %v5224_v6 }
 0x51d   : > { %v5343_v52 = vpop.f32.mrf.mxu3  ;;  %v14041_v12 = vshll.u32 %v13243_v46, 16  ;;  %v13268_v49 = vsel %vm3095_vm3, %v13149_v33, %v7353_v21  ;;  %v7059_v59 = vrot.slane %v13243_v46, 2 }
 0x51e   : > { %v3878_v27 = vmax.f32 %v3837_v55, 0.0  ;;  %v13247_v36 = vadd.f32 %v5343_v52, %v13156_v17  ;;  %v4891_v42 = vpop.f32.mrf.mxu2  ;;  %v14251_v55 = vshrl.u32 %v12796_v30, 16  ;;  %14253 = vst [vmem:[#allocation16_spill] sm:$0xff] %v13268_v49  ;;  %v5944_v6 = vrot.slane %v10644_v8, 1 }
 0x51f   : > { %v13251_v4 = vadd.f32 %v4891_v42, %v4534_v20  ;;  %v14252_v20 = vshll.u32 %v12796_v30, 16  ;;  %v5586_v30 = vshrl.u32 %v13202_v0, 16  ;;  %v13279_v33 = vsel %vm2241_vm2, %v7057_v54, %v7059_v59 }
 0x520   : > { %v4165_v35 = vmul.f32 %v4123_v50, %v3878_v27  ;;  %5796 = vmatmul.bf16.vlgmr.msrb.gmra.mxu1 %v5585_v14  ;;  %v6719_v52 = vrot.slane %v14251_v55, 1  ;;  %v13262_v27 = vld [vmem:[#allocation2 + $0x1c] sm:$0xff]  ;;  %v6204_v50 = vshrl.u32 %v10644_v8, 16  ;;  %v7355_v14 = vrot.slane %v14038_v11, 2  ;;  %14254 = vst [vmem:[#allocation9_spill] sm:$0xff] %v13279_v33 }
 0x521   : > { %v3750_v43 = vpop.f32.mrf.mxu0  ;;  %v4536_v17 = vpop.f32.mrf.mxu1  ;;  %v6722_v32 = vrot.slane %v14252_v20, 2  ;;  %v6207_v55 = vshll.u32 %v10644_v8, 16  ;;  %v7356_v20 = vrot.slane %v14041_v12, 3  ;;  %v6211_v33 = vrot.slane %v5586_v30, 1 }
 0x522   : > { %v4206_v38 = vpack.c.bf16 %v4165_v35, %v4165_v35  ;;  %5385 = vmatmul.bf16.gmra.mxu3 %v5225_v18  ;;  %v5590_v43 = vshll.u32 %v13262_v27, 16  ;;  %v14255_v49 = vshll.u32 %v13202_v0, 16  ;;  %v6206_v12 = vrot.slane %v6204_v50, 1 }
 0x523   : > { %v13264_v23 = vld [vmem:[#allocation2 + $0x9c] sm:$0xff]  ;;  %v6723_v11 = vor.u32 %v6722_v32, %v6719_v52 }
 0x524   : > { %4248 = vst [vmem:[#allocation2 + $0xa4] sm:$0x3] %v4206_v38  ;;  %v14043_v35 = vshrl.u32 %v13264_v23, 16  ;;  %v5946_v38 = vsel %vm1097_vm1, %v5944_v6, %v14042_v10  ;;  %v7061_v39 = vrot.slane %v13264_v23, 2  ;;  %v6212_v6 = vrot.slane %v14255_v49, 2 }
 0x525   : > { %v5346_v42 = vpop.f32.mrf.mxu3 }
 0x526   : > { %v13282_v18 = vadd.f32 %v5346_v42, %v13183_v45  ;;  %v4893_v57 = vpop.f32.mrf.mxu2  ;;  %v7359_v54 = vrot.slane %v14043_v35, 2  ;;  %v7357_v42 = vor.u32 %v7356_v20, %v7355_v14  ;;  %v13296_v8 = vsel %vm2241_vm2, %v7059_v59, %v7061_v39 }
 0x527   : > { %6055 = vmatmul.bf16.vlgmr.msrb.gmra.mxu2 %v5946_v38  ;;  %v4894_v45 = vadd.f32 %v4893_v57, %v4536_v17  ;;  %14256 = vst [vmem:[#allocation15_spill] sm:$0xff] %v13296_v8  ;;  %v14257_v38 = vshll.u32 %v13264_v23, 16  ;;  %v6724_v35 = vsel %vm1808_vm4, %v13214_v61, %v6723_v11  ;;  %v5592_v57 = vrot.slane %v5590_v43, 1 }
 0x528   : > { %v13301_v10 = vsel %vm3095_vm3, %v7353_v21, %v7357_v42  ;;  %v6209_v17 = vrot.slane %v6207_v55, 2  ;;  %v5588_v8 = vor.u32 %v5586_v30, %v13237_v53  ;;  %v6213_v37 = vor.u32 %v6212_v6, %v6211_v33 }
 0x529   : > { %v7360_v52 = vrot.slane %v14257_v38, 3  ;;  %v4539_v32 = vpop.f32.mrf.mxu1  ;;  %14258 = vst [vmem:[#allocation18_spill] sm:$0xff] %v13301_v10  ;;  %v5947_v33 = vrot.slane %v13262_v27, 1 }
 0x52a   : > { %v5593_v61 = vsel %vm541_vm0, %v5588_v8, %v5592_v57  ;;  %v6210_v55 = vor.u32 %v6209_v17, %v6206_v12  ;;  %v14262_v12 = vshrl.u32 %v12859_v56, 16  ;;  %v14263_v8 = vshll.u32 %v12859_v56, 16  ;;  %v13331_v17 = vld [vmem:[#allocation2 + $0x24] sm:$0xff]  ;;  %v10114_v56 = vld [vmem:[%s13997_s6 + $0x30] sm:$0xff] }
 0x52b   : > { %v6525_v14 = vld [vmem:[#allocation2 + $0xa4] sm:$0x3]  ;;  %v13305_v20 = vor.u32 %v7360_v52, %v7359_v54  ;;  %8000 = vmatpush.bf16.msra.mxu3 %v10114_v56 }
 0x52c   : > { %6920 = vmatmul.bf16.gmra.mxu0 %v6724_v35  ;;  %v6616_v49 = vunpack.c.l.b16 %v6525_v14  ;;  %v6214_v53 = vsel %vm1808_vm4, %v6210_v55, %v6213_v37  ;;  %v6728_v6 = vrot.slane %v14262_v12, 1  ;;  %v6216_v12 = vrot.slane %v5590_v43, 2 }
 0x52d   : > { %14259 = vst [vmem:[#allocation17_spill] sm:$0xff] %v13305_v20  ;;  %v5348_v59 = vpop.f32.mrf.mxu3  ;;  %v13310_v50 = vsel %vm3095_vm3, %v7357_v42, %v13305_v20  ;;  %v5949_v20 = vrot.slane %v13331_v17, 1 }
 0x52e   : > { %14260 = vst [vmem:[#allocation21_spill] sm:$0xff] %v13310_v50  ;;  %v13313_v21 = vadd.f32 %v5348_v59, %v13217_v13  ;;  %v13315_v38 = vpack.c.b16 %v6616_v49, %v6616_v49  ;;  %v4896_v54 = vpop.f32.mrf.mxu2  ;;  %v10088_v13 = vld [vmem:[%s13995_s4 + $0x230] sm:$0xff]  ;;  %v5594_v49 = vshrl.u32 %v13262_v27, 16 }
 0x52f   : > { %v4897_v35 = vadd.f32 %v4896_v54, %v4539_v32  ;;  %v6731_v32 = vrot.slane %v14263_v8, 2  ;;  %7439 = vmatpush.bf16.msra.mxu2 %v10088_v13 }
 0x530   : > { %5801 = vmatmul.bf16.gmra.mxu1 %v5593_v61  ;;  %v7063_v52 = vrot.slane %v13315_v38, 2  ;;  %v14264_v61 = vrot.slane %v13202_v0, 1  ;;  %v6215_v13 = vrot.slane %v5594_v49, 1 }
 0x531   : > { %v4541_v30 = vpop.f32.mrf.mxu1  ;;  %v6732_v55 = vor.u32 %v6731_v32, %v6728_v6  ;;  %v5596_v32 = vor.u32 %v5594_v49, %v5592_v57  ;;  %v13357_v49 = vld [vmem:[#allocation2 + $0x2c] sm:$0xff] }
 0x532   : > { %6362 = vmatmul.bf16.vlgmr.msrb.gmra.mxu3 %v6214_v53  ;;  %v13325_v42 = vsel %vm2241_vm2, %v7061_v39, %v7063_v52  ;;  %v5948_v39 = vsel %vm1097_vm1, %v14264_v61, %v5947_v33  ;;  %v5598_v52 = vshll.u32 %v13331_v17, 16 }
 0x533   : > { %14261 = vst [vmem:[#allocation14_spill] sm:$0xff] %v13325_v42  ;;  %v6733_v27 = vsel %vm1808_vm4, %v6723_v11, %v6732_v55  ;;  %v14265_v11 = vshrl.u32 %v12918_v7, 16 }
 0x534   : > { %v5600_v8 = vrot.slane %v5598_v52, 1 }
 0x535   : > { %v5351_v14 = vpop.f32.mrf.mxu3 }
 0x536   : > { %v13335_v59 = vadd.f32 %v5351_v14, %v13251_v4  ;;  %v4898_v54 = vpop.f32.mrf.mxu2  ;;  %v10080_v4 = vld [vmem:[%s13995_s4 + $0x1f0] sm:$0xff]  ;;  %v6217_v14 = vor.u32 %v6216_v12, %v6215_v13  ;;  %v5602_v13 = vshrl.u32 %v13331_v17, 16 }
 0x537   : > { %6060 = vmatmul.bf16.gmra.mxu2 %v5948_v39  ;;  %v4899_v53 = vadd.f32 %v4898_v54, %v4541_v30  ;;  %7132 = vmatpush.bf16.msra.mxu1 %v10080_v4  ;;  %v5601_v30 = vsel %vm541_vm0, %v5596_v32, %v5600_v8  ;;  %v6737_v4 = vrot.slane %v14265_v11, 1  ;;  %v5606_v32 = vshll.u32 %v13357_v49, 16 }
 0x538   : > { %v6218_v54 = vsel %vm1808_vm4, %v6213_v37, %v6217_v14  ;;  %v5604_v50 = vor.u32 %v5602_v13, %v5600_v8  ;;  %v14269_v8 = vshll.u32 %v12986_v31, 16 }
 0x539   : > { %v4544_v0 = vpop.f32.mrf.mxu1 }
 0x53c   : > { %6925 = vmatmul.bf16.gmra.mxu0 %v6733_v27  ;;  %v14266_v27 = vshll.u32 %v12918_v7, 16 }
 0x53d   : > { %v5353_v6 = vpop.f32.mrf.mxu3 }
 0x53e   : > { %v13348_v61 = vadd.f32 %v5353_v6, %v4894_v45  ;;  %v4901_v39 = vpop.f32.mrf.mxu2  ;;  %v6740_v57 = vrot.slane %v14266_v27, 2  ;;  %v5608_v27 = vrot.slane %v5606_v32, 1 }
 0x53f   : > { %v4902_v43 = vadd.f32 %v4901_v39, %v4544_v0  ;;  %v5950_v0 = vsel %vm1097_vm1, %v5947_v33, %v5949_v20  ;;  %v6219_v39 = vrot.slane %v5602_v13, 1  ;;  %v6749_v13 = vrot.slane %v14269_v8, 2 }
 0x540   : > { %5806 = vmatmul.bf16.gmra.mxu1 %v5601_v30  ;;  %v6741_v37 = vor.u32 %v6740_v57, %v6737_v4  ;;  %v5609_v33 = vsel %vm541_vm0, %v5604_v50, %v5608_v27  ;;  %v5610_v50 = vshrl.u32 %v13357_v49, 16 }
 0x541   : > { %v4546_v56 = vpop.f32.mrf.mxu1 }
 0x542   : > { %6367 = vmatmul.bf16.gmra.mxu3 %v6218_v54  ;;  %v6220_v54 = vrot.slane %v5598_v52, 2  ;;  %v6742_v7 = vsel %vm1808_vm4, %v6732_v55, %v6741_v37  ;;  %v5951_v55 = vrot.slane %v13357_v49, 1  ;;  %v5612_v8 = vor.u32 %v5610_v50, %v5608_v27 }
 0x544   : > { %v6221_v17 = vor.u32 %v6220_v54, %v6219_v39  ;;  %v13376_v39 = vld [vmem:[#allocation2 + $0x34] sm:$0xff]  ;;  %v5952_v54 = vsel %vm1097_vm1, %v5949_v20, %v5951_v55 }
 0x545   : > { %v5356_v45 = vpop.f32.mrf.mxu3 }
 0x546   : > { %v13360_v12 = vadd.f32 %v5356_v45, %v4897_v35  ;;  %v4903_v6 = vpop.f32.mrf.mxu2  ;;  %v13365_v35 = vpop.f32.mrf.mxu0 }
 0x547   : > { %6065 = vmatmul.bf16.gmra.mxu2 %v5950_v0  ;;  %v4904_v30 = vadd.f32 %v4903_v6, %v4546_v56  ;;  %14267 = vst [vmem:[#allocation20_spill] sm:$0xff] %v13365_v35  ;;  %v6222_v56 = vsel %vm1808_vm4, %v6217_v14, %v6221_v17  ;;  %v14268_v0 = vshrl.u32 %v12986_v31, 16  ;;  %v6224_v31 = vrot.slane %v5606_v32, 2 }
 0x549   : > { %v4549_v11 = vpop.f32.mrf.mxu1  ;;  %v6746_v6 = vrot.slane %v14268_v0, 1  ;;  %v10087_v0 = vld [vmem:[%s13995_s4 + $0x228] sm:$0xff] }
 0x54a   : > { %7440 = vmatpush.bf16.msra.mxu2 %v10087_v0 }
 0x54b   : > { %v6750_v14 = vor.u32 %v6749_v13, %v6746_v6 }
 0x54c   : > { %6930 = vmatmul.bf16.gmra.mxu0 %v6742_v7  ;;  %v5614_v7 = vshll.u32 %v13376_v39, 16 }
 0x54d   : > { %v5358_v42 = vpop.f32.mrf.mxu3  ;;  %v6751_v20 = vsel %vm1808_vm4, %v6741_v37, %v6750_v14 }
 0x54e   : > { %v13367_v45 = vadd.f32 %v5358_v42, %v4899_v53  ;;  %v4906_v4 = vpop.f32.mrf.mxu2  ;;  %v5616_v6 = vrot.slane %v5614_v7, 1 }
 0x54f   : > { %v4907_v57 = vadd.f32 %v4906_v4, %v4549_v11 }
 0x550   : > { %5811 = vmatmul.bf16.gmra.mxu1 %v5609_v33  ;;  %v13383_v33 = vpop.f32.mrf.mxu0 }
 0x551   : > { %v4551_v52 = vpop.f32.mrf.mxu1  ;;  %14270 = vst [vmem:[#allocation23_spill] sm:$0xff] %v13383_v33  ;;  %v14272_v33 = vshrl.u32 %v13045_v24, 16 }
 0x552   : > { %6372 = vmatmul.bf16.gmra.mxu3 %v6222_v56  ;;  %v6223_v56 = vrot.slane %v5610_v50, 1 }
 0x553   : > { %v6755_v27 = vrot.slane %v14272_v33, 1  ;;  %v6228_v33 = vrot.slane %v5614_v7, 2 }
 0x554   : > { %v6225_v13 = vor.u32 %v6224_v31, %v6223_v56  ;;  %v13406_v56 = vld [vmem:[#allocation2 + $0x3c] sm:$0xff] }
 0x555   : > { %v5361_v42 = vpop.f32.mrf.mxu3 }
 0x556   : > { %v13379_v53 = vadd.f32 %v5361_v42, %v4902_v43  ;;  %v4908_v11 = vpop.f32.mrf.mxu2  ;;  %v10113_v43 = vld [vmem:[%s13997_s6 + $0x28] sm:$0xff]  ;;  %v6226_v37 = vsel %vm1808_vm4, %v6221_v17, %v6225_v13 }
 0x557   : > { %6070 = vmatmul.bf16.gmra.mxu2 %v5952_v54  ;;  %v4909_v4 = vadd.f32 %v4908_v11, %v4551_v52  ;;  %8001 = vmatpush.bf16.msra.mxu3 %v10113_v43  ;;  %v10079_v52 = vld [vmem:[%s13995_s4 + $0x1e8] sm:$0xff]  ;;  %v5617_v54 = vsel %vm541_vm0, %v5612_v8, %v5616_v6 }
 0x558   : > { %7133 = vmatpush.bf16.msra.mxu1 %v10079_v52  ;;  %v13399_v0 = vpop.f32.mrf.mxu0  ;;  %v5618_v52 = vshrl.u32 %v13376_v39, 16 }
 0x559   : > { %v4554_v49 = vpop.f32.mrf.mxu1  ;;  %14271 = vst [vmem:[#allocation22_spill] sm:$0xff] %v13399_v0 }
 0x55c   : > { %6935 = vmatmul.bf16.gmra.mxu0 %v6751_v20  ;;  %v5953_v20 = vrot.slane %v13376_v39, 1 }
 0x55d   : > { %v5363_v32 = vpop.f32.mrf.mxu3 }
 0x55e   : > { %v13395_v42 = vadd.f32 %v5363_v32, %v4904_v30  ;;  %v4911_v11 = vpop.f32.mrf.mxu2  ;;  %v14273_v30 = vshll.u32 %v13045_v24, 16  ;;  %v5954_v17 = vsel %vm1097_vm1, %v5951_v55, %v5953_v20 }
 0x55f   : > { %v4912_v10 = vadd.f32 %v4911_v11, %v4554_v49 }
 0x560   : > { %5816 = vmatmul.bf16.gmra.mxu1 %v5617_v54  ;;  %v6758_v50 = vrot.slane %v14273_v30, 2  ;;  %v5622_v54 = vshll.u32 %v13406_v56, 16  ;;  %v13414_v35 = vpop.f32.mrf.mxu0 }
 0x561   : > { %v4556_v43 = vpop.f32.mrf.mxu1  ;;  %14275 = vst [vmem:[#allocation19_spill] sm:$0xff] %v13414_v35 }
 0x562   : > { %6377 = vmatmul.bf16.gmra.mxu3 %v6226_v37  ;;  %v6759_v32 = vor.u32 %v6758_v50, %v6755_v27  ;;  %v6227_v37 = vrot.slane %v5618_v52, 1  ;;  %v5624_v30 = vrot.slane %v5622_v54, 1 }
 0x564   : > { %v6760_v24 = vsel %vm1808_vm4, %v6750_v14, %v6759_v32  ;;  %v5955_v14 = vrot.slane %v13406_v56, 1 }
 0x565   : > { %v5366_v31 = vpop.f32.mrf.mxu3 }
 0x566   : > { %v13409_v49 = vadd.f32 %v5366_v31, %v4907_v57  ;;  %v4913_v8 = vpop.f32.mrf.mxu2  ;;  %v5620_v57 = vor.u32 %v5618_v52, %v5616_v6  ;;  %v6229_v31 = vor.u32 %v6228_v33, %v6227_v37  ;;  %v13425_v52 = vld [vmem:[#allocation2 + $0x44] sm:$0xff]  ;;  %v5626_v37 = vshrl.u32 %v13406_v56, 16 }
 0x567   : > { %6075 = vmatmul.bf16.gmra.mxu2 %v5954_v17  ;;  %v4914_v11 = vadd.f32 %v4913_v8, %v4556_v43  ;;  %v14277_v17 = vshrl.u32 %v13112_v26, 16 }
 0x568   : > { %14274 = vst [vmem:[#allocation26_spill] sm:$0xff] %v13409_v49  ;;  %v5625_v55 = vsel %vm541_vm0, %v5620_v57, %v5624_v30  ;;  %v6230_v43 = vsel %vm1808_vm4, %v6225_v13, %v6229_v31  ;;  %v13428_v33 = vpop.f32.mrf.mxu0  ;;  %v5956_v13 = vsel %vm1097_vm1, %v5953_v20, %v5955_v14  ;;  %v10086_v20 = vld [vmem:[%s13995_s4 + $0x220] sm:$0xff] }
 0x569   : > { %v4559_v0 = vpop.f32.mrf.mxu1  ;;  %v6764_v8 = vrot.slane %v14277_v17, 1  ;;  %14279 = vst [vmem:[#allocation28_spill] sm:$0xff] %v13428_v33  ;;  %7441 = vmatpush.bf16.msra.mxu2 %v10086_v20 }
 0x56c   : > { %6940 = vmatmul.bf16.gmra.mxu0 %v6760_v24  ;;  %v14278_v24 = vshll.u32 %v13112_v26, 16  ;;  %v6232_v26 = vrot.slane %v5622_v54, 2 }
 0x56d   : > { %v5368_v39 = vpop.f32.mrf.mxu3 }
 0x56e   : > { %v13416_v49 = vadd.f32 %v5368_v39, %v4909_v4  ;;  %v4916_v27 = vpop.f32.mrf.mxu2  ;;  %v6767_v6 = vrot.slane %v14278_v24, 2 }
 0x56f   : > { %v4917_v50 = vadd.f32 %v4916_v27, %v4559_v0 }
 0x570   : > { %14276 = vst [vmem:[#allocation25_spill] sm:$0xff] %v13416_v49  ;;  %5821 = vmatmul.bf16.gmra.mxu1 %v5625_v55  ;;  %v6768_v39 = vor.u32 %v6767_v6, %v6764_v8  ;;  %v5630_v55 = vshll.u32 %v13425_v52, 16  ;;  %v5628_v49 = vor.u32 %v5626_v37, %v5624_v30 }
 0x571   : > { %v4561_v7 = vpop.f32.mrf.mxu1 }
 0x572   : > { %6382 = vmatmul.bf16.gmra.mxu3 %v6230_v43  ;;  %v6231_v43 = vrot.slane %v5626_v37, 1  ;;  %v6769_v17 = vsel %vm1808_vm4, %v6759_v32, %v6768_v39  ;;  %v5632_v35 = vrot.slane %v5630_v55, 1  ;;  %v13444_v32 = vpop.f32.mrf.mxu0  ;;  %v14281_v37 = vshrl.u32 %v13185_v22, 16 }
 0x573   : > { %14280 = vst [vmem:[#allocation27_spill] sm:$0xff] %v13444_v32 }
 0x574   : > { %v6233_v33 = vor.u32 %v6232_v26, %v6231_v43  ;;  %v5633_v54 = vsel %vm541_vm0, %v5628_v49, %v5632_v35  ;;  %v14282_v49 = vshll.u32 %v13185_v22, 16  ;;  %v13455_v43 = vld [vmem:[#allocation2 + $0x4c] sm:$0xff]  ;;  %v6236_v22 = vrot.slane %v5630_v55, 2 }
 0x575   : > { %v5371_v4 = vpop.f32.mrf.mxu3  ;;  %v5959_v55 = vrot.slane %v13455_v43, 1 }
 0x576   : > { %v13430_v0 = vadd.f32 %v5371_v4, %v4912_v10  ;;  %v4918_v57 = vpop.f32.mrf.mxu2  ;;  %v6234_v30 = vsel %vm1808_vm4, %v6229_v31, %v6233_v33  ;;  %v5957_v4 = vrot.slane %v13425_v52, 1  ;;  %v5634_v31 = vshrl.u32 %v13425_v52, 16 }
 0x577   : > { %6080 = vmatmul.bf16.gmra.mxu2 %v5956_v13  ;;  %v4919_v27 = vadd.f32 %v4918_v57, %v4561_v7  ;;  %v10112_v7 = vld [vmem:[%s13997_s6 + $0x20] sm:$0xff]  ;;  %v6773_v13 = vrot.slane %v14281_v37, 1  ;;  %v6776_v57 = vrot.slane %v14282_v49, 2 }
 0x578   : > { %8002 = vmatpush.bf16.msra.mxu3 %v10112_v7 }
 0x579   : > { %v4564_v24 = vpop.f32.mrf.mxu1  ;;  %v6777_v20 = vor.u32 %v6776_v57, %v6773_v13  ;;  %v14286_v57 = vshrl.u32 %v13243_v46, 16 }
 0x57a   : > { %v13462_v37 = vpop.f32.mrf.mxu0 }
 0x57b   : > { %14284 = vst [vmem:[#allocation33_spill] sm:$0xff] %v13462_v37 }
 0x57c   : > { %6945 = vmatmul.bf16.gmra.mxu0 %v6769_v17 }
 0x57d   : > { %v5373_v56 = vpop.f32.mrf.mxu3 }
 0x57e   : > { %v13435_v10 = vadd.f32 %v5373_v56, %v4914_v11  ;;  %v4921_v8 = vpop.f32.mrf.mxu2  ;;  %v10078_v11 = vld [vmem:[%s13995_s4 + $0x1e0] sm:$0xff]  ;;  %v5958_v56 = vsel %vm1097_vm1, %v5955_v14, %v5957_v4 }
 0x57f   : > { %v4922_v6 = vadd.f32 %v4921_v8, %v4564_v24  ;;  %7134 = vmatpush.bf16.msra.mxu1 %v10078_v11  ;;  %v6778_v11 = vsel %vm1808_vm4, %v6768_v39, %v6777_v20  ;;  %v14287_v39 = vshll.u32 %v13243_v46, 16 }
 0x580   : > { %5826 = vmatmul.bf16.gmra.mxu1 %v5633_v54  ;;  %v5638_v54 = vshll.u32 %v13455_v43, 16 }
 0x581   : > { %v4566_v26 = vpop.f32.mrf.mxu1 }
 0x582   : > { %6387 = vmatmul.bf16.gmra.mxu3 %v6234_v30  ;;  %v6235_v30 = vrot.slane %v5634_v31, 1  ;;  %v5640_v49 = vrot.slane %v5638_v54, 1 }
 0x585   : > { %v5376_v17 = vpop.f32.mrf.mxu3 }
 0x586   : > { %v13458_v24 = vadd.f32 %v5376_v17, %v4917_v50  ;;  %v4923_v7 = vpop.f32.mrf.mxu2  ;;  %v5636_v50 = vor.u32 %v5634_v31, %v5632_v35  ;;  %v6237_v17 = vor.u32 %v6236_v22, %v6235_v30  ;;  %v13476_v35 = vpop.f32.mrf.mxu0  ;;  %v5642_v30 = vshrl.u32 %v13455_v43, 16 }
 0x587   : > { %6085 = vmatmul.bf16.gmra.mxu2 %v5958_v56  ;;  %v4924_v8 = vadd.f32 %v4923_v7, %v4566_v26  ;;  %v6782_v26 = vrot.slane %v14286_v57, 1  ;;  %v6785_v56 = vrot.slane %v14287_v39, 2  ;;  %v13474_v7 = vld [vmem:[#allocation2 + $0x54] sm:$0xff]  ;;  %14288 = vst [vmem:[#allocation29_spill] sm:$0xff] %v13476_v35 }
 0x588   : > { %14283 = vst [vmem:[#allocation24_spill] sm:$0xff] %v13458_v24  ;;  %v5641_v14 = vsel %vm541_vm0, %v5636_v50, %v5640_v49  ;;  %v6238_v13 = vsel %vm1808_vm4, %v6233_v33, %v6237_v17  ;;  %v5960_v33 = vsel %vm1097_vm1, %v5957_v4, %v5959_v55  ;;  %v6239_v50 = vrot.slane %v5642_v30, 1 }
 0x58c   : > { %6950 = vmatmul.bf16.gmra.mxu0 %v6778_v11  ;;  %v6786_v11 = vor.u32 %v6785_v56, %v6782_v26 }
 0x58d   : > { %v4569_v32 = vpop.f32.mrf.mxu1  ;;  %v5378_v52 = vpop.f32.mrf.mxu3 }
 0x58e   : > { %v13465_v24 = vadd.f32 %v5378_v52, %v4919_v27  ;;  %v5646_v52 = vshll.u32 %v13474_v7, 16  ;;  %v6787_v57 = vsel %vm1808_vm4, %v6777_v20, %v6786_v11 }
 0x590   : > { %14285 = vst [vmem:[#allocation32_spill] sm:$0xff] %v13465_v24  ;;  %5831 = vmatmul.bf16.gmra.mxu1 %v5641_v14  ;;  %v6240_v14 = vrot.slane %v5638_v54, 2  ;;  %v5648_v39 = vrot.slane %v5646_v52, 1  ;;  %v5644_v24 = vor.u32 %v5642_v30, %v5640_v49  ;;  %v5961_v49 = vrot.slane %v13474_v7, 1 }
 0x591   : > { %v14289_v30 = vshrl.u32 %v13264_v23, 16 }
 0x592   : > { %6392 = vmatmul.bf16.gmra.mxu3 %v6238_v13  ;;  %v6241_v43 = vor.u32 %v6240_v14, %v6239_v50  ;;  %v5649_v26 = vsel %vm541_vm0, %v5644_v24, %v5648_v39  ;;  %v10111_v24 = vld [vmem:[%s13997_s6 + $0x18] sm:$0xff]  ;;  %v5650_v50 = vshrl.u32 %v13474_v7, 16  ;;  %v6244_v7 = vrot.slane %v5646_v52, 2 }
 0x593   : > { %8003 = vmatpush.bf16.msra.mxu3 %v10111_v24  ;;  %v6801_v52 = vshll.u32 %v13315_v38, 16 }
 0x594   : > { %v6242_v54 = vsel %vm1808_vm4, %v6237_v17, %v6241_v43  ;;  %v5652_v24 = vor.u32 %v5650_v50, %v5648_v39 }
 0x595   : > { %v4571_v27 = vpop.f32.mrf.mxu1  ;;  %v5381_v31 = vpop.f32.mrf.mxu3 }
 0x596   : > { %v13479_v22 = vadd.f32 %v5381_v31, %v4922_v6  ;;  %v13484_v6 = vpop.f32.mrf.mxu0 }
 0x597   : > { %6090 = vmatmul.bf16.gmra.mxu2 %v5960_v33  ;;  %v6791_v33 = vrot.slane %v14289_v30, 1 }
 0x59a   : > { %v4926_v46 = vpop.f32.mrf.mxu2 }
 0x59b   : > { %v4927_v13 = vadd.f32 %v4926_v46, %v4569_v32  ;;  %v10085_v32 = vld [vmem:[%s13995_s4 + $0x218] sm:$0xff]  ;;  %v5962_v46 = vsel %vm1097_vm1, %v5959_v55, %v5961_v49 }
 0x59c   : > { %6955 = vmatmul.bf16.gmra.mxu0 %v6787_v57  ;;  %7442 = vmatpush.bf16.msra.mxu2 %v10085_v32  ;;  %v6243_v32 = vrot.slane %v5650_v50, 1 }
 0x59d   : > { %v5797_v35 = vpop.f32.mrf.mxu1  ;;  %v5383_v37 = vpop.f32.mrf.mxu3 }
 0x59e   : > { %v5887_v4 = vadd.f32 %v5797_v35, %v12698_v62  ;;  %v13487_v31 = vadd.f32 %v5383_v37, %v4924_v8  ;;  %v14290_v62 = vshll.u32 %v13264_v23, 16  ;;  %v13499_v37 = vld [vmem:[#allocation2 + $0x5c] sm:$0xff] }
 0x59f   : > { %v10077_v23 = vld [vmem:[%s13995_s4 + $0x1d8] sm:$0xff]  ;;  %v5963_v39 = vrot.slane %v13499_v37, 1 }
 0x5a0   : > { %5836 = vmatmul.bf16.gmra.mxu1 %v5649_v26  ;;  %v6794_v8 = vrot.slane %v14290_v62, 2  ;;  %v5654_v26 = vshll.u32 %v13499_v37, 16 }
 0x5a1   : > { %7135 = vmatpush.bf16.msra.mxu1 %v10077_v23 }
 0x5a2   : > { %v4928_v20 = vpop.f32.mrf.mxu2  ;;  %6397 = vmatmul.bf16.gmra.mxu3 %v6242_v54  ;;  %v6795_v57 = vor.u32 %v6794_v8, %v6791_v33  ;;  %v13513_v54 = vpop.f32.mrf.mxu0 }
 0x5a3   : > { %v4929_v56 = vadd.f32 %v4928_v20, %v4571_v27 }
 0x5a5   : > { %v5799_v17 = vpop.f32.mrf.mxu1  ;;  %v5386_v35 = vpop.f32.mrf.mxu3 }
 0x5a6   : > { %v5888_v27 = vadd.f32 %v5799_v17, %v12736_v44  ;;  %v13506_v14 = vadd.f32 %v5386_v35, %v4927_v13  ;;  %v6796_v44 = vsel %vm1808_vm4, %v6786_v11, %v6795_v57  ;;  %v5656_v13 = vrot.slane %v5654_v26, 1 }
 0x5a7   : > { %6095 = vmatmul.bf16.gmra.mxu2 %v5962_v46  ;;  %v6245_v17 = vor.u32 %v6244_v7, %v6243_v32  ;;  %v6798_v46 = vshrl.u32 %v13315_v38, 16 }
 0x5a8   : > { %v5657_v8 = vsel %vm541_vm0, %v5652_v24, %v5656_v13 }
 0x5a9   : > { %v6800_v32 = vrot.slane %v6798_v46, 1 }
 0x5aa   : > { %v6056_v20 = vpop.f32.mrf.mxu2  ;;  %v13523_v11 = vpop.f32.mrf.mxu0 }
 0x5ab   : > { %v6146_v30 = vadd.f32 %v6056_v20, %v5887_v4  ;;  %v6246_v4 = vsel %vm1808_vm4, %v6241_v43, %v6245_v17  ;;  %14291 = vst [vmem:[#allocation38_spill] sm:$0xff] %v13523_v11  ;;  %v5964_v43 = vsel %vm1097_vm1, %v5961_v49, %v5963_v39 }
 0x5ac   : > { %6960 = vmatmul.bf16.gmra.mxu0 %v6796_v44  ;;  %v5658_v44 = vshrl.u32 %v13499_v37, 16 }
 0x5ad   : > { %v5802_v55 = vpop.f32.mrf.mxu1  ;;  %v5388_v62 = vpop.f32.mrf.mxu3 }
 0x5ae   : > { %v5889_v35 = vadd.f32 %v5802_v55, %v12764_v28  ;;  %v13517_v33 = vadd.f32 %v5388_v62, %v4929_v56  ;;  %v6803_v28 = vrot.slane %v6801_v52, 2  ;;  %v13526_v56 = vld [vmem:[#allocation2 + $0x64] sm:$0xff] }
 0x5af   : > { %v5662_v24 = vshll.u32 %v13526_v56, 16 }
 0x5b0   : > { %5841 = vmatmul.bf16.gmra.mxu1 %v5657_v8  ;;  %v6804_v62 = vor.u32 %v6803_v28, %v6800_v32  ;;  %v6247_v8 = vrot.slane %v5658_v44, 1 }
 0x5b2   : > { %v6058_v23 = vpop.f32.mrf.mxu2  ;;  %6402 = vmatmul.bf16.gmra.mxu3 %v6246_v4  ;;  %v6805_v4 = vsel %vm1808_vm4, %v6795_v57, %v6804_v62  ;;  %v13535_v11 = vpop.f32.mrf.mxu0  ;;  %v5965_v57 = vrot.slane %v13526_v56, 1 }
 0x5b3   : > { %v6147_v50 = vadd.f32 %v6058_v23, %v5888_v27  ;;  %v6248_v27 = vrot.slane %v5654_v26, 2  ;;  %v5664_v23 = vrot.slane %v5662_v24, 1 }
 0x5b5   : > { %v5804_v7 = vpop.f32.mrf.mxu1  ;;  %v6363_v20 = vpop.f32.mrf.mxu3 }
 0x5b6   : > { %v5890_v38 = vadd.f32 %v5804_v7, %v12803_v34  ;;  %v13530_v55 = vadd.f32 %v6363_v20, %v6146_v30  ;;  %v5660_v30 = vor.u32 %v5658_v44, %v5656_v13  ;;  %v6249_v7 = vor.u32 %v6248_v27, %v6247_v8 }
 0x5b7   : > { %6100 = vmatmul.bf16.gmra.mxu2 %v5964_v43  ;;  %v13543_v43 = vld [vmem:[#allocation2 + $0x6c] sm:$0xff]  ;;  %v5666_v13 = vshrl.u32 %v13526_v56, 16  ;;  %v5966_v44 = vsel %vm1097_vm1, %v5963_v39, %v5965_v57  ;;  %v6252_v56 = vrot.slane %v5662_v24, 2 }
 0x5b8   : > { %v5665_v32 = vsel %vm541_vm0, %v5660_v30, %v5664_v23  ;;  %v6250_v26 = vsel %vm1808_vm4, %v6245_v17, %v6249_v7  ;;  %v10084_v17 = vld [vmem:[%s13995_s4 + $0x210] sm:$0xff]  ;;  %v5670_v8 = vshll.u32 %v13543_v43, 16 }
 0x5b9   : > { %7443 = vmatpush.bf16.msra.mxu2 %v10084_v17  ;;  %v6251_v27 = vrot.slane %v5666_v13, 1  ;;  %v5668_v30 = vor.u32 %v5666_v13, %v5664_v23  ;;  %v13566_v17 = vld [vmem:[#allocation2 + $0x74] sm:$0xff]  ;;  %v5674_v23 = vshrl.u32 %v13543_v43, 16 }
 0x5ba   : > { %v6061_v46 = vpop.f32.mrf.mxu2 }
 0x5bb   : > { %v6148_v52 = vadd.f32 %v6061_v46, %v5889_v35 }
 0x5bc   : > { %6965 = vmatmul.bf16.gmra.mxu0 %v6805_v4  ;;  %v5672_v4 = vrot.slane %v5670_v8, 1 }
 0x5bd   : > { %v5807_v37 = vpop.f32.mrf.mxu1  ;;  %v6365_v34 = vpop.f32.mrf.mxu3 }
 0x5be   : > { %v5891_v49 = vadd.f32 %v5807_v37, %v12832_v19  ;;  %v13538_v20 = vadd.f32 %v6365_v34, %v6147_v50 }
 0x5c0   : > { %5846 = vmatmul.bf16.gmra.mxu1 %v5665_v32  ;;  %v6253_v32 = vor.u32 %v6252_v56, %v6251_v27  ;;  %v6255_v27 = vrot.slane %v5674_v23, 1  ;;  %v6256_v56 = vrot.slane %v5670_v8, 2  ;;  %v5969_v8 = vrot.slane %v13566_v17, 1 }
 0x5c2   : > { %v6063_v35 = vpop.f32.mrf.mxu2  ;;  %6407 = vmatmul.bf16.gmra.mxu3 %v6250_v26  ;;  %v6254_v24 = vsel %vm1808_vm4, %v6249_v7, %v6253_v32  ;;  %v5678_v7 = vshll.u32 %v13566_v17, 16 }
 0x5c3   : > { %v6149_v28 = vadd.f32 %v6063_v35, %v5890_v38  ;;  %v10110_v38 = vld [vmem:[%s13997_s6 + $0x10] sm:$0xff] }
 0x5c4   : > { %8004 = vmatpush.bf16.msra.mxu3 %v10110_v38 }
 0x5c5   : > { %v5809_v62 = vpop.f32.mrf.mxu1  ;;  %v6368_v46 = vpop.f32.mrf.mxu3 }
 0x5c6   : > { %v5892_v19 = vadd.f32 %v5809_v62, %v12866_v15  ;;  %v13547_v50 = vadd.f32 %v6368_v46, %v6148_v52  ;;  %v10076_v15 = vld [vmem:[%s13995_s4 + $0x1d0] sm:$0xff]  ;;  %v5673_v62 = vsel %vm541_vm0, %v5668_v30, %v5672_v4 }
 0x5c7   : > { %6105 = vmatmul.bf16.gmra.mxu2 %v5966_v44  ;;  %7136 = vmatpush.bf16.msra.mxu1 %v10076_v15  ;;  %v5967_v44 = vrot.slane %v13543_v43, 1 }
 0x5c9   : > { %v5968_v13 = vsel %vm1097_vm1, %v5965_v57, %v5967_v44 }
 0x5ca   : > { %v6066_v39 = vpop.f32.mrf.mxu2 }
 0x5cb   : > { %v6150_v52 = vadd.f32 %v6066_v39, %v5891_v49 }
 0x5cd   : > { %v5812_v37 = vpop.f32.mrf.mxu1  ;;  %v6370_v34 = vpop.f32.mrf.mxu3 }
 0x5ce   : > { %v5893_v26 = vadd.f32 %v5812_v37, %v12891_v41  ;;  %v13561_v35 = vadd.f32 %v6370_v34, %v6149_v28 }
 0x5d0   : > { %5851 = vmatmul.bf16.gmra.mxu1 %v5673_v62  ;;  %v5676_v62 = vor.u32 %v5674_v23, %v5672_v4  ;;  %v5682_v4 = vshrl.u32 %v13566_v17, 16  ;;  %v5970_v23 = vsel %vm1097_vm1, %v5967_v44, %v5969_v8 }
 0x5d2   : > { %v6068_v46 = vpop.f32.mrf.mxu2  ;;  %6412 = vmatmul.bf16.gmra.mxu3 %v6254_v24  ;;  %v6257_v24 = vor.u32 %v6256_v56, %v6255_v27  ;;  %v6259_v27 = vrot.slane %v5682_v4, 1  ;;  %v6260_v56 = vrot.slane %v5678_v7, 2 }
 0x5d3   : > { %v6151_v49 = vadd.f32 %v6068_v46, %v5892_v19  ;;  %v5680_v19 = vrot.slane %v5678_v7, 1 }
 0x5d4   : > { %v6258_v57 = vsel %vm1808_vm4, %v6253_v32, %v6257_v24 }
 0x5d5   : > { %v5814_v38 = vpop.f32.mrf.mxu1  ;;  %v6373_v15 = vpop.f32.mrf.mxu3  ;;  %v5684_v44 = vor.u32 %v5682_v4, %v5680_v19  ;;  %v13603_v4 = vld [vmem:[#allocation2 + $0x84] sm:$0xff] }
 0x5d6   : > { %v5894_v41 = vadd.f32 %v5814_v38, %v12925_v3  ;;  %v13570_v28 = vadd.f32 %v6373_v15, %v6150_v52  ;;  %v5681_v3 = vsel %vm541_vm0, %v5676_v62, %v5680_v19  ;;  %v6261_v62 = vor.u32 %v6260_v56, %v6259_v27 }
 0x5d7   : > { %6110 = vmatmul.bf16.gmra.mxu2 %v5968_v13 }
 0x5da   : > { %v6071_v39 = vpop.f32.mrf.mxu2 }
 0x5db   : > { %v6152_v37 = vadd.f32 %v6071_v39, %v5893_v26  ;;  %v13580_v26 = vld [vmem:[#allocation2 + $0x7c] sm:$0xff] }
 0x5dc   : > { %v5686_v32 = vshll.u32 %v13580_v26, 16  ;;  %v5971_v19 = vrot.slane %v13580_v26, 1 }
 0x5dd   : > { %v5817_v34 = vpop.f32.mrf.mxu1  ;;  %v6375_v30 = vpop.f32.mrf.mxu3 }
 0x5de   : > { %v5895_v43 = vadd.f32 %v5817_v34, %v12959_v40  ;;  %v13575_v46 = vadd.f32 %v6375_v30, %v6151_v49  ;;  %v5688_v30 = vrot.slane %v5686_v32, 1 }
 0x5e0   : > { %5856 = vmatmul.bf16.gmra.mxu1 %v5681_v3 }
 0x5e2   : > { %v6073_v52 = vpop.f32.mrf.mxu2  ;;  %6417 = vmatmul.bf16.gmra.mxu3 %v6258_v57  ;;  %v10075_v57 = vld [vmem:[%s13995_s4 + $0x1c8] sm:$0xff] }
 0x5e3   : > { %v6153_v38 = vadd.f32 %v6073_v52, %v5894_v41  ;;  %v10083_v41 = vld [vmem:[%s13995_s4 + $0x208] sm:$0xff]  ;;  %v6262_v52 = vsel %vm1808_vm4, %v6257_v24, %v6261_v62  ;;  %7137 = vmatpush.bf16.msra.mxu1 %v10075_v57  ;;  %v5694_v24 = vshll.u32 %v13603_v4, 16 }
 0x5e4   : > { %7444 = vmatpush.bf16.msra.mxu2 %v10083_v41  ;;  %v5972_v41 = vsel %vm1097_vm1, %v5969_v8, %v5971_v19 }
 0x5e5   : > { %v5819_v15 = vpop.f32.mrf.mxu1  ;;  %v6378_v13 = vpop.f32.mrf.mxu3 }
 0x5e6   : > { %v5896_v40 = vadd.f32 %v5819_v15, %v12993_v2  ;;  %v13584_v49 = vadd.f32 %v6378_v13, %v6152_v37  ;;  %v10109_v2 = vld [vmem:[%s13997_s6 + $0x8] sm:$0xff] }
 0x5e7   : > { %6115 = vmatmul.bf16.gmra.mxu2 %v5970_v23  ;;  %8005 = vmatpush.bf16.msra.mxu3 %v10109_v2  ;;  %v5690_v23 = vshrl.u32 %v13580_v26, 16  ;;  %v6264_v2 = vrot.slane %v5686_v32, 2  ;;  %v5973_v32 = vrot.slane %v13603_v4, 1 }
 0x5ea   : > { %v6076_v39 = vpop.f32.mrf.mxu2 }
 0x5eb   : > { %v6154_v34 = vadd.f32 %v6076_v39, %v5895_v43  ;;  %v5689_v43 = vsel %vm541_vm0, %v5684_v44, %v5688_v30  ;;  %v6263_v39 = vrot.slane %v5690_v23, 1 }
 0x5ed   : > { %v5822_v17 = vpop.f32.mrf.mxu1  ;;  %v6380_v37 = vpop.f32.mrf.mxu3 }
 0x5ee   : > { %v5897_v3 = vadd.f32 %v5822_v17, %v13018_v29  ;;  %v13595_v7 = vadd.f32 %v6380_v37, %v6153_v38 }
 0x5f0   : > { %5861 = vmatmul.bf16.gmra.mxu1 %v5689_v43  ;;  %v5692_v43 = vor.u32 %v5690_v23, %v5688_v30  ;;  %v5698_v30 = vshrl.u32 %v13603_v4, 16  ;;  %v5974_v23 = vsel %vm1097_vm1, %v5971_v19, %v5973_v32  ;;  %v10108_v19 = vld [vmem:[%s13997_s6] sm:$0xff] }
 0x5f1   : > { %8006 = vmatpush.bf16.msra.mxu3 %v10108_v19  ;;  %v5463_v19 = vld [vmem:[#allocation2 + $0x9c] sm:$0x1] }
 0x5f2   : > { %v6078_v15 = vpop.f32.mrf.mxu2  ;;  %6422 = vmatmul.bf16.gmra.mxu3 %v6262_v52  ;;  %v6265_v52 = vor.u32 %v6264_v2, %v6263_v39  ;;  %v6267_v39 = vrot.slane %v5698_v30, 1  ;;  %v6268_v2 = vrot.slane %v5694_v24, 2 }
 0x5f3   : > { %v6155_v13 = vadd.f32 %v6078_v15, %v5896_v40  ;;  %v5696_v40 = vrot.slane %v5694_v24, 1 }
 0x5f4   : > { %v6266_v8 = vsel %vm1808_vm4, %v6261_v62, %v6265_v52 }
 0x5f5   : > { %v5824_v29 = vpop.f32.mrf.mxu1  ;;  %v6383_v38 = vpop.f32.mrf.mxu3 }
 0x5f6   : > { %v5898_v27 = vadd.f32 %v5824_v29, %v13052_v60  ;;  %v13607_v56 = vadd.f32 %v6383_v38, %v6154_v34  ;;  %v5697_v60 = vsel %vm541_vm0, %v5692_v43, %v5696_v40 }
 0x5f7   : > { %6120 = vmatmul.bf16.gmra.mxu2 %v5972_v41 }
 0x5fa   : > { %v6081_v17 = vpop.f32.mrf.mxu2 }
 0x5fb   : > { %v6156_v37 = vadd.f32 %v6081_v17, %v5897_v3  ;;  %v13617_v3 = vld [vmem:[#allocation2 + $0x8c] sm:$0xff] }
 0x5fc   : > { %v5702_v62 = vshll.u32 %v13617_v3, 16 }
 0x5fd   : > { %v5827_v44 = vpop.f32.mrf.mxu1  ;;  %v6385_v57 = vpop.f32.mrf.mxu3 }
 0x5fe   : > { %v5899_v26 = vadd.f32 %v5827_v44, %v13088_v47  ;;  %v13612_v15 = vadd.f32 %v6385_v57, %v6155_v13 }
 0x600   : > { %5866 = vmatmul.bf16.gmra.mxu1 %v5697_v60  ;;  %v5700_v60 = vor.u32 %v5698_v30, %v5696_v40 }
 0x602   : > { %v6083_v34 = vpop.f32.mrf.mxu2  ;;  %6427 = vmatmul.bf16.gmra.mxu3 %v6266_v8  ;;  %v6269_v8 = vor.u32 %v6268_v2, %v6267_v39 }
 0x603   : > { %v6157_v29 = vadd.f32 %v6083_v34, %v5898_v27  ;;  %v5704_v27 = vrot.slane %v5702_v62, 1 }
 0x605   : > { %v5829_v38 = vpop.f32.mrf.mxu1  ;;  %v6388_v41 = vpop.f32.mrf.mxu3  ;;  %v5705_v24 = vsel %vm541_vm0, %v5700_v60, %v5704_v27 }
 0x606   : > { %v5900_v47 = vadd.f32 %v5829_v38, %v13122_v63  ;;  %v13621_v13 = vadd.f32 %v6388_v41, %v6156_v37  ;;  %v10082_v63 = vld [vmem:[%s13995_s4 + $0x200] sm:$0xff]  ;;  %v6270_v37 = vsel %vm1808_vm4, %v6265_v52, %v6269_v8  ;;  %v13640_v38 = vld [vmem:[#allocation2 + $0x94] sm:$0xff] }
 0x607   : > { %6125 = vmatmul.bf16.gmra.mxu2 %v5974_v23  ;;  %v5706_v23 = vshrl.u32 %v13617_v3, 16 }
 0x608   : > { %7445 = vmatpush.bf16.msra.mxu2 %v10082_v63 }
 0x60a   : > { %v6086_v17 = vpop.f32.mrf.mxu2 }
 0x60b   : > { %v6158_v44 = vadd.f32 %v6086_v17, %v5899_v26  ;;  %v5975_v26 = vrot.slane %v13617_v3, 1  ;;  %v5710_v17 = vshll.u32 %v13640_v38, 16 }
 0x60d   : > { %v5832_v57 = vpop.f32.mrf.mxu1  ;;  %v6390_v43 = vpop.f32.mrf.mxu3  ;;  %v5976_v2 = vsel %vm1097_vm1, %v5973_v32, %v5975_v26  ;;  %v5712_v63 = vrot.slane %v5710_v17, 1  ;;  %v5554_v32 = vunpack.c.l.b16 %v5463_v19 }
 0x60e   : > { %v5901_v4 = vadd.f32 %v5832_v57, %v13147_v48  ;;  %v13626_v34 = vadd.f32 %v6390_v43, %v6157_v29  ;;  %v10074_v48 = vld [vmem:[%s13995_s4 + $0x1c0] sm:$0xff]  ;;  %v6271_v57 = vrot.slane %v5706_v23, 1  ;;  %v6272_v43 = vrot.slane %v5702_v62, 2 }
 0x60f   : > { %7138 = vmatpush.bf16.msra.mxu1 %v10074_v48  ;;  %v5708_v48 = vor.u32 %v5706_v23, %v5704_v27  ;;  %v5977_v62 = vrot.slane %v13640_v38, 1  ;;  %v5714_v27 = vshrl.u32 %v13640_v38, 16 }
 0x610   : > { %5871 = vmatmul.bf16.gmra.mxu1 %v5705_v24 }
 0x611   : > { %v5978_v23 = vsel %vm1097_vm1, %v5975_v26, %v5977_v62 }
 0x612   : > { %v6088_v40 = vpop.f32.mrf.mxu2  ;;  %6432 = vmatmul.bf16.gmra.mxu3 %v6270_v37 }
 0x613   : > { %v6159_v29 = vadd.f32 %v6088_v40, %v5900_v47  ;;  %v6273_v40 = vor.u32 %v6272_v43, %v6271_v57  ;;  %v6275_v43 = vrot.slane %v5714_v27, 1 }
 0x615   : > { %v5834_v41 = vpop.f32.mrf.mxu1  ;;  %v6393_v30 = vpop.f32.mrf.mxu3 }
 0x616   : > { %v5902_v39 = vadd.f32 %v5834_v41, %v13178_v58  ;;  %v13644_v52 = vadd.f32 %v6393_v30, %v6158_v44  ;;  %v5713_v44 = vsel %vm541_vm0, %v5708_v48, %v5712_v63  ;;  %v6274_v41 = vsel %vm1808_vm4, %v6269_v8, %v6273_v40 }
 0x617   : > { %6130 = vmatmul.bf16.gmra.mxu2 %v5976_v2  ;;  %v5573_v2 = vpack.c.b16 %v5554_v32, %v5554_v32  ;;  %v6276_v8 = vrot.slane %v5710_v17, 2  ;;  %v5716_v48 = vor.u32 %v5714_v27, %v5712_v63 }
 0x618   : > { %14292 = vst [vmem:[#allocation37_spill] sm:$0xff] %v13644_v52 }
 0x619   : > { %v5718_v57 = vshll.u32 %v5573_v2, 16  ;;  %v5979_v63 = vrot.slane %v5573_v2, 1 }
 0x61a   : > { %v6091_v60 = vpop.f32.mrf.mxu2 }
 0x61b   : > { %v6160_v47 = vadd.f32 %v6091_v60, %v5901_v4 }
 0x61d   : > { %v5837_v24 = vpop.f32.mrf.mxu1  ;;  %v6395_v37 = vpop.f32.mrf.mxu3 }
 0x61e   : > { %v5903_v3 = vadd.f32 %v5837_v24, %v13210_v25  ;;  %v13649_v58 = vadd.f32 %v6395_v37, %v6159_v29  ;;  %v6182_v24 = vld [vmem:[#allocation2 + $0x9c] sm:$0x3] }
 0x620   : > { %5876 = vmatmul.bf16.gmra.mxu1 %v5713_v44 }
 0x622   : > { %v6093_v30 = vpop.f32.mrf.mxu2  ;;  %6437 = vmatmul.bf16.gmra.mxu3 %v6274_v41  ;;  %v6277_v41 = vor.u32 %v6276_v8, %v6275_v43  ;;  %v5980_v43 = vsel %vm1097_vm1, %v5977_v62, %v5979_v63 }
 0x623   : > { %v6161_v4 = vadd.f32 %v6093_v30, %v5902_v39  ;;  %v5720_v39 = vrot.slane %v5718_v57, 1  ;;  %v6201_v30 = vunpack.c.l.b16 %v6182_v24 }
 0x624   : > { %v6278_v26 = vsel %vm1808_vm4, %v6273_v40, %v6277_v41 }
 0x625   : > { %v5839_v60 = vpop.f32.mrf.mxu1  ;;  %v6398_v52 = vpop.f32.mrf.mxu3 }
 0x626   : > { %v5904_v25 = vadd.f32 %v5839_v60, %v13247_v36  ;;  %v13656_v29 = vadd.f32 %v6398_v52, %v6160_v47  ;;  %v5721_v52 = vsel %vm541_vm0, %v5716_v48, %v5720_v39  ;;  %v6202_v47 = vpack.c.b16 %v6201_v30, %v6201_v30  ;;  %v9712_v48 = vld [vmem:[%s10763_s26 + $0x10] sm:$0xc]  ;;  %v10090_v39 = vld [vmem:[%s10763_s26 + $0x10] sm:$0xf0] }
 0x627   : > { %6135 = vmatmul.bf16.gmra.mxu2 %v5978_v23 }
 0x628   : > { %v6280_v23 = vshrl.u32 %v6202_v47, 16  ;;  %v6283_v57 = vshll.u32 %v6202_v47, 16 }
 0x62a   : > { %v6096_v19 = vpop.f32.mrf.mxu2  ;;  %v6282_v40 = vrot.slane %v6280_v23, 1  ;;  %v6285_v8 = vrot.slane %v6283_v57, 2 }
 0x62b   : > { %v6162_v37 = vadd.f32 %v6096_v19, %v5903_v3 }
 0x62d   : > { %v5842_v44 = vpop.f32.mrf.mxu1  ;;  %v6400_v32 = vpop.f32.mrf.mxu3 }
 0x62e   : > { %v5905_v38 = vadd.f32 %v5842_v44, %v13282_v18  ;;  %v13660_v36 = vadd.f32 %v6400_v32, %v6161_v4  ;;  %v6286_v44 = vor.u32 %v6285_v8, %v6282_v40 }
 0x630   : > { %5881 = vmatmul.bf16.gmra.mxu1 %v5721_v52  ;;  %v10091_v52 = vld [vmem:[%s10763_s26 + $0x18] sm:$0xff]  ;;  %v6287_v62 = vsel %vm1808_vm4, %v6277_v41, %v6286_v44 }
 0x631   : > { %v7775_v63 = vshll.u32 %v10091_v52, 16 }
 0x632   : > { %v6098_v17 = vpop.f32.mrf.mxu2  ;;  %6442 = vmatmul.bf16.gmra.mxu3 %v6278_v26 }
 0x633   : > { %v6163_v3 = vadd.f32 %v6098_v17, %v5904_v25  ;;  %v7772_v17 = vshrl.u32 %v10091_v52, 16  ;;  %v7777_v41 = vrot.slane %v7775_v63, 3 }
 0x635   : > { %v5844_v60 = vpop.f32.mrf.mxu1  ;;  %v6403_v27 = vpop.f32.mrf.mxu3  ;;  %v7774_v57 = vrot.slane %v7772_v17, 2 }
 0x636   : > { %v5906_v18 = vadd.f32 %v5844_v60, %v13313_v21  ;;  %v13665_v4 = vadd.f32 %v6403_v27, %v6162_v37  ;;  %v9713_v21 = vor.u32 %v10090_v39, %v9712_v48 }
 0x637   : > { %6140 = vmatmul.bf16.gmra.mxu2 %v5980_v43 }
 0x638   : > { %v7764_v26 = vshrl.u32 %v9713_v21, 16 }
 0x63a   : > { %v6101_v19 = vpop.f32.mrf.mxu2 }
 0x63b   : > { %v6164_v24 = vadd.f32 %v6101_v19, %v5905_v38  ;;  %v7767_v38 = vshll.u32 %v9713_v21, 16 }
 0x63d   : > { %v5847_v2 = vpop.f32.mrf.mxu1  ;;  %v6405_v25 = vpop.f32.mrf.mxu3 }
 0x63e   : > { %v5907_v32 = vadd.f32 %v5847_v2, %v13335_v59  ;;  %v13671_v30 = vadd.f32 %v6405_v25, %v6163_v3  ;;  %v7766_v3 = vrot.slane %v7764_v26, 2 }
 0x640   : > { %7139 = vmatmul.bf16.vlgmr.msra.gmra.mxu1 %v12423_v51  ;;  %v7769_v51 = vrot.slane %v7767_v38, 3 }
 0x642   : > { %v6103_v37 = vpop.f32.mrf.mxu2  ;;  %6447 = vmatmul.bf16.gmra.mxu3 %v6287_v62  ;;  %v7770_v8 = vor.u32 %v7769_v51, %v7766_v3  ;;  %v10093_v3 = vld [vmem:[%s10763_s26 + $0x28] sm:$0xff] }
 0x643   : > { %v6165_v47 = vadd.f32 %v6103_v37, %v5906_v18  ;;  %v7778_v18 = vor.u32 %v7777_v41, %v7774_v57  ;;  %v7793_v57 = vshll.u32 %v10093_v3, 16 }
 0x645   : > { %v5849_v60 = vpop.f32.mrf.mxu1  ;;  %v6408_v27 = vpop.f32.mrf.mxu3 }
 0x646   : > { %v5908_v23 = vadd.f32 %v5849_v60, %v13348_v61  ;;  %v13677_v59 = vadd.f32 %v6408_v27, %v6164_v24  ;;  %v7779_v61 = vsel %vm3095_vm3, %v7770_v8, %v7778_v18  ;;  %v10092_v24 = vld [vmem:[%s10763_s26 + $0x20] sm:$0xff] }
 0x647   : > { %7446 = vmatmul.bf16.vlgmr.msra.gmra.mxu2 %v12433_v16  ;;  %v7781_v44 = vshrl.u32 %v10092_v24, 16  ;;  %v7784_v21 = vshll.u32 %v10092_v24, 16 }
 0x649   : > { %v7786_v26 = vrot.slane %v7784_v21, 3 }
 0x64a   : > { %v6106_v43 = vpop.f32.mrf.mxu2 }
 0x64b   : > { %v6166_v40 = vadd.f32 %v6106_v43, %v5907_v32 }
 0x64d   : > { %v5852_v19 = vpop.f32.mrf.mxu1  ;;  %v6410_v48 = vpop.f32.mrf.mxu3 }
 0x64e   : > { %v5909_v39 = vadd.f32 %v5852_v19, %v13360_v12  ;;  %v13681_v2 = vadd.f32 %v6410_v48, %v6165_v47  ;;  %v7783_v12 = vrot.slane %v7781_v44, 2  ;;  %v7795_v48 = vrot.slane %v7793_v57, 3 }
 0x650   : > { %7144 = vmatmul.bf16.gmra.mxu1 %v12446_v1  ;;  %v7787_v17 = vor.u32 %v7786_v26, %v7783_v12 }
 0x652   : > { %v6108_v16 = vpop.f32.mrf.mxu2  ;;  %8007 = vmatmul.bf16.vlgmr.msra.gmra.mxu3 %v7779_v61 }
 0x653   : > { %v6167_v25 = vadd.f32 %v6108_v16, %v5908_v23  ;;  %v7788_v23 = vsel %vm3095_vm3, %v7778_v18, %v7787_v17  ;;  %v14294_v16 = vld [vmem:[#allocation26_spill] sm:$0xff] }
 0x655   : > { %v5854_v32 = vpop.f32.mrf.mxu1  ;;  %v6413_v52 = vpop.f32.mrf.mxu3 }
 0x656   : > { %v5910_v62 = vadd.f32 %v5854_v32, %v13367_v45  ;;  %v13687_v37 = vadd.f32 %v6413_v52, %v6166_v40  ;;  %v10094_v32 = vld [vmem:[%s10763_s26 + $0x30] sm:$0xff] }
 0x657   : > { %7451 = vmatmul.bf16.gmra.mxu2 %v12466_v9  ;;  %v7790_v9 = vshrl.u32 %v10093_v3, 16  ;;  %v14295_v52 = vld [vmem:[#allocation43_spill] sm:$0xff]  ;;  %v7799_v12 = vshrl.u32 %v10094_v32, 16  ;;  %v7802_v26 = vshll.u32 %v10094_v32, 16 }
 0x659   : > { %v7792_v19 = vrot.slane %v7790_v9, 2  ;;  %v7801_v3 = vrot.slane %v7799_v12, 2 }
 0x65a   : > { %v6111_v47 = vpop.f32.mrf.mxu2 }
 0x65b   : > { %v6168_v38 = vadd.f32 %v6111_v47, %v5909_v39  ;;  %v7796_v61 = vor.u32 %v7795_v48, %v7792_v19  ;;  %v10095_v19 = vld [vmem:[%s10763_s26 + $0x38] sm:$0xff]  ;;  %v14298_v48 = vld [vmem:[#allocation42_spill] sm:$0xff] }
 0x65d   : > { %v5857_v1 = vpop.f32.mrf.mxu1  ;;  %v6415_v63 = vpop.f32.mrf.mxu3  ;;  %v7797_v21 = vsel %vm3095_vm3, %v7787_v17, %v7796_v61 }
 0x65e   : > { %v5911_v60 = vadd.f32 %v5857_v1, %v13379_v53  ;;  %v13691_v27 = vadd.f32 %v6415_v63, %v6167_v25  ;;  %v14293_v53 = vld [vmem:[#allocation31_spill] sm:$0xff]  ;;  %v14296_v1 = vld [vmem:[#allocation25_spill] sm:$0xff] }
 0x660   : > { %7149 = vmatmul.bf16.gmra.mxu1 %v12478_v5 }
 0x662   : > { %v6113_v45 = vpop.f32.mrf.mxu2  ;;  %8012 = vmatmul.bf16.gmra.mxu3 %v7788_v23  ;;  %v14297_v23 = vld [vmem:[#allocation34_spill] sm:$0xff] }
 0x663   : > { %v6169_v51 = vadd.f32 %v6113_v45, %v5910_v62  ;;  %v7804_v45 = vrot.slane %v7802_v26, 3 }
 0x665   : > { %v5859_v41 = vpop.f32.mrf.mxu1  ;;  %v6418_v43 = vpop.f32.mrf.mxu3  ;;  %v7805_v9 = vor.u32 %v7804_v45, %v7801_v3  ;;  %v10096_v3 = vld [vmem:[%s10763_s26 + $0x40] sm:$0xff]  ;;  %v14301_v45 = vld [vmem:[#allocation36_spill] sm:$0xff] }
 0x666   : > { %v5912_v40 = vadd.f32 %v5859_v41, %v13395_v42  ;;  %v13697_v8 = vadd.f32 %v6418_v43, %v6168_v38 }
 0x667   : > { %7456 = vmatmul.bf16.gmra.mxu2 %v14293_v53  ;;  %v7806_v53 = vsel %vm3095_vm3, %v7796_v61, %v7805_v9 }
 0x66a   : > { %v6116_v18 = vpop.f32.mrf.mxu2 }
 0x66b   : > { %v6170_v39 = vadd.f32 %v6116_v18, %v5911_v60 }
 0x66d   : > { %v5862_v5 = vpop.f32.mrf.mxu1  ;;  %v6420_v24 = vpop.f32.mrf.mxu3 }
 0x66e   : > { %v5913_v25 = vadd.f32 %v5862_v5, %v14294_v16  ;;  %v13701_v44 = vadd.f32 %v6420_v24, %v6169_v51  ;;  %v7808_v5 = vshrl.u32 %v10095_v19, 16  ;;  %v7811_v24 = vshll.u32 %v10095_v19, 16 }
 0x670   : > { %7154 = vmatmul.bf16.gmra.mxu1 %v14295_v52  ;;  %v7810_v52 = vrot.slane %v7808_v5, 2 }
 0x672   : > { %v6118_v42 = vpop.f32.mrf.mxu2  ;;  %8017 = vmatmul.bf16.gmra.mxu3 %v7797_v21 }
 0x673   : > { %v6171_v62 = vadd.f32 %v6118_v42, %v5912_v40  ;;  %v7813_v42 = vrot.slane %v7811_v24, 3 }
 0x675   : > { %v5864_v47 = vpop.f32.mrf.mxu1  ;;  %v6423_v38 = vpop.f32.mrf.mxu3  ;;  %v7814_v12 = vor.u32 %v7813_v42, %v7810_v52 }
 0x676   : > { %v5914_v63 = vadd.f32 %v5864_v47, %v14296_v1  ;;  %v13707_v60 = vadd.f32 %v6423_v38, %v6170_v39  ;;  %v14300_v38 = vld [vmem:[#allocation24_spill] sm:$0xff] }
 0x677   : > { %7461 = vmatmul.bf16.gmra.mxu2 %v14297_v23  ;;  %v7815_v23 = vsel %vm3095_vm3, %v7805_v9, %v7814_v12 }
 0x67a   : > { %v6121_v17 = vpop.f32.mrf.mxu2 }
 0x67b   : > { %v6172_v51 = vadd.f32 %v6121_v17, %v5913_v25 }
 0x67d   : > { %v5867_v57 = vpop.f32.mrf.mxu1  ;;  %v6425_v41 = vpop.f32.mrf.mxu3 }
 0x67e   : > { %v5915_v43 = vadd.f32 %v5867_v57, %v13430_v0  ;;  %v13711_v40 = vadd.f32 %v6425_v41, %v6171_v62  ;;  %v14299_v0 = vld [vmem:[#allocation35_spill] sm:$0xff]  ;;  %v7820_v57 = vshll.u32 %v10096_v3, 16 }
 0x680   : > { %7159 = vmatmul.bf16.gmra.mxu1 %v14298_v48  ;;  %v7822_v5 = vrot.slane %v7820_v57, 3 }
 0x682   : > { %v6123_v18 = vpop.f32.mrf.mxu2  ;;  %8022 = vmatmul.bf16.gmra.mxu3 %v7806_v53  ;;  %v14302_v53 = vld [vmem:[#allocation32_spill] sm:$0xff] }
 0x683   : > { %v6173_v39 = vadd.f32 %v6123_v18, %v5914_v63  ;;  %v14303_v18 = vld [vmem:[#allocation46_spill] sm:$0xff] }
 0x685   : > { %v5869_v16 = vpop.f32.mrf.mxu1  ;;  %v6428_v25 = vpop.f32.mrf.mxu3 }
 0x686   : > { %v5916_v21 = vadd.f32 %v5869_v16, %v13435_v10  ;;  %v13717_v32 = vadd.f32 %v6428_v25, %v6172_v51  ;;  %v7817_v51 = vshrl.u32 %v10096_v3, 16 }
 0x687   : > { %7466 = vmatmul.bf16.gmra.mxu2 %v14299_v0 }
 0x68a   : > { %v6126_v61 = vpop.f32.mrf.mxu2 }
 0x68b   : > { %v6174_v62 = vadd.f32 %v6126_v61, %v5915_v43  ;;  %v10097_v61 = vld [vmem:[%s10763_s26 + $0x48] sm:$0xff] }
 0x68d   : > { %v5872_v26 = vpop.f32.mrf.mxu1  ;;  %v6430_v47 = vpop.f32.mrf.mxu3 }
 0x68e   : > { %v5917_v1 = vadd.f32 %v5872_v26, %v14300_v38  ;;  %v13721_v63 = vadd.f32 %v6430_v47, %v6173_v39  ;;  %v7819_v39 = vrot.slane %v7817_v51, 2  ;;  %v14304_v26 = vld [vmem:[#allocation39_spill] sm:$0xff]  ;;  %v7826_v38 = vshrl.u32 %v10097_v61, 16 }
 0x690   : > { %7164 = vmatmul.bf16.gmra.mxu1 %v14301_v45  ;;  %v7823_v16 = vor.u32 %v7822_v5, %v7819_v39  ;;  %v10098_v5 = vld [vmem:[%s10763_s26 + $0x50] sm:$0xff] }
 0x692   : > { %v6128_v10 = vpop.f32.mrf.mxu2  ;;  %8027 = vmatmul.bf16.gmra.mxu3 %v7815_v23  ;;  %v7824_v42 = vsel %vm3095_vm3, %v7814_v12, %v7823_v16  ;;  %v7829_v23 = vshll.u32 %v10097_v61, 16 }
 0x693   : > { %v6175_v17 = vadd.f32 %v6128_v10, %v5916_v21 }
 0x694   : > { %v7831_v51 = vrot.slane %v7829_v23, 3 }
 0x695   : > { %v5874_v41 = vpop.f32.mrf.mxu1  ;;  %v6433_v43 = vpop.f32.mrf.mxu3 }
 0x696   : > { %v5918_v19 = vadd.f32 %v5874_v41, %v14302_v53  ;;  %v13727_v48 = vadd.f32 %v6433_v43, %v6174_v62 }
 0x697   : > { %7471 = vmatmul.bf16.gmra.mxu2 %v14303_v18 }
 0x69a   : > { %v6131_v9 = vpop.f32.mrf.mxu2 }
 0x69b   : > { %v6176_v24 = vadd.f32 %v6131_v9, %v5917_v1  ;;  %v14306_v9 = vld [vmem:[#allocation40_spill] sm:$0xff] }
 0x69d   : > { %v5877_v25 = vpop.f32.mrf.mxu1  ;;  %v6435_v0 = vpop.f32.mrf.mxu3 }
 0x69e   : > { %v5919_v21 = vadd.f32 %v5877_v25, %v13479_v22  ;;  %v13731_v52 = vadd.f32 %v6435_v0, %v6175_v17  ;;  %v14305_v22 = vld [vmem:[#allocation44_spill] sm:$0xff]  ;;  %v7828_v17 = vrot.slane %v7826_v38, 2  ;;  %v7835_v25 = vshrl.u32 %v10098_v5, 16 }
 0x69f   : > { %v7838_v0 = vshll.u32 %v10098_v5, 16 }
 0x6a0   : > { %7169 = vmatmul.bf16.gmra.mxu1 %v14304_v26  ;;  %v7832_v41 = vor.u32 %v7831_v51, %v7828_v17  ;;  %v10099_v17 = vld [vmem:[%s10763_s26 + $0x58] sm:$0xff]  ;;  %v14308_v51 = vld [vmem:[#allocation47_spill] sm:$0xff] }
 0x6a2   : > { %v6133_v62 = vpop.f32.mrf.mxu2  ;;  %8032 = vmatmul.bf16.gmra.mxu3 %v7824_v42  ;;  %v7833_v39 = vsel %vm3095_vm3, %v7823_v16, %v7832_v41 }
 0x6a3   : > { %v6177_v47 = vadd.f32 %v6133_v62, %v5918_v19  ;;  %v7837_v62 = vrot.slane %v7835_v25, 2 }
 0x6a5   : > { %v5879_v3 = vpop.f32.mrf.mxu1  ;;  %v6438_v1 = vpop.f32.mrf.mxu3 }
 0x6a6   : > { %v5920_v45 = vadd.f32 %v5879_v3, %v13487_v31  ;;  %v13737_v10 = vadd.f32 %v6438_v1, %v6176_v24 }
 0x6a7   : > { %7476 = vmatmul.bf16.gmra.mxu2 %v14305_v22 }
 0x6aa   : > { %v6136_v12 = vpop.f32.mrf.mxu2 }
 0x6ab   : > { %v6178_v57 = vadd.f32 %v6136_v12, %v5919_v21 }
 0x6ad   : > { %v5882_v43 = vpop.f32.mrf.mxu1  ;;  %v6440_v53 = vpop.f32.mrf.mxu3 }
 0x6ae   : > { %v5921_v19 = vadd.f32 %v5882_v43, %v13506_v14  ;;  %v13741_v18 = vadd.f32 %v6440_v53, %v6177_v47  ;;  %v14307_v14 = vld [vmem:[#allocation41_spill] sm:$0xff]  ;;  %v7840_v47 = vrot.slane %v7838_v0, 3  ;;  %v7847_v43 = vshll.u32 %v10099_v17, 16 }
 0x6b0   : > { %7174 = vmatmul.bf16.gmra.mxu1 %v14306_v9  ;;  %v7841_v23 = vor.u32 %v7840_v47, %v7837_v62 }
 0x6b2   : > { %v6138_v31 = vpop.f32.mrf.mxu2  ;;  %8037 = vmatmul.bf16.gmra.mxu3 %v7833_v39 }
 0x6b3   : > { %v6179_v24 = vadd.f32 %v6138_v31, %v5920_v45  ;;  %v7842_v45 = vsel %vm3095_vm3, %v7832_v41, %v7841_v23  ;;  %v7849_v31 = vrot.slane %v7847_v43, 3 }
 0x6b5   : > { %v5884_v42 = vpop.f32.mrf.mxu1  ;;  %v6443_v21 = vpop.f32.mrf.mxu3 }
 0x6b6   : > { %v5922_v61 = vadd.f32 %v5884_v42, %v13517_v33  ;;  %v13747_v26 = vadd.f32 %v6443_v21, %v6178_v57  ;;  %v7844_v57 = vshrl.u32 %v10099_v17, 16 }
 0x6b7   : > { %7481 = vmatmul.bf16.gmra.mxu2 %v14307_v14  ;;  %v10100_v14 = vld [vmem:[%s10763_s26 + $0x60] sm:$0xff] }
 0x6b8   : > { %v7846_v9 = vrot.slane %v7844_v57, 2  ;;  %v7853_v47 = vshrl.u32 %v10100_v14, 16 }
 0x6ba   : > { %v6141_v16 = vpop.f32.mrf.mxu2  ;;  %v7850_v25 = vor.u32 %v7849_v31, %v7846_v9  ;;  %v7855_v43 = vrot.slane %v7853_v47, 2 }
 0x6bb   : > { %v6180_v38 = vadd.f32 %v6141_v16, %v5921_v19  ;;  %v14309_v19 = vld [vmem:[#allocation48_spill] sm:$0xff]  ;;  %v7856_v16 = vshll.u32 %v10100_v14, 16 }
 0x6bc   : > { %v7851_v21 = vsel %vm3095_vm3, %v7841_v23, %v7850_v25  ;;  %v13770_v23 = vld [vmem:[%s13998_s7] ss:$0 sm:$0xff] }
 0x6bd   : > { %v7140_v3 = vpop.f32.mrf.mxu1  ;;  %v6445_v1 = vpop.f32.mrf.mxu3 }
 0x6be   : > { %v13750_v22 = vadd.f32 %v6445_v1, %v6179_v24 }
 0x6c0   : > { %7179 = vmatmul.bf16.gmra.mxu1 %v14308_v51 }
 0x6c2   : > { %v6143_v12 = vpop.f32.mrf.mxu2  ;;  %8042 = vmatmul.bf16.gmra.mxu3 %v7842_v45 }
 0x6c3   : > { %v6181_v33 = vadd.f32 %v6143_v12, %v5922_v61  ;;  %v14310_v61 = vld [vmem:[#allocation8_spill] sm:$0xff]  ;;  %v14312_v12 = vld [vmem:[#allocation23_spill] sm:$0xff] }
 0x6c4   : > { %v6972_v57 = vadd.f32 %v14312_v12, %v13538_v20 }
 0x6c5   : > { %v7142_v53 = vpop.f32.mrf.mxu1  ;;  %v6448_v39 = vpop.f32.mrf.mxu3 }
 0x6c6   : > { %v13755_v5 = vadd.f32 %v6448_v39, %v6180_v38  ;;  %v14311_v38 = vld [vmem:[#allocation20_spill] sm:$0xff]  ;;  %v7858_v39 = vrot.slane %v7856_v16, 3 }
 0x6c7   : > { %7486 = vmatmul.bf16.gmra.mxu2 %v14309_v19  ;;  %v6971_v1 = vadd.f32 %v14311_v38, %v13530_v55  ;;  %v7231_v19 = vadd.f32 %v7142_v53, %v6972_v57  ;;  %v13776_v55 = vld [vmem:[%s13996_s5] ss:$0 sm:$0xff]  ;;  %v10101_v38 = vld [vmem:[%s10763_s26 + $0x68] sm:$0xff] }
 0x6c8   : > { %v7862_v57 = vshrl.u32 %v10101_v38, 16 }
 0x6c9   : > { %v7230_v51 = vadd.f32 %v7140_v3, %v6971_v1 }
 0x6ca   : > { %v7447_v24 = vpop.f32.mrf.mxu2 }
 0x6cb   : > { %v7537_v9 = vadd.f32 %v7447_v24, %v7230_v51  ;;  %v14314_v51 = vld [vmem:[#allocation4_spill] sm:$0xff] }
 0x6cd   : > { %v7145_v41 = vpop.f32.mrf.mxu1  ;;  %v6450_v0 = vpop.f32.mrf.mxu3 }
 0x6ce   : > { %v13758_v42 = vadd.f32 %v6450_v0, %v6181_v33  ;;  %v14313_v33 = vld [vmem:[#allocation45_spill] sm:$0xff]  ;;  %v7859_v0 = vor.u32 %v7858_v39, %v7855_v43  ;;  %v14315_v43 = vld [vmem:[#allocation22_spill] sm:$0xff] }
 0x6cf   : > { %v6973_v39 = vadd.f32 %v14315_v43, %v13547_v50 }
 0x6d0   : > { %7184 = vmatmul.bf16.gmra.mxu1 %v14310_v61  ;;  %v7860_v24 = vsel %vm3095_vm3, %v7850_v25, %v7859_v0 }
 0x6d2   : > { %v7449_v62 = vpop.f32.mrf.mxu2  ;;  %8047 = vmatmul.bf16.gmra.mxu3 %v7851_v21  ;;  %v7577_v21 = vadd.f32 %v13776_v55, %v7537_v9 }
 0x6d3   : > { %v7538_v3 = vadd.f32 %v7449_v62, %v7231_v19 }
 0x6d5   : > { %v7147_v45 = vpop.f32.mrf.mxu1  ;;  %v8008_v17 = vpop.f32.mrf.mxu3  ;;  %v7578_v47 = vadd.f32 %v13776_v55, %v7538_v3  ;;  %v7232_v3 = vadd.f32 %v7145_v41, %v6973_v39 }
 0x6d6   : > { %v8009_v20 = vadd.f32 %v13770_v23, %v8008_v17 }
 0x6d7   : > { %7491 = vmatmul.bf16.gmra.mxu2 %v14313_v33  ;;  %v7865_v33 = vshll.u32 %v10101_v38, 16 }
 0x6d8   : > { %v8098_v16 = vadd.f32 %v8009_v20, %v7577_v21  ;;  %v14316_v20 = vld [vmem:[#allocation19_spill] sm:$0xff] }
 0x6d9   : > { %v6974_v21 = vadd.f32 %v14316_v20, %v13561_v35 }
 0x6da   : > { %v7452_v31 = vpop.f32.mrf.mxu2  ;;  %v8134_v62 = vmax.f32 %v8098_v16, 0.0  ;;  %v7867_v16 = vrot.slane %v7865_v33, 3 }
 0x6dd   : > { %v7150_v14 = vpop.f32.mrf.mxu1  ;;  %v8010_v61 = vpop.f32.mrf.mxu3 }
 0x6de   : > { %v8011_v53 = vadd.f32 %v13770_v23, %v8010_v61  ;;  %v14317_v61 = vld [vmem:[#allocation7_spill] sm:$0xff] }
 0x6e0   : > { %v8099_v1 = vadd.f32 %v8011_v53, %v7578_v47  ;;  %7189 = vmatmul.bf16.gmra.mxu1 %v14314_v51  ;;  %v7864_v47 = vrot.slane %v7862_v57, 2  ;;  %v7233_v53 = vadd.f32 %v7147_v45, %v6974_v21  ;;  %v10102_v57 = vld [vmem:[%s10763_s26 + $0x70] sm:$0xff] }
 0x6e1   : > { %v7874_v20 = vshll.u32 %v10102_v57, 16  ;;  %v14319_v21 = vld [vmem:[#allocation28_spill] sm:$0xff] }
 0x6e2   : > { %v8135_v17 = vmax.f32 %v8099_v1, 0.0  ;;  %v7454_v12 = vpop.f32.mrf.mxu2  ;;  %8052 = vmatmul.bf16.gmra.mxu3 %v7860_v24  ;;  %v7539_v24 = vadd.f32 %v7452_v31, %v7232_v3  ;;  %v7868_v50 = vor.u32 %v7867_v16, %v7864_v47  ;;  %v14318_v31 = vld [vmem:[#allocation3_spill] sm:$0xff]  ;;  %v7871_v3 = vshrl.u32 %v10102_v57, 16 }
 0x6e3   : > { %v7540_v1 = vadd.f32 %v7454_v12, %v7233_v53 }
 0x6e4   : > { %v10286_v25 = vpack.c.bf16 %v8135_v17, %v8134_v62  ;;  %v7579_v62 = vadd.f32 %v13776_v55, %v7539_v24 }
 0x6e5   : > { %v7152_v19 = vpop.f32.mrf.mxu1  ;;  %v8013_v9 = vpop.f32.mrf.mxu3  ;;  %v7580_v43 = vadd.f32 %v13776_v55, %v7540_v1 }
 0x6e6   : > { %10287 = vst [vmem:[%s13789_s9] sm:$0xff] %v10286_v25   ;;  %v8014_v38 = vadd.f32 %v13770_v23, %v8013_v9  ;;  %v7869_v25 = vsel %vm3095_vm3, %v7859_v0, %v7868_v50  ;;  %v14320_v0 = vld [vmem:[#allocation27_spill] sm:$0xff] }
 0x6e7   : > { %7496 = vmatmul.bf16.gmra.mxu2 %v14317_v61  ;;  %v6975_v61 = vadd.f32 %v14319_v21, %v13570_v28  ;;  %v6976_v1 = vadd.f32 %v14320_v0, %v13575_v46  ;;  %v14323_v0 = vld [vmem:[#allocation33_spill] sm:$0xff] }
 0x6e8   : > { %v8100_v35 = vadd.f32 %v8014_v38, %v7579_v62  ;;  %v14321_v38 = vld [vmem:[#allocation13_spill] sm:$0xff]  ;;  %v7873_v62 = vrot.slane %v7871_v3, 2 }
 0x6e9   : > { %v7234_v24 = vadd.f32 %v7150_v14, %v6975_v61 }
 0x6ea   : > { %v7457_v51 = vpop.f32.mrf.mxu2  ;;  %v8136_v12 = vmax.f32 %v8100_v35, 0.0 }
 0x6eb   : > { %v7541_v35 = vadd.f32 %v7457_v51, %v7234_v24 }
 0x6ed   : > { %v7155_v17 = vpop.f32.mrf.mxu1  ;;  %v8015_v41 = vpop.f32.mrf.mxu3 }
 0x6ee   : > { %v8016_v39 = vadd.f32 %v13770_v23, %v8015_v41  ;;  %v7876_v41 = vrot.slane %v7874_v20, 3 }
 0x6f0   : > { %v8101_v45 = vadd.f32 %v8016_v39, %v7580_v43  ;;  %7194 = vmatmul.bf16.gmra.mxu1 %v14318_v31  ;;  %v7235_v43 = vadd.f32 %v7152_v19, %v6976_v1  ;;  %v7877_v28 = vor.u32 %v7876_v41, %v7873_v62  ;;  %v10103_v19 = vld [vmem:[%s10763_s26 + $0x78] sm:$0xff]  ;;  %v6977_v1 = vadd.f32 %v14323_v0, %v13584_v49 }
 0x6f1   : > { %v7883_v24 = vshll.u32 %v10103_v19, 16 }
 0x6f2   : > { %v8137_v33 = vmax.f32 %v8101_v45, 0.0  ;;  %v7459_v9 = vpop.f32.mrf.mxu2  ;;  %8057 = vmatmul.bf16.gmra.mxu3 %v7869_v25  ;;  %v7581_v45 = vadd.f32 %v13776_v55, %v7541_v35  ;;  %v7878_v20 = vsel %vm3095_vm3, %v7868_v50, %v7877_v28  ;;  %v14324_v50 = vld [vmem:[#allocation29_spill] sm:$0xff] }
 0x6f3   : > { %v7542_v39 = vadd.f32 %v7459_v9, %v7235_v43  ;;  %v14322_v9 = vld [vmem:[#allocation11_spill] sm:$0xff]  ;;  %v7236_v43 = vadd.f32 %v7155_v17, %v6977_v1  ;;  %v6978_v35 = vadd.f32 %v14324_v50, %v13595_v7  ;;  %v6979_v50 = vadd.f32 %v13484_v6, %v13607_v56 }
 0x6f4   : > { %v10291_v47 = vpack.c.bf16 %v8137_v33, %v8136_v12  ;;  %v13812_v12 = vpop.f32.mrf.mxu0 }
 0x6f5   : > { %v7157_v16 = vpop.f32.mrf.mxu1  ;;  %v8018_v53 = vpop.f32.mrf.mxu3  ;;  %v7582_v46 = vadd.f32 %v13776_v55, %v7542_v39  ;;  %v14325_v39 = vld [vmem:[#allocation12_spill] sm:$0xff] }
 0x6f6   : > { %10412 = vst [vmem:[%s13789_s9 + $0x8] sm:$0xff] %v10291_v47   ;;  %v8019_v25 = vadd.f32 %v13770_v23, %v8018_v53  ;;  %v7880_v53 = vshrl.u32 %v10103_v19, 16 }
 0x6f7   : > { %7501 = vmatmul.bf16.gmra.mxu2 %v14321_v38 }
 0x6f8   : > { %v8102_v33 = vadd.f32 %v8019_v25, %v7581_v45  ;;  %v7882_v25 = vrot.slane %v7880_v53, 2  ;;  %v7885_v45 = vrot.slane %v7883_v24, 3  ;;  %v10104_v24 = vld [vmem:[%s10763_s26 + $0x80] sm:$0xff] }
 0x6fa   : > { %v7462_v57 = vpop.f32.mrf.mxu2  ;;  %v8138_v21 = vmax.f32 %v8102_v33, 0.0  ;;  %v7886_v19 = vor.u32 %v7885_v45, %v7882_v25  ;;  %v6980_v45 = vadd.f32 %v13513_v54, %v13612_v15 }
 0x6fb   : > { %v7543_v33 = vadd.f32 %v7462_v57, %v7236_v43  ;;  %v14326_v57 = vld [vmem:[#allocation10_spill] sm:$0xff]  ;;  %v7892_v43 = vshll.u32 %v10104_v24, 16 }
 0x6fc   : > { %v7887_v53 = vsel %vm3095_vm3, %v7877_v28, %v7886_v19 }
 0x6fd   : > { %v7160_v31 = vpop.f32.mrf.mxu1  ;;  %v8020_v14 = vpop.f32.mrf.mxu3  ;;  %v7583_v17 = vadd.f32 %v13776_v55, %v7543_v33 }
 0x6fe   : > { %v8021_v3 = vadd.f32 %v13770_v23, %v8020_v14  ;;  %v13825_v14 = vpop.f32.mrf.mxu0  ;;  %v7238_v28 = vadd.f32 %v7160_v31, %v6979_v50  ;;  %v14329_v50 = vld [vmem:[#allocation38_spill] sm:$0xff] }
 0x700   : > { %v8103_v51 = vadd.f32 %v8021_v3, %v7582_v46  ;;  %7199 = vmatmul.bf16.gmra.mxu1 %v14322_v9  ;;  %v7237_v46 = vadd.f32 %v7157_v16, %v6978_v35 }
 0x702   : > { %v8139_v61 = vmax.f32 %v8103_v51, 0.0  ;;  %v7464_v47 = vpop.f32.mrf.mxu2  ;;  %8062 = vmatmul.bf16.gmra.mxu3 %v7878_v20 }
 0x703   : > { %v7544_v3 = vadd.f32 %v7464_v47, %v7237_v46  ;;  %v14327_v46 = vld [vmem:[#allocation5_spill] sm:$0xff] }
 0x704   : > { %v10296_v38 = vpack.c.bf16 %v8139_v61, %v8138_v21 }
 0x705   : > { %v7162_v62 = vpop.f32.mrf.mxu1  ;;  %v8023_v41 = vpop.f32.mrf.mxu3  ;;  %v7584_v7 = vadd.f32 %v13776_v55, %v7544_v3  ;;  %v7894_v3 = vrot.slane %v7892_v43, 3 }
 0x706   : > { %10413 = vst [vmem:[%s13789_s9 + $0x10] sm:$0xff] %v10296_v38   ;;  %v8024_v49 = vadd.f32 %v13770_v23, %v8023_v41  ;;  %v13834_v47 = vpop.f32.mrf.mxu0  ;;  %v7889_v41 = vshrl.u32 %v10104_v24, 16 }
 0x707   : > { %7506 = vmatmul.bf16.gmra.mxu2 %v14325_v39 }
 0x708   : > { %v8104_v21 = vadd.f32 %v8024_v49, %v7583_v17  ;;  %v7891_v33 = vrot.slane %v7889_v41, 2  ;;  %v7239_v49 = vadd.f32 %v7162_v62, %v6980_v45  ;;  %v10105_v62 = vld [vmem:[%s10763_s26 + $0x88] sm:$0xff] }
 0x709   : > { %v7898_v41 = vshrl.u32 %v10105_v62, 16  ;;  %v7901_v43 = vshll.u32 %v10105_v62, 16 }
 0x70a   : > { %v7467_v20 = vpop.f32.mrf.mxu2  ;;  %v8140_v0 = vmax.f32 %v8104_v21, 0.0  ;;  %v7895_v6 = vor.u32 %v7894_v3, %v7891_v33  ;;  %v6982_v33 = vadd.f32 %v13535_v11, %v13626_v34  ;;  %v14330_v3 = vld [vmem:[#allocation16_spill] sm:$0xff] }
 0x70b   : > { %v7545_v17 = vadd.f32 %v7467_v20, %v7238_v28 }
 0x70d   : > { %v7165_v51 = vpop.f32.mrf.mxu1  ;;  %v8025_v9 = vpop.f32.mrf.mxu3  ;;  %v7585_v31 = vadd.f32 %v13776_v55, %v7545_v17  ;;  %v7903_v17 = vrot.slane %v7901_v43, 3 }
 0x70e   : > { %v8026_v61 = vadd.f32 %v13770_v23, %v8025_v9  ;;  %v13843_v56 = vpop.f32.mrf.mxu0 }
 0x710   : > { %v8105_v16 = vadd.f32 %v8026_v61, %v7584_v7  ;;  %7204 = vmatmul.bf16.gmra.mxu1 %v14326_v57  ;;  %v14328_v57 = vld [vmem:[#allocation6_spill] sm:$0xff] }
 0x712   : > { %v8141_v1 = vmax.f32 %v8105_v16, 0.0  ;;  %v7469_v38 = vpop.f32.mrf.mxu2  ;;  %8067 = vmatmul.bf16.gmra.mxu3 %v7887_v53  ;;  %v7896_v16 = vsel %vm3095_vm3, %v7886_v19, %v7895_v6 }
 0x713   : > { %v7546_v9 = vadd.f32 %v7469_v38, %v7239_v49  ;;  %v7900_v49 = vrot.slane %v7898_v41, 2 }
 0x714   : > { %v10301_v35 = vpack.c.bf16 %v8141_v1, %v8140_v0 }
 0x715   : > { %v7167_v39 = vpop.f32.mrf.mxu1  ;;  %v8028_v25 = vpop.f32.mrf.mxu3  ;;  %v7586_v54 = vadd.f32 %v13776_v55, %v7546_v9 }
 0x716   : > { %10414 = vst [vmem:[%s13789_s9 + $0x18] sm:$0xff] %v10301_v35   ;;  %v8029_v7 = vadd.f32 %v13770_v23, %v8028_v25  ;;  %v6981_v35 = vadd.f32 %v14329_v50, %v13621_v13  ;;  %v7241_v9 = vadd.f32 %v7167_v39, %v6982_v33  ;;  %v14332_v50 = vld [vmem:[#allocation37_spill] sm:$0xff]  ;;  %v6984_v33 = vadd.f32 %v13825_v14, %v13649_v58 }
 0x717   : > { %7511 = vmatmul.bf16.gmra.mxu2 %v14327_v46  ;;  %v13853_v46 = vpop.f32.mrf.mxu0 }
 0x718   : > { %v8106_v15 = vadd.f32 %v8029_v7, %v7585_v31  ;;  %v7240_v19 = vadd.f32 %v7165_v51, %v6981_v35  ;;  %v6983_v35 = vadd.f32 %v13812_v12, %v14332_v50 }
 0x71a   : > { %v7472_v21 = vpop.f32.mrf.mxu2  ;;  %v8142_v0 = vmax.f32 %v8106_v15, 0.0 }
 0x71b   : > { %v7547_v7 = vadd.f32 %v7472_v21, %v7240_v19 }
 0x71d   : > { %v7170_v61 = vpop.f32.mrf.mxu1  ;;  %v8030_v53 = vpop.f32.mrf.mxu3  ;;  %v7587_v15 = vadd.f32 %v13776_v55, %v7547_v7 }
 0x71e   : > { %v8031_v24 = vadd.f32 %v13770_v23, %v8030_v53 }
 0x71f   : > { %v13865_v39 = vpop.f32.mrf.mxu0 }
 0x720   : > { %v8107_v20 = vadd.f32 %v8031_v24, %v7586_v54  ;;  %7209 = vmatmul.bf16.gmra.mxu1 %v14328_v57  ;;  %v7904_v54 = vor.u32 %v7903_v17, %v7900_v49  ;;  %v14331_v57 = vld [vmem:[#allocation9_spill] sm:$0xff] }
 0x722   : > { %v8143_v1 = vmax.f32 %v8107_v20, 0.0  ;;  %v7474_v38 = vpop.f32.mrf.mxu2  ;;  %8072 = vmatmul.bf16.gmra.mxu3 %v7896_v16  ;;  %v7905_v62 = vsel %vm3095_vm3, %v7895_v6, %v7904_v54  ;;  %v10106_v20 = vld [vmem:[%s10763_s26 + $0x90] sm:$0xff]  ;;  %v7242_v6 = vadd.f32 %v7170_v61, %v6983_v35  ;;  %v6985_v35 = vadd.f32 %v13834_v47, %v13656_v29 }
 0x723   : > { %v7548_v31 = vadd.f32 %v7474_v38, %v7241_v9  ;;  %v7907_v41 = vshrl.u32 %v10106_v20, 16  ;;  %v7910_v43 = vshll.u32 %v10106_v20, 16 }
 0x724   : > { %v10306_v25 = vpack.c.bf16 %v8143_v1, %v8142_v0 }
 0x725   : > { %v7172_v28 = vpop.f32.mrf.mxu1  ;;  %v8033_v45 = vpop.f32.mrf.mxu3  ;;  %v7588_v16 = vadd.f32 %v13776_v55, %v7548_v31  ;;  %v7909_v49 = vrot.slane %v7907_v41, 2  ;;  %v7912_v17 = vrot.slane %v7910_v43, 3 }
 0x726   : > { %10415 = vst [vmem:[%s13789_s9 + $0x20] sm:$0xff] %v10306_v25   ;;  %v8034_v13 = vadd.f32 %v13770_v23, %v8033_v45  ;;  %v7243_v9 = vadd.f32 %v7172_v28, %v6984_v33 }
 0x727   : > { %7516 = vmatmul.bf16.gmra.mxu2 %v14330_v3  ;;  %v14333_v3 = vld [vmem:[#allocation18_spill] sm:$0xff]  ;;  %v13874_v31 = vpop.f32.mrf.mxu0 }
 0x728   : > { %v8108_v11 = vadd.f32 %v8034_v13, %v7587_v15 }
 0x72a   : > { %v7477_v53 = vpop.f32.mrf.mxu2  ;;  %v8144_v0 = vmax.f32 %v8108_v11, 0.0 }
 0x72b   : > { %v7549_v7 = vadd.f32 %v7477_v53, %v7242_v6  ;;  %v10107_v53 = vld [vmem:[%s10763_s26 + $0x98] sm:$0xff] }
 0x72c   : > { %v7916_v41 = vshrl.u32 %v10107_v53, 16  ;;  %v7919_v43 = vshll.u32 %v10107_v53, 16 }
 0x72d   : > { %v7175_v24 = vpop.f32.mrf.mxu1  ;;  %v8035_v51 = vpop.f32.mrf.mxu3  ;;  %v7589_v61 = vadd.f32 %v13776_v55, %v7549_v7 }
 0x72e   : > { %v8036_v34 = vadd.f32 %v13770_v23, %v8035_v51  ;;  %v7913_v51 = vor.u32 %v7912_v17, %v7909_v49  ;;  %v7244_v33 = vadd.f32 %v7175_v24, %v6985_v35  ;;  %v14335_v49 = vld [vmem:[#allocation21_spill] sm:$0xff]  ;;  %v7918_v17 = vrot.slane %v7916_v41, 2 }
 0x72f   : > { %v13885_v50 = vpop.f32.mrf.mxu0 }
 0x730   : > { %v8109_v21 = vadd.f32 %v8036_v34, %v7588_v16  ;;  %7214 = vmatmul.bf16.gmra.mxu1 %v14331_v57  ;;  %v7914_v28 = vsel %vm3095_vm3, %v7904_v54, %v7913_v51 }
 0x732   : > { %v8145_v1 = vmax.f32 %v8109_v21, 0.0  ;;  %v7479_v38 = vpop.f32.mrf.mxu2  ;;  %8077 = vmatmul.bf16.gmra.mxu3 %v7905_v62  ;;  %v7266_v62 = vld [vmem:[#allocation2 + $0xa4] sm:$0x7]  ;;  %v14334_v21 = vld [vmem:[#allocation15_spill] sm:$0xff] }
 0x733   : > { %v7550_v13 = vadd.f32 %v7479_v38, %v7243_v9  ;;  %v7285_v57 = vunpack.c.l.b16 %v7266_v62  ;;  %v7921_v9 = vrot.slane %v7919_v43, 3 }
 0x734   : > { %v10311_v25 = vpack.c.bf16 %v8145_v1, %v8144_v0 }
 0x735   : > { %v7177_v45 = vpop.f32.mrf.mxu1  ;;  %v8038_v19 = vpop.f32.mrf.mxu3  ;;  %v7590_v14 = vadd.f32 %v13776_v55, %v7550_v13  ;;  %v7286_v6 = vpack.c.b16 %v7285_v57, %v7285_v57 }
 0x736   : > { %10416 = vst [vmem:[%s13789_s9 + $0x28] sm:$0xff] %v10311_v25   ;;  %v8039_v12 = vadd.f32 %v13770_v23, %v8038_v19 }
 0x737   : > { %7521 = vmatmul.bf16.gmra.mxu2 %v14333_v3  ;;  %v6986_v3 = vadd.f32 %v13843_v56, %v13660_v36 }
 0x738   : > { %v8110_v11 = vadd.f32 %v8039_v12, %v7589_v61  ;;  %v7649_v12 = vld [vmem:[%s10763_s26 + $0xa0] sm:$0x7]  ;;  %v7364_v61 = vshrl.u32 %v7286_v6, 16 }
 0x739   : > { %v7245_v7 = vadd.f32 %v7177_v45, %v6986_v3 }
 0x73a   : > { %v7482_v15 = vpop.f32.mrf.mxu2  ;;  %v8146_v0 = vmax.f32 %v8110_v11, 0.0  ;;  %v7922_v11 = vor.u32 %v7921_v9, %v7918_v17  ;;  %v7366_v56 = vrot.slane %v7364_v61, 2  ;;  %v6988_v17 = vadd.f32 %v13865_v39, %v13671_v30  ;;  %v14337_v9 = vld [vmem:[#allocation17_spill] sm:$0xff] }
 0x73b   : > { %v7551_v13 = vadd.f32 %v7482_v15, %v7244_v33 }
 0x73d   : > { %v13878_v16 = vpop.f32.mrf.mxu1  ;;  %v8040_v58 = vpop.f32.mrf.mxu3  ;;  %v7591_v24 = vadd.f32 %v13776_v55, %v7551_v13 }
 0x73e   : > { %v8041_v34 = vadd.f32 %v13770_v23, %v8040_v58 }
 0x740   : > { %v8111_v20 = vadd.f32 %v8041_v34, %v7590_v14  ;;  %7219 = vmatmul.bf16.gmra.mxu1 %v14334_v21  ;;  %v7367_v14 = vshll.u32 %v7286_v6, 16  ;;  %v7743_v34 = vunpack.c.l.b16 %v7649_v12  ;;  %v7923_v21 = vsel %vm3095_vm3, %v7913_v51, %v7922_v11 }
 0x741   : > { %v6987_v6 = vadd.f32 %v13853_v46, %v13665_v4 }
 0x742   : > { %v8147_v1 = vmax.f32 %v8111_v20, 0.0  ;;  %v7484_v38 = vpop.f32.mrf.mxu2  ;;  %8082 = vmatmul.bf16.gmra.mxu3 %v7914_v28  ;;  %v13896_v28 = vpop.f32.mrf.mxu0  ;;  %v7369_v20 = vrot.slane %v7367_v14, 3  ;;  %v7762_v57 = vpack.c.b16 %v7743_v34, %v7743_v34 }
 0x743   : > { %v7552_v58 = vadd.f32 %v7484_v38, %v7245_v7  ;;  %v7246_v51 = vadd.f32 %v13878_v16, %v6987_v6 }
 0x744   : > { %v10316_v25 = vpack.c.bf16 %v8147_v1, %v8146_v0  ;;  %v14336_v1 = vld [vmem:[#allocation14_spill] sm:$0xff]  ;;  %v7370_v35 = vor.u32 %v7369_v20, %v7366_v56 }
 0x745   : > { %v7182_v54 = vpop.f32.mrf.mxu1  ;;  %v8043_v19 = vpop.f32.mrf.mxu3  ;;  %v7592_v53 = vadd.f32 %v13776_v55, %v7552_v58 }
 0x746   : > { %10417 = vst [vmem:[%s13789_s9 + $0x30] sm:$0xff] %v10316_v25   ;;  %v8044_v29 = vadd.f32 %v13770_v23, %v8043_v19  ;;  %v7925_v25 = vshrl.u32 %v7762_v57, 16  ;;  %v7928_v19 = vshll.u32 %v7762_v57, 16  ;;  %v7371_v7 = vsel %vm3095_vm3, %v14337_v9, %v7370_v35 }
 0x747   : > { %7526 = vmatmul.bf16.gmra.mxu2 %v14335_v49  ;;  %v7247_v58 = vadd.f32 %v7182_v54, %v6988_v17  ;;  %v6991_v9 = vadd.f32 %v13896_v28, %v13687_v37 }
 0x748   : > { %v8112_v45 = vadd.f32 %v8044_v29, %v7591_v24  ;;  %v7927_v13 = vrot.slane %v7925_v25, 2  ;;  %v7930_v12 = vrot.slane %v7928_v19, 3 }
 0x74a   : > { %v7487_v47 = vpop.f32.mrf.mxu2  ;;  %v8148_v38 = vmax.f32 %v8112_v45, 0.0  ;;  %v6933_v61 = vpop.f32.mrf.mxu0  ;;  %v7931_v34 = vor.u32 %v7930_v12, %v7927_v13 }
 0x74b   : > { %v7553_v29 = vadd.f32 %v7487_v47, %v7246_v51 }
 0x74d   : > { %v7185_v62 = vpop.f32.mrf.mxu1  ;;  %v8045_v36 = vpop.f32.mrf.mxu3  ;;  %v7593_v16 = vadd.f32 %v13776_v55, %v7553_v29 }
 0x74e   : > { %v8046_v15 = vadd.f32 %v13770_v23, %v8045_v36 }
 0x750   : > { %v8113_v0 = vadd.f32 %v8046_v15, %v7592_v53  ;;  %7224 = vmatmul.bf16.gmra.mxu1 %v14336_v1  ;;  %v7932_v53 = vsel %vm3095_vm3, %v7922_v11, %v7931_v34 }
 0x752   : > { %v8149_v41 = vmax.f32 %v8113_v0, 0.0  ;;  %v7489_v43 = vpop.f32.mrf.mxu2  ;;  %8087 = vmatmul.bf16.gmra.mxu3 %v7923_v21  ;;  %v6936_v54 = vpop.f32.mrf.mxu0  ;;  %v6989_v21 = vadd.f32 %v13874_v31, %v13677_v59 }
 0x753   : > { %v7554_v14 = vadd.f32 %v7489_v43, %v7247_v58 }
 0x754   : > { %v10321_v33 = vpack.c.bf16 %v8149_v41, %v8148_v38  ;;  %v7248_v38 = vadd.f32 %v7185_v62, %v6989_v21  ;;  %v6990_v41 = vadd.f32 %v13885_v50, %v13681_v2 }
 0x755   : > { %v7187_v3 = vpop.f32.mrf.mxu1  ;;  %v8048_v49 = vpop.f32.mrf.mxu3  ;;  %v7594_v30 = vadd.f32 %v13776_v55, %v7554_v14  ;;  %v6992_v14 = vadd.f32 %v6933_v61, %v13691_v27 }
 0x756   : > { %10418 = vst [vmem:[%s13789_s9 + $0x38] sm:$0xff] %v10321_v33   ;;  %v8049_v4 = vadd.f32 %v13770_v23, %v8048_v49  ;;  %v7249_v43 = vadd.f32 %v7187_v3, %v6990_v41 }
 0x757   : > { %7531 = vmatmul.bf16.gmra.mxu2 %v7371_v7 }
 0x758   : > { %v8114_v39 = vadd.f32 %v8049_v4, %v7593_v16 }
 0x75a   : > { %v7492_v46 = vpop.f32.mrf.mxu2  ;;  %v8150_v47 = vmax.f32 %v8114_v39, 0.0  ;;  %v6938_v6 = vpop.f32.mrf.mxu0 }
 0x75b   : > { %v7555_v35 = vadd.f32 %v7492_v46, %v7248_v38 }
 0x75d   : > { %v7190_v24 = vpop.f32.mrf.mxu1  ;;  %v8050_v36 = vpop.f32.mrf.mxu3  ;;  %v7595_v33 = vadd.f32 %v13776_v55, %v7555_v35 }
 0x75e   : > { %v8051_v56 = vadd.f32 %v13770_v23, %v8050_v36  ;;  %v7250_v29 = vadd.f32 %v7190_v24, %v6991_v9 }
 0x760   : > { %v8115_v45 = vadd.f32 %v8051_v56, %v7594_v30 }
 0x762   : > { %v8151_v15 = vmax.f32 %v8115_v45, 0.0  ;;  %v7494_v20 = vpop.f32.mrf.mxu2  ;;  %8092 = vmatmul.bf16.gmra.mxu3 %v7932_v53  ;;  %v6941_v58 = vpop.f32.mrf.mxu0 }
 0x763   : > { %v7556_v11 = vadd.f32 %v7494_v20, %v7249_v43 }
 0x764   : > { %v10326_v57 = vpack.c.bf16 %v8151_v15, %v8150_v47  ;;  %v6993_v15 = vadd.f32 %v6936_v54, %v13697_v8 }
 0x765   : > { %v7192_v0 = vpop.f32.mrf.mxu1  ;;  %v8053_v1 = vpop.f32.mrf.mxu3  ;;  %v7596_v31 = vadd.f32 %v13776_v55, %v7556_v11 }
 0x766   : > { %10419 = vst [vmem:[%s13789_s9 + $0x40] sm:$0xff] %v10326_v57   ;;  %v8054_v25 = vadd.f32 %v13770_v23, %v8053_v1  ;;  %v7251_v4 = vadd.f32 %v7192_v0, %v6992_v14  ;;  %v6994_v1 = vadd.f32 %v6938_v6, %v13701_v44 }
 0x768   : > { %v8116_v51 = vadd.f32 %v8054_v25, %v7595_v33 }
 0x76a   : > { %v7497_v19 = vpop.f32.mrf.mxu2  ;;  %v8152_v2 = vmax.f32 %v8116_v51, 0.0  ;;  %v6943_v24 = vpop.f32.mrf.mxu0 }
 0x76b   : > { %v7557_v46 = vadd.f32 %v7497_v19, %v7250_v29 }
 0x76d   : > { %v7195_v49 = vpop.f32.mrf.mxu1  ;;  %v8055_v59 = vpop.f32.mrf.mxu3  ;;  %v7597_v30 = vadd.f32 %v13776_v55, %v7557_v46 }
 0x76e   : > { %v8056_v62 = vadd.f32 %v13770_v23, %v8055_v59  ;;  %v7252_v0 = vadd.f32 %v7195_v49, %v6993_v15 }
 0x770   : > { %v8117_v17 = vadd.f32 %v8056_v62, %v7596_v31 }
 0x772   : > { %v8153_v50 = vmax.f32 %v8117_v17, 0.0  ;;  %v7499_v3 = vpop.f32.mrf.mxu2  ;;  %v6946_v43 = vpop.f32.mrf.mxu0  ;;  %v6995_v17 = vadd.f32 %v6941_v58, %v13707_v60 }
 0x773   : > { %v7558_v34 = vadd.f32 %v7499_v3, %v7251_v4 }
 0x774   : > { %v10331_v7 = vpack.c.bf16 %v8153_v50, %v8152_v2 }
 0x775   : > { %v7197_v13 = vpop.f32.mrf.mxu1  ;;  %v8058_v12 = vpop.f32.mrf.mxu3  ;;  %v7598_v37 = vadd.f32 %v13776_v55, %v7558_v34 }
 0x776   : > { %10420 = vst [vmem:[%s13789_s9 + $0x48] sm:$0xff] %v10331_v7   ;;  %v8059_v16 = vadd.f32 %v13770_v23, %v8058_v12  ;;  %v7253_v38 = vadd.f32 %v7197_v13, %v6994_v1  ;;  %v6996_v7 = vadd.f32 %v6943_v24, %v13711_v40 }
 0x778   : > { %v8118_v28 = vadd.f32 %v8059_v16, %v7597_v30 }
 0x77a   : > { %v7502_v36 = vpop.f32.mrf.mxu2  ;;  %v8154_v27 = vmax.f32 %v8118_v28, 0.0  ;;  %v6948_v62 = vpop.f32.mrf.mxu0  ;;  %v6997_v28 = vadd.f32 %v6946_v43, %v13717_v32 }
 0x77b   : > { %v7559_v41 = vadd.f32 %v7502_v36, %v7252_v0 }
 0x77d   : > { %v7200_v39 = vpop.f32.mrf.mxu1  ;;  %v8060_v56 = vpop.f32.mrf.mxu3  ;;  %v7599_v19 = vadd.f32 %v13776_v55, %v7559_v41 }
 0x77e   : > { %v8061_v53 = vadd.f32 %v13770_v23, %v8060_v56  ;;  %v7254_v9 = vadd.f32 %v7200_v39, %v6995_v17 }
 0x780   : > { %v8119_v45 = vadd.f32 %v8061_v53, %v7598_v37 }
 0x782   : > { %v8155_v61 = vmax.f32 %v8119_v45, 0.0  ;;  %v7504_v47 = vpop.f32.mrf.mxu2  ;;  %v6951_v16 = vpop.f32.mrf.mxu0 }
 0x783   : > { %v7560_v35 = vadd.f32 %v7504_v47, %v7253_v38 }
 0x784   : > { %v10336_v20 = vpack.c.bf16 %v8155_v61, %v8154_v27  ;;  %v6998_v27 = vadd.f32 %v6948_v62, %v13721_v63 }
 0x785   : > { %v7202_v21 = vpop.f32.mrf.mxu1  ;;  %v8063_v57 = vpop.f32.mrf.mxu3  ;;  %v7600_v8 = vadd.f32 %v13776_v55, %v7560_v35 }
 0x786   : > { %10421 = vst [vmem:[%s13789_s9 + $0x50] sm:$0xff] %v10336_v20   ;;  %v8064_v11 = vadd.f32 %v13770_v23, %v8063_v57  ;;  %v7255_v13 = vadd.f32 %v7202_v21, %v6996_v7 }
 0x788   : > { %v8120_v54 = vadd.f32 %v8064_v11, %v7599_v19 }
 0x78a   : > { %v7507_v25 = vpop.f32.mrf.mxu2  ;;  %v8156_v44 = vmax.f32 %v8120_v54, 0.0  ;;  %v6953_v61 = vpop.f32.mrf.mxu0 }
 0x78b   : > { %v7561_v12 = vadd.f32 %v7507_v25, %v7254_v9 }
 0x78d   : > { %v7205_v33 = vpop.f32.mrf.mxu1  ;;  %v8065_v59 = vpop.f32.mrf.mxu3  ;;  %v7601_v46 = vadd.f32 %v13776_v55, %v7561_v12 }
 0x78e   : > { %v8066_v49 = vadd.f32 %v13770_v23, %v8065_v59  ;;  %v7256_v45 = vadd.f32 %v7205_v33, %v6997_v28  ;;  %v6999_v59 = vadd.f32 %v6951_v16, %v13727_v48 }
 0x790   : > { %v8121_v31 = vadd.f32 %v8066_v49, %v7600_v8 }
 0x792   : > { %v8157_v6 = vmax.f32 %v8121_v31, 0.0  ;;  %v7509_v51 = vpop.f32.mrf.mxu2  ;;  %v6956_v63 = vpop.f32.mrf.mxu0  ;;  %v7000_v31 = vadd.f32 %v6953_v61, %v13731_v52 }
 0x793   : > { %v7562_v29 = vadd.f32 %v7509_v51, %v7255_v13 }
 0x794   : > { %v10341_v2 = vpack.c.bf16 %v8157_v6, %v8156_v44 }
 0x795   : > { %v7207_v50 = vpop.f32.mrf.mxu1  ;;  %v8068_v3 = vpop.f32.mrf.mxu3  ;;  %v7602_v60 = vadd.f32 %v13776_v55, %v7562_v29 }
 0x796   : > { %10422 = vst [vmem:[%s13789_s9 + $0x58] sm:$0xff] %v10341_v2   ;;  %v8069_v14 = vadd.f32 %v13770_v23, %v8068_v3  ;;  %v7257_v47 = vadd.f32 %v7207_v50, %v6998_v27 }
 0x798   : > { %v8122_v58 = vadd.f32 %v8069_v14, %v7601_v46 }
 0x79a   : > { %v7512_v4 = vpop.f32.mrf.mxu2  ;;  %v8158_v40 = vmax.f32 %v8122_v58, 0.0  ;;  %v6958_v2 = vpop.f32.mrf.mxu0 }
 0x79b   : > { %v7563_v15 = vadd.f32 %v7512_v4, %v7256_v45  ;;  %v7001_v4 = vadd.f32 %v6956_v63, %v13737_v10  ;;  %v7002_v58 = vadd.f32 %v6958_v2, %v13741_v18 }
 0x79d   : > { %v8070_v34 = vpop.f32.mrf.mxu3  ;;  %v7210_v30 = vpop.f32.mrf.mxu1  ;;  %v7603_v1 = vadd.f32 %v13776_v55, %v7563_v15 }
 0x79e   : > { %v8071_v36 = vadd.f32 %v13770_v23, %v8070_v34  ;;  %v7258_v49 = vadd.f32 %v7210_v30, %v6999_v59 }
 0x7a0   : > { %v8123_v39 = vadd.f32 %v8071_v36, %v7602_v60 }
 0x7a2   : > { %v8159_v56 = vmax.f32 %v8123_v39, 0.0  ;;  %v7514_v37 = vpop.f32.mrf.mxu2  ;;  %v6961_v16 = vpop.f32.mrf.mxu0 }
 0x7a3   : > { %v7564_v21 = vadd.f32 %v7514_v37, %v7257_v47 }
 0x7a4   : > { %v10346_v53 = vpack.c.bf16 %v8159_v56, %v8158_v40 }
 0x7a5   : > { %v8073_v24 = vpop.f32.mrf.mxu3  ;;  %v7212_v20 = vpop.f32.mrf.mxu1  ;;  %v7604_v32 = vadd.f32 %v13776_v55, %v7564_v21  ;;  %v7003_v21 = vadd.f32 %v6961_v16, %v13747_v26 }
 0x7a6   : > { %10423 = vst [vmem:[%s13789_s9 + $0x60] sm:$0xff] %v10346_v53   ;;  %v8074_v57 = vadd.f32 %v13770_v23, %v8073_v24  ;;  %v7259_v44 = vadd.f32 %v7212_v20, %v7000_v31 }
 0x7a8   : > { %v8124_v41 = vadd.f32 %v8074_v57, %v7603_v1 }
 0x7aa   : > { %v7517_v0 = vpop.f32.mrf.mxu2  ;;  %v8160_v11 = vmax.f32 %v8124_v41, 0.0  ;;  %v6963_v27 = vpop.f32.mrf.mxu0 }
 0x7ab   : > { %v7565_v6 = vadd.f32 %v7517_v0, %v7258_v49 }
 0x7ad   : > { %v8075_v38 = vpop.f32.mrf.mxu3  ;;  %v7215_v33 = vpop.f32.mrf.mxu1  ;;  %v7605_v50 = vadd.f32 %v13776_v55, %v7565_v6 }
 0x7ae   : > { %v8076_v43 = vadd.f32 %v13770_v23, %v8075_v38  ;;  %v7260_v60 = vadd.f32 %v7215_v33, %v7001_v4  ;;  %v7004_v38 = vadd.f32 %v6963_v27, %v13750_v22 }
 0x7b0   : > { %v8125_v35 = vadd.f32 %v8076_v43, %v7604_v32 }
 0x7b2   : > { %v8161_v25 = vmax.f32 %v8125_v35, 0.0  ;;  %v7519_v19 = vpop.f32.mrf.mxu2  ;;  %v6966_v43 = vpop.f32.mrf.mxu0 }
 0x7b3   : > { %v7566_v51 = vadd.f32 %v7519_v19, %v7259_v44  ;;  %v7005_v44 = vadd.f32 %v6966_v43, %v13755_v5 }
 0x7b4   : > { %v10351_v8 = vpack.c.bf16 %v8161_v25, %v8160_v11 }
 0x7b5   : > { %v8078_v54 = vpop.f32.mrf.mxu3  ;;  %v7217_v3 = vpop.f32.mrf.mxu1  ;;  %v7606_v48 = vadd.f32 %v13776_v55, %v7566_v51 }
 0x7b6   : > { %10424 = vst [vmem:[%s13789_s9 + $0x68] sm:$0xff] %v10351_v8   ;;  %v8079_v62 = vadd.f32 %v13770_v23, %v8078_v54  ;;  %v7261_v30 = vadd.f32 %v7217_v3, %v7002_v58 }
 0x7b8   : > { %v8126_v7 = vadd.f32 %v8079_v62, %v7605_v50 }
 0x7ba   : > { %v7522_v17 = vpop.f32.mrf.mxu2  ;;  %v8162_v52 = vmax.f32 %v8126_v7, 0.0  ;;  %v6968_v31 = vpop.f32.mrf.mxu0 }
 0x7bb   : > { %v7567_v39 = vadd.f32 %v7522_v17, %v7260_v60  ;;  %v7006_v2 = vadd.f32 %v6968_v31, %v13758_v42 }
 0x7bd   : > { %v8080_v9 = vpop.f32.mrf.mxu3  ;;  %v7220_v36 = vpop.f32.mrf.mxu1  ;;  %v7607_v28 = vadd.f32 %v13776_v55, %v7567_v39 }
 0x7be   : > { %v8081_v13 = vadd.f32 %v13770_v23, %v8080_v9  ;;  %v7262_v1 = vadd.f32 %v7220_v36, %v7003_v21 }
 0x7c0   : > { %v8127_v12 = vadd.f32 %v8081_v13, %v7606_v48 }
 0x7c2   : > { %v8163_v29 = vmax.f32 %v8127_v12, 0.0  ;;  %v7524_v14 = vpop.f32.mrf.mxu2 }
 0x7c3   : > { %v7568_v40 = vadd.f32 %v7524_v14, %v7261_v30 }
 0x7c4   : > { %v10356_v46 = vpack.c.bf16 %v8163_v29, %v8162_v52 }
 0x7c5   : > { %v8083_v34 = vpop.f32.mrf.mxu3  ;;  %v7608_v10 = vadd.f32 %v13776_v55, %v7568_v40  ;;  %v7222_v18 = vpop.f32.mrf.mxu1 }
 0x7c6   : > { %10425 = vst [vmem:[%s13789_s9 + $0x70] sm:$0xff] %v10356_v46   ;;  %v8084_v56 = vadd.f32 %v13770_v23, %v8083_v34  ;;  %v7263_v32 = vadd.f32 %v7222_v18, %v7004_v38 }
 0x7c8   : > { %v8128_v24 = vadd.f32 %v8084_v56, %v7607_v28 }
 0x7ca   : > { %v7527_v37 = vpop.f32.mrf.mxu2  ;;  %v8164_v47 = vmax.f32 %v8128_v24, 0.0 }
 0x7cb   : > { %v7569_v41 = vadd.f32 %v7527_v37, %v7262_v1 }
 0x7cd   : > { %v8085_v53 = vpop.f32.mrf.mxu3  ;;  %v7225_v11 = vpop.f32.mrf.mxu1  ;;  %v7609_v25 = vadd.f32 %v13776_v55, %v7569_v41 }
 0x7ce   : > { %v8086_v45 = vadd.f32 %v13770_v23, %v8085_v53  ;;  %v7264_v17 = vadd.f32 %v7225_v11, %v7005_v44 }
 0x7d0   : > { %v8129_v61 = vadd.f32 %v8086_v45, %v7608_v10 }
 0x7d2   : > { %v8165_v15 = vmax.f32 %v8129_v61, 0.0  ;;  %v7529_v20 = vpop.f32.mrf.mxu2 }
 0x7d3   : > { %v7570_v35 = vadd.f32 %v7529_v20, %v7263_v32 }
 0x7d4   : > { %v10361_v57 = vpack.c.bf16 %v8165_v15, %v8164_v47 }
 0x7d5   : > { %v8088_v0 = vpop.f32.mrf.mxu3  ;;  %v7610_v26 = vadd.f32 %v13776_v55, %v7570_v35  ;;  %v7227_v51 = vpop.f32.mrf.mxu1 }
 0x7d6   : > { %10426 = vst [vmem:[%s13789_s9 + $0x78] sm:$0xff] %v10361_v57   ;;  %v8089_v63 = vadd.f32 %v13770_v23, %v8088_v0  ;;  %v7265_v3 = vadd.f32 %v7227_v51, %v7006_v2 }
 0x7d8   : > { %v8130_v59 = vadd.f32 %v8089_v63, %v7609_v25 }
 0x7da   : > { %v7532_v19 = vpop.f32.mrf.mxu2  ;;  %v8166_v22 = vmax.f32 %v8130_v59, 0.0 }
 0x7db   : > { %v7571_v9 = vadd.f32 %v7532_v19, %v7264_v17 }
 0x7dd   : > { %v8090_v33 = vpop.f32.mrf.mxu3  ;;  %v7611_v13 = vadd.f32 %v13776_v55, %v7571_v9 }
 0x7de   : > { %v8091_v8 = vadd.f32 %v13770_v23, %v8090_v33 }
 0x7e0   : > { %v8131_v54 = vadd.f32 %v8091_v8, %v7610_v26 }
 0x7e2   : > { %v8167_v49 = vmax.f32 %v8131_v54, 0.0  ;;  %v7534_v50 = vpop.f32.mrf.mxu2 }
 0x7e3   : > { %v7572_v48 = vadd.f32 %v7534_v50, %v7265_v3 }
 0x7e4   : > { %v10366_v6 = vpack.c.bf16 %v8167_v49, %v8166_v22 }
 0x7e5   : > { %v8093_v62 = vpop.f32.mrf.mxu3  ;;  %v7612_v52 = vadd.f32 %v13776_v55, %v7572_v48 }
 0x7e6   : > { %10427 = vst [vmem:[%s13789_s9 + $0x80] sm:$0xff] %v10366_v6   ;;  %v8094_v7 = vadd.f32 %v13770_v23, %v8093_v62 }
 0x7e8   : > { %v8132_v5 = vadd.f32 %v8094_v7, %v7611_v13 }
 0x7ea   : > { %v8168_v4 = vmax.f32 %v8132_v5, 0.0 }
 0x7ed   : > { %v8095_v12 = vpop.f32.mrf.mxu3 }
 0x7ee   : > { %v8096_v29 = vadd.f32 %v13770_v23, %v8095_v12 }
 0x7f0   : > { %v8133_v14 = vadd.f32 %v8096_v29, %v7612_v52 }
 0x7f2   : > { %v8169_v46 = vmax.f32 %v8133_v14, 0.0 }
 0x7f4   : > { %v10371_v42 = vpack.c.bf16 %v8169_v46, %v8168_v4 }
 0x7f6   : > { %10428 = vst [vmem:[%s13789_s9 + $0x88] sm:$0xff] %v10371_v42  }
 0x7f7 PF: > { %s18_s29 = sadd.s32 1, %s10667_s29   ;;  %s14338_s27 = smov %s10663_s28 }
 0x7f8   : > { %p15_p5 = scmp.ge.s32.totalorder %s18_s29, 4   ;;  %s14339_s28 = smov %s14341_s30 }
 0x7fa   :  { %17 = sbr.rel (!%p15_p5) target bundleno = 2 (0x2), region = 101 }

</bundles_post_ra>
